<compile_context>
chip_gen: v5e
topology: v5e:2x2
jax: 0.10.0
libtpu: 0.0.40
codegen_flags: <defaults>
</compile_context>

<pallas_src>
import math

import numpy as np

import jax
import jax.numpy as jnp
from jax.experimental import pallas as pl
from jax.experimental.pallas import tpu as pltpu

# ----------------------- small, module-consistent hyper-params ----------------
B = 2              # batch
C_IN = 4           # in_channels
H = W = 12         # spatial size of the input / positional-encoding image
PATCH = 2          # backbone patch size -> 6*6 = 36 tokens
SEQ = (H // PATCH) * (W // PATCH)     # 36 (module hardcodes 36)
CPP = C_IN * PATCH * PATCH            # 16 features per patch
D = 32             # embed_dim
HEADS = 4          # num_heads
DH = D // HEADS    # 8
LAYERS = 2         # num_layers
FF = 2048          # dim_feedforward (as in the module)
FF_CHUNK = 512     # in-kernel chunking of the FFN hidden dim (vreg pressure)
NUM_CLASSES = 36   # num_classes argument (output dim of the mlp head)
LN_EPS = 1e-5
BN_EPS = 1e-5

# Set to jnp.bfloat16 on v6e/v7x to halve weight DMA (matmuls still accumulate
# in f32 via preferred_element_type).  Kept f32 by default for exact parity
# with the PyTorch module.
WEIGHT_DTYPE = jnp.float32

_ATTN_SCALE = 1.0 / math.sqrt(DH)
_INV_SQRT2 = 1.0 / math.sqrt(2.0)


# ----------------------------- in-kernel helpers -------------------------------

def _layernorm(z, g, b):
    # biased variance over last axis (PyTorch LayerNorm semantics)
    mu = jnp.mean(z, axis=-1, keepdims=True)
    d = z - mu
    var = jnp.mean(d * d, axis=-1, keepdims=True)
    return d * jax.lax.rsqrt(var + LN_EPS) * g + b


def _erf(x):
    # Abramowitz & Stegun 7.1.26 rational approximation (|error| <= 1.5e-7,
    # i.e. float32-level), since lax.erf has no Pallas/Mosaic lowering.
    # TODO(synk): switch to jax.lax.erf if Mosaic grows an erf lowering rule.
    p = 0.3275911
    a1, a2, a3, a4, a5 = (0.254829592, -0.284496736, 1.421413741,
                          -1.453152027, 1.061405429)
    sgn = jnp.where(x < 0.0, -1.0, 1.0)
    ax = jnp.abs(x)
    t = 1.0 / (1.0 + p * ax)
    poly = ((((a5 * t + a4) * t + a3) * t + a2) * t + a1) * t
    return sgn * (1.0 - poly * jnp.exp(-ax * ax))


def _gelu_exact(x):
    # nn.GELU() default = exact erf formulation
    return 0.5 * x * (1.0 + _erf(x * _INV_SQRT2))


# ----------------------------- fused encoder kernel ----------------------------

def _encoder_kernel(patches_ref, pw_ref, pb_ref, pos_ref,
                    in_w_ref, in_b_ref, out_w_ref, out_b_ref,
                    ln1_g_ref, ln1_b_ref, ff1_w_ref, ff1_b_ref,
                    ff2_w_ref, ff2_b_ref, ln2_g_ref, ln2_b_ref,
                    h_out_ref):
    """One batch element per grid step: backbone + pos add + both encoder layers."""
    # patch-embed (backbone) + precomputed positional tokens
    x = jnp.dot(patches_ref[0], pw_ref[...],
                preferred_element_type=jnp.float32) + pb_ref[...]
    h = x + pos_ref[...]                                          # (S, D)

    for l in range(LAYERS):                 # static unroll over the 2 layers
        # ---------- multi-head self-attention (post-norm, PyTorch defaults) ----
        qkv = jnp.dot(h, in_w_ref[l],
                      preferred_element_type=jnp.float32) + in_b_ref[l]  # (S, 3D)
        heads = []
        for hd in range(HEADS):             # static unroll; all heads in-kernel
            q = qkv[:, hd * DH:(hd + 1) * DH] * _ATTN_SCALE
            k = qkv[:, D + hd * DH:D + (hd + 1) * DH]
            v = qkv[:, 2 * D + hd * DH:2 * D + (hd + 1) * DH]
            s = jax.lax.dot_general(q, k, (((1,), (1,)), ((), ())),
                                    preferred_element_type=jnp.float32)  # (S, S)
            m = jnp.max(s, axis=-1, keepdims=True)
            e = jnp.exp(s - m)
            p = e * pl.reciprocal(jnp.sum(e, axis=-1, keepdims=True),
                                  approx=True)
            heads.append(jnp.dot(p, v, preferred_element_type=jnp.float32))
        attn = jnp.concatenate(heads, axis=-1)                           # (S, D)
        attn = jnp.dot(attn, out_w_ref[l],
                       preferred_element_type=jnp.float32) + out_b_ref[l]
        h = _layernorm(h + attn, ln1_g_ref[l], ln1_b_ref[l])             # norm1

        # ---------- feed-forward (Linear -> ReLU -> Linear), chunked over FF ----
        acc = jnp.zeros((SEQ, D), jnp.float32)
        for c in range(0, FF, FF_CHUNK):
            ff_c = jnp.dot(h, ff1_w_ref[l, :, c:c + FF_CHUNK],
                           preferred_element_type=jnp.float32)
            ff_c = jnp.maximum(ff_c + ff1_b_ref[l, :, c:c + FF_CHUNK], 0.0)
            acc = acc + jnp.dot(ff_c, ff2_w_ref[l, c:c + FF_CHUNK, :],
                                preferred_element_type=jnp.float32)
        ff = acc + ff2_b_ref[l]
        h = _layernorm(h + ff, ln2_g_ref[l], ln2_b_ref[l])               # norm2

    h_out_ref[0] = h


def encoder_fused(patches, params):
    Bn = patches.shape[0]
    L = params["layers"]
    in_specs = [
        pl.BlockSpec((1, SEQ, CPP), lambda i: (i, 0, 0)),            # patches
        pl.BlockSpec((CPP, D), lambda i: (0, 0)),                    # patch_w2
        pl.BlockSpec((1, D), lambda i: (0, 0)),                      # patch_b
        pl.BlockSpec((SEQ, D), lambda i: (0, 0)),                    # pos_tok
        pl.BlockSpec((LAYERS, D, 3 * D), lambda i: (0, 0, 0)),       # in_w
        pl.BlockSpec((LAYERS, 1, 3 * D), lambda i: (0, 0, 0)),       # in_b
        pl.BlockSpec((LAYERS, D, D), lambda i: (0, 0, 0)),           # out_w
        pl.BlockSpec((LAYERS, 1, D), lambda i: (0, 0, 0)),           # out_b
        pl.BlockSpec((LAYERS, 1, D), lambda i: (0, 0, 0)),           # ln1_g
        pl.BlockSpec((LAYERS, 1, D), lambda i: (0, 0, 0)),           # ln1_b
        pl.BlockSpec((LAYERS, D, FF), lambda i: (0, 0, 0)),          # ff1_w
        pl.BlockSpec((LAYERS, 1, FF), lambda i: (0, 0, 0)),          # ff1_b
        pl.BlockSpec((LAYERS, FF, D), lambda i: (0, 0, 0)),          # ff2_w
        pl.BlockSpec((LAYERS, 1, D), lambda i: (0, 0, 0)),           # ff2_b
        pl.BlockSpec((LAYERS, 1, D), lambda i: (0, 0, 0)),           # ln2_g
        pl.BlockSpec((LAYERS, 1, D), lambda i: (0, 0, 0)),           # ln2_b
    ]
    return pl.pallas_call(
        _encoder_kernel,
        out_shape=jax.ShapeDtypeStruct((Bn, SEQ, D), jnp.float32),
        grid=(Bn,),
        in_specs=in_specs,
        out_specs=pl.BlockSpec((1, SEQ, D), lambda i: (i, 0, 0)),
        compiler_params=pltpu.CompilerParams(
            dimension_semantics=("parallel",)),      # 2 TCs on v7x; no-op v5e/v6e
    )(patches, params["patch_w2"], params["patch_b"], params["pos_tok"],
      L["in_w"], L["in_b"], L["out_w"], L["out_b"], L["ln1_g"], L["ln1_b"],
      L["ff1_w"], L["ff1_b"], L["ff2_w"], L["ff2_b"], L["ln2_g"], L["ln2_b"])


# ------------------------------ fused head kernel -------------------------------

def _head_kernel(flat_ref, pw_ref, pb_ref, mean_ref, var_ref, g_ref, beta_ref,
                 mw_ref, mb_ref, o_ref):
    # proj -> BatchNorm1d(eval, running stats) -> GELU(exact) -> Linear -> ReLU
    y = jnp.dot(flat_ref[...], pw_ref[...],
                preferred_element_type=jnp.float32) + pb_ref[...]
    y = (y - mean_ref[...]) * jax.lax.rsqrt(var_ref[...] + BN_EPS) * g_ref[...] \
        + beta_ref[...]
    y = _gelu_exact(y)
    z = jnp.dot(y, mw_ref[...], preferred_element_type=jnp.float32) + mb_ref[...]
    o_ref[...] = jnp.maximum(z, 0.0)
    # F.dropout(p=0.1) is identity in inference mode


_VMEM = pl.BlockSpec(memory_space=pltpu.MemorySpace.VMEM)


def head_fused(flat, params):
    Bn = flat.shape[0]
    return pl.pallas_call(
        _head_kernel,
        out_shape=jax.ShapeDtypeStruct((Bn, NUM_CLASSES), jnp.float32),
        in_specs=[_VMEM] * 9,
        out_specs=_VMEM,
    )(flat, params["proj_w"], params["proj_b"],
      params["bn_mean"], params["bn_var"], params["bn_g"], params["bn_b"],
      params["mlp_w"], params["mlp_b"])


# --------------------------------- forward -------------------------------------

def _extract_patches(x_nchw):
    """NCHW image -> (B, S, C*P*P) patch features (pure layout, done in XLA)."""
    Bn, Cc, Hh, Ww = x_nchw.shape
    Hp, Wp = Hh // PATCH, Ww // PATCH
    xp = x_nchw.reshape(Bn, Cc, Hp, PATCH, Wp, PATCH)
    xp = xp.transpose(0, 2, 4, 1, 3, 5).reshape(Bn, Hp * Wp, Cc * PATCH * PATCH)
    return xp


def ctran_forward(x_nchw, params):
    patches = _extract_patches(x_nchw)                 # (B, S, CPP)
    h = encoder_fused(patches, params)                 # (B, S, D)  one pallas_call
    flat = h.reshape(h.shape[0], SEQ * D)              # free contiguous reshape
    return head_fused(flat, params)                    # (B, NUM_CLASSES)


# --------------------------- positional encoding -------------------------------

def positionalencoding2d(d_model, height, width):
    pe = np.zeros((d_model, height, width), dtype=np.float32)
    dm = d_model // 2
    div_term = np.exp(np.arange(0.0, dm, 2) * -(math.log(10000.0) / dm))
    pos_w = np.arange(0.0, width)[:, None]
    pos_h = np.arange(0.0, height)[:, None]
    pe[0:dm:2, :, :] = np.repeat(np.sin(pos_w * div_term).T[:, None, :], height, axis=1)
    pe[1:dm:2, :, :] = np.repeat(np.cos(pos_w * div_term).T[:, None, :], height, axis=1)
    pe[dm::2, :, :] = np.repeat(np.sin(pos_h * div_term).T[:, :, None], width, axis=2)
    pe[dm + 1::2, :, :] = np.repeat(np.cos(pos_h * div_term).T[:, :, None], width, axis=2)
    return pe


# ------------------------------ parameter init ---------------------------------

def init_params(key):
    keys = iter(jax.random.split(key, 64))

    def rnd(shape, s=0.02):
        return s * jax.random.normal(next(keys), shape, jnp.float32)

    params = {}
    # synthetic backbone: Conv2d(C_IN, D, kernel=PATCH, stride=PATCH) as a matmul
    patch_w = rnd((D, C_IN, PATCH, PATCH))
    params["patch_w2"] = patch_w.reshape(D, CPP).T.astype(WEIGHT_DTYPE)   # (CPP, D)
    params["patch_b"] = rnd((1, D))

    # positional_encoding parameter: mean over embed dim, broadcast to in_channels.
    # backbone(positional_encoding) is a constant in eval mode, so its tokens are
    # precomputed ONCE here and just added inside the fused encoder kernel.
    pe = positionalencoding2d(D, H, W)                        # (D, H, W)
    pe = pe.mean(axis=0, keepdims=True)[None]                 # (1, 1, H, W)
    pos_enc = jnp.asarray(np.broadcast_to(pe, (1, C_IN, H, W)).copy(), jnp.float32)
    pos_patches = _extract_patches(pos_enc)[0]                # (S, CPP)
    params["pos_tok"] = (pos_patches @ params["patch_w2"].astype(jnp.float32)
                         + params["patch_b"])                 # (S, D)

    # transformer layers, stacked along a leading LAYERS axis (weights stored
    # already transposed as (in_features, out_features))
    per = []
    for _ in range(LAYERS):
        per.append(dict(
            in_w=rnd((D, 3 * D)).astype(WEIGHT_DTYPE), in_b=rnd((1, 3 * D)),
            out_w=rnd((D, D)).astype(WEIGHT_DTYPE), out_b=rnd((1, D)),
            ln1_g=jnp.ones((1, D), jnp.float32), ln1_b=jnp.zeros((1, D), jnp.float32),
            ff1_w=rnd((D, FF)).astype(WEIGHT_DTYPE), ff1_b=rnd((1, FF)),
            ff2_w=rnd((FF, D)).astype(WEIGHT_DTYPE), ff2_b=rnd((1, D)),
            ln2_g=jnp.ones((1, D), jnp.float32), ln2_b=jnp.zeros((1, D), jnp.float32),
        ))
    params["layers"] = {k: jnp.stack([p[k] for p in per], axis=0) for k in per[0]}

    # head: proj + BatchNorm1d(eval) + (GELU, Linear, ReLU)
    params["proj_w"] = rnd((SEQ * D, 2 * D)).astype(WEIGHT_DTYPE)
    params["proj_b"] = rnd((1, 2 * D))
    params["bn_g"] = jnp.ones((1, 2 * D), jnp.float32)
    params["bn_b"] = jnp.zeros((1, 2 * D), jnp.float32)
    params["bn_mean"] = rnd((1, 2 * D))
    params["bn_var"] = jnp.abs(rnd((1, 2 * D))) + 1.0
    params["mlp_w"] = rnd((2 * D, NUM_CLASSES)).astype(WEIGHT_DTYPE)
    params["mlp_b"] = rnd((1, NUM_CLASSES))
    return params


# ----------------------------------- main ---------------------------------------

if __name__ == "__main__":
    key = jax.random.PRNGKey(0)
    pkey, xkey = jax.random.split(key)
    params = init_params(pkey)
    x = jax.random.normal(xkey, (B, C_IN, H, W), jnp.float32)   # NCHW input

    fwd = jax.jit(ctran_forward)
    out = jax.block_until_ready(fwd(x, params))
    assert out.shape == (B, NUM_CLASSES), out.shape
    assert bool(jnp.all(jnp.isfinite(out)))
    print("KERNEL_OK")
</pallas_src>

<mosaic_0001>
module attributes {stable_mosaic.version = 11 : i64} {
  func.func @_encoder_kernel(%arg0: i32, %arg1: memref<1x36x16xf32, #tpu.memory_space<vmem>>, %arg2: memref<16x32xf32, #tpu.memory_space<vmem>>, %arg3: memref<1x32xf32, #tpu.memory_space<vmem>>, %arg4: memref<36x32xf32, #tpu.memory_space<vmem>>, %arg5: memref<2x32x96xf32, #tpu.memory_space<vmem>>, %arg6: memref<2x1x96xf32, #tpu.memory_space<vmem>>, %arg7: memref<2x32x32xf32, #tpu.memory_space<vmem>>, %arg8: memref<2x1x32xf32, #tpu.memory_space<vmem>>, %arg9: memref<2x1x32xf32, #tpu.memory_space<vmem>>, %arg10: memref<2x1x32xf32, #tpu.memory_space<vmem>>, %arg11: memref<2x32x2048xf32, #tpu.memory_space<vmem>>, %arg12: memref<2x1x2048xf32, #tpu.memory_space<vmem>>, %arg13: memref<2x2048x32xf32, #tpu.memory_space<vmem>>, %arg14: memref<2x1x32xf32, #tpu.memory_space<vmem>>, %arg15: memref<2x1x32xf32, #tpu.memory_space<vmem>>, %arg16: memref<2x1x32xf32, #tpu.memory_space<vmem>>, %arg17: memref<1x36x32xf32, #tpu.memory_space<vmem>>) attributes {dimension_semantics = [#tpu.dimension_semantics<parallel>], iteration_bounds = array<i64: 2>, scalar_prefetch = 0 : i64, scratch_operands = 0 : i64, tpu.core_type = #tpu.core_type<tc>, window_params = [{transform_indices = @transform_0, window_bounds = array<i64: 1, 36, 16>}, {pipeline_mode = #tpu.pipeline_mode<synchronous>, transform_indices = @transform_1, window_bounds = array<i64: 16, 32>}, {pipeline_mode = #tpu.pipeline_mode<synchronous>, transform_indices = @transform_2, window_bounds = array<i64: 1, 32>}, {pipeline_mode = #tpu.pipeline_mode<synchronous>, transform_indices = @transform_3, window_bounds = array<i64: 36, 32>}, {pipeline_mode = #tpu.pipeline_mode<synchronous>, transform_indices = @transform_4, window_bounds = array<i64: 2, 32, 96>}, {pipeline_mode = #tpu.pipeline_mode<synchronous>, transform_indices = @transform_5, window_bounds = array<i64: 2, 1, 96>}, {pipeline_mode = #tpu.pipeline_mode<synchronous>, transform_indices = @transform_6, window_bounds = array<i64: 2, 32, 32>}, {pipeline_mode = #tpu.pipeline_mode<synchronous>, transform_indices = @transform_7, window_bounds = array<i64: 2, 1, 32>}, {pipeline_mode = #tpu.pipeline_mode<synchronous>, transform_indices = @transform_8, window_bounds = array<i64: 2, 1, 32>}, {pipeline_mode = #tpu.pipeline_mode<synchronous>, transform_indices = @transform_9, window_bounds = array<i64: 2, 1, 32>}, {pipeline_mode = #tpu.pipeline_mode<synchronous>, transform_indices = @transform_10, window_bounds = array<i64: 2, 32, 2048>}, {pipeline_mode = #tpu.pipeline_mode<synchronous>, transform_indices = @transform_11, window_bounds = array<i64: 2, 1, 2048>}, {pipeline_mode = #tpu.pipeline_mode<synchronous>, transform_indices = @transform_12, window_bounds = array<i64: 2, 2048, 32>}, {pipeline_mode = #tpu.pipeline_mode<synchronous>, transform_indices = @transform_13, window_bounds = array<i64: 2, 1, 32>}, {pipeline_mode = #tpu.pipeline_mode<synchronous>, transform_indices = @transform_14, window_bounds = array<i64: 2, 1, 32>}, {pipeline_mode = #tpu.pipeline_mode<synchronous>, transform_indices = @transform_15, window_bounds = array<i64: 2, 1, 32>}, {transform_indices = @transform_16, window_bounds = array<i64: 1, 36, 32>}]} {
    %c0 = arith.constant 0 : index
    %c0_0 = arith.constant 0 : index
    %c0_1 = arith.constant 0 : index
    %0 = vector.load %arg1[%c0, %c0_0, %c0_1] : memref<1x36x16xf32, #tpu.memory_space<vmem>>, vector<1x36x16xf32>
    %1 = vector.shape_cast %0 : vector<1x36x16xf32> to vector<36x16xf32>
    %c0_2 = arith.constant 0 : index
    %c0_3 = arith.constant 0 : index
    %2 = vector.load %arg2[%c0_2, %c0_3] : memref<16x32xf32, #tpu.memory_space<vmem>>, vector<16x32xf32>
    %cst = arith.constant dense<0.000000e+00> : vector<36x32xf32>
    %3 = tpu.matmul %1, %2, %cst {dimension_numbers = #tpu.dot_dimension_numbers<[1], [0], [0], [1], [0, 0, 1, 1], [], []>} : vector<36x16xf32>, vector<16x32xf32>, vector<36x32xf32> -> vector<36x32xf32>
    %c0_4 = arith.constant 0 : index
    %c0_5 = arith.constant 0 : index
    %4 = vector.load %arg3[%c0_4, %c0_5] : memref<1x32xf32, #tpu.memory_space<vmem>>, vector<1x32xf32>
    %5 = vector.broadcast %4 : vector<1x32xf32> to vector<36x32xf32>
    %6 = arith.addf %3, %5 : vector<36x32xf32>
    %c0_6 = arith.constant 0 : index
    %c0_7 = arith.constant 0 : index
    %7 = vector.load %arg4[%c0_6, %c0_7] : memref<36x32xf32, #tpu.memory_space<vmem>>, vector<36x32xf32>
    %8 = arith.addf %6, %7 : vector<36x32xf32>
    %c0_8 = arith.constant 0 : index
    %c0_9 = arith.constant 0 : index
    %c0_10 = arith.constant 0 : index
    %9 = vector.load %arg5[%c0_8, %c0_9, %c0_10] : memref<2x32x96xf32, #tpu.memory_space<vmem>>, vector<1x32x96xf32>
    %10 = vector.shape_cast %9 : vector<1x32x96xf32> to vector<32x96xf32>
    %cst_11 = arith.constant dense<0.000000e+00> : vector<36x96xf32>
    %11 = tpu.matmul %8, %10, %cst_11 {dimension_numbers = #tpu.dot_dimension_numbers<[1], [0], [0], [1], [0, 0, 1, 1], [], []>} : vector<36x32xf32>, vector<32x96xf32>, vector<36x96xf32> -> vector<36x96xf32>
    %c0_12 = arith.constant 0 : index
    %c0_13 = arith.constant 0 : index
    %c0_14 = arith.constant 0 : index
    %12 = vector.load %arg6[%c0_12, %c0_13, %c0_14] : memref<2x1x96xf32, #tpu.memory_space<vmem>>, vector<1x1x96xf32>
    %13 = vector.shape_cast %12 : vector<1x1x96xf32> to vector<1x96xf32>
    %14 = vector.broadcast %13 : vector<1x96xf32> to vector<36x96xf32>
    %15 = arith.addf %11, %14 : vector<36x96xf32>
    %16 = vector.extract_strided_slice %15 {offsets = [0, 0], sizes = [36, 8], strides = [1, 1]} : vector<36x96xf32> to vector<36x8xf32>
    %cst_15 = arith.constant 0.353553385 : f32
    %17 = vector.broadcast %cst_15 : f32 to vector<36x8xf32>
    %18 = arith.mulf %16, %17 : vector<36x8xf32>
    %19 = vector.extract_strided_slice %15 {offsets = [0, 32], sizes = [36, 8], strides = [1, 1]} : vector<36x96xf32> to vector<36x8xf32>
    %20 = vector.extract_strided_slice %15 {offsets = [0, 64], sizes = [36, 8], strides = [1, 1]} : vector<36x96xf32> to vector<36x8xf32>
    %cst_16 = arith.constant dense<0.000000e+00> : vector<36x36xf32>
    %21 = tpu.matmul %18, %19, %cst_16 {dimension_numbers = #tpu.dot_dimension_numbers<[1], [1], [0], [0], [0, 0, 1, 0], [], []>} : vector<36x8xf32>, vector<36x8xf32>, vector<36x36xf32> -> vector<36x36xf32>
    %cst_17 = arith.constant dense<0xFF800000> : vector<36xf32>
    %22 = vector.multi_reduction <maximumf>, %21, %cst_17 [1] : vector<36x36xf32> to vector<36xf32>
    %23 = vector.shape_cast %22 : vector<36xf32> to vector<36x1xf32>
    %24 = vector.broadcast %23 : vector<36x1xf32> to vector<36x36xf32>
    %25 = arith.subf %21, %24 : vector<36x36xf32>
    %26 = math.exp %25 : vector<36x36xf32>
    %cst_18 = arith.constant dense<0.000000e+00> : vector<36xf32>
    %27 = vector.multi_reduction <add>, %26, %cst_18 [1] : vector<36x36xf32> to vector<36xf32>
    %28 = vector.shape_cast %27 : vector<36xf32> to vector<36x1xf32>
    %29 = tpu.reciprocal %28 {approx = true} : vector<36x1xf32> -> vector<36x1xf32>
    %30 = vector.broadcast %29 : vector<36x1xf32> to vector<36x36xf32>
    %31 = arith.mulf %26, %30 : vector<36x36xf32>
    %cst_19 = arith.constant dense<0.000000e+00> : vector<36x8xf32>
    %32 = tpu.matmul %31, %20, %cst_19 {dimension_numbers = #tpu.dot_dimension_numbers<[1], [0], [0], [1], [0, 0, 1, 1], [], []>} : vector<36x36xf32>, vector<36x8xf32>, vector<36x8xf32> -> vector<36x8xf32>
    %33 = vector.extract_strided_slice %15 {offsets = [0, 8], sizes = [36, 8], strides = [1, 1]} : vector<36x96xf32> to vector<36x8xf32>
    %cst_20 = arith.constant 0.353553385 : f32
    %34 = vector.broadcast %cst_20 : f32 to vector<36x8xf32>
    %35 = arith.mulf %33, %34 : vector<36x8xf32>
    %36 = vector.extract_strided_slice %15 {offsets = [0, 40], sizes = [36, 8], strides = [1, 1]} : vector<36x96xf32> to vector<36x8xf32>
    %37 = vector.extract_strided_slice %15 {offsets = [0, 72], sizes = [36, 8], strides = [1, 1]} : vector<36x96xf32> to vector<36x8xf32>
    %cst_21 = arith.constant dense<0.000000e+00> : vector<36x36xf32>
    %38 = tpu.matmul %35, %36, %cst_21 {dimension_numbers = #tpu.dot_dimension_numbers<[1], [1], [0], [0], [0, 0, 1, 0], [], []>} : vector<36x8xf32>, vector<36x8xf32>, vector<36x36xf32> -> vector<36x36xf32>
    %cst_22 = arith.constant dense<0xFF800000> : vector<36xf32>
    %39 = vector.multi_reduction <maximumf>, %38, %cst_22 [1] : vector<36x36xf32> to vector<36xf32>
    %40 = vector.shape_cast %39 : vector<36xf32> to vector<36x1xf32>
    %41 = vector.broadcast %40 : vector<36x1xf32> to vector<36x36xf32>
    %42 = arith.subf %38, %41 : vector<36x36xf32>
    %43 = math.exp %42 : vector<36x36xf32>
    %cst_23 = arith.constant dense<0.000000e+00> : vector<36xf32>
    %44 = vector.multi_reduction <add>, %43, %cst_23 [1] : vector<36x36xf32> to vector<36xf32>
    %45 = vector.shape_cast %44 : vector<36xf32> to vector<36x1xf32>
    %46 = tpu.reciprocal %45 {approx = true} : vector<36x1xf32> -> vector<36x1xf32>
    %47 = vector.broadcast %46 : vector<36x1xf32> to vector<36x36xf32>
    %48 = arith.mulf %43, %47 : vector<36x36xf32>
    %cst_24 = arith.constant dense<0.000000e+00> : vector<36x8xf32>
    %49 = tpu.matmul %48, %37, %cst_24 {dimension_numbers = #tpu.dot_dimension_numbers<[1], [0], [0], [1], [0, 0, 1, 1], [], []>} : vector<36x36xf32>, vector<36x8xf32>, vector<36x8xf32> -> vector<36x8xf32>
    %50 = vector.extract_strided_slice %15 {offsets = [0, 16], sizes = [36, 8], strides = [1, 1]} : vector<36x96xf32> to vector<36x8xf32>
    %cst_25 = arith.constant 0.353553385 : f32
    %51 = vector.broadcast %cst_25 : f32 to vector<36x8xf32>
    %52 = arith.mulf %50, %51 : vector<36x8xf32>
    %53 = vector.extract_strided_slice %15 {offsets = [0, 48], sizes = [36, 8], strides = [1, 1]} : vector<36x96xf32> to vector<36x8xf32>
    %54 = vector.extract_strided_slice %15 {offsets = [0, 80], sizes = [36, 8], strides = [1, 1]} : vector<36x96xf32> to vector<36x8xf32>
    %cst_26 = arith.constant dense<0.000000e+00> : vector<36x36xf32>
    %55 = tpu.matmul %52, %53, %cst_26 {dimension_numbers = #tpu.dot_dimension_numbers<[1], [1], [0], [0], [0, 0, 1, 0], [], []>} : vector<36x8xf32>, vector<36x8xf32>, vector<36x36xf32> -> vector<36x36xf32>
    %cst_27 = arith.constant dense<0xFF800000> : vector<36xf32>
    %56 = vector.multi_reduction <maximumf>, %55, %cst_27 [1] : vector<36x36xf32> to vector<36xf32>
    %57 = vector.shape_cast %56 : vector<36xf32> to vector<36x1xf32>
    %58 = vector.broadcast %57 : vector<36x1xf32> to vector<36x36xf32>
    %59 = arith.subf %55, %58 : vector<36x36xf32>
    %60 = math.exp %59 : vector<36x36xf32>
    %cst_28 = arith.constant dense<0.000000e+00> : vector<36xf32>
    %61 = vector.multi_reduction <add>, %60, %cst_28 [1] : vector<36x36xf32> to vector<36xf32>
    %62 = vector.shape_cast %61 : vector<36xf32> to vector<36x1xf32>
    %63 = tpu.reciprocal %62 {approx = true} : vector<36x1xf32> -> vector<36x1xf32>
    %64 = vector.broadcast %63 : vector<36x1xf32> to vector<36x36xf32>
    %65 = arith.mulf %60, %64 : vector<36x36xf32>
    %cst_29 = arith.constant dense<0.000000e+00> : vector<36x8xf32>
    %66 = tpu.matmul %65, %54, %cst_29 {dimension_numbers = #tpu.dot_dimension_numbers<[1], [0], [0], [1], [0, 0, 1, 1], [], []>} : vector<36x36xf32>, vector<36x8xf32>, vector<36x8xf32> -> vector<36x8xf32>
    %67 = vector.extract_strided_slice %15 {offsets = [0, 24], sizes = [36, 8], strides = [1, 1]} : vector<36x96xf32> to vector<36x8xf32>
    %cst_30 = arith.constant 0.353553385 : f32
    %68 = vector.broadcast %cst_30 : f32 to vector<36x8xf32>
    %69 = arith.mulf %67, %68 : vector<36x8xf32>
    %70 = vector.extract_strided_slice %15 {offsets = [0, 56], sizes = [36, 8], strides = [1, 1]} : vector<36x96xf32> to vector<36x8xf32>
    %71 = vector.extract_strided_slice %15 {offsets = [0, 88], sizes = [36, 8], strides = [1, 1]} : vector<36x96xf32> to vector<36x8xf32>
    %cst_31 = arith.constant dense<0.000000e+00> : vector<36x36xf32>
    %72 = tpu.matmul %69, %70, %cst_31 {dimension_numbers = #tpu.dot_dimension_numbers<[1], [1], [0], [0], [0, 0, 1, 0], [], []>} : vector<36x8xf32>, vector<36x8xf32>, vector<36x36xf32> -> vector<36x36xf32>
    %cst_32 = arith.constant dense<0xFF800000> : vector<36xf32>
    %73 = vector.multi_reduction <maximumf>, %72, %cst_32 [1] : vector<36x36xf32> to vector<36xf32>
    %74 = vector.shape_cast %73 : vector<36xf32> to vector<36x1xf32>
    %75 = vector.broadcast %74 : vector<36x1xf32> to vector<36x36xf32>
    %76 = arith.subf %72, %75 : vector<36x36xf32>
    %77 = math.exp %76 : vector<36x36xf32>
    %cst_33 = arith.constant dense<0.000000e+00> : vector<36xf32>
    %78 = vector.multi_reduction <add>, %77, %cst_33 [1] : vector<36x36xf32> to vector<36xf32>
    %79 = vector.shape_cast %78 : vector<36xf32> to vector<36x1xf32>
    %80 = tpu.reciprocal %79 {approx = true} : vector<36x1xf32> -> vector<36x1xf32>
    %81 = vector.broadcast %80 : vector<36x1xf32> to vector<36x36xf32>
    %82 = arith.mulf %77, %81 : vector<36x36xf32>
    %cst_34 = arith.constant dense<0.000000e+00> : vector<36x8xf32>
    %83 = tpu.matmul %82, %71, %cst_34 {dimension_numbers = #tpu.dot_dimension_numbers<[1], [0], [0], [1], [0, 0, 1, 1], [], []>} : vector<36x36xf32>, vector<36x8xf32>, vector<36x8xf32> -> vector<36x8xf32>
    %84 = tpu.concatenate %32, %49, %66, %83 in 1 : vector<36x8xf32>, vector<36x8xf32>, vector<36x8xf32>, vector<36x8xf32> -> vector<36x32xf32>
    %c0_35 = arith.constant 0 : index
    %c0_36 = arith.constant 0 : index
    %c0_37 = arith.constant 0 : index
    %85 = vector.load %arg7[%c0_35, %c0_36, %c0_37] : memref<2x32x32xf32, #tpu.memory_space<vmem>>, vector<1x32x32xf32>
    %86 = vector.shape_cast %85 : vector<1x32x32xf32> to vector<32x32xf32>
    %cst_38 = arith.constant dense<0.000000e+00> : vector<36x32xf32>
    %87 = tpu.matmul %84, %86, %cst_38 {dimension_numbers = #tpu.dot_dimension_numbers<[1], [0], [0], [1], [0, 0, 1, 1], [], []>} : vector<36x32xf32>, vector<32x32xf32>, vector<36x32xf32> -> vector<36x32xf32>
    %c0_39 = arith.constant 0 : index
    %c0_40 = arith.constant 0 : index
    %c0_41 = arith.constant 0 : index
    %88 = vector.load %arg8[%c0_39, %c0_40, %c0_41] : memref<2x1x32xf32, #tpu.memory_space<vmem>>, vector<1x1x32xf32>
    %89 = vector.shape_cast %88 : vector<1x1x32xf32> to vector<1x32xf32>
    %90 = vector.broadcast %89 : vector<1x32xf32> to vector<36x32xf32>
    %91 = arith.addf %87, %90 : vector<36x32xf32>
    %92 = arith.addf %8, %91 : vector<36x32xf32>
    %c0_42 = arith.constant 0 : index
    %c0_43 = arith.constant 0 : index
    %c0_44 = arith.constant 0 : index
    %93 = vector.load %arg9[%c0_42, %c0_43, %c0_44] : memref<2x1x32xf32, #tpu.memory_space<vmem>>, vector<1x1x32xf32>
    %94 = vector.shape_cast %93 : vector<1x1x32xf32> to vector<1x32xf32>
    %c0_45 = arith.constant 0 : index
    %c0_46 = arith.constant 0 : index
    %c0_47 = arith.constant 0 : index
    %95 = vector.load %arg10[%c0_45, %c0_46, %c0_47] : memref<2x1x32xf32, #tpu.memory_space<vmem>>, vector<1x1x32xf32>
    %96 = vector.shape_cast %95 : vector<1x1x32xf32> to vector<1x32xf32>
    %cst_48 = arith.constant dense<0.000000e+00> : vector<36xf32>
    %97 = vector.multi_reduction <add>, %92, %cst_48 [1] : vector<36x32xf32> to vector<36xf32>
    %98 = vector.shape_cast %97 : vector<36xf32> to vector<36x1xf32>
    %cst_49 = arith.constant 3.200000e+01 : f32
    %99 = vector.broadcast %cst_49 : f32 to vector<36x1xf32>
    %100 = arith.divf %98, %99 : vector<36x1xf32>
    %101 = vector.broadcast %100 : vector<36x1xf32> to vector<36x32xf32>
    %102 = arith.subf %92, %101 : vector<36x32xf32>
    %103 = arith.mulf %102, %102 : vector<36x32xf32>
    %cst_50 = arith.constant dense<0.000000e+00> : vector<36xf32>
    %104 = vector.multi_reduction <add>, %103, %cst_50 [1] : vector<36x32xf32> to vector<36xf32>
    %105 = vector.shape_cast %104 : vector<36xf32> to vector<36x1xf32>
    %cst_51 = arith.constant 3.200000e+01 : f32
    %106 = vector.broadcast %cst_51 : f32 to vector<36x1xf32>
    %107 = arith.divf %105, %106 : vector<36x1xf32>
    %cst_52 = arith.constant 9.99999974E-6 : f32
    %108 = vector.broadcast %cst_52 : f32 to vector<36x1xf32>
    %109 = arith.addf %107, %108 : vector<36x1xf32>
    %110 = math.rsqrt %109 : vector<36x1xf32>
    %111 = vector.broadcast %110 : vector<36x1xf32> to vector<36x32xf32>
    %112 = arith.mulf %102, %111 : vector<36x32xf32>
    %113 = vector.broadcast %94 : vector<1x32xf32> to vector<36x32xf32>
    %114 = arith.mulf %112, %113 : vector<36x32xf32>
    %115 = vector.broadcast %96 : vector<1x32xf32> to vector<36x32xf32>
    %116 = arith.addf %114, %115 : vector<36x32xf32>
    %cst_53 = arith.constant 0.000000e+00 : f32
    %117 = vector.broadcast %cst_53 : f32 to vector<36x32xf32>
    %c0_54 = arith.constant 0 : index
    %c0_55 = arith.constant 0 : index
    %c0_56 = arith.constant 0 : index
    %118 = vector.load %arg11[%c0_54, %c0_55, %c0_56] : memref<2x32x2048xf32, #tpu.memory_space<vmem>>, vector<1x32x512xf32>
    %119 = vector.shape_cast %118 : vector<1x32x512xf32> to vector<32x512xf32>
    %cst_57 = arith.constant dense<0.000000e+00> : vector<36x512xf32>
    %120 = tpu.matmul %116, %119, %cst_57 {dimension_numbers = #tpu.dot_dimension_numbers<[1], [0], [0], [1], [0, 0, 1, 1], [], []>} : vector<36x32xf32>, vector<32x512xf32>, vector<36x512xf32> -> vector<36x512xf32>
    %c0_58 = arith.constant 0 : index
    %c0_59 = arith.constant 0 : index
    %c0_60 = arith.constant 0 : index
    %121 = vector.load %arg12[%c0_58, %c0_59, %c0_60] : memref<2x1x2048xf32, #tpu.memory_space<vmem>>, vector<1x1x512xf32>
    %122 = vector.shape_cast %121 : vector<1x1x512xf32> to vector<1x512xf32>
    %123 = vector.broadcast %122 : vector<1x512xf32> to vector<36x512xf32>
    %124 = arith.addf %120, %123 : vector<36x512xf32>
    %cst_61 = arith.constant 0.000000e+00 : f32
    %125 = vector.broadcast %cst_61 : f32 to vector<36x512xf32>
    %126 = arith.maximumf %124, %125 : vector<36x512xf32>
    %c0_62 = arith.constant 0 : index
    %c0_63 = arith.constant 0 : index
    %c0_64 = arith.constant 0 : index
    %127 = vector.load %arg13[%c0_62, %c0_63, %c0_64] : memref<2x2048x32xf32, #tpu.memory_space<vmem>>, vector<1x512x32xf32>
    %128 = vector.shape_cast %127 : vector<1x512x32xf32> to vector<512x32xf32>
    %cst_65 = arith.constant dense<0.000000e+00> : vector<36x32xf32>
    %129 = tpu.matmul %126, %128, %cst_65 {dimension_numbers = #tpu.dot_dimension_numbers<[1], [0], [0], [1], [0, 0, 1, 1], [], []>} : vector<36x512xf32>, vector<512x32xf32>, vector<36x32xf32> -> vector<36x32xf32>
    %130 = arith.addf %117, %129 : vector<36x32xf32>
    %c0_66 = arith.constant 0 : index
    %c0_67 = arith.constant 0 : index
    %c512 = arith.constant 512 : index
    %131 = vector.load %arg11[%c0_66, %c0_67, %c512] : memref<2x32x2048xf32, #tpu.memory_space<vmem>>, vector<1x32x512xf32>
    %132 = vector.shape_cast %131 : vector<1x32x512xf32> to vector<32x512xf32>
    %cst_68 = arith.constant dense<0.000000e+00> : vector<36x512xf32>
    %133 = tpu.matmul %116, %132, %cst_68 {dimension_numbers = #tpu.dot_dimension_numbers<[1], [0], [0], [1], [0, 0, 1, 1], [], []>} : vector<36x32xf32>, vector<32x512xf32>, vector<36x512xf32> -> vector<36x512xf32>
    %c0_69 = arith.constant 0 : index
    %c0_70 = arith.constant 0 : index
    %c512_71 = arith.constant 512 : index
    %134 = vector.load %arg12[%c0_69, %c0_70, %c512_71] : memref<2x1x2048xf32, #tpu.memory_space<vmem>>, vector<1x1x512xf32>
    %135 = vector.shape_cast %134 : vector<1x1x512xf32> to vector<1x512xf32>
    %136 = vector.broadcast %135 : vector<1x512xf32> to vector<36x512xf32>
    %137 = arith.addf %133, %136 : vector<36x512xf32>
    %cst_72 = arith.constant 0.000000e+00 : f32
    %138 = vector.broadcast %cst_72 : f32 to vector<36x512xf32>
    %139 = arith.maximumf %137, %138 : vector<36x512xf32>
    %c0_73 = arith.constant 0 : index
    %c512_74 = arith.constant 512 : index
    %c0_75 = arith.constant 0 : index
    %140 = vector.load %arg13[%c0_73, %c512_74, %c0_75] : memref<2x2048x32xf32, #tpu.memory_space<vmem>>, vector<1x512x32xf32>
    %141 = vector.shape_cast %140 : vector<1x512x32xf32> to vector<512x32xf32>
    %cst_76 = arith.constant dense<0.000000e+00> : vector<36x32xf32>
    %142 = tpu.matmul %139, %141, %cst_76 {dimension_numbers = #tpu.dot_dimension_numbers<[1], [0], [0], [1], [0, 0, 1, 1], [], []>} : vector<36x512xf32>, vector<512x32xf32>, vector<36x32xf32> -> vector<36x32xf32>
    %143 = arith.addf %130, %142 : vector<36x32xf32>
    %c0_77 = arith.constant 0 : index
    %c0_78 = arith.constant 0 : index
    %c1024 = arith.constant 1024 : index
    %144 = vector.load %arg11[%c0_77, %c0_78, %c1024] : memref<2x32x2048xf32, #tpu.memory_space<vmem>>, vector<1x32x512xf32>
    %145 = vector.shape_cast %144 : vector<1x32x512xf32> to vector<32x512xf32>
    %cst_79 = arith.constant dense<0.000000e+00> : vector<36x512xf32>
    %146 = tpu.matmul %116, %145, %cst_79 {dimension_numbers = #tpu.dot_dimension_numbers<[1], [0], [0], [1], [0, 0, 1, 1], [], []>} : vector<36x32xf32>, vector<32x512xf32>, vector<36x512xf32> -> vector<36x512xf32>
    %c0_80 = arith.constant 0 : index
    %c0_81 = arith.constant 0 : index
    %c1024_82 = arith.constant 1024 : index
    %147 = vector.load %arg12[%c0_80, %c0_81, %c1024_82] : memref<2x1x2048xf32, #tpu.memory_space<vmem>>, vector<1x1x512xf32>
    %148 = vector.shape_cast %147 : vector<1x1x512xf32> to vector<1x512xf32>
    %149 = vector.broadcast %148 : vector<1x512xf32> to vector<36x512xf32>
    %150 = arith.addf %146, %149 : vector<36x512xf32>
    %cst_83 = arith.constant 0.000000e+00 : f32
    %151 = vector.broadcast %cst_83 : f32 to vector<36x512xf32>
    %152 = arith.maximumf %150, %151 : vector<36x512xf32>
    %c0_84 = arith.constant 0 : index
    %c1024_85 = arith.constant 1024 : index
    %c0_86 = arith.constant 0 : index
    %153 = vector.load %arg13[%c0_84, %c1024_85, %c0_86] : memref<2x2048x32xf32, #tpu.memory_space<vmem>>, vector<1x512x32xf32>
    %154 = vector.shape_cast %153 : vector<1x512x32xf32> to vector<512x32xf32>
    %cst_87 = arith.constant dense<0.000000e+00> : vector<36x32xf32>
    %155 = tpu.matmul %152, %154, %cst_87 {dimension_numbers = #tpu.dot_dimension_numbers<[1], [0], [0], [1], [0, 0, 1, 1], [], []>} : vector<36x512xf32>, vector<512x32xf32>, vector<36x32xf32> -> vector<36x32xf32>
    %156 = arith.addf %143, %155 : vector<36x32xf32>
    %c0_88 = arith.constant 0 : index
    %c0_89 = arith.constant 0 : index
    %c1536 = arith.constant 1536 : index
    %157 = vector.load %arg11[%c0_88, %c0_89, %c1536] : memref<2x32x2048xf32, #tpu.memory_space<vmem>>, vector<1x32x512xf32>
    %158 = vector.shape_cast %157 : vector<1x32x512xf32> to vector<32x512xf32>
    %cst_90 = arith.constant dense<0.000000e+00> : vector<36x512xf32>
    %159 = tpu.matmul %116, %158, %cst_90 {dimension_numbers = #tpu.dot_dimension_numbers<[1], [0], [0], [1], [0, 0, 1, 1], [], []>} : vector<36x32xf32>, vector<32x512xf32>, vector<36x512xf32> -> vector<36x512xf32>
    %c0_91 = arith.constant 0 : index
    %c0_92 = arith.constant 0 : index
    %c1536_93 = arith.constant 1536 : index
    %160 = vector.load %arg12[%c0_91, %c0_92, %c1536_93] : memref<2x1x2048xf32, #tpu.memory_space<vmem>>, vector<1x1x512xf32>
    %161 = vector.shape_cast %160 : vector<1x1x512xf32> to vector<1x512xf32>
    %162 = vector.broadcast %161 : vector<1x512xf32> to vector<36x512xf32>
    %163 = arith.addf %159, %162 : vector<36x512xf32>
    %cst_94 = arith.constant 0.000000e+00 : f32
    %164 = vector.broadcast %cst_94 : f32 to vector<36x512xf32>
    %165 = arith.maximumf %163, %164 : vector<36x512xf32>
    %c0_95 = arith.constant 0 : index
    %c1536_96 = arith.constant 1536 : index
    %c0_97 = arith.constant 0 : index
    %166 = vector.load %arg13[%c0_95, %c1536_96, %c0_97] : memref<2x2048x32xf32, #tpu.memory_space<vmem>>, vector<1x512x32xf32>
    %167 = vector.shape_cast %166 : vector<1x512x32xf32> to vector<512x32xf32>
    %cst_98 = arith.constant dense<0.000000e+00> : vector<36x32xf32>
    %168 = tpu.matmul %165, %167, %cst_98 {dimension_numbers = #tpu.dot_dimension_numbers<[1], [0], [0], [1], [0, 0, 1, 1], [], []>} : vector<36x512xf32>, vector<512x32xf32>, vector<36x32xf32> -> vector<36x32xf32>
    %169 = arith.addf %156, %168 : vector<36x32xf32>
    %c0_99 = arith.constant 0 : index
    %c0_100 = arith.constant 0 : index
    %c0_101 = arith.constant 0 : index
    %170 = vector.load %arg14[%c0_99, %c0_100, %c0_101] : memref<2x1x32xf32, #tpu.memory_space<vmem>>, vector<1x1x32xf32>
    %171 = vector.shape_cast %170 : vector<1x1x32xf32> to vector<1x32xf32>
    %172 = vector.broadcast %171 : vector<1x32xf32> to vector<36x32xf32>
    %173 = arith.addf %169, %172 : vector<36x32xf32>
    %174 = arith.addf %116, %173 : vector<36x32xf32>
    %c0_102 = arith.constant 0 : index
    %c0_103 = arith.constant 0 : index
    %c0_104 = arith.constant 0 : index
    %175 = vector.load %arg15[%c0_102, %c0_103, %c0_104] : memref<2x1x32xf32, #tpu.memory_space<vmem>>, vector<1x1x32xf32>
    %176 = vector.shape_cast %175 : vector<1x1x32xf32> to vector<1x32xf32>
    %c0_105 = arith.constant 0 : index
    %c0_106 = arith.constant 0 : index
    %c0_107 = arith.constant 0 : index
    %177 = vector.load %arg16[%c0_105, %c0_106, %c0_107] : memref<2x1x32xf32, #tpu.memory_space<vmem>>, vector<1x1x32xf32>
    %178 = vector.shape_cast %177 : vector<1x1x32xf32> to vector<1x32xf32>
    %cst_108 = arith.constant dense<0.000000e+00> : vector<36xf32>
    %179 = vector.multi_reduction <add>, %174, %cst_108 [1] : vector<36x32xf32> to vector<36xf32>
    %180 = vector.shape_cast %179 : vector<36xf32> to vector<36x1xf32>
    %cst_109 = arith.constant 3.200000e+01 : f32
    %181 = vector.broadcast %cst_109 : f32 to vector<36x1xf32>
    %182 = arith.divf %180, %181 : vector<36x1xf32>
    %183 = vector.broadcast %182 : vector<36x1xf32> to vector<36x32xf32>
    %184 = arith.subf %174, %183 : vector<36x32xf32>
    %185 = arith.mulf %184, %184 : vector<36x32xf32>
    %cst_110 = arith.constant dense<0.000000e+00> : vector<36xf32>
    %186 = vector.multi_reduction <add>, %185, %cst_110 [1] : vector<36x32xf32> to vector<36xf32>
    %187 = vector.shape_cast %186 : vector<36xf32> to vector<36x1xf32>
    %cst_111 = arith.constant 3.200000e+01 : f32
    %188 = vector.broadcast %cst_111 : f32 to vector<36x1xf32>
    %189 = arith.divf %187, %188 : vector<36x1xf32>
    %cst_112 = arith.constant 9.99999974E-6 : f32
    %190 = vector.broadcast %cst_112 : f32 to vector<36x1xf32>
    %191 = arith.addf %189, %190 : vector<36x1xf32>
    %192 = math.rsqrt %191 : vector<36x1xf32>
    %193 = vector.broadcast %192 : vector<36x1xf32> to vector<36x32xf32>
    %194 = arith.mulf %184, %193 : vector<36x32xf32>
    %195 = vector.broadcast %176 : vector<1x32xf32> to vector<36x32xf32>
    %196 = arith.mulf %194, %195 : vector<36x32xf32>
    %197 = vector.broadcast %178 : vector<1x32xf32> to vector<36x32xf32>
    %198 = arith.addf %196, %197 : vector<36x32xf32>
    %c1 = arith.constant 1 : index
    %c0_113 = arith.constant 0 : index
    %c0_114 = arith.constant 0 : index
    %199 = vector.load %arg5[%c1, %c0_113, %c0_114] : memref<2x32x96xf32, #tpu.memory_space<vmem>>, vector<1x32x96xf32>
    %200 = vector.shape_cast %199 : vector<1x32x96xf32> to vector<32x96xf32>
    %cst_115 = arith.constant dense<0.000000e+00> : vector<36x96xf32>
    %201 = tpu.matmul %198, %200, %cst_115 {dimension_numbers = #tpu.dot_dimension_numbers<[1], [0], [0], [1], [0, 0, 1, 1], [], []>} : vector<36x32xf32>, vector<32x96xf32>, vector<36x96xf32> -> vector<36x96xf32>
    %c1_116 = arith.constant 1 : index
    %c0_117 = arith.constant 0 : index
    %c0_118 = arith.constant 0 : index
    %202 = vector.load %arg6[%c1_116, %c0_117, %c0_118] : memref<2x1x96xf32, #tpu.memory_space<vmem>>, vector<1x1x96xf32>
    %203 = vector.shape_cast %202 : vector<1x1x96xf32> to vector<1x96xf32>
    %204 = vector.broadcast %203 : vector<1x96xf32> to vector<36x96xf32>
    %205 = arith.addf %201, %204 : vector<36x96xf32>
    %206 = vector.extract_strided_slice %205 {offsets = [0, 0], sizes = [36, 8], strides = [1, 1]} : vector<36x96xf32> to vector<36x8xf32>
    %cst_119 = arith.constant 0.353553385 : f32
    %207 = vector.broadcast %cst_119 : f32 to vector<36x8xf32>
    %208 = arith.mulf %206, %207 : vector<36x8xf32>
    %209 = vector.extract_strided_slice %205 {offsets = [0, 32], sizes = [36, 8], strides = [1, 1]} : vector<36x96xf32> to vector<36x8xf32>
    %210 = vector.extract_strided_slice %205 {offsets = [0, 64], sizes = [36, 8], strides = [1, 1]} : vector<36x96xf32> to vector<36x8xf32>
    %cst_120 = arith.constant dense<0.000000e+00> : vector<36x36xf32>
    %211 = tpu.matmul %208, %209, %cst_120 {dimension_numbers = #tpu.dot_dimension_numbers<[1], [1], [0], [0], [0, 0, 1, 0], [], []>} : vector<36x8xf32>, vector<36x8xf32>, vector<36x36xf32> -> vector<36x36xf32>
    %cst_121 = arith.constant dense<0xFF800000> : vector<36xf32>
    %212 = vector.multi_reduction <maximumf>, %211, %cst_121 [1] : vector<36x36xf32> to vector<36xf32>
    %213 = vector.shape_cast %212 : vector<36xf32> to vector<36x1xf32>
    %214 = vector.broadcast %213 : vector<36x1xf32> to vector<36x36xf32>
    %215 = arith.subf %211, %214 : vector<36x36xf32>
    %216 = math.exp %215 : vector<36x36xf32>
    %cst_122 = arith.constant dense<0.000000e+00> : vector<36xf32>
    %217 = vector.multi_reduction <add>, %216, %cst_122 [1] : vector<36x36xf32> to vector<36xf32>
    %218 = vector.shape_cast %217 : vector<36xf32> to vector<36x1xf32>
    %219 = tpu.reciprocal %218 {approx = true} : vector<36x1xf32> -> vector<36x1xf32>
    %220 = vector.broadcast %219 : vector<36x1xf32> to vector<36x36xf32>
    %221 = arith.mulf %216, %220 : vector<36x36xf32>
    %cst_123 = arith.constant dense<0.000000e+00> : vector<36x8xf32>
    %222 = tpu.matmul %221, %210, %cst_123 {dimension_numbers = #tpu.dot_dimension_numbers<[1], [0], [0], [1], [0, 0, 1, 1], [], []>} : vector<36x36xf32>, vector<36x8xf32>, vector<36x8xf32> -> vector<36x8xf32>
    %223 = vector.extract_strided_slice %205 {offsets = [0, 8], sizes = [36, 8], strides = [1, 1]} : vector<36x96xf32> to vector<36x8xf32>
    %cst_124 = arith.constant 0.353553385 : f32
    %224 = vector.broadcast %cst_124 : f32 to vector<36x8xf32>
    %225 = arith.mulf %223, %224 : vector<36x8xf32>
    %226 = vector.extract_strided_slice %205 {offsets = [0, 40], sizes = [36, 8], strides = [1, 1]} : vector<36x96xf32> to vector<36x8xf32>
    %227 = vector.extract_strided_slice %205 {offsets = [0, 72], sizes = [36, 8], strides = [1, 1]} : vector<36x96xf32> to vector<36x8xf32>
    %cst_125 = arith.constant dense<0.000000e+00> : vector<36x36xf32>
    %228 = tpu.matmul %225, %226, %cst_125 {dimension_numbers = #tpu.dot_dimension_numbers<[1], [1], [0], [0], [0, 0, 1, 0], [], []>} : vector<36x8xf32>, vector<36x8xf32>, vector<36x36xf32> -> vector<36x36xf32>
    %cst_126 = arith.constant dense<0xFF800000> : vector<36xf32>
    %229 = vector.multi_reduction <maximumf>, %228, %cst_126 [1] : vector<36x36xf32> to vector<36xf32>
    %230 = vector.shape_cast %229 : vector<36xf32> to vector<36x1xf32>
    %231 = vector.broadcast %230 : vector<36x1xf32> to vector<36x36xf32>
    %232 = arith.subf %228, %231 : vector<36x36xf32>
    %233 = math.exp %232 : vector<36x36xf32>
    %cst_127 = arith.constant dense<0.000000e+00> : vector<36xf32>
    %234 = vector.multi_reduction <add>, %233, %cst_127 [1] : vector<36x36xf32> to vector<36xf32>
    %235 = vector.shape_cast %234 : vector<36xf32> to vector<36x1xf32>
    %236 = tpu.reciprocal %235 {approx = true} : vector<36x1xf32> -> vector<36x1xf32>
    %237 = vector.broadcast %236 : vector<36x1xf32> to vector<36x36xf32>
    %238 = arith.mulf %233, %237 : vector<36x36xf32>
    %cst_128 = arith.constant dense<0.000000e+00> : vector<36x8xf32>
    %239 = tpu.matmul %238, %227, %cst_128 {dimension_numbers = #tpu.dot_dimension_numbers<[1], [0], [0], [1], [0, 0, 1, 1], [], []>} : vector<36x36xf32>, vector<36x8xf32>, vector<36x8xf32> -> vector<36x8xf32>
    %240 = vector.extract_strided_slice %205 {offsets = [0, 16], sizes = [36, 8], strides = [1, 1]} : vector<36x96xf32> to vector<36x8xf32>
    %cst_129 = arith.constant 0.353553385 : f32
    %241 = vector.broadcast %cst_129 : f32 to vector<36x8xf32>
    %242 = arith.mulf %240, %241 : vector<36x8xf32>
    %243 = vector.extract_strided_slice %205 {offsets = [0, 48], sizes = [36, 8], strides = [1, 1]} : vector<36x96xf32> to vector<36x8xf32>
    %244 = vector.extract_strided_slice %205 {offsets = [0, 80], sizes = [36, 8], strides = [1, 1]} : vector<36x96xf32> to vector<36x8xf32>
    %cst_130 = arith.constant dense<0.000000e+00> : vector<36x36xf32>
    %245 = tpu.matmul %242, %243, %cst_130 {dimension_numbers = #tpu.dot_dimension_numbers<[1], [1], [0], [0], [0, 0, 1, 0], [], []>} : vector<36x8xf32>, vector<36x8xf32>, vector<36x36xf32> -> vector<36x36xf32>
    %cst_131 = arith.constant dense<0xFF800000> : vector<36xf32>
    %246 = vector.multi_reduction <maximumf>, %245, %cst_131 [1] : vector<36x36xf32> to vector<36xf32>
    %247 = vector.shape_cast %246 : vector<36xf32> to vector<36x1xf32>
    %248 = vector.broadcast %247 : vector<36x1xf32> to vector<36x36xf32>
    %249 = arith.subf %245, %248 : vector<36x36xf32>
    %250 = math.exp %249 : vector<36x36xf32>
    %cst_132 = arith.constant dense<0.000000e+00> : vector<36xf32>
    %251 = vector.multi_reduction <add>, %250, %cst_132 [1] : vector<36x36xf32> to vector<36xf32>
    %252 = vector.shape_cast %251 : vector<36xf32> to vector<36x1xf32>
    %253 = tpu.reciprocal %252 {approx = true} : vector<36x1xf32> -> vector<36x1xf32>
    %254 = vector.broadcast %253 : vector<36x1xf32> to vector<36x36xf32>
    %255 = arith.mulf %250, %254 : vector<36x36xf32>
    %cst_133 = arith.constant dense<0.000000e+00> : vector<36x8xf32>
    %256 = tpu.matmul %255, %244, %cst_133 {dimension_numbers = #tpu.dot_dimension_numbers<[1], [0], [0], [1], [0, 0, 1, 1], [], []>} : vector<36x36xf32>, vector<36x8xf32>, vector<36x8xf32> -> vector<36x8xf32>
    %257 = vector.extract_strided_slice %205 {offsets = [0, 24], sizes = [36, 8], strides = [1, 1]} : vector<36x96xf32> to vector<36x8xf32>
    %cst_134 = arith.constant 0.353553385 : f32
    %258 = vector.broadcast %cst_134 : f32 to vector<36x8xf32>
    %259 = arith.mulf %257, %258 : vector<36x8xf32>
    %260 = vector.extract_strided_slice %205 {offsets = [0, 56], sizes = [36, 8], strides = [1, 1]} : vector<36x96xf32> to vector<36x8xf32>
    %261 = vector.extract_strided_slice %205 {offsets = [0, 88], sizes = [36, 8], strides = [1, 1]} : vector<36x96xf32> to vector<36x8xf32>
    %cst_135 = arith.constant dense<0.000000e+00> : vector<36x36xf32>
    %262 = tpu.matmul %259, %260, %cst_135 {dimension_numbers = #tpu.dot_dimension_numbers<[1], [1], [0], [0], [0, 0, 1, 0], [], []>} : vector<36x8xf32>, vector<36x8xf32>, vector<36x36xf32> -> vector<36x36xf32>
    %cst_136 = arith.constant dense<0xFF800000> : vector<36xf32>
    %263 = vector.multi_reduction <maximumf>, %262, %cst_136 [1] : vector<36x36xf32> to vector<36xf32>
    %264 = vector.shape_cast %263 : vector<36xf32> to vector<36x1xf32>
    %265 = vector.broadcast %264 : vector<36x1xf32> to vector<36x36xf32>
    %266 = arith.subf %262, %265 : vector<36x36xf32>
    %267 = math.exp %266 : vector<36x36xf32>
    %cst_137 = arith.constant dense<0.000000e+00> : vector<36xf32>
    %268 = vector.multi_reduction <add>, %267, %cst_137 [1] : vector<36x36xf32> to vector<36xf32>
    %269 = vector.shape_cast %268 : vector<36xf32> to vector<36x1xf32>
    %270 = tpu.reciprocal %269 {approx = true} : vector<36x1xf32> -> vector<36x1xf32>
    %271 = vector.broadcast %270 : vector<36x1xf32> to vector<36x36xf32>
    %272 = arith.mulf %267, %271 : vector<36x36xf32>
    %cst_138 = arith.constant dense<0.000000e+00> : vector<36x8xf32>
    %273 = tpu.matmul %272, %261, %cst_138 {dimension_numbers = #tpu.dot_dimension_numbers<[1], [0], [0], [1], [0, 0, 1, 1], [], []>} : vector<36x36xf32>, vector<36x8xf32>, vector<36x8xf32> -> vector<36x8xf32>
    %274 = tpu.concatenate %222, %239, %256, %273 in 1 : vector<36x8xf32>, vector<36x8xf32>, vector<36x8xf32>, vector<36x8xf32> -> vector<36x32xf32>
    %c1_139 = arith.constant 1 : index
    %c0_140 = arith.constant 0 : index
    %c0_141 = arith.constant 0 : index
    %275 = vector.load %arg7[%c1_139, %c0_140, %c0_141] : memref<2x32x32xf32, #tpu.memory_space<vmem>>, vector<1x32x32xf32>
    %276 = vector.shape_cast %275 : vector<1x32x32xf32> to vector<32x32xf32>
    %cst_142 = arith.constant dense<0.000000e+00> : vector<36x32xf32>
    %277 = tpu.matmul %274, %276, %cst_142 {dimension_numbers = #tpu.dot_dimension_numbers<[1], [0], [0], [1], [0, 0, 1, 1], [], []>} : vector<36x32xf32>, vector<32x32xf32>, vector<36x32xf32> -> vector<36x32xf32>
    %c1_143 = arith.constant 1 : index
    %c0_144 = arith.constant 0 : index
    %c0_145 = arith.constant 0 : index
    %278 = vector.load %arg8[%c1_143, %c0_144, %c0_145] : memref<2x1x32xf32, #tpu.memory_space<vmem>>, vector<1x1x32xf32>
    %279 = vector.shape_cast %278 : vector<1x1x32xf32> to vector<1x32xf32>
    %280 = vector.broadcast %279 : vector<1x32xf32> to vector<36x32xf32>
    %281 = arith.addf %277, %280 : vector<36x32xf32>
    %282 = arith.addf %198, %281 : vector<36x32xf32>
    %c1_146 = arith.constant 1 : index
    %c0_147 = arith.constant 0 : index
    %c0_148 = arith.constant 0 : index
    %283 = vector.load %arg9[%c1_146, %c0_147, %c0_148] : memref<2x1x32xf32, #tpu.memory_space<vmem>>, vector<1x1x32xf32>
    %284 = vector.shape_cast %283 : vector<1x1x32xf32> to vector<1x32xf32>
    %c1_149 = arith.constant 1 : index
    %c0_150 = arith.constant 0 : index
    %c0_151 = arith.constant 0 : index
    %285 = vector.load %arg10[%c1_149, %c0_150, %c0_151] : memref<2x1x32xf32, #tpu.memory_space<vmem>>, vector<1x1x32xf32>
    %286 = vector.shape_cast %285 : vector<1x1x32xf32> to vector<1x32xf32>
    %cst_152 = arith.constant dense<0.000000e+00> : vector<36xf32>
    %287 = vector.multi_reduction <add>, %282, %cst_152 [1] : vector<36x32xf32> to vector<36xf32>
    %288 = vector.shape_cast %287 : vector<36xf32> to vector<36x1xf32>
    %cst_153 = arith.constant 3.200000e+01 : f32
    %289 = vector.broadcast %cst_153 : f32 to vector<36x1xf32>
    %290 = arith.divf %288, %289 : vector<36x1xf32>
    %291 = vector.broadcast %290 : vector<36x1xf32> to vector<36x32xf32>
    %292 = arith.subf %282, %291 : vector<36x32xf32>
    %293 = arith.mulf %292, %292 : vector<36x32xf32>
    %cst_154 = arith.constant dense<0.000000e+00> : vector<36xf32>
    %294 = vector.multi_reduction <add>, %293, %cst_154 [1] : vector<36x32xf32> to vector<36xf32>
    %295 = vector.shape_cast %294 : vector<36xf32> to vector<36x1xf32>
    %cst_155 = arith.constant 3.200000e+01 : f32
    %296 = vector.broadcast %cst_155 : f32 to vector<36x1xf32>
    %297 = arith.divf %295, %296 : vector<36x1xf32>
    %cst_156 = arith.constant 9.99999974E-6 : f32
    %298 = vector.broadcast %cst_156 : f32 to vector<36x1xf32>
    %299 = arith.addf %297, %298 : vector<36x1xf32>
    %300 = math.rsqrt %299 : vector<36x1xf32>
    %301 = vector.broadcast %300 : vector<36x1xf32> to vector<36x32xf32>
    %302 = arith.mulf %292, %301 : vector<36x32xf32>
    %303 = vector.broadcast %284 : vector<1x32xf32> to vector<36x32xf32>
    %304 = arith.mulf %302, %303 : vector<36x32xf32>
    %305 = vector.broadcast %286 : vector<1x32xf32> to vector<36x32xf32>
    %306 = arith.addf %304, %305 : vector<36x32xf32>
    %cst_157 = arith.constant 0.000000e+00 : f32
    %307 = vector.broadcast %cst_157 : f32 to vector<36x32xf32>
    %c1_158 = arith.constant 1 : index
    %c0_159 = arith.constant 0 : index
    %c0_160 = arith.constant 0 : index
    %308 = vector.load %arg11[%c1_158, %c0_159, %c0_160] : memref<2x32x2048xf32, #tpu.memory_space<vmem>>, vector<1x32x512xf32>
    %309 = vector.shape_cast %308 : vector<1x32x512xf32> to vector<32x512xf32>
    %cst_161 = arith.constant dense<0.000000e+00> : vector<36x512xf32>
    %310 = tpu.matmul %306, %309, %cst_161 {dimension_numbers = #tpu.dot_dimension_numbers<[1], [0], [0], [1], [0, 0, 1, 1], [], []>} : vector<36x32xf32>, vector<32x512xf32>, vector<36x512xf32> -> vector<36x512xf32>
    %c1_162 = arith.constant 1 : index
    %c0_163 = arith.constant 0 : index
    %c0_164 = arith.constant 0 : index
    %311 = vector.load %arg12[%c1_162, %c0_163, %c0_164] : memref<2x1x2048xf32, #tpu.memory_space<vmem>>, vector<1x1x512xf32>
    %312 = vector.shape_cast %311 : vector<1x1x512xf32> to vector<1x512xf32>
    %313 = vector.broadcast %312 : vector<1x512xf32> to vector<36x512xf32>
    %314 = arith.addf %310, %313 : vector<36x512xf32>
    %cst_165 = arith.constant 0.000000e+00 : f32
    %315 = vector.broadcast %cst_165 : f32 to vector<36x512xf32>
    %316 = arith.maximumf %314, %315 : vector<36x512xf32>
    %c1_166 = arith.constant 1 : index
    %c0_167 = arith.constant 0 : index
    %c0_168 = arith.constant 0 : index
    %317 = vector.load %arg13[%c1_166, %c0_167, %c0_168] : memref<2x2048x32xf32, #tpu.memory_space<vmem>>, vector<1x512x32xf32>
    %318 = vector.shape_cast %317 : vector<1x512x32xf32> to vector<512x32xf32>
    %cst_169 = arith.constant dense<0.000000e+00> : vector<36x32xf32>
    %319 = tpu.matmul %316, %318, %cst_169 {dimension_numbers = #tpu.dot_dimension_numbers<[1], [0], [0], [1], [0, 0, 1, 1], [], []>} : vector<36x512xf32>, vector<512x32xf32>, vector<36x32xf32> -> vector<36x32xf32>
    %320 = arith.addf %307, %319 : vector<36x32xf32>
    %c1_170 = arith.constant 1 : index
    %c0_171 = arith.constant 0 : index
    %c512_172 = arith.constant 512 : index
    %321 = vector.load %arg11[%c1_170, %c0_171, %c512_172] : memref<2x32x2048xf32, #tpu.memory_space<vmem>>, vector<1x32x512xf32>
    %322 = vector.shape_cast %321 : vector<1x32x512xf32> to vector<32x512xf32>
    %cst_173 = arith.constant dense<0.000000e+00> : vector<36x512xf32>
    %323 = tpu.matmul %306, %322, %cst_173 {dimension_numbers = #tpu.dot_dimension_numbers<[1], [0], [0], [1], [0, 0, 1, 1], [], []>} : vector<36x32xf32>, vector<32x512xf32>, vector<36x512xf32> -> vector<36x512xf32>
    %c1_174 = arith.constant 1 : index
    %c0_175 = arith.constant 0 : index
    %c512_176 = arith.constant 512 : index
    %324 = vector.load %arg12[%c1_174, %c0_175, %c512_176] : memref<2x1x2048xf32, #tpu.memory_space<vmem>>, vector<1x1x512xf32>
    %325 = vector.shape_cast %324 : vector<1x1x512xf32> to vector<1x512xf32>
    %326 = vector.broadcast %325 : vector<1x512xf32> to vector<36x512xf32>
    %327 = arith.addf %323, %326 : vector<36x512xf32>
    %cst_177 = arith.constant 0.000000e+00 : f32
    %328 = vector.broadcast %cst_177 : f32 to vector<36x512xf32>
    %329 = arith.maximumf %327, %328 : vector<36x512xf32>
    %c1_178 = arith.constant 1 : index
    %c512_179 = arith.constant 512 : index
    %c0_180 = arith.constant 0 : index
    %330 = vector.load %arg13[%c1_178, %c512_179, %c0_180] : memref<2x2048x32xf32, #tpu.memory_space<vmem>>, vector<1x512x32xf32>
    %331 = vector.shape_cast %330 : vector<1x512x32xf32> to vector<512x32xf32>
    %cst_181 = arith.constant dense<0.000000e+00> : vector<36x32xf32>
    %332 = tpu.matmul %329, %331, %cst_181 {dimension_numbers = #tpu.dot_dimension_numbers<[1], [0], [0], [1], [0, 0, 1, 1], [], []>} : vector<36x512xf32>, vector<512x32xf32>, vector<36x32xf32> -> vector<36x32xf32>
    %333 = arith.addf %320, %332 : vector<36x32xf32>
    %c1_182 = arith.constant 1 : index
    %c0_183 = arith.constant 0 : index
    %c1024_184 = arith.constant 1024 : index
    %334 = vector.load %arg11[%c1_182, %c0_183, %c1024_184] : memref<2x32x2048xf32, #tpu.memory_space<vmem>>, vector<1x32x512xf32>
    %335 = vector.shape_cast %334 : vector<1x32x512xf32> to vector<32x512xf32>
    %cst_185 = arith.constant dense<0.000000e+00> : vector<36x512xf32>
    %336 = tpu.matmul %306, %335, %cst_185 {dimension_numbers = #tpu.dot_dimension_numbers<[1], [0], [0], [1], [0, 0, 1, 1], [], []>} : vector<36x32xf32>, vector<32x512xf32>, vector<36x512xf32> -> vector<36x512xf32>
    %c1_186 = arith.constant 1 : index
    %c0_187 = arith.constant 0 : index
    %c1024_188 = arith.constant 1024 : index
    %337 = vector.load %arg12[%c1_186, %c0_187, %c1024_188] : memref<2x1x2048xf32, #tpu.memory_space<vmem>>, vector<1x1x512xf32>
    %338 = vector.shape_cast %337 : vector<1x1x512xf32> to vector<1x512xf32>
    %339 = vector.broadcast %338 : vector<1x512xf32> to vector<36x512xf32>
    %340 = arith.addf %336, %339 : vector<36x512xf32>
    %cst_189 = arith.constant 0.000000e+00 : f32
    %341 = vector.broadcast %cst_189 : f32 to vector<36x512xf32>
    %342 = arith.maximumf %340, %341 : vector<36x512xf32>
    %c1_190 = arith.constant 1 : index
    %c1024_191 = arith.constant 1024 : index
    %c0_192 = arith.constant 0 : index
    %343 = vector.load %arg13[%c1_190, %c1024_191, %c0_192] : memref<2x2048x32xf32, #tpu.memory_space<vmem>>, vector<1x512x32xf32>
    %344 = vector.shape_cast %343 : vector<1x512x32xf32> to vector<512x32xf32>
    %cst_193 = arith.constant dense<0.000000e+00> : vector<36x32xf32>
    %345 = tpu.matmul %342, %344, %cst_193 {dimension_numbers = #tpu.dot_dimension_numbers<[1], [0], [0], [1], [0, 0, 1, 1], [], []>} : vector<36x512xf32>, vector<512x32xf32>, vector<36x32xf32> -> vector<36x32xf32>
    %346 = arith.addf %333, %345 : vector<36x32xf32>
    %c1_194 = arith.constant 1 : index
    %c0_195 = arith.constant 0 : index
    %c1536_196 = arith.constant 1536 : index
    %347 = vector.load %arg11[%c1_194, %c0_195, %c1536_196] : memref<2x32x2048xf32, #tpu.memory_space<vmem>>, vector<1x32x512xf32>
    %348 = vector.shape_cast %347 : vector<1x32x512xf32> to vector<32x512xf32>
    %cst_197 = arith.constant dense<0.000000e+00> : vector<36x512xf32>
    %349 = tpu.matmul %306, %348, %cst_197 {dimension_numbers = #tpu.dot_dimension_numbers<[1], [0], [0], [1], [0, 0, 1, 1], [], []>} : vector<36x32xf32>, vector<32x512xf32>, vector<36x512xf32> -> vector<36x512xf32>
    %c1_198 = arith.constant 1 : index
    %c0_199 = arith.constant 0 : index
    %c1536_200 = arith.constant 1536 : index
    %350 = vector.load %arg12[%c1_198, %c0_199, %c1536_200] : memref<2x1x2048xf32, #tpu.memory_space<vmem>>, vector<1x1x512xf32>
    %351 = vector.shape_cast %350 : vector<1x1x512xf32> to vector<1x512xf32>
    %352 = vector.broadcast %351 : vector<1x512xf32> to vector<36x512xf32>
    %353 = arith.addf %349, %352 : vector<36x512xf32>
    %cst_201 = arith.constant 0.000000e+00 : f32
    %354 = vector.broadcast %cst_201 : f32 to vector<36x512xf32>
    %355 = arith.maximumf %353, %354 : vector<36x512xf32>
    %c1_202 = arith.constant 1 : index
    %c1536_203 = arith.constant 1536 : index
    %c0_204 = arith.constant 0 : index
    %356 = vector.load %arg13[%c1_202, %c1536_203, %c0_204] : memref<2x2048x32xf32, #tpu.memory_space<vmem>>, vector<1x512x32xf32>
    %357 = vector.shape_cast %356 : vector<1x512x32xf32> to vector<512x32xf32>
    %cst_205 = arith.constant dense<0.000000e+00> : vector<36x32xf32>
    %358 = tpu.matmul %355, %357, %cst_205 {dimension_numbers = #tpu.dot_dimension_numbers<[1], [0], [0], [1], [0, 0, 1, 1], [], []>} : vector<36x512xf32>, vector<512x32xf32>, vector<36x32xf32> -> vector<36x32xf32>
    %359 = arith.addf %346, %358 : vector<36x32xf32>
    %c1_206 = arith.constant 1 : index
    %c0_207 = arith.constant 0 : index
    %c0_208 = arith.constant 0 : index
    %360 = vector.load %arg14[%c1_206, %c0_207, %c0_208] : memref<2x1x32xf32, #tpu.memory_space<vmem>>, vector<1x1x32xf32>
    %361 = vector.shape_cast %360 : vector<1x1x32xf32> to vector<1x32xf32>
    %362 = vector.broadcast %361 : vector<1x32xf32> to vector<36x32xf32>
    %363 = arith.addf %359, %362 : vector<36x32xf32>
    %364 = arith.addf %306, %363 : vector<36x32xf32>
    %c1_209 = arith.constant 1 : index
    %c0_210 = arith.constant 0 : index
    %c0_211 = arith.constant 0 : index
    %365 = vector.load %arg15[%c1_209, %c0_210, %c0_211] : memref<2x1x32xf32, #tpu.memory_space<vmem>>, vector<1x1x32xf32>
    %366 = vector.shape_cast %365 : vector<1x1x32xf32> to vector<1x32xf32>
    %c1_212 = arith.constant 1 : index
    %c0_213 = arith.constant 0 : index
    %c0_214 = arith.constant 0 : index
    %367 = vector.load %arg16[%c1_212, %c0_213, %c0_214] : memref<2x1x32xf32, #tpu.memory_space<vmem>>, vector<1x1x32xf32>
    %368 = vector.shape_cast %367 : vector<1x1x32xf32> to vector<1x32xf32>
    %cst_215 = arith.constant dense<0.000000e+00> : vector<36xf32>
    %369 = vector.multi_reduction <add>, %364, %cst_215 [1] : vector<36x32xf32> to vector<36xf32>
    %370 = vector.shape_cast %369 : vector<36xf32> to vector<36x1xf32>
    %cst_216 = arith.constant 3.200000e+01 : f32
    %371 = vector.broadcast %cst_216 : f32 to vector<36x1xf32>
    %372 = arith.divf %370, %371 : vector<36x1xf32>
    %373 = vector.broadcast %372 : vector<36x1xf32> to vector<36x32xf32>
    %374 = arith.subf %364, %373 : vector<36x32xf32>
    %375 = arith.mulf %374, %374 : vector<36x32xf32>
    %cst_217 = arith.constant dense<0.000000e+00> : vector<36xf32>
    %376 = vector.multi_reduction <add>, %375, %cst_217 [1] : vector<36x32xf32> to vector<36xf32>
    %377 = vector.shape_cast %376 : vector<36xf32> to vector<36x1xf32>
    %cst_218 = arith.constant 3.200000e+01 : f32
    %378 = vector.broadcast %cst_218 : f32 to vector<36x1xf32>
    %379 = arith.divf %377, %378 : vector<36x1xf32>
    %cst_219 = arith.constant 9.99999974E-6 : f32
    %380 = vector.broadcast %cst_219 : f32 to vector<36x1xf32>
    %381 = arith.addf %379, %380 : vector<36x1xf32>
    %382 = math.rsqrt %381 : vector<36x1xf32>
    %383 = vector.broadcast %382 : vector<36x1xf32> to vector<36x32xf32>
    %384 = arith.mulf %374, %383 : vector<36x32xf32>
    %385 = vector.broadcast %366 : vector<1x32xf32> to vector<36x32xf32>
    %386 = arith.mulf %384, %385 : vector<36x32xf32>
    %387 = vector.broadcast %368 : vector<1x32xf32> to vector<36x32xf32>
    %388 = arith.addf %386, %387 : vector<36x32xf32>
    %c0_220 = arith.constant 0 : index
    %c0_221 = arith.constant 0 : index
    %c0_222 = arith.constant 0 : index
    %389 = vector.load %arg17[%c0_220, %c0_221, %c0_222] : memref<1x36x32xf32, #tpu.memory_space<vmem>>, vector<1x36x32xf32>
    %390 = vector.shape_cast %389 : vector<1x36x32xf32> to vector<36x32xf32>
    %391 = vector.shape_cast %388 : vector<36x32xf32> to vector<1x36x32xf32>
    tpu.vector_store %arg17[%c0_220, %c0_221, %c0_222], %391 {strides = array<i32>} : memref<1x36x32xf32, #tpu.memory_space<vmem>>, vector<1x36x32xf32>,
    return
  }
  func.func @transform_0(%arg0: i32) -> (i32, i32, i32) {
    %c0_i32 = arith.constant 0 : i32
    %c0_i32_0 = arith.constant 0 : i32
    %c0_i32_1 = arith.constant 0 : i32
    return %arg0, %c0_i32, %c0_i32_0 : i32, i32, i32
  }
  func.func @transform_1(%arg0: i32) -> (i32, i32) {
    %c0_i32 = arith.constant 0 : i32
    %c0_i32_0 = arith.constant 0 : i32
    %c0_i32_1 = arith.constant 0 : i32
    return %c0_i32, %c0_i32_0 : i32, i32
  }
  func.func @transform_2(%arg0: i32) -> (i32, i32) {
    %c0_i32 = arith.constant 0 : i32
    %c0_i32_0 = arith.constant 0 : i32
    %c0_i32_1 = arith.constant 0 : i32
    return %c0_i32, %c0_i32_0 : i32, i32
  }
  func.func @transform_3(%arg0: i32) -> (i32, i32) {
    %c0_i32 = arith.constant 0 : i32
    %c0_i32_0 = arith.constant 0 : i32
    %c0_i32_1 = arith.constant 0 : i32
    return %c0_i32, %c0_i32_0 : i32, i32
  }
  func.func @transform_4(%arg0: i32) -> (i32, i32, i32) {
    %c0_i32 = arith.constant 0 : i32
    %c0_i32_0 = arith.constant 0 : i32
    %c0_i32_1 = arith.constant 0 : i32
    %c0_i32_2 = arith.constant 0 : i32
    return %c0_i32, %c0_i32_0, %c0_i32_1 : i32, i32, i32
  }
  func.func @transform_5(%arg0: i32) -> (i32, i32, i32) {
    %c0_i32 = arith.constant 0 : i32
    %c0_i32_0 = arith.constant 0 : i32
    %c0_i32_1 = arith.constant 0 : i32
    %c0_i32_2 = arith.constant 0 : i32
    return %c0_i32, %c0_i32_0, %c0_i32_1 : i32, i32, i32
  }
  func.func @transform_6(%arg0: i32) -> (i32, i32, i32) {
    %c0_i32 = arith.constant 0 : i32
    %c0_i32_0 = arith.constant 0 : i32
    %c0_i32_1 = arith.constant 0 : i32
    %c0_i32_2 = arith.constant 0 : i32
    return %c0_i32, %c0_i32_0, %c0_i32_1 : i32, i32, i32
  }
  func.func @transform_7(%arg0: i32) -> (i32, i32, i32) {
    %c0_i32 = arith.constant 0 : i32
    %c0_i32_0 = arith.constant 0 : i32
    %c0_i32_1 = arith.constant 0 : i32
    %c0_i32_2 = arith.constant 0 : i32
    return %c0_i32, %c0_i32_0, %c0_i32_1 : i32, i32, i32
  }
  func.func @transform_8(%arg0: i32) -> (i32, i32, i32) {
    %c0_i32 = arith.constant 0 : i32
    %c0_i32_0 = arith.constant 0 : i32
    %c0_i32_1 = arith.constant 0 : i32
    %c0_i32_2 = arith.constant 0 : i32
    return %c0_i32, %c0_i32_0, %c0_i32_1 : i32, i32, i32
  }
  func.func @transform_9(%arg0: i32) -> (i32, i32, i32) {
    %c0_i32 = arith.constant 0 : i32
    %c0_i32_0 = arith.constant 0 : i32
    %c0_i32_1 = arith.constant 0 : i32
    %c0_i32_2 = arith.constant 0 : i32
    return %c0_i32, %c0_i32_0, %c0_i32_1 : i32, i32, i32
  }
  func.func @transform_10(%arg0: i32) -> (i32, i32, i32) {
    %c0_i32 = arith.constant 0 : i32
    %c0_i32_0 = arith.constant 0 : i32
    %c0_i32_1 = arith.constant 0 : i32
    %c0_i32_2 = arith.constant 0 : i32
    return %c0_i32, %c0_i32_0, %c0_i32_1 : i32, i32, i32
  }
  func.func @transform_11(%arg0: i32) -> (i32, i32, i32) {
    %c0_i32 = arith.constant 0 : i32
    %c0_i32_0 = arith.constant 0 : i32
    %c0_i32_1 = arith.constant 0 : i32
    %c0_i32_2 = arith.constant 0 : i32
    return %c0_i32, %c0_i32_0, %c0_i32_1 : i32, i32, i32
  }
  func.func @transform_12(%arg0: i32) -> (i32, i32, i32) {
    %c0_i32 = arith.constant 0 : i32
    %c0_i32_0 = arith.constant 0 : i32
    %c0_i32_1 = arith.constant 0 : i32
    %c0_i32_2 = arith.constant 0 : i32
    return %c0_i32, %c0_i32_0, %c0_i32_1 : i32, i32, i32
  }
  func.func @transform_13(%arg0: i32) -> (i32, i32, i32) {
    %c0_i32 = arith.constant 0 : i32
    %c0_i32_0 = arith.constant 0 : i32
    %c0_i32_1 = arith.constant 0 : i32
    %c0_i32_2 = arith.constant 0 : i32
    return %c0_i32, %c0_i32_0, %c0_i32_1 : i32, i32, i32
  }
  func.func @transform_14(%arg0: i32) -> (i32, i32, i32) {
    %c0_i32 = arith.constant 0 : i32
    %c0_i32_0 = arith.constant 0 : i32
    %c0_i32_1 = arith.constant 0 : i32
    %c0_i32_2 = arith.constant 0 : i32
    return %c0_i32, %c0_i32_0, %c0_i32_1 : i32, i32, i32
  }
  func.func @transform_15(%arg0: i32) -> (i32, i32, i32) {
    %c0_i32 = arith.constant 0 : i32
    %c0_i32_0 = arith.constant 0 : i32
    %c0_i32_1 = arith.constant 0 : i32
    %c0_i32_2 = arith.constant 0 : i32
    return %c0_i32, %c0_i32_0, %c0_i32_1 : i32, i32, i32
  }
  func.func @transform_16(%arg0: i32) -> (i32, i32, i32) {
    %c0_i32 = arith.constant 0 : i32
    %c0_i32_0 = arith.constant 0 : i32
    %c0_i32_1 = arith.constant 0 : i32
    return %arg0, %c0_i32, %c0_i32_0 : i32, i32, i32
  }
}

module attributes {stable_mosaic.version = 11 : i64} {
  func.func @_head_kernel(%arg0: memref<2x1152xf32, #tpu.memory_space<vmem>>, %arg1: memref<1152x64xf32, #tpu.memory_space<vmem>>, %arg2: memref<1x64xf32, #tpu.memory_space<vmem>>, %arg3: memref<1x64xf32, #tpu.memory_space<vmem>>, %arg4: memref<1x64xf32, #tpu.memory_space<vmem>>, %arg5: memref<1x64xf32, #tpu.memory_space<vmem>>, %arg6: memref<1x64xf32, #tpu.memory_space<vmem>>, %arg7: memref<64x36xf32, #tpu.memory_space<vmem>>, %arg8: memref<1x36xf32, #tpu.memory_space<vmem>>, %arg9: memref<2x36xf32, #tpu.memory_space<vmem>>) attributes {dimension_semantics = [], scalar_prefetch = 0 : i64, scratch_operands = 0 : i64, tpu.core_type = #tpu.core_type<tc>} {
    %c0 = arith.constant 0 : index
    %c0_0 = arith.constant 0 : index
    %0 = vector.load %arg0[%c0, %c0_0] : memref<2x1152xf32, #tpu.memory_space<vmem>>, vector<2x1152xf32>
    %c0_1 = arith.constant 0 : index
    %c0_2 = arith.constant 0 : index
    %1 = vector.load %arg1[%c0_1, %c0_2] : memref<1152x64xf32, #tpu.memory_space<vmem>>, vector<1152x64xf32>
    %cst = arith.constant dense<0.000000e+00> : vector<2x64xf32>
    %2 = tpu.matmul %0, %1, %cst {dimension_numbers = #tpu.dot_dimension_numbers<[1], [0], [0], [1], [0, 0, 1, 1], [], []>} : vector<2x1152xf32>, vector<1152x64xf32>, vector<2x64xf32> -> vector<2x64xf32>
    %c0_3 = arith.constant 0 : index
    %c0_4 = arith.constant 0 : index
    %3 = vector.load %arg2[%c0_3, %c0_4] : memref<1x64xf32, #tpu.memory_space<vmem>>, vector<1x64xf32>
    %4 = vector.broadcast %3 : vector<1x64xf32> to vector<2x64xf32>
    %5 = arith.addf %2, %4 : vector<2x64xf32>
    %c0_5 = arith.constant 0 : index
    %c0_6 = arith.constant 0 : index
    %6 = vector.load %arg3[%c0_5, %c0_6] : memref<1x64xf32, #tpu.memory_space<vmem>>, vector<1x64xf32>
    %7 = vector.broadcast %6 : vector<1x64xf32> to vector<2x64xf32>
    %8 = arith.subf %5, %7 : vector<2x64xf32>
    %c0_7 = arith.constant 0 : index
    %c0_8 = arith.constant 0 : index
    %9 = vector.load %arg4[%c0_7, %c0_8] : memref<1x64xf32, #tpu.memory_space<vmem>>, vector<1x64xf32>
    %cst_9 = arith.constant 9.99999974E-6 : f32
    %10 = vector.broadcast %cst_9 : f32 to vector<1x64xf32>
    %11 = arith.addf %9, %10 : vector<1x64xf32>
    %12 = math.rsqrt %11 : vector<1x64xf32>
    %13 = vector.broadcast %12 : vector<1x64xf32> to vector<2x64xf32>
    %14 = arith.mulf %8, %13 : vector<2x64xf32>
    %c0_10 = arith.constant 0 : index
    %c0_11 = arith.constant 0 : index
    %15 = vector.load %arg5[%c0_10, %c0_11] : memref<1x64xf32, #tpu.memory_space<vmem>>, vector<1x64xf32>
    %16 = vector.broadcast %15 : vector<1x64xf32> to vector<2x64xf32>
    %17 = arith.mulf %14, %16 : vector<2x64xf32>
    %c0_12 = arith.constant 0 : index
    %c0_13 = arith.constant 0 : index
    %18 = vector.load %arg6[%c0_12, %c0_13] : memref<1x64xf32, #tpu.memory_space<vmem>>, vector<1x64xf32>
    %19 = vector.broadcast %18 : vector<1x64xf32> to vector<2x64xf32>
    %20 = arith.addf %17, %19 : vector<2x64xf32>
    %cst_14 = arith.constant 5.000000e-01 : f32
    %21 = vector.broadcast %cst_14 : f32 to vector<2x64xf32>
    %22 = arith.mulf %21, %20 : vector<2x64xf32>
    %cst_15 = arith.constant 0.707106769 : f32
    %23 = vector.broadcast %cst_15 : f32 to vector<2x64xf32>
    %24 = arith.mulf %20, %23 : vector<2x64xf32>
    %cst_16 = arith.constant 0.000000e+00 : f32
    %25 = vector.broadcast %cst_16 : f32 to vector<2x64xf32>
    %26 = arith.cmpf olt, %24, %25 : vector<2x64xf32>
    %cst_17 = arith.constant -1.000000e+00 : f32
    %cst_18 = arith.constant 1.000000e+00 : f32
    %27 = vector.broadcast %cst_17 : f32 to vector<2x64xf32>
    %28 = vector.broadcast %cst_18 : f32 to vector<2x64xf32>
    %29 = arith.select %26, %27, %28 : vector<2x64xi1>, vector<2x64xf32>
    %30 = math.absf %24 : vector<2x64xf32>
    %cst_19 = arith.constant 0.327591091 : f32
    %31 = vector.broadcast %cst_19 : f32 to vector<2x64xf32>
    %32 = arith.mulf %31, %30 : vector<2x64xf32>
    %cst_20 = arith.constant 1.000000e+00 : f32
    %33 = vector.broadcast %cst_20 : f32 to vector<2x64xf32>
    %34 = arith.addf %33, %32 : vector<2x64xf32>
    %cst_21 = arith.constant 1.000000e+00 : f32
    %35 = vector.broadcast %cst_21 : f32 to vector<2x64xf32>
    %36 = arith.divf %35, %34 : vector<2x64xf32>
    %cst_22 = arith.constant 1.06140542 : f32
    %37 = vector.broadcast %cst_22 : f32 to vector<2x64xf32>
    %38 = arith.mulf %37, %36 : vector<2x64xf32>
    %cst_23 = arith.constant -1.45315206 : f32
    %39 = vector.broadcast %cst_23 : f32 to vector<2x64xf32>
    %40 = arith.addf %38, %39 : vector<2x64xf32>
    %41 = arith.mulf %40, %36 : vector<2x64xf32>
    %cst_24 = arith.constant 1.42141378 : f32
    %42 = vector.broadcast %cst_24 : f32 to vector<2x64xf32>
    %43 = arith.addf %41, %42 : vector<2x64xf32>
    %44 = arith.mulf %43, %36 : vector<2x64xf32>
    %cst_25 = arith.constant -0.284496725 : f32
    %45 = vector.broadcast %cst_25 : f32 to vector<2x64xf32>
    %46 = arith.addf %44, %45 : vector<2x64xf32>
    %47 = arith.mulf %46, %36 : vector<2x64xf32>
    %cst_26 = arith.constant 0.254829586 : f32
    %48 = vector.broadcast %cst_26 : f32 to vector<2x64xf32>
    %49 = arith.addf %47, %48 : vector<2x64xf32>
    %50 = arith.mulf %49, %36 : vector<2x64xf32>
    %cst_27 = arith.constant 0.000000e+00 : f32
    %51 = vector.broadcast %cst_27 : f32 to vector<2x64xf32>
    %52 = arith.subf %51, %30 : vector<2x64xf32>
    %53 = arith.mulf %52, %30 : vector<2x64xf32>
    %54 = math.exp %53 : vector<2x64xf32>
    %55 = arith.mulf %50, %54 : vector<2x64xf32>
    %cst_28 = arith.constant 1.000000e+00 : f32
    %56 = vector.broadcast %cst_28 : f32 to vector<2x64xf32>
    %57 = arith.subf %56, %55 : vector<2x64xf32>
    %58 = arith.mulf %29, %57 : vector<2x64xf32>
    %cst_29 = arith.constant 1.000000e+00 : f32
    %59 = vector.broadcast %cst_29 : f32 to vector<2x64xf32>
    %60 = arith.addf %59, %58 : vector<2x64xf32>
    %61 = arith.mulf %22, %60 : vector<2x64xf32>
    %c0_30 = arith.constant 0 : index
    %c0_31 = arith.constant 0 : index
    %62 = vector.load %arg7[%c0_30, %c0_31] : memref<64x36xf32, #tpu.memory_space<vmem>>, vector<64x36xf32>
    %cst_32 = arith.constant dense<0.000000e+00> : vector<2x36xf32>
    %63 = tpu.matmul %61, %62, %cst_32 {dimension_numbers = #tpu.dot_dimension_numbers<[1], [0], [0], [1], [0, 0, 1, 1], [], []>} : vector<2x64xf32>, vector<64x36xf32>, vector<2x36xf32> -> vector<2x36xf32>
    %c0_33 = arith.constant 0 : index
    %c0_34 = arith.constant 0 : index
    %64 = vector.load %arg8[%c0_33, %c0_34] : memref<1x36xf32, #tpu.memory_space<vmem>>, vector<1x36xf32>
    %65 = vector.broadcast %64 : vector<1x36xf32> to vector<2x36xf32>
    %66 = arith.addf %63, %65 : vector<2x36xf32>
    %cst_35 = arith.constant 0.000000e+00 : f32
    %67 = vector.broadcast %cst_35 : f32 to vector<2x36xf32>
    %68 = arith.maximumf %66, %67 : vector<2x36xf32>
    %c0_36 = arith.constant 0 : index
    %c0_37 = arith.constant 0 : index
    %69 = vector.load %arg9[%c0_36, %c0_37] : memref<2x36xf32, #tpu.memory_space<vmem>>, vector<2x36xf32>
    tpu.vector_store %arg9[%c0_36, %c0_37], %68 {strides = array<i32>} : memref<2x36xf32, #tpu.memory_space<vmem>>, vector<2x36xf32>,
    return
  }
}

</mosaic_0001>

<bundles_post_ra>
// kernel: ctran_forward.3
= control target key start
LH: loop header
LB: loop body
LE: loop exit
PB: predicated region body
PF: predicated region fallthrough
CT: control target
= control target key end

     0   :  { %s1093_s0 = inlined_call_operand.vmem [shape: f32[2,1152], index: 0, kind: input, shape index: {}]   ;;  %s1094_s1 = inlined_call_operand.vmem [shape: f32[1152,64], index: 1, kind: input, shape index: {}]   ;;  %s1095_s2 = inlined_call_operand.vmem [shape: f32[1,64], index: 2, kind: input, shape index: {}]   ;;  %s1096_s3 = inlined_call_operand.vmem [shape: f32[1,64], index: 3, kind: input, shape index: {}]   ;;  %s1097_s4 = inlined_call_operand.vmem [shape: f32[1,64], index: 4, kind: input, shape index: {}]   ;;  %s1098_s5 = inlined_call_operand.vmem [shape: f32[1,64], index: 5, kind: input, shape index: {}]   ;;  %s1099_s6 = inlined_call_operand.vmem [shape: f32[1,64], index: 6, kind: input, shape index: {}]   ;;  %s1100_s7 = inlined_call_operand.vmem [shape: f32[64,36], index: 7, kind: input, shape index: {}]   ;;  %s1101_s8 = inlined_call_operand.vmem [shape: f32[1,36], index: 8, kind: input, shape index: {}]   ;;  %s1102_s9 = inlined_call_operand.hbm [shape: f32[2,36], index: 9, kind: output, shape index: {}]  }
   0x1   :  { %v51_v0 = vld [vmem:[%s1094_s1 + $0x78] sm:$0xff]  ;;  %v50_v1 = vld [vmem:[%s1094_s1 + $0x70] sm:$0xff]  ;;  %v49_v3 = vld [vmem:[%s1094_s1 + $0x68] sm:$0xff] }
   0x2   :  { %209 = vmatpush.msra.mxu0 %v51_v0  ;;  %v83_v2 = vld [vmem:[%s1094_s1 + $0x178] sm:$0xff]  ;;  %v82_v4 = vld [vmem:[%s1094_s1 + $0x170] sm:$0xff]  ;;  %v81_v7 = vld [vmem:[%s1094_s1 + $0x168] sm:$0xff] }
   0x3   :  { %249 = vmatpush.msra.mxu2 %v83_v2  ;;  %v99_v5 = vld [vmem:[%s1094_s1 + $0x1f8] sm:$0xff]  ;;  %v98_v8 = vld [vmem:[%s1094_s1 + $0x1f0] sm:$0xff]  ;;  %v48_v9 = vld [vmem:[%s1094_s1 + $0x60] sm:$0xff] }
   0x4   :  { %210 = vmatpush.msra.mxu0 %v50_v1  ;;  %269 = vmatpush.msra.mxu3 %v99_v5  ;;  %v67_v6 = vld [vmem:[%s1094_s1 + $0xf8] sm:$0xff]  ;;  %v66_v10 = vld [vmem:[%s1094_s1 + $0xf0] sm:$0xff]  ;;  %v80_v11 = vld [vmem:[%s1094_s1 + $0x160] sm:$0xff] }
   0x5   :  { %250 = vmatpush.msra.mxu2 %v82_v4  ;;  %229 = vmatpush.msra.mxu1 %v67_v6  ;;  %v97_v12 = vld [vmem:[%s1094_s1 + $0x1e8] sm:$0xff]  ;;  %v47_v14 = vld [vmem:[%s1094_s1 + $0x58] sm:$0xff]  ;;  %v96_v15 = vld [vmem:[%s1094_s1 + $0x1e0] sm:$0xff] }
   0x6   :  { %211 = vmatpush.msra.mxu0 %v49_v3  ;;  %270 = vmatpush.msra.mxu3 %v98_v8  ;;  %v65_v13 = vld [vmem:[%s1094_s1 + $0xe8] sm:$0xff]  ;;  %v79_v16 = vld [vmem:[%s1094_s1 + $0x158] sm:$0xff]  ;;  %v64_v17 = vld [vmem:[%s1094_s1 + $0xe0] sm:$0xff] }
   0x7   :  { %251 = vmatpush.msra.mxu2 %v81_v7  ;;  %230 = vmatpush.msra.mxu1 %v66_v10  ;;  %v46_v18 = vld [vmem:[%s1094_s1 + $0x50] sm:$0xff]  ;;  %v95_v19 = vld [vmem:[%s1094_s1 + $0x1d8] sm:$0xff]  ;;  %v45_v22 = vld [vmem:[%s1094_s1 + $0x48] sm:$0xff] }
   0x8   :  { %212 = vmatpush.msra.mxu0 %v48_v9  ;;  %271 = vmatpush.msra.mxu3 %v97_v12  ;;  %v78_v20 = vld [vmem:[%s1094_s1 + $0x150] sm:$0xff]  ;;  %v63_v21 = vld [vmem:[%s1094_s1 + $0xd8] sm:$0xff]  ;;  %v77_v24 = vld [vmem:[%s1094_s1 + $0x148] sm:$0xff] }
   0x9   :  { %252 = vmatpush.msra.mxu2 %v80_v11  ;;  %231 = vmatpush.msra.mxu1 %v65_v13  ;;  %v94_v23 = vld [vmem:[%s1094_s1 + $0x1d0] sm:$0xff]  ;;  %v44_v26 = vld [vmem:[%s1094_s1 + $0x40] sm:$0xff]  ;;  %v93_v27 = vld [vmem:[%s1094_s1 + $0x1c8] sm:$0xff] }
   0xa   :  { %213 = vmatpush.msra.mxu0 %v47_v14  ;;  %272 = vmatpush.msra.mxu3 %v96_v15  ;;  %v62_v25 = vld [vmem:[%s1094_s1 + $0xd0] sm:$0xff]  ;;  %v76_v28 = vld [vmem:[%s1094_s1 + $0x140] sm:$0xff]  ;;  %v61_v29 = vld [vmem:[%s1094_s1 + $0xc8] sm:$0xff] }
   0xb   :  { %253 = vmatpush.msra.mxu2 %v79_v16  ;;  %232 = vmatpush.msra.mxu1 %v64_v17  ;;  %v43_v30 = vld [vmem:[%s1094_s1 + $0x38] sm:$0xff]  ;;  %v92_v31 = vld [vmem:[%s1094_s1 + $0x1c0] sm:$0xff]  ;;  %v42_v34 = vld [vmem:[%s1094_s1 + $0x30] sm:$0xff] }
   0xc   :  { %214 = vmatpush.msra.mxu0 %v46_v18  ;;  %273 = vmatpush.msra.mxu3 %v95_v19  ;;  %v75_v32 = vld [vmem:[%s1094_s1 + $0x138] sm:$0xff]  ;;  %v60_v33 = vld [vmem:[%s1094_s1 + $0xc0] sm:$0xff]  ;;  %v74_v36 = vld [vmem:[%s1094_s1 + $0x130] sm:$0xff] }
   0xd   :  { %254 = vmatpush.msra.mxu2 %v78_v20  ;;  %233 = vmatpush.msra.mxu1 %v63_v21  ;;  %v91_v35 = vld [vmem:[%s1094_s1 + $0x1b8] sm:$0xff]  ;;  %v41_v38 = vld [vmem:[%s1094_s1 + $0x28] sm:$0xff]  ;;  %v90_v39 = vld [vmem:[%s1094_s1 + $0x1b0] sm:$0xff] }
   0xe   :  { %215 = vmatpush.msra.mxu0 %v45_v22  ;;  %274 = vmatpush.msra.mxu3 %v94_v23  ;;  %v59_v37 = vld [vmem:[%s1094_s1 + $0xb8] sm:$0xff]  ;;  %v73_v40 = vld [vmem:[%s1094_s1 + $0x128] sm:$0xff]  ;;  %v58_v41 = vld [vmem:[%s1094_s1 + $0xb0] sm:$0xff] }
   0xf   :  { %255 = vmatpush.msra.mxu2 %v77_v24  ;;  %234 = vmatpush.msra.mxu1 %v62_v25  ;;  %v40_v42 = vld [vmem:[%s1094_s1 + $0x20] sm:$0xff]  ;;  %v89_v43 = vld [vmem:[%s1094_s1 + $0x1a8] sm:$0xff]  ;;  %v39_v46 = vld [vmem:[%s1094_s1 + $0x18] sm:$0xff] }
  0x10   :  { %216 = vmatpush.msra.mxu0 %v44_v26  ;;  %275 = vmatpush.msra.mxu3 %v93_v27  ;;  %v72_v44 = vld [vmem:[%s1094_s1 + $0x120] sm:$0xff]  ;;  %v57_v45 = vld [vmem:[%s1094_s1 + $0xa8] sm:$0xff]  ;;  %v71_v48 = vld [vmem:[%s1094_s1 + $0x118] sm:$0xff] }
  0x11   :  { %256 = vmatpush.msra.mxu2 %v76_v28  ;;  %235 = vmatpush.msra.mxu1 %v61_v29  ;;  %v88_v47 = vld [vmem:[%s1094_s1 + $0x1a0] sm:$0xff]  ;;  %v38_v50 = vld [vmem:[%s1094_s1 + $0x10] sm:$0xff]  ;;  %v87_v51 = vld [vmem:[%s1094_s1 + $0x198] sm:$0xff] }
  0x12   :  { %217 = vmatpush.msra.mxu0 %v43_v30  ;;  %276 = vmatpush.msra.mxu3 %v92_v31  ;;  %v56_v49 = vld [vmem:[%s1094_s1 + $0xa0] sm:$0xff]  ;;  %v70_v52 = vld [vmem:[%s1094_s1 + $0x110] sm:$0xff]  ;;  %v55_v53 = vld [vmem:[%s1094_s1 + $0x98] sm:$0xff] }
  0x13   :  { %257 = vmatpush.msra.mxu2 %v75_v32  ;;  %236 = vmatpush.msra.mxu1 %v60_v33  ;;  %v37_v54 = vld [vmem:[%s1094_s1 + $0x8] sm:$0xff]  ;;  %v86_v55 = vld [vmem:[%s1094_s1 + $0x190] sm:$0xff]  ;;  %v36_v58 = vld [vmem:[%s1094_s1] sm:$0xff] }
  0x14   :  { %218 = vmatpush.msra.mxu0 %v42_v34  ;;  %277 = vmatpush.msra.mxu3 %v91_v35  ;;  %v69_v56 = vld [vmem:[%s1094_s1 + $0x108] sm:$0xff]  ;;  %v54_v57 = vld [vmem:[%s1094_s1 + $0x90] sm:$0xff]  ;;  %v115_v60 = vld [vmem:[%s1094_s1 + $0x278] sm:$0xff] }
  0x15   :  { %258 = vmatpush.msra.mxu2 %v74_v36  ;;  %237 = vmatpush.msra.mxu1 %v59_v37  ;;  %v85_v59 = vld [vmem:[%s1094_s1 + $0x188] sm:$0xff]  ;;  %v68_v61 = vld [vmem:[%s1094_s1 + $0x100] sm:$0xff]  ;;  %v147_v62 = vld [vmem:[%s1094_s1 + $0x378] sm:$0xff] }
  0x16   :  { %219 = vmatpush.msra.mxu0 %v41_v38  ;;  %278 = vmatpush.msra.mxu3 %v90_v39  ;;  %v53_v63 = vld [vmem:[%s1094_s1 + $0x88] sm:$0xff]  ;;  %v114_v0 = vld [vmem:[%s1094_s1 + $0x270] sm:$0xff]  ;;  %v84_v1 = vld [vmem:[%s1094_s1 + $0x180] sm:$0xff] }
  0x17   :  { %259 = vmatpush.msra.mxu2 %v73_v40  ;;  %238 = vmatpush.msra.mxu1 %v58_v41  ;;  %v146_v2 = vld [vmem:[%s1094_s1 + $0x370] sm:$0xff]  ;;  %v163_v3 = vld [vmem:[%s1094_s1 + $0x3f8] sm:$0xff]  ;;  %v113_v4 = vld [vmem:[%s1094_s1 + $0x268] sm:$0xff] }
  0x18   :  { %220 = vmatpush.msra.mxu0 %v40_v42  ;;  %279 = vmatpush.msra.mxu3 %v89_v43  ;;  %v52_v5 = vld [vmem:[%s1094_s1 + $0x80] sm:$0xff]  ;;  %v131_v6 = vld [vmem:[%s1094_s1 + $0x2f8] sm:$0xff]  ;;  %v145_v7 = vld [vmem:[%s1094_s1 + $0x368] sm:$0xff] }
  0x19   :  { %260 = vmatpush.msra.mxu2 %v72_v44  ;;  %239 = vmatpush.msra.mxu1 %v57_v45  ;;  %v112_v8 = vld [vmem:[%s1094_s1 + $0x260] sm:$0xff]  ;;  %v162_v9 = vld [vmem:[%s1094_s1 + $0x3f0] sm:$0xff]  ;;  %v111_v12 = vld [vmem:[%s1094_s1 + $0x258] sm:$0xff] }
  0x1a   :  { %221 = vmatpush.msra.mxu0 %v39_v46  ;;  %280 = vmatpush.msra.mxu3 %v88_v47  ;;  %v130_v10 = vld [vmem:[%s1094_s1 + $0x2f0] sm:$0xff]  ;;  %v144_v11 = vld [vmem:[%s1094_s1 + $0x360] sm:$0xff]  ;;  %v161_v13 = vld [vmem:[%s1094_s1 + $0x3e8] sm:$0xff] }
  0x1b   :  { %261 = vmatpush.msra.mxu2 %v71_v48  ;;  %240 = vmatpush.msra.mxu1 %v56_v49  ;;  %v33_v14 = vld [vmem:[%s1093_s0] sm:$0xff]  ;;  %v129_v15 = vld [vmem:[%s1094_s1 + $0x2e8] sm:$0xff]  ;;  %v143_v16 = vld [vmem:[%s1094_s1 + $0x358] sm:$0xff] }
  0x1c   :  { %222 = vmatpush.msra.mxu0 %v38_v50  ;;  %281 = vmatpush.msra.mxu3 %v87_v51  ;;  %187 = vst [vmem:[#allocation1] ss:$4 sm:$0xff] %v33_v14  ;;  %v110_v17 = vld [vmem:[%s1094_s1 + $0x250] sm:$0xff]  ;;  %v160_v18 = vld [vmem:[%s1094_s1 + $0x3e0] sm:$0xff]  ;;  %v109_v19 = vld [vmem:[%s1094_s1 + $0x248] sm:$0xff] }
  0x1d   :  { %262 = vmatpush.msra.mxu2 %v70_v52  ;;  %241 = vmatpush.msra.mxu1 %v55_v53  ;;  %v128_v20 = vld [vmem:[%s1094_s1 + $0x2e0] sm:$0xff]  ;;  %v142_v21 = vld [vmem:[%s1094_s1 + $0x350] sm:$0xff]  ;;  %v159_v23 = vld [vmem:[%s1094_s1 + $0x3d8] sm:$0xff] }
  0x1e   :  { %223 = vmatpush.msra.mxu0 %v37_v54  ;;  %282 = vmatpush.msra.mxu3 %v86_v55  ;;  %v108_v22 = vld [vmem:[%s1094_s1 + $0x240] sm:$0xff]  ;;  %v127_v24 = vld [vmem:[%s1094_s1 + $0x2d8] sm:$0xff]  ;;  %v141_v25 = vld [vmem:[%s1094_s1 + $0x348] sm:$0xff] }
  0x1f   :  { %263 = vmatpush.msra.mxu2 %v69_v56  ;;  %242 = vmatpush.msra.mxu1 %v54_v57  ;;  %v158_v26 = vld [vmem:[%s1094_s1 + $0x3d0] sm:$0xff]  ;;  %v107_v28 = vld [vmem:[%s1094_s1 + $0x238] sm:$0xff]  ;;  %v140_v29 = vld [vmem:[%s1094_s1 + $0x340] sm:$0xff] }
  0x20   :  { %224 = vmatpush.msra.mxu0 %v36_v58  ;;  %283 = vmatpush.msra.mxu3 %v85_v59  ;;  %v126_v27 = vld [vmem:[%s1094_s1 + $0x2d0] sm:$0xff]  ;;  %v157_v30 = vld [vmem:[%s1094_s1 + $0x3c8] sm:$0xff]  ;;  %v139_v33 = vld [vmem:[%s1094_s1 + $0x338] sm:$0xff] }
  0x21   :  { %264 = vmatpush.msra.mxu2 %v68_v61  ;;  %243 = vmatpush.msra.mxu1 %v53_v63  ;;  %v34_v31 = vld [vmem:[%s1093_s0 + $0x8] sm:$0xff]  ;;  %v35_v34 = vld [vmem:[%s1093_s0 + $0x10] sm:$0x3]  ;;  %v156_v41 = vld [vmem:[%s1094_s1 + $0x3c0] sm:$0xff] }
  0x22   :  { %289 = vmatpush.msrb.mxu0 %v115_v60  ;;  %284 = vmatpush.msra.mxu3 %v84_v1  ;;  %v125_v32 = vld [vmem:[%s1094_s1 + $0x2c8] sm:$0xff]  ;;  %189 = vst [vmem:[#allocation1 + $0x20] ss:$4 sm:$0xff] %v34_v31  ;;  %v106_v35 = vld [vmem:[%s1094_s1 + $0x230] sm:$0xff]  ;;  %v124_v42 = vld [vmem:[%s1094_s1 + $0x2c0] sm:$0xff] }
  0x23   :  { %329 = vmatpush.msrb.mxu2 %v147_v62  ;;  %244 = vmatpush.msra.mxu1 %v52_v5  ;;  %v192_v36 = vld.sshfl [vmem:[#allocation1 + $0x10] sm:$0xff pattern:$0x73625140]  ;;  %v190_v37 = vld.sshfl [vmem:[#allocation1] sm:$0xff pattern:$0x73625140] }
  0x24   :  { %290 = vmatpush.msrb.mxu0 %v114_v0  ;;  %349 = vmatpush.msrb.mxu3 %v163_v3  ;;  %v193_v38 = vld.sshfl [vmem:[#allocation1 + $0x18] sm:$0xff pattern:$0x73625140]  ;;  %v191_v39 = vld.sshfl [vmem:[#allocation1 + $0x8] sm:$0xff pattern:$0x73625140] }
  0x25   :  { %330 = vmatpush.msrb.mxu2 %v146_v2  ;;  %309 = vmatpush.msrb.mxu1 %v131_v6  ;;  %v105_v40 = vld [vmem:[%s1094_s1 + $0x228] sm:$0xff]  ;;  %198 = vst [vmem:[#allocation1] ss:$4 sm:$0xff] %v35_v34  ;;  %v138_v43 = vld [vmem:[%s1094_s1 + $0x330] sm:$0xff]  ;;  %v155_v44 = vld [vmem:[%s1094_s1 + $0x3b8] sm:$0xff] }
  0x26   :  { %291 = vmatpush.msrb.mxu0 %v113_v4  ;;  %350 = vmatpush.msrb.mxu3 %v162_v9  ;;  %v123_v45 = vld [vmem:[%s1094_s1 + $0x2b8] sm:$0xff]  ;;  %v137_v46 = vld [vmem:[%s1094_s1 + $0x328] sm:$0xff]  ;;  %v104_v47 = vld [vmem:[%s1094_s1 + $0x220] sm:$0xff] }
  0x27   :  { %331 = vmatpush.msrb.mxu2 %v145_v7  ;;  %310 = vmatpush.msrb.mxu1 %v130_v10  ;;  %v154_v48 = vld [vmem:[%s1094_s1 + $0x3b0] sm:$0xff]  ;;  %v136_v50 = vld [vmem:[%s1094_s1 + $0x320] sm:$0xff]  ;;  %v103_v51 = vld [vmem:[%s1094_s1 + $0x218] sm:$0xff] }
  0x28   :  { %292 = vmatpush.msrb.mxu0 %v112_v8  ;;  %351 = vmatpush.msrb.mxu3 %v161_v13  ;;  %v122_v49 = vld [vmem:[%s1094_s1 + $0x2b0] sm:$0xff]  ;;  %v153_v52 = vld [vmem:[%s1094_s1 + $0x3a8] sm:$0xff] }
  0x29   :  { %332 = vmatpush.msrb.mxu2 %v144_v11  ;;  %311 = vmatpush.msrb.mxu1 %v129_v15 }
  0x2a   :  { %293 = vmatpush.msrb.mxu0 %v111_v12  ;;  %352 = vmatpush.msrb.mxu3 %v160_v18 }
  0x2b   :  { %333 = vmatpush.msrb.mxu2 %v143_v16  ;;  %312 = vmatpush.msrb.mxu1 %v128_v20 }
  0x2c   :  { %294 = vmatpush.msrb.mxu0 %v110_v17  ;;  %353 = vmatpush.msrb.mxu3 %v159_v23 }
  0x2d   :  { %334 = vmatpush.msrb.mxu2 %v142_v21  ;;  %313 = vmatpush.msrb.mxu1 %v127_v24 }
  0x2e   :  { %295 = vmatpush.msrb.mxu0 %v109_v19  ;;  %354 = vmatpush.msrb.mxu3 %v158_v26 }
  0x2f   :  { %335 = vmatpush.msrb.mxu2 %v141_v25  ;;  %314 = vmatpush.msrb.mxu1 %v126_v27 }
  0x30   :  { %296 = vmatpush.msrb.mxu0 %v108_v22  ;;  %355 = vmatpush.msrb.mxu3 %v157_v30 }
  0x31   :  { %336 = vmatpush.msrb.mxu2 %v140_v29  ;;  %315 = vmatpush.msrb.mxu1 %v125_v32 }
  0x32   :  { %297 = vmatpush.msrb.mxu0 %v107_v28  ;;  %356 = vmatpush.msrb.mxu3 %v156_v41 }
  0x33   :  { %337 = vmatpush.msrb.mxu2 %v139_v33  ;;  %316 = vmatpush.msrb.mxu1 %v124_v42 }
  0x34   :  { %298 = vmatpush.msrb.mxu0 %v106_v35  ;;  %357 = vmatpush.msrb.mxu3 %v155_v44 }
  0x35   :  { %338 = vmatpush.msrb.mxu2 %v138_v43  ;;  %317 = vmatpush.msrb.mxu1 %v123_v45 }
  0x36   :  { %299 = vmatpush.msrb.mxu0 %v105_v40 }
  0x37   :  { %339 = vmatpush.msrb.mxu2 %v137_v46 }
  0x38   :  { %14 = vsyncpa [#allocation3], 0  ;;  %300 = vmatpush.msrb.mxu0 %v104_v47  ;;  %358 = vmatpush.msrb.mxu3 %v154_v48  ;;  %v121_v53 = vld [vmem:[%s1094_s1 + $0x2a8] sm:$0xff]  ;;  %v102_v54 = vld [vmem:[%s1094_s1 + $0x210] sm:$0xff]  ;;  %vm472_vm8 = vcmask 523264   ;;  %s556_s24 = smov [#allocation2]  }
  0x39   :  { %318 = vmatpush.msrb.mxu1 %v122_v49  ;;  %340 = vmatpush.msrb.mxu2 %v136_v50  ;;  %v135_v55 = vld [vmem:[%s1094_s1 + $0x318] sm:$0xff]  ;;  %v152_v56 = vld [vmem:[%s1094_s1 + $0x3a0] sm:$0xff]  ;;  %v101_v57 = vld [vmem:[%s1094_s1 + $0x208] sm:$0xff]  ;;  %s504_s25 = sshll.u32 %s556_s24, 4  ;;  %s506_s28 = sshll.u32 %s1102_s9, 4  ;;  %vm497_vm9 = vcmask 287744   ;;  %s505_s25 = int_to_ptr.vmem [resolvable:$true] %s504_s25  ;;  %s507_s28 = int_to_ptr.hbm [resolvable:$true] %s506_s28 }
  0x3a   :  { %301 = vmatpush.msrb.mxu0 %v103_v51  ;;  %359 = vmatpush.msrb.mxu3 %v153_v52  ;;  %v120_v58 = vld [vmem:[%s1094_s1 + $0x2a0] sm:$0xff]  ;;  %v134_v59 = vld [vmem:[%s1094_s1 + $0x310] sm:$0xff]  ;;  %v151_v61 = vld [vmem:[%s1094_s1 + $0x398] sm:$0xff] }
  0x3b   :  { %265 = vmatmul.f32.vlgmr.msra.gmra.mxu2 %v192_v36  ;;  %319 = vmatpush.msrb.mxu1 %v121_v53  ;;  %v100_v60 = vld [vmem:[%s1094_s1 + $0x200] sm:$0xff]  ;;  %v179_v62 = vld [vmem:[%s1094_s1 + $0x478] sm:$0xff]  ;;  %v133_v0 = vld [vmem:[%s1094_s1 + $0x308] sm:$0xff] }
  0x3c   :  { %302 = vmatpush.msrb.mxu0 %v102_v54  ;;  %341 = vmatpush.msrb.mxu2 %v135_v55  ;;  %v119_v63 = vld [vmem:[%s1094_s1 + $0x298] sm:$0xff]  ;;  %v178_v1 = vld [vmem:[%s1094_s1 + $0x470] sm:$0xff]  ;;  %v132_v4 = vld [vmem:[%s1094_s1 + $0x300] sm:$0xff] }
  0x3d   :  { %360 = vmatpush.msrb.mxu3 %v152_v56  ;;  %225 = vmatmul.f32.vlgmr.msra.gmra.mxu0 %v190_v37  ;;  %v150_v2 = vld [vmem:[%s1094_s1 + $0x390] sm:$0xff]  ;;  %v177_v5 = vld [vmem:[%s1094_s1 + $0x468] sm:$0xff]  ;;  %v176_v9 = vld [vmem:[%s1094_s1 + $0x460] sm:$0xff] }
  0x3e   :  { %303 = vmatpush.msrb.mxu0 %v101_v57  ;;  %285 = vmatmul.f32.vlgmr.msra.gmra.mxu3 %v193_v38  ;;  %v118_v3 = vld [vmem:[%s1094_s1 + $0x290] sm:$0xff]  ;;  %v149_v6 = vld [vmem:[%s1094_s1 + $0x388] sm:$0xff]  ;;  %v148_v10 = vld [vmem:[%s1094_s1 + $0x380] sm:$0xff] }
  0x3f   :  { %320 = vmatpush.msrb.mxu1 %v120_v58  ;;  %342 = vmatpush.msrb.mxu2 %v134_v59  ;;  %v196_v7 = vld.sshfl [vmem:[#allocation1 + $0x30] sm:$0xff pattern:$0x73625140]  ;;  %v117_v8 = vld [vmem:[%s1094_s1 + $0x288] sm:$0xff]  ;;  %v175_v13 = vld [vmem:[%s1094_s1 + $0x458] sm:$0xff] }
  0x40   :  { %304 = vmatpush.msrb.mxu0 %v100_v60  ;;  %361 = vmatpush.msrb.mxu3 %v151_v61  ;;  %v194_v11 = vld.sshfl [vmem:[#allocation1 + $0x20] sm:$0xff pattern:$0x73625140]  ;;  %v197_v12 = vld.sshfl [vmem:[#allocation1 + $0x38] sm:$0xff pattern:$0x73625140] }
  0x41   :  { %245 = vmatmul.f32.vlgmr.msra.gmra.mxu1 %v191_v39  ;;  %343 = vmatpush.msrb.mxu2 %v133_v0  ;;  %v116_v14 = vld [vmem:[%s1094_s1 + $0x280] sm:$0xff]  ;;  %v195_v15 = vld.sshfl [vmem:[#allocation1 + $0x28] sm:$0xff pattern:$0x73625140]  ;;  %v174_v16 = vld [vmem:[%s1094_s1 + $0x450] sm:$0xff] }
  0x42   :  { %369 = vmatpush.msra.mxu0 %v179_v62  ;;  %321 = vmatpush.msrb.mxu1 %v119_v63  ;;  %v173_v17 = vld [vmem:[%s1094_s1 + $0x448] sm:$0xff]  ;;  %v172_v18 = vld [vmem:[%s1094_s1 + $0x440] sm:$0xff]  ;;  %v171_v19 = vld [vmem:[%s1094_s1 + $0x438] sm:$0xff] }
  0x43   :  { %362 = vmatpush.msrb.mxu3 %v150_v2  ;;  %344 = vmatpush.msrb.mxu2 %v132_v4  ;;  %v170_v20 = vld [vmem:[%s1094_s1 + $0x430] sm:$0xff]  ;;  %v169_v21 = vld [vmem:[%s1094_s1 + $0x428] sm:$0xff]  ;;  %v168_v22 = vld [vmem:[%s1094_s1 + $0x420] sm:$0xff] }
  0x44   :  { %370 = vmatpush.msra.mxu0 %v178_v1  ;;  %322 = vmatpush.msrb.mxu1 %v118_v3  ;;  %v167_v23 = vld [vmem:[%s1094_s1 + $0x418] sm:$0xff]  ;;  %v166_v24 = vld [vmem:[%s1094_s1 + $0x410] sm:$0xff]  ;;  %v165_v25 = vld [vmem:[%s1094_s1 + $0x408] sm:$0xff] }
  0x45   :  { %363 = vmatpush.msrb.mxu3 %v149_v6  ;;  %345 = vmatmul.f32.vlgmr.msrb.gmra.mxu2 %v196_v7  ;;  %v164_v26 = vld [vmem:[%s1094_s1 + $0x400] sm:$0xff]  ;;  %v467_v53 = vld [vmem:[%s1100_s7 + $0x38] sm:$0xff]  ;;  %v466_v54 = vld [vmem:[%s1100_s7 + $0x30] sm:$0xff] }
  0x46   :  { %371 = vmatpush.msra.mxu0 %v177_v5  ;;  %323 = vmatpush.msrb.mxu1 %v117_v8  ;;  %v199_v27 = vld.sshfl [vmem:[#allocation1] sm:$0xff pattern:$0x73625140]  ;;  %v465_v58 = vld [vmem:[%s1100_s7 + $0x28] sm:$0xff]  ;;  %v463_v0 = vld [vmem:[%s1100_s7 + $0x18] sm:$0xff] }
  0x47   :  { %364 = vmatpush.msrb.mxu3 %v148_v10  ;;  %305 = vmatmul.f32.vlgmr.msrb.gmra.mxu0 %v194_v11  ;;  %v394_v28 = vld [vmem:[%s1097_s4] sm:$0x1]  ;;  %v462_v3 = vld [vmem:[%s1100_s7 + $0x10] sm:$0xff]  ;;  %v461_v5 = vld [vmem:[%s1100_s7 + $0x8] sm:$0xff] }
  0x48   :  { %372 = vmatpush.msra.mxu0 %v176_v9  ;;  %365 = vmatmul.f32.vlgmr.msrb.gmra.mxu3 %v197_v12  ;;  %v395_v29 = vadd.f32 1e-05, %v394_v28  ;;  %v518_v30 = vld [vmem:[%s1095_s2] ss:$0 sm:$0xff] }
  0x49   :  { %324 = vmatpush.msrb.mxu1 %v116_v14  ;;  %v519_v56 = vld [vmem:[%s1096_s3] ss:$0 sm:$0xff] }
  0x4a   :  { %373 = vmatpush.msra.mxu0 %v175_v13  ;;  %325 = vmatmul.f32.vlgmr.msrb.gmra.mxu1 %v195_v15  ;;  %523 = vrsqrt.f32 %v395_v29  ;;  %vm402_vm0 = vweird.f32 %v395_v29  ;;  %v464_v61 = vld [vmem:[%s1100_s7 + $0x20] sm:$0xff] }
  0x4b   :  { %484 = vmatpush.msra.mxu1 %v467_v53  ;;  %v520_v63 = vld [vmem:[%s1098_s5] ss:$0 sm:$0xff] }
  0x4c   :  { %374 = vmatpush.msra.mxu0 %v174_v16  ;;  %v521_v2 = vld [vmem:[%s1099_s6] ss:$0 sm:$0xff] }
  0x4d   :  { %485 = vmatpush.msra.mxu1 %v466_v54  ;;  %v460_v7 = vld [vmem:[%s1100_s7] sm:$0xff] }
  0x4e   :  { %375 = vmatpush.msra.mxu0 %v173_v17 }
  0x4f   :  { %486 = vmatpush.msra.mxu1 %v465_v58 }
  0x50   :  { %376 = vmatpush.msra.mxu0 %v172_v18  ;;  %v524_v34 = vpop.eup %523 }
  0x51   :  { %v397_v37 = vmul.f32 %v524_v34, %v395_v29  ;;  %vm403_vm1 = vweird.f32 %v524_v34  ;;  %487 = vmatpush.msra.mxu1 %v464_v61 }
  0x52   :  { %377 = vmatpush.msra.mxu0 %v171_v19  ;;  %vm404_vm2 = vmor %vm402_vm0, %vm403_vm1 }
  0x53   :  { %v398_v40 = vmul.f32 %v524_v34, %v397_v37  ;;  %488 = vmatpush.msra.mxu1 %v463_v0  ;;  %v555_v37 = vmov 1.0  }
  0x54   :  { %378 = vmatpush.msra.mxu0 %v170_v20 }
  0x55   :  { %v399_v43 = vmul.f32 0.5, %v398_v40  ;;  %489 = vmatpush.msra.mxu1 %v462_v3 }
  0x56   :  { %379 = vmatpush.msra.mxu0 %v169_v21 }
  0x57   :  { %v400_v46 = vsub.f32 1.5, %v399_v43  ;;  %490 = vmatpush.msra.mxu1 %v461_v5  ;;  %v522_v43 = vld [vmem:[%s1101_s8] ss:$0 sm:$0xff] }
  0x58   :  { %380 = vmatpush.msra.mxu0 %v168_v22 }
  0x59   :  { %v401_v49 = vmul.f32 %v524_v34, %v400_v46  ;;  %491 = vmatpush.msra.mxu1 %v460_v7 }
  0x5a   :  { %381 = vmatpush.msra.mxu0 %v167_v23 }
  0x5b   :  { %v405_v52 = vsel %vm404_vm2, %v524_v34, %v401_v49 }
  0x5c   :  { %382 = vmatpush.msra.mxu0 %v166_v24  ;;  %v407_v60 = vperm.slane %v405_v52, 0 }
  0x5e   :  { %383 = vmatpush.msra.mxu0 %v165_v25 }
  0x60   :  { %384 = vmatpush.msra.mxu0 %v164_v26 }
  0x61   :  { %385 = vmatmul.f32.vlgmr.msra.gmra.mxu0 %v199_v27 }
  0xba   :  { %v226_v31 = vpop.f32.mrf.mxu0 }
  0xbb   :  { %v227_v32 = vadd.f32 %v518_v30, %v226_v31 }
  0xbe   :  { %v246_v33 = vpop.f32.mrf.mxu1  ;;  %v266_v36 = vpop.f32.mrf.mxu2 }
  0xbf   :  { %v247_v35 = vadd.f32 %v246_v33, %v227_v32 }
  0xc1   :  { %v267_v38 = vadd.f32 %v266_v36, %v247_v35  ;;  %v286_v39 = vpop.f32.mrf.mxu3 }
  0xc3   :  { %v287_v41 = vadd.f32 %v286_v39, %v267_v38 }
  0xc4   :  { %v306_v42 = vpop.f32.mrf.mxu0 }
  0xc5   :  { %v307_v44 = vadd.f32 %v306_v42, %v287_v41 }
  0xc7   :  { %v326_v45 = vpop.f32.mrf.mxu1 }
  0xc8   :  { %v327_v47 = vadd.f32 %v326_v45, %v307_v44  ;;  %v346_v48 = vpop.f32.mrf.mxu2 }
  0xca   :  { %v347_v50 = vadd.f32 %v346_v48, %v327_v47 }
  0xcb   :  { %v366_v51 = vpop.f32.mrf.mxu3 }
  0xcc   :  { %v367_v55 = vadd.f32 %v366_v51, %v347_v50 }
  0xde   :  { %v386_v57 = vpop.f32.mrf.mxu0 }
  0xdf   :  { %v387_v59 = vadd.f32 %v386_v57, %v367_v55 }
  0xe1   :  { %v393_v62 = vsub.f32 %v387_v59, %v519_v56 }
  0xe3   :  { %v409_v1 = vmul.f32 %v407_v60, %v393_v62 }
  0xe5   :  { %v414_v4 = vmul.f32 %v520_v63, %v409_v1 }
  0xe7   :  { %v419_v6 = vadd.f32 %v521_v2, %v414_v4 }
  0xe9   :  { %v421_v8 = vmul.f32 0.70710677, %v419_v6  ;;  %v420_v40 = vmul.f32 0.5, %v419_v6 }
  0xeb   :  { %v424_v9 = vand.u32 2147483647, %v421_v8  ;;  %vm422_vm7 = vcmp.lt.f32.partialorder %v421_v8, 0.0 }
  0xec   :  { %v423_v38 = vsel %vm422_vm7, -1.0, %v555_v37 }
  0xed   :  { %v425_v10 = vmul.f32 0.3275911, %v424_v9  ;;  %v451_v21 = vsub.f32 0.0, %v424_v9 }
  0xef   :  { %v426_v11 = vadd.f32 1.0, %v425_v10  ;;  %v452_v25 = vmul.f32 %v451_v21, %v424_v9 }
  0xf1   :  { %525 = vrcp.f32 %v426_v11  ;;  %v438_v15 = vand.u32 2147483648, %v426_v11  ;;  %v436_v17 = vand.u32 2147483647, %v426_v11  ;;  %vm432_vm4 = vweird.f32 %v426_v11 }
  0xf2   :  { %v453_v28 = vmul.f32 1.442695, %v452_v25 }
  0xf3   :  { %v439_v19 = vor.u32 1.1754944e-38, %v438_v15  ;;  %vm437_vm6 = vcmp.eq.f32.partialorder %v436_v17, 8.507059e+37 }
  0xf4   :  { %527 = vpow2.f32 %v453_v28 }
  0xf7   :  { %v526_v12 = vpop.eup %525 }
  0xf8   :  { %v428_v13 = vmul.f32 %v526_v12, %v426_v11  ;;  %vm433_vm3 = vweird.f32 %v526_v12 }
  0xf9   :  { %vm434_vm5 = vmor %vm432_vm4, %vm433_vm3 }
  0xfa   :  { %v429_v14 = vsub.f32 1.0, %v428_v13  ;;  %v528_v34 = vpop.eup %527 }
  0xfc   :  { %v430_v16 = vmul.f32 %v526_v12, %v429_v14 }
  0xfe   :  { %v431_v18 = vadd.f32 %v526_v12, %v430_v16 }
 0x100   :  { %v435_v20 = vsel %vm434_vm5, %v526_v12, %v431_v18 }
 0x101   :  { %v440_v22 = vsel %vm437_vm6, %v439_v19, %v435_v20 }
 0x102   :  { %v442_v23 = vmul.f32 1.0614054, %v440_v22 }
 0x104   :  { %v443_v24 = vadd.f32 -1.4531521, %v442_v23 }
 0x106   :  { %v444_v26 = vmul.f32 %v443_v24, %v440_v22 }
 0x108   :  { %v445_v27 = vadd.f32 1.4214138, %v444_v26 }
 0x10a   :  { %v446_v29 = vmul.f32 %v445_v27, %v440_v22 }
 0x10c   :  { %v447_v30 = vadd.f32 -0.28449672, %v446_v29 }
 0x10e   :  { %v448_v31 = vmul.f32 %v447_v30, %v440_v22 }
 0x110   :  { %v449_v32 = vadd.f32 0.2548296, %v448_v31 }
 0x112   :  { %v450_v33 = vmul.f32 %v449_v32, %v440_v22 }
 0x114   :  { %v455_v35 = vmul.f32 %v528_v34, %v450_v33 }
 0x116   :  { %v456_v36 = vsub.f32 1.0, %v455_v35 }
 0x118   :  { %v457_v39 = vmul.f32 %v456_v36, %v423_v38 }
 0x11a   :  { %v458_v41 = vadd.f32 1.0, %v457_v39 }
 0x11c   :  { %v459_v42 = vmul.f32 %v458_v41, %v420_v40 }
 0x11e   :  { %515 = vmatmul.msk.f32.vlgmr.msra.gmra.mxu1 %vm472_vm8, %v459_v42 }
 0x19b   :  { %v493_v44 = vpop.f32.mrf.mxu1 }
 0x19c   :  { %v494_v45 = vadd.f32 %v522_v43, %v493_v44 }
 0x19e   :  { %v496_v46 = vmax.f32 %v494_v45, 0.0 }
 0x1a0   :  { %498 = vst.msk [vmem:[#allocation2] sm:$0x3] %vm497_vm9, %v496_v46 }
 0x1a1   :  { %509 = dma.vmem_to_hbm [thread:$0]  %s505_s25, 32, %s507_s28, [#allocation3]  }
 0x1a2   :  { %553 = dma.done.wait [#allocation3], 32  }
 0x1a3   :  { %554 = vsyncadd [#allocation3], 4294967264 }
 0x1a4   :  { %514 = vsyncpa [#allocation3], 1 }

// kernel: ctran_forward.2
= control target key start
LH: loop header
LB: loop body
LE: loop exit
PB: predicated region body
PF: predicated region fallthrough
CT: control target
= control target key end

     0   :  { %s7202_s21 = smov 0   ;;  %s11348_s0 = inlined_call_operand.vmem [shape: f32[2,36,16], index: 0, kind: input, shape index: {}]   ;;  %s11349_s1 = inlined_call_operand.vmem [shape: f32[16,32], index: 1, kind: input, shape index: {}]   ;;  %s11350_s2 = inlined_call_operand.vmem [shape: f32[1,32], index: 2, kind: input, shape index: {}]   ;;  %s11351_s3 = inlined_call_operand.vmem [shape: f32[36,32], index: 3, kind: input, shape index: {}]   ;;  %s11352_s4 = inlined_call_operand.vmem [shape: f32[2,32,96], index: 4, kind: input, shape index: {}]   ;;  %s11353_s5 = inlined_call_operand.vmem [shape: f32[2,1,96], index: 5, kind: input, shape index: {}]   ;;  %s11354_s6 = inlined_call_operand.vmem [shape: f32[2,32,32], index: 6, kind: input, shape index: {}]   ;;  %s11355_s7 = inlined_call_operand.vmem [shape: f32[2,1,32], index: 7, kind: input, shape index: {}]   ;;  %s11356_s8 = inlined_call_operand.vmem [shape: f32[2,1,32], index: 8, kind: input, shape index: {}]   ;;  %s11357_s9 = inlined_call_operand.vmem [shape: f32[2,1,32], index: 9, kind: input, shape index: {}]   ;;  %s11358_s10 = inlined_call_operand.vmem [shape: f32[2,32,2048], index: 10, kind: input, shape index: {}]   ;;  %s11359_s11 = inlined_call_operand.vmem [shape: f32[2,1,2048], index: 11, kind: input, shape index: {}]   ;;  %s11360_s12 = inlined_call_operand.vmem [shape: f32[2,2048,32], index: 12, kind: input, shape index: {}]   ;;  %s11361_s13 = inlined_call_operand.vmem [shape: f32[2,1,32], index: 13, kind: input, shape index: {}]   ;;  %s11362_s14 = inlined_call_operand.vmem [shape: f32[2,1,32], index: 14, kind: input, shape index: {}]   ;;  %s11363_s15 = inlined_call_operand.vmem [shape: f32[2,1,32], index: 15, kind: input, shape index: {}]   ;;  %s11364_s16 = inlined_call_operand.vmem [shape: f32[2,36,32], index: 16, kind: output, shape index: {}]  }
   0x1   :  { %11394 = sst [smem:[#allocation27_spill]] %s11348_s0 }
   0x2 LB: > { %s6105_s22 = sadd.s32 4294967295, %s7100_s21   ;;  %p6109_p0 = scmp.ge.s32.totalorder %s7100_s21, 1  ;;  %s7100_s21 = sphi %s7202_s21, %s26_s21  }
   0x3   : > { %p462_p1 = scmp.lt.s32.totalorder %s7100_s21, 3 }
   0x5   : > { %p463_p2 = pnand %p6109_p0, %p462_p1 }
   0x7   : > { %466 = sbr.rel (%p463_p2) target bundleno = 5430 (0x1536), region = 84 }
   0xc   : > { %v528_v0 = vld [vmem:[%s11349_s1 + $0x8] sm:$0xff]  ;;  %v527_v1 = vld [vmem:[%s11349_s1] sm:$0xff]  ;;  %p512_p3 = scmp.lt.s32.totalorder %s6105_s22, 1  ;;  %v594_v2 = vld [vmem:[%s11352_s4 + $0x18] sm:$0xff]  ;;  %vm533_vm0 = vcmask 130048   ;;  %s11395_s17 = sld [smem:[#allocation27_spill]] }
   0xd   : > { %563 = vmatpush.msra.mxu0 %v528_v0  ;;  %6766 = vmatpush.msra.mxu1 %v528_v0  ;;  %v593_v8 = vld [vmem:[%s11352_s4 + $0x10] sm:$0xff]  ;;  %v592_v9 = vld [vmem:[%s11352_s4 + $0x8] sm:$0xff]  ;;  %v591_v10 = vld [vmem:[%s11352_s4] sm:$0xff]  ;;  %vm599_vm1 = vcmask 261120   ;;  %s7102_s30 = smov 96   ;;  %s11372_s0 = smov 64  }
   0xe   : > { %s11459_s22 = smov (!%p512_p3, %s6105_s22), 1  ;;  %v6877_v11 = vld [vmem:[%s11350_s2] ss:$0 sm:$0xff]  ;;  %v582_v17 = vld [vmem:[%s11351_s3 + $0x8] sm:$0xff]  ;;  %v583_v21 = vld [vmem:[%s11351_s3 + $0x10] sm:$0xff]  ;;  %s7106_s19 = smov 120  }
   0xf   : > { %564 = vmatpush.msra.mxu0 %v527_v1  ;;  %6767 = vmatpush.msra.mxu1 %v527_v1  ;;  %s11365_s29 = smul.u32 40, %s11459_s22  ;;  %v581_v13 = vld [vmem:[%s11351_s3] sm:$0xff]  ;;  %v584_v26 = vld [vmem:[%s11351_s3 + $0x18] sm:$0xff]  ;;  %s11382_s20 = smov 72   ;;  %vm667_vm2 = vcmask 64512   ;;  %vm811_vm3 = vcmask 1043456  }
  0x10   : > { %v585_v30 = vld [vmem:[%s11351_s3 + $0x20] sm:$0xf]  ;;  %vm725_vm4 = vcmask 293888   ;;  %vm738_vm5 = vcmask 289792   ;;  %s11378_s23 = smov 112   ;;  %s11376_s24 = smov 104  }
  0x11   : > { %627 = vmatpush.msrb.mxu1 %v594_v2  ;;  %v6878_v32 = vld [vmem:[%s11353_s5] ss:$0 sm:$0xff]  ;;  %s11374_s25 = smov 56   ;;  %s11366_s26 = smov 48   ;;  %vm1486_vm6 = vcmask 195584   ;;  %vm1566_vm7 = vcmask 257024  }
  0x12   : > { %s516_s18 = scalar_lea.vmem %s11395_s17, %s11365_s29  ;;  %s7104_s17 = smov 88  }
  0x13   : > { %v522_v3 = vld [vmem:[%s516_s18] sm:$0xff]  ;;  %v525_v4 = vld [vmem:[%s516_s18 + $0x18] sm:$0xff]  ;;  %v523_v5 = vld [vmem:[%s516_s18 + $0x8] sm:$0xff]  ;;  %628 = vmatpush.msrb.mxu1 %v593_v8  ;;  %s11370_s27 = smov 40   ;;  %s11368_s28 = smov 8  }
  0x14   : > { %6112 = vmatmul.msk.f32.vlgmr.msra.gmra.mxu0 %vm533_vm0, %v522_v3  ;;  %6115 = vmatmul.msk.f32.vlgmr.msra.gmra.mxu1 %vm533_vm0, %v525_v4  ;;  %v526_v6 = vld [vmem:[%s516_s18 + $0x20] sm:$0xf]  ;;  %v524_v7 = vld [vmem:[%s516_s18 + $0x10] sm:$0xff]  ;;  %s11380_s18 = smov 80   ;;  %s11386_s29 = smov 24  }
  0x15   : > { %629 = vmatpush.msrb.mxu1 %v592_v9 }
  0x17   : > { %630 = vmatpush.msrb.mxu1 %v591_v10 }
  0x1c   : > { %6113 = vmatmul.msk.f32.gmra.mxu0 %vm533_vm0, %v523_v5  ;;  %6116 = vmatmul.msk.f32.gmra.mxu1 %vm533_vm0, %v526_v6 }
  0x24   : > { %6114 = vmatmul.msk.f32.gmra.mxu0 %vm533_vm0, %v524_v7 }
  0x91   : > { %v566_v12 = vpop.f32.mrf.mxu0  ;;  %v575_v22 = vpop.f32.mrf.mxu1 }
  0x92   : > { %v567_v14 = vadd.f32 %v6877_v11, %v566_v12  ;;  %v576_v25 = vadd.f32 %v6877_v11, %v575_v22 }
  0x94   : > { %v7247_v15 = vadd.f32 %v581_v13, %v567_v14  ;;  %v7268_v27 = vadd.f32 %v584_v26, %v576_v25 }
  0x96   : > { %6117 = vmatmul.msk.f32.vlgmr.msrb.gmra.mxu1 %vm599_vm1, %v7247_v15 }
  0x99   : > { %v569_v16 = vpop.f32.mrf.mxu0  ;;  %v578_v28 = vpop.f32.mrf.mxu1 }
  0x9a   : > { %v570_v18 = vadd.f32 %v6877_v11, %v569_v16  ;;  %v579_v29 = vadd.f32 %v6877_v11, %v578_v28 }
  0x9c   : > { %v7254_v19 = vadd.f32 %v582_v17, %v570_v18  ;;  %v7275_v31 = vadd.f32 %v585_v30, %v579_v29 }
  0x9e   : > { %6118 = vmatmul.msk.f32.gmra.mxu1 %vm599_vm1, %v7254_v19 }
  0xa1   : > { %v572_v20 = vpop.f32.mrf.mxu0 }
  0xa2   : > { %v573_v23 = vadd.f32 %v6877_v11, %v572_v20 }
  0xa4   : > { %v7261_v24 = vadd.f32 %v583_v21, %v573_v23 }
  0xa6   : > { %6119 = vmatmul.msk.f32.gmra.mxu1 %vm599_vm1, %v7261_v24 }
  0xae   : > { %6120 = vmatmul.msk.f32.gmra.mxu1 %vm599_vm1, %v7268_v27 }
  0xb6   : > { %6121 = vmatmul.msk.f32.gmra.mxu1 %vm599_vm1, %v7275_v31 }
 0x113   : > { %v632_v33 = vpop.f32.mrf.mxu1 }
 0x114   : > { %v7282_v34 = vadd.f32 %v6878_v32, %v632_v33 }
 0x116   : > { %657 = vrot.lane.b32.xlu2 %v7282_v34, %s7102_s30  ;;  %v7321_v45 = vmul.f32 0.35355338, %v7282_v34 }
 0x11b   : > { %v635_v35 = vpop.f32.mrf.mxu1 }
 0x11c   : > { %v7290_v39 = vadd.f32 %v6878_v32, %v635_v35 }
 0x11e   : > { %v7306_v44 = vpack.i.bf16 %v7282_v34, %v7290_v39  ;;  %v7339_v47 = vmul.f32 0.35355338, %v7290_v39 }
 0x123   : > { %v638_v36 = vpop.f32.mrf.mxu1 }
 0x124   : > { %v7286_v37 = vadd.f32 %v6878_v32, %v638_v36 }
 0x126   : > { %661 = vrot.lane.b32.xlu1 %v7286_v37, %s7102_s30  ;;  %v7334_v46 = vmul.f32 0.35355338, %v7286_v37 }
 0x12b   : > { %v641_v38 = vpop.f32.mrf.mxu1 }
 0x12c   : > { %v7292_v40 = vadd.f32 %v6878_v32, %v641_v38 }
 0x12e   : > { %659 = vrot.lane.b32.xlu1 %v7290_v39, %s7102_s30  ;;  %v7298_v41 = vpack.i.bf16 %v7286_v37, %v7292_v40  ;;  %v7352_v48 = vmul.f32 0.35355338, %v7292_v40 }
 0x130   : > { %6798 = vrot.lane.b32.xlu2 %v7298_v41, %s11372_s0 }
 0x133   : > { %v644_v42 = vpop.f32.mrf.mxu1 }
 0x134   : > { %v7302_v43 = vadd.f32 %v6878_v32, %v644_v42 }
 0x136   : > { %665 = vrot.lane.b32.xlu0 %v7302_v43, %s7102_s30  ;;  %6803 = vrot.lane.b32.xlu1 %v7306_v44, %s11372_s0  ;;  %v7382_v7 = vmul.f32 0.35355338, %v7302_v43 }
 0x138   : > { %862 = vrot.lane.b32.xlu2 %v7292_v40, %s7104_s17 }
 0x13e   : > { %663 = vrot.lane.b32.xlu0 %v7292_v40, %s7102_s30  ;;  %860 = vrot.lane.b32.xlu1 %v7286_v37, %s7104_s17 }
 0x140   : > { %1052 = vrot.lane.b32.xlu2 %v7292_v40, %s11380_s18 }
 0x146   : > { %858 = vrot.lane.b32.xlu1 %v7290_v39, %s7104_s17  ;;  %846 = vrot.lane.b32.xlu0 %v7321_v45, %s7106_s19 }
 0x148   : > { %1050 = vrot.lane.b32.xlu2 %v7286_v37, %s11380_s18 }
 0x14e   : > { %856 = vrot.lane.b32.xlu1 %v7282_v34, %s7104_s17  ;;  %1046 = vrot.lane.b32.xlu0 %v7282_v34, %s11380_s18 }
 0x150   : > { %850 = vrot.lane.b32.xlu2 %v7334_v46, %s7106_s19 }
 0x156   : > { %848 = vrot.lane.b32.xlu1 %v7339_v47, %s7106_s19  ;;  %864 = vrot.lane.b32.xlu0 %v7302_v43, %s7104_s17 }
 0x158   : > { %1054 = vrot.lane.b32.xlu2 %v7302_v43, %s11380_s18 }
 0x15e   : > { %1048 = vrot.lane.b32.xlu1 %v7290_v39, %s11380_s18 }
 0x160   : > { %1244 = vrot.lane.b32.xlu2 %v7302_v43, %s11382_s20 }
 0x166   : > { %852 = vrot.lane.b32.xlu1 %v7352_v48, %s7106_s19 }
 0x16e   : > { %790 = vrot.lane.b32.xlu1 %v7302_v43, %s11372_s0 }
 0x170   : > { %v658_v49 = vpop.permute.xlu2 %657 }
 0x18a   : > { %v6799_v51 = vpop.permute.xlu2 %6798 }
 0x18b   : > { %v6800_v9 = vunpack.i.l.bf16 %v6799_v51  ;;  %v6801_v10 = vunpack.i.h.bf16 %v6799_v51 }
 0x192   : > { %v863_v53 = vpop.permute.xlu2 %862 }
 0x198   : > { %v662_v50 = vpop.permute.xlu1 %661 }
 0x19a   : > { %v1053_v58 = vpop.permute.xlu2 %1052 }
 0x1a0   : > { %v660_v52 = vpop.permute.xlu1 %659 }
 0x1a2   : > { %v1051_v61 = vpop.permute.xlu2 %1050 }
 0x1a8   : > { %v666_v54 = vpop.permute.xlu0 %665  ;;  %v6804_v55 = vpop.permute.xlu1 %6803 }
 0x1a9   : > { %6122 = vmatpush.xpose.msk.msra.mxu2 %vm667_vm2, %v666_v54  ;;  %v6805_v11 = vunpack.i.l.bf16 %v6804_v55  ;;  %v6806_v12 = vunpack.i.h.bf16 %v6804_v55 }
 0x1aa   : > { %v851_v0 = vpop.permute.xlu2 %850 }
 0x1b0   : > { %v664_v56 = vpop.permute.xlu0 %663  ;;  %v861_v57 = vpop.permute.xlu1 %860 }
 0x1b1   : > { %6123 = vmatpush.xpose.msk.msra.mxu2 %vm667_vm2, %v664_v56 }
 0x1b2   : > { %v1055_v3 = vpop.permute.xlu2 %1054 }
 0x1b5   : > { %6124 = vmatpush.xpose.msk.msra.mxu2 %vm667_vm2, %v662_v50 }
 0x1b8   : > { %v859_v59 = vpop.permute.xlu1 %858  ;;  %v847_v60 = vpop.permute.xlu0 %846 }
 0x1b9   : > { %6125 = vmatpush.xpose.msk.msra.mxu2 %vm667_vm2, %v660_v52 }
 0x1ba   : > { %v7375_v6 = vpop.permute.xlu2 %1244 }
 0x1bd   : > { %6126 = vmatpush.xpose.msk.msra.mxu2 %vm667_vm2, %v658_v49 }
 0x1c0   : > { %v857_v62 = vpop.permute.xlu1 %856  ;;  %v1047_v63 = vpop.permute.xlu0 %1046  ;;  %6127 = vmatmul.msk.f32.vlgmr.msra.gmra.mxu2 %vm667_vm2, %v7321_v45 }
 0x1c8   : > { %v849_v1 = vpop.permute.xlu1 %848  ;;  %v865_v2 = vpop.permute.xlu0 %864  ;;  %6128 = vmatmul.msk.f32.gmra.mxu2 %vm667_vm2, %v7339_v47 }
 0x1c9   : > { %6138 = vmatpush.xpose.msk.msrb.mxu0 %vm667_vm2, %v865_v2 }
 0x1cd   : > { %6139 = vmatpush.xpose.msk.msrb.mxu0 %vm667_vm2, %v863_v53 }
 0x1d0   : > { %v1049_v4 = vpop.permute.xlu1 %1048  ;;  %6129 = vmatmul.msk.f32.gmra.mxu2 %vm667_vm2, %v7334_v46 }
 0x1d1   : > { %6140 = vmatpush.xpose.msk.msrb.mxu0 %vm667_vm2, %v861_v57 }
 0x1d5   : > { %6141 = vmatpush.xpose.msk.msrb.mxu0 %vm667_vm2, %v859_v59 }
 0x1d8   : > { %v853_v5 = vpop.permute.xlu1 %852  ;;  %6130 = vmatmul.msk.f32.gmra.mxu2 %vm667_vm2, %v7352_v48 }
 0x1d9   : > { %6142 = vmatpush.xpose.msk.msrb.mxu0 %vm667_vm2, %v857_v62 }
 0x1dc   : > { %6143 = vmatmul.msk.f32.vlgmr.msrb.gmra.mxu0 %vm667_vm2, %v847_v60 }
 0x1dd   : > { %6170 = vmatpush.xpose.msk.msra.mxu0 %vm667_vm2, %v7375_v6 }
 0x1e0   : > { %v791_v8 = vpop.permute.xlu1 %790  ;;  %6131 = vmatmul.msk.f32.gmra.mxu2 %vm667_vm2, %v7382_v7 }
 0x1e1   : > { %6132 = vmatpush.msk.msra.mxu3 %vm811_vm3, %v791_v8 }
 0x1e3   : > { %826 = vmatpush.msra.mxu3 %v6800_v9 }
 0x1e4   : > { %6144 = vmatmul.msk.f32.gmra.mxu0 %vm667_vm2, %v849_v1 }
 0x1e5   : > { %827 = vmatpush.msra.mxu3 %v6801_v10 }
 0x1e7   : > { %828 = vmatpush.msra.mxu3 %v6805_v11 }
 0x1e9   : > { %829 = vmatpush.msra.mxu3 %v6806_v12 }
 0x1eb   : > { %6154 = vmatpush.xpose.msk.msrb.mxu3 %vm667_vm2, %v1055_v3 }
 0x1ec   : > { %6145 = vmatmul.msk.f32.gmra.mxu0 %vm667_vm2, %v851_v0 }
 0x1ef   : > { %6155 = vmatpush.xpose.msk.msrb.mxu3 %vm667_vm2, %v1053_v58 }
 0x1f3   : > { %6156 = vmatpush.xpose.msk.msrb.mxu3 %vm667_vm2, %v1051_v61 }
 0x1f4   : > { %6146 = vmatmul.msk.f32.gmra.mxu0 %vm667_vm2, %v853_v5 }
 0x1f7   : > { %6157 = vmatpush.xpose.msk.msrb.mxu3 %vm667_vm2, %v1049_v4 }
 0x1fb   : > { %6158 = vmatpush.xpose.msk.msrb.mxu3 %vm667_vm2, %v1047_v63 }
 0x243   : > { %v710_v13 = vpop.f32.mrf.mxu2 }
 0x244   : > { %v726_v14 = vsel %vm725_vm4, %v710_v13, -inf }
 0x245   : > { %727 = vmax.xlane.f32.xlu2 %v726_v14 }
 0x24b   : > { %v713_v16 = vpop.f32.mrf.mxu2 }
 0x24c   : > { %v729_v17 = vsel %vm725_vm4, %v713_v16, -inf }
 0x24d   : > { %730 = vmax.xlane.f32.xlu0 %v729_v17 }
 0x253   : > { %v716_v18 = vpop.f32.mrf.mxu2 }
 0x254   : > { %v732_v20 = vsel %vm725_vm4, %v716_v18, -inf }
 0x255   : > { %733 = vmax.xlane.f32.xlu1 %v732_v20 }
 0x25b   : > { %v719_v21 = vpop.f32.mrf.mxu2 }
 0x25c   : > { %v735_v22 = vsel %vm725_vm4, %v719_v21, -inf }
 0x25d   : > { %736 = vmax.xlane.f32.xlu2 %v735_v22 }
 0x263   : > { %v722_v23 = vpop.f32.mrf.mxu2 }
 0x264   : > { %v739_v25 = vsel %vm738_vm5, %v722_v23, -inf }
 0x265   : > { %740 = vmax.xlane.f32.xlu2 %v739_v25 }
 0x26e   : > { %1036 = vrot.lane.b32.xlu1 %v7321_v45, %s11378_s23 }
 0x276   : > { %854 = vrot.lane.b32.xlu1 %v7382_v7, %s7106_s19 }
 0x27d   : > { %1242 = vrot.lane.b32.xlu2 %v7292_v40, %s11382_s20 }
 0x2b8   : > { %v728_v26 = vpop.xlane.xlu2 %727 }
 0x2b9   : > { %v742_v28 = vsub.f32 %v710_v13, %v728_v26 }
 0x2bb   : > { %v747_v29 = vmul.f32 1.442695, %v742_v28 }
 0x2bd   : > { %6892 = vpow2.f32 %v747_v29 }
 0x2c0   : > { %v731_v30 = vpop.xlane.xlu0 %730 }
 0x2c1   : > { %v743_v32 = vsub.f32 %v713_v16, %v731_v30 }
 0x2c3   : > { %v6893_v33 = vpop.eup %6892  ;;  %v749_v35 = vmul.f32 1.442695, %v743_v32 }
 0x2c4   : > { %v757_v36 = vsel %vm725_vm4, %v6893_v33, 0.0 }
 0x2c5   : > { %6894 = vpow2.f32 %v749_v35  ;;  %758 = vadd.xlane.f32.xlu0 %v757_v36 }
 0x2c8   : > { %v734_v38 = vpop.xlane.xlu1 %733 }
 0x2c9   : > { %v744_v42 = vsub.f32 %v716_v18, %v734_v38 }
 0x2cb   : > { %v6895_v49 = vpop.eup %6894  ;;  %v751_v50 = vmul.f32 1.442695, %v744_v42 }
 0x2cc   : > { %v760_v51 = vsel %vm725_vm4, %v6895_v49, 0.0 }
 0x2cd   : > { %6896 = vpow2.f32 %v751_v50  ;;  %761 = vadd.xlane.f32.xlu0 %v760_v51 }
 0x2d0   : > { %v737_v40 = vpop.xlane.xlu2 %736 }
 0x2d1   : > { %v745_v52 = vsub.f32 %v719_v21, %v737_v40 }
 0x2d3   : > { %v6897_v53 = vpop.eup %6896  ;;  %v753_v54 = vmul.f32 1.442695, %v745_v52 }
 0x2d4   : > { %v763_v55 = vsel %vm725_vm4, %v6897_v53, 0.0 }
 0x2d5   : > { %6898 = vpow2.f32 %v753_v54  ;;  %764 = vadd.xlane.f32.xlu2 %v763_v55 }
 0x2d8   : > { %v741_v56 = vpop.xlane.xlu2 %740 }
 0x2db   : > { %v7409_v57 = vpop.eup %6898 }
 0x2dc   : > { %v766_v58 = vsel %vm725_vm4, %v7409_v57, 0.0 }
 0x2dd   : > { %767 = vadd.xlane.f32.xlu1 %v766_v58 }
 0x2e0   : > { %v7413_v59 = vpop.permute.xlu1 %1036  ;;  %v1243_v60 = vpop.permute.xlu2 %1242 }
 0x2e1   : > { %1238 = vrot.lane.b32.xlu0 %v7290_v39, %s11382_s20  ;;  %6171 = vmatpush.xpose.msk.msra.mxu0 %vm667_vm2, %v1243_v60  ;;  %v746_v39 = vsub.f32 %v722_v23, %v741_v56 }
 0x2e3   : > { %v755_v62 = vmul.f32 1.442695, %v746_v39 }
 0x2e5   : > { %6900 = vpow2.f32 %v755_v62 }
 0x2e8   : > { %v855_v61 = vpop.permute.xlu1 %854 }
 0x2e9   : > { %1226 = vrot.lane.b32.xlu0 %v7321_v45, %s11376_s24  ;;  %6147 = vmatmul.msk.f32.gmra.mxu0 %vm667_vm2, %v855_v61  ;;  %v7438_v45 = vpop.f32.mrf.mxu0 }
 0x2ed   : > { %1240 = vrot.lane.b32.xlu2 %v7286_v37, %s11382_s20  ;;  %v6901_v37 = vpop.eup %6900 }
 0x2f1   : > { %v7440_v63 = vpop.f32.mrf.mxu0 }
 0x2f2   : > { %v921_v16 = vsel %vm725_vm4, %v7440_v63, -inf }
 0x2f5   : > { %1038 = vrot.lane.b32.xlu2 %v7339_v47, %s11378_s23 }
 0x2f6   : > { %1236 = vrot.lane.b32.xlu1 %v7282_v34, %s11382_s20  ;;  %v769_v34 = vsel %vm738_vm5, %v6901_v37, 0.0  ;;  %s11449_s20 = smov 104  }
 0x2fd   : > { %1040 = vrot.lane.b32.xlu2 %v7334_v46, %s11378_s23 }
 0x2fe   : > { %1228 = vrot.lane.b32.xlu1 %v7339_v47, %s11376_s24  ;;  %v7444_v47 = vpop.f32.mrf.mxu0 }
 0x2ff   : > { %v924_v1 = vsel %vm725_vm4, %v7444_v47, -inf }
 0x305   : > { %1230 = vrot.lane.b32.xlu2 %v7334_v46, %s11376_s24  ;;  %v918_v46 = vsel %vm725_vm4, %v7438_v45, -inf }
 0x306   : > { %1044 = vrot.lane.b32.xlu1 %v7382_v7, %s11378_s23  ;;  %v7450_v0 = vpop.f32.mrf.mxu0 }
 0x307   : > { %v927_v2 = vsel %vm725_vm4, %v7450_v0, -inf }
 0x30d   : > { %1234 = vrot.lane.b32.xlu2 %v7382_v7, %s11376_s24 }
 0x313   : > { %770 = vadd.xlane.f32.xlu0 %v769_v34 }
 0x327   : > { %1042 = vrot.lane.b32.xlu0 %v7352_v48, %s11378_s23  ;;  %s11452_s23 = smov 40  }
 0x32f   : > { %1232 = vrot.lane.b32.xlu0 %v7352_v48, %s11376_s24  ;;  %s11453_s24 = smov 48  }
 0x330   : > { %919 = vmax.xlane.f32.xlu1 %v918_v46 }
 0x336   : > { %925 = vmax.xlane.f32.xlu2 %v924_v1 }
 0x338   : > { %v759_v3 = vpop.xlane.xlu0 %758  ;;  %928 = vmax.xlane.f32.xlu1 %v927_v2 }
 0x339   : > { %6902 = vrcp.f32 %v759_v3 }
 0x33f   : > { %v6903_v4 = vpop.eup %6902 }
 0x340   : > { %v762_v5 = vpop.xlane.xlu0 %761  ;;  %v777_v7 = vmul.f32 %v6903_v4, %v6893_v33 }
 0x341   : > { %6904 = vrcp.f32 %v762_v5 }
 0x342   : > { %6133 = vmatmul.msk.f32.vlgmr.msra.gmra.mxu3 %vm725_vm4, %v777_v7 }
 0x343   : > { %6768 = vmatpush.xpose.msk.msra.mxu3 %vm667_vm2, %v7375_v6 }
 0x347   : > { %v6905_v48 = vpop.eup %6904  ;;  %6769 = vmatpush.xpose.msk.msra.mxu3 %vm667_vm2, %v1243_v60 }
 0x348   : > { %v765_v8 = vpop.xlane.xlu2 %764  ;;  %v778_v9 = vmul.f32 %v6905_v48, %v6895_v49 }
 0x349   : > { %6906 = vrcp.f32 %v765_v8 }
 0x34a   : > { %6134 = vmatmul.msk.f32.gmra.mxu3 %vm725_vm4, %v778_v9 }
 0x34f   : > { %v6907_v10 = vpop.eup %6906 }
 0x350   : > { %v768_v11 = vpop.xlane.xlu1 %767  ;;  %v1241_v12 = vpop.permute.xlu2 %1240  ;;  %v779_v13 = vmul.f32 %v6907_v10, %v6897_v53 }
 0x351   : > { %6908 = vrcp.f32 %v768_v11  ;;  %6172 = vmatpush.xpose.msk.msra.mxu0 %vm667_vm2, %v1241_v12  ;;  %6770 = vmatpush.xpose.msk.msra.mxu3 %vm667_vm2, %v1241_v12 }
 0x352   : > { %6135 = vmatmul.msk.f32.gmra.mxu3 %vm725_vm4, %v779_v13 }
 0x353   : > { %v1239_v6 = vpop.permute.xlu0 %1238 }
 0x355   : > { %6173 = vmatpush.xpose.msk.msra.mxu0 %vm667_vm2, %v1239_v6  ;;  %6771 = vmatpush.xpose.msk.msra.mxu3 %vm667_vm2, %v1239_v6 }
 0x357   : > { %v6909_v14 = vpop.eup %6908 }
 0x358   : > { %v780_v17 = vmul.f32 %v6909_v14, %v7409_v57  ;;  %v1039_v20 = vpop.permute.xlu2 %1038 }
 0x359   : > { %922 = vmax.xlane.f32.xlu0 %v921_v16 }
 0x35a   : > { %6136 = vmatmul.msk.f32.gmra.mxu3 %vm725_vm4, %v780_v17 }
 0x35b   : > { %v1227_v23 = vpop.permute.xlu0 %1226 }
 0x360   : > { %v1041_v25 = vpop.permute.xlu2 %1040 }
 0x366   : > { %v7470_v18 = vpop.f32.mrf.mxu0 }
 0x367   : > { %v930_v21 = vsel %vm738_vm5, %v7470_v18, -inf }
 0x368   : > { %v1237_v22 = vpop.permute.xlu1 %1236  ;;  %931 = vmax.xlane.f32.xlu2 %v930_v21  ;;  %v1231_v28 = vpop.permute.xlu2 %1230 }
 0x369   : > { %6174 = vmatpush.xpose.msk.msra.mxu0 %vm667_vm2, %v1237_v22  ;;  %6772 = vmatpush.xpose.msk.msra.mxu3 %vm667_vm2, %v1237_v22 }
 0x36c   : > { %6175 = vmatmul.msk.f32.vlgmr.msra.gmra.mxu0 %vm667_vm2, %v1227_v23 }
 0x370   : > { %v1229_v26 = vpop.permute.xlu1 %1228  ;;  %v1235_v40 = vpop.permute.xlu2 %1234 }
 0x374   : > { %6176 = vmatmul.msk.f32.gmra.mxu0 %vm667_vm2, %v1229_v26 }
 0x378   : > { %v1045_v35 = vpop.permute.xlu1 %1044 }
 0x37c   : > { %6177 = vmatmul.msk.f32.gmra.mxu0 %vm667_vm2, %v1231_v28 }
 0x386   : > { %v771_v29 = vpop.xlane.xlu0 %770 }
 0x387   : > { %6910 = vrcp.f32 %v771_v29 }
 0x38d   : > { %v6911_v30 = vpop.eup %6910 }
 0x38e   : > { %v781_v32 = vmul.f32 %v6911_v30, %v6901_v37 }
 0x390   : > { %6137 = vmatmul.msk.f32.gmra.mxu3 %vm725_vm4, %v781_v32 }
 0x398   : > { %6159 = vmatmul.msk.f32.vlgmr.msrb.gmra.mxu3 %vm667_vm2, %v7413_v59 }
 0x399   : > { %v1043_v33 = vpop.permute.xlu0 %1042 }
 0x3a0   : > { %6160 = vmatmul.msk.f32.gmra.mxu3 %vm667_vm2, %v1039_v20 }
 0x3a1   : > { %v1233_v36 = vpop.permute.xlu0 %1232 }
 0x3a2   : > { %6178 = vmatmul.msk.f32.gmra.mxu0 %vm667_vm2, %v1233_v36 }
 0x3a3   : > { %v920_v38 = vpop.xlane.xlu1 %919 }
 0x3a4   : > { %v933_v42 = vsub.f32 %v7438_v45, %v920_v38 }
 0x3a6   : > { %v938_v49 = vmul.f32 1.442695, %v933_v42 }
 0x3a8   : > { %6912 = vpow2.f32 %v938_v49  ;;  %6161 = vmatmul.msk.f32.gmra.mxu3 %vm667_vm2, %v1041_v25 }
 0x3a9   : > { %v926_v60 = vpop.xlane.xlu2 %925 }
 0x3aa   : > { %v935_v39 = vsub.f32 %v7444_v47, %v926_v60 }
 0x3ab   : > { %v929_v45 = vpop.xlane.xlu1 %928 }
 0x3ac   : > { %v942_v34 = vmul.f32 1.442695, %v935_v39  ;;  %v936_v46 = vsub.f32 %v7450_v0, %v929_v45 }
 0x3ae   : > { %v7486_v50 = vpop.eup %6912  ;;  %v944_v47 = vmul.f32 1.442695, %v936_v46 }
 0x3af   : > { %v948_v51 = vsel %vm725_vm4, %v7486_v50, 0.0 }
 0x3b0   : > { %949 = vadd.xlane.f32.xlu2 %v948_v51  ;;  %6162 = vmatmul.msk.f32.gmra.mxu3 %vm667_vm2, %v1043_v33 }
 0x3b8   : > { %6163 = vmatmul.msk.f32.gmra.mxu3 %vm667_vm2, %v1045_v35 }
 0x3c0   : > { %6179 = vmatmul.msk.f32.vlgmr.msra.gmra.mxu3 %vm667_vm2, %v1235_v40 }
 0x3c5   : > { %v7497_v54 = vpop.f32.mrf.mxu3 }
 0x3cc   : > { %v923_v55 = vpop.xlane.xlu0 %922 }
 0x3cd   : > { %v934_v56 = vsub.f32 %v7440_v63, %v923_v55  ;;  %v7504_v61 = vpop.f32.mrf.mxu3 }
 0x3cf   : > { %v940_v59 = vmul.f32 1.442695, %v934_v56 }
 0x3d1   : > { %6914 = vpow2.f32 %v940_v59 }
 0x3d2   : > { %6916 = vpow2.f32 %v942_v34 }
 0x3d3   : > { %6918 = vpow2.f32 %v944_v47 }
 0x3d5   : > { %v7514_v1 = vpop.f32.mrf.mxu3 }
 0x3d7   : > { %v7511_v63 = vpop.eup %6914 }
 0x3d8   : > { %v951_v2 = vsel %vm725_vm4, %v7511_v63, 0.0  ;;  %v7520_v4 = vpop.eup %6916 }
 0x3d9   : > { %v954_v5 = vsel %vm725_vm4, %v7520_v4, 0.0  ;;  %v7531_v8 = vpop.eup %6918 }
 0x3da   : > { %v957_v9 = vsel %vm725_vm4, %v7531_v8, 0.0 }
 0x3db   : > { %v932_v3 = vpop.xlane.xlu2 %931 }
 0x3dc   : > { %v937_v0 = vsub.f32 %v7470_v18, %v932_v3 }
 0x3dd   : > { %v7527_v7 = vpop.f32.mrf.mxu3 }
 0x3de   : > { %v946_v48 = vmul.f32 1.442695, %v937_v0 }
 0x3e0   : > { %6920 = vpow2.f32 %v946_v48 }
 0x3e6   : > { %v7539_v11 = vpop.eup %6920 }
 0x3e7   : > { %v960_v12 = vsel %vm738_vm5, %v7539_v11, 0.0 }
 0x3e9   : > { %v7493_v52 = vpop.f32.mrf.mxu0 }
 0x3ea   : > { %v1298_v53 = vsel %vm725_vm4, %v7493_v52, -inf }
 0x3eb   : > { %1299 = vmax.xlane.f32.xlu1 %v1298_v53 }
 0x3f1   : > { %v7500_v57 = vpop.f32.mrf.mxu0 }
 0x3f2   : > { %v1301_v58 = vsel %vm725_vm4, %v7500_v57, -inf }
 0x3f3   : > { %1302 = vmax.xlane.f32.xlu0 %v1301_v58 }
 0x3f9   : > { %v7507_v62 = vpop.f32.mrf.mxu0 }
 0x3fa   : > { %v1304_v37 = vsel %vm725_vm4, %v7507_v62, -inf }
 0x3fb   : > { %1305 = vmax.xlane.f32.xlu2 %v1304_v37 }
 0x403   : > { %952 = vadd.xlane.f32.xlu2 %v951_v2 }
 0x404   : > { %6808 = vrot.lane.b32.xlu1 %v7298_v41, %s11374_s25 }
 0x407   : > { %981 = vrot.lane.b32.xlu0 %v7302_v43, %s11374_s25 }
 0x40b   : > { %955 = vadd.xlane.f32.xlu2 %v954_v5 }
 0x40c   : > { %6818 = vrot.lane.b32.xlu1 %v7298_v41, %s11366_s26 }
 0x40f   : > { %6813 = vrot.lane.b32.xlu0 %v7306_v44, %s11374_s25  ;;  %s11454_s25 = smov 8  }
 0x413   : > { %v7537_v10 = vpop.f32.mrf.mxu3  ;;  %958 = vadd.xlane.f32.xlu2 %v957_v9 }
 0x41b   : > { %v7543_v13 = vpop.f32.mrf.mxu3  ;;  %961 = vadd.xlane.f32.xlu2 %v960_v12 }
 0x41c   : > { %v1108_v26 = vsel %vm725_vm4, %v7543_v13, -inf }
 0x41f   : > { %v7555_v20 = vpop.f32.mrf.mxu0 }
 0x420   : > { %v1307_v22 = vsel %vm725_vm4, %v7555_v20, -inf }
 0x423   : > { %v7545_v6 = vpop.f32.mrf.mxu3  ;;  %v950_v30 = vpop.xlane.xlu2 %949 }
 0x424   : > { %v1111_v14 = vsel %vm725_vm4, %v7545_v6, -inf }
 0x425   : > { %1112 = vmax.xlane.f32.xlu2 %v1111_v14 }
 0x42b   : > { %v7549_v16 = vpop.f32.mrf.mxu3 }
 0x42c   : > { %v1114_v21 = vsel %vm725_vm4, %v7549_v16, -inf }
 0x433   : > { %v7551_v17 = vpop.f32.mrf.mxu3 }
 0x434   : > { %v1117_v18 = vsel %vm725_vm4, %v7551_v17, -inf }
 0x435   : > { %1118 = vmax.xlane.f32.xlu2 %v1117_v18 }
 0x436   : > { %1115 = vmax.xlane.f32.xlu1 %v1114_v21 }
 0x439   : > { %1308 = vmax.xlane.f32.xlu0 %v1307_v22 }
 0x43b   : > { %v7561_v23 = vpop.f32.mrf.mxu3 }
 0x43c   : > { %v1120_v25 = vsel %vm738_vm5, %v7561_v23, -inf }
 0x43e   : > { %1121 = vmax.xlane.f32.xlu1 %v1120_v25 }
 0x441   : > { %1109 = vmax.xlane.f32.xlu0 %v1108_v26 }
 0x443   : > { %v7567_v28 = vpop.f32.mrf.mxu3 }
 0x444   : > { %v1310_v29 = vsel %vm738_vm5, %v7567_v28, -inf }
 0x445   : > { %1311 = vmax.xlane.f32.xlu2 %v1310_v29 }
 0x455   : > { %1171 = vrot.lane.b32.xlu0 %v7302_v43, %s11366_s26 }
 0x457   : > { %1361 = vrot.lane.b32.xlu1 %v7302_v43, %s11370_s27 }
 0x45d   : > { %6823 = vrot.lane.b32.xlu2 %v7306_v44, %s11366_s26  ;;  %s11384_s26 = smov 16  }
 0x45e   : > { %v1300_v32 = vpop.xlane.xlu1 %1299 }
 0x45f   : > { %6828 = vrot.lane.b32.xlu1 %v7298_v41, %s11370_s27  ;;  %v1313_v33 = vsub.f32 %v7493_v52, %v1300_v32 }
 0x461   : > { %v1318_v35 = vmul.f32 1.442695, %v1313_v33 }
 0x463   : > { %6922 = vpow2.f32 %v1318_v35 }
 0x464   : > { %6924 = vrcp.f32 %v950_v30 }
 0x466   : > { %v1303_v36 = vpop.xlane.xlu0 %1302 }
 0x467   : > { %6833 = vrot.lane.b32.xlu1 %v7306_v44, %s11370_s27  ;;  %v1314_v52 = vsub.f32 %v7500_v57, %v1303_v36  ;;  %s11455_s27 = smov 24  }
 0x469   : > { %v7585_v51 = vpop.eup %6922  ;;  %v1320_v58 = vmul.f32 1.442695, %v1314_v52 }
 0x46a   : > { %v1328_v44 = vsel %vm725_vm4, %v7585_v51, 0.0  ;;  %v6925_v55 = vpop.eup %6924 }
 0x46b   : > { %v968_v60 = vmul.f32 %v6925_v55, %v7486_v50 }
 0x46e   : > { %v7582_v38 = vpop.xlane.xlu2 %1305 }
 0x476   : > { %v6809_v42 = vpop.permute.xlu1 %6808  ;;  %v953_v41 = vpop.xlane.xlu2 %952 }
 0x477   : > { %v6810_v49 = vunpack.i.l.bf16 %v6809_v42  ;;  %v6811_v40 = vunpack.i.h.bf16 %v6809_v42  ;;  %6926 = vrcp.f32 %v953_v41 }
 0x478   : > { %6928 = vpow2.f32 %v1320_v58 }
 0x479   : > { %v982_v43 = vpop.permute.xlu0 %981 }
 0x47a   : > { %6148 = vmatpush.msk.msra.mxu1 %vm811_vm3, %v982_v43 }
 0x47c   : > { %1016 = vmatpush.msra.mxu1 %v6810_v49 }
 0x47d   : > { %v6927_v37 = vpop.eup %6926 }
 0x47e   : > { %1017 = vmatpush.msra.mxu1 %v6811_v40  ;;  %v956_v39 = vpop.xlane.xlu2 %955  ;;  %v7592_v34 = vpop.eup %6928  ;;  %v969_v57 = vmul.f32 %v6927_v37, %v7511_v63 }
 0x47f   : > { %1329 = vadd.xlane.f32.xlu0 %v1328_v44  ;;  %6930 = vrcp.f32 %v956_v39  ;;  %v1331_v46 = vsel %vm725_vm4, %v7592_v34, 0.0  ;;  %v6819_v63 = vpop.permute.xlu1 %6818 }
 0x480   : > { %v6821_v58 = vunpack.i.h.bf16 %v6819_v63 }
 0x481   : > { %v6814_v53 = vpop.permute.xlu0 %6813 }
 0x482   : > { %v6815_v56 = vunpack.i.l.bf16 %v6814_v53  ;;  %v6816_v59 = vunpack.i.h.bf16 %v6814_v53 }
 0x484   : > { %1018 = vmatpush.msra.mxu1 %v6815_v56 }
 0x485   : > { %v6931_v2 = vpop.eup %6930 }
 0x486   : > { %1019 = vmatpush.msra.mxu1 %v6816_v59  ;;  %v959_v45 = vpop.xlane.xlu2 %958  ;;  %v970_v50 = vmul.f32 %v6931_v2, %v7520_v4 }
 0x487   : > { %6149 = vmatmul.msk.f32.vlgmr.msra.gmra.mxu1 %vm725_vm4, %v968_v60  ;;  %6932 = vrcp.f32 %v959_v45 }
 0x48d   : > { %v6933_v3 = vpop.eup %6932 }
 0x48e   : > { %v962_v47 = vpop.xlane.xlu2 %961  ;;  %v971_v0 = vmul.f32 %v6933_v3, %v7531_v8 }
 0x48f   : > { %6150 = vmatmul.msk.f32.gmra.mxu1 %vm725_vm4, %v969_v57  ;;  %6934 = vrcp.f32 %v962_v47 }
 0x491   : > { %1332 = vadd.xlane.f32.xlu1 %v1331_v46 }
 0x495   : > { %v6935_v48 = vpop.eup %6934 }
 0x496   : > { %v972_v9 = vmul.f32 %v6935_v48, %v7539_v11 }
 0x497   : > { %6151 = vmatmul.msk.f32.gmra.mxu1 %vm725_vm4, %v970_v50 }
 0x498   : > { %v1113_v5 = vpop.xlane.xlu2 %1112 }
 0x49f   : > { %6152 = vmatmul.msk.f32.gmra.mxu1 %vm725_vm4, %v971_v0 }
 0x4a7   : > { %6153 = vmatmul.msk.f32.gmra.mxu1 %vm725_vm4, %v972_v9 }
 0x4a8   : > { %v1119_v12 = vpop.xlane.xlu2 %1118 }
 0x4a9   : > { %v1116_v14 = vpop.xlane.xlu1 %1115  ;;  %v1126_v18 = vsub.f32 %v7551_v17, %v1119_v12 }
 0x4aa   : > { %v1125_v4 = vsub.f32 %v7549_v16, %v1116_v14  ;;  %v1124_v16 = vsub.f32 %v7545_v6, %v1113_v5 }
 0x4ab   : > { %v1134_v25 = vmul.f32 1.442695, %v1126_v18 }
 0x4ac   : > { %v1132_v21 = vmul.f32 1.442695, %v1125_v4  ;;  %v1309_v22 = vpop.xlane.xlu0 %1308  ;;  %v1130_v36 = vmul.f32 1.442695, %v1124_v16 }
 0x4ad   : > { %v1316_v52 = vsub.f32 %v7555_v20, %v1309_v22 }
 0x4ae   : > { %6936 = vpow2.f32 %v1132_v21 }
 0x4af   : > { %6938 = vpow2.f32 %v1134_v25  ;;  %v1324_v59 = vmul.f32 1.442695, %v1316_v52 }
 0x4b1   : > { %v1122_v8 = vpop.xlane.xlu1 %1121 }
 0x4b2   : > { %v1127_v29 = vsub.f32 %v7561_v23, %v1122_v8 }
 0x4b4   : > { %v7606_v26 = vpop.eup %6936  ;;  %v1110_v30 = vpop.xlane.xlu0 %1109  ;;  %v1136_v33 = vmul.f32 1.442695, %v1127_v29 }
 0x4b5   : > { %v1123_v11 = vsub.f32 %v7543_v13, %v1110_v30  ;;  %v1144_v32 = vsel %vm725_vm4, %v7606_v26, 0.0  ;;  %v7613_v35 = vpop.eup %6938  ;;  %v1315_v13 = vsub.f32 %v7507_v62, %v7582_v38  ;;  %v6820_v38 = vunpack.i.l.bf16 %v6819_v63 }
 0x4b6   : > { %1145 = vadd.xlane.f32.xlu0 %v1144_v32  ;;  %v1147_v42 = vsel %vm725_vm4, %v7613_v35, 0.0 }
 0x4b7   : > { %v1128_v17 = vmul.f32 1.442695, %v1123_v11  ;;  %v1322_v41 = vmul.f32 1.442695, %v1315_v13 }
 0x4b8   : > { %v1312_v43 = vpop.xlane.xlu2 %1311 }
 0x4b9   : > { %6940 = vpow2.f32 %v1128_v17  ;;  %v1317_v37 = vsub.f32 %v7567_v28, %v1312_v43 }
 0x4ba   : > { %6942 = vpow2.f32 %v1136_v33 }
 0x4bb   : > { %6944 = vpow2.f32 %v1130_v36  ;;  %v1326_v2 = vmul.f32 1.442695, %v1317_v37 }
 0x4bc   : > { %6946 = vpow2.f32 %v1322_v41 }
 0x4bd   : > { %6948 = vpow2.f32 %v1324_v59 }
 0x4be   : > { %1148 = vadd.xlane.f32.xlu0 %v1147_v42  ;;  %6950 = vpow2.f32 %v1326_v2  ;;  %v1495_v2 = vld [vmem:[%s11354_s6 + $0x18] sm:$0xff] }
 0x4bf   : > { %v7617_v23 = vpop.eup %6940  ;;  %1527 = vmatpush.msrb.mxu3 %v1495_v2 }
 0x4c0   : > { %v1138_v6 = vsel %vm725_vm4, %v7617_v23, 0.0  ;;  %v7623_v49 = vpop.eup %6942  ;;  %v6824_v55 = vpop.permute.xlu2 %6823 }
 0x4c1   : > { %1139 = vadd.xlane.f32.xlu2 %v1138_v6  ;;  %v7625_v40 = vpop.eup %6944  ;;  %v1150_v44 = vsel %vm738_vm5, %v7623_v49, 0.0  ;;  %v6825_v60 = vunpack.i.l.bf16 %v6824_v55  ;;  %v6826_v20 = vunpack.i.h.bf16 %v6824_v55 }
 0x4c2   : > { %v1141_v62 = vsel %vm725_vm4, %v7625_v40, 0.0  ;;  %v6947_v39 = vpop.eup %6946 }
 0x4c3   : > { %v1334_v57 = vsel %vm725_vm4, %v6947_v39, 0.0  ;;  %v6949_v47 = vpop.eup %6948 }
 0x4c4   : > { %v1337_v3 = vsel %vm725_vm4, %v6949_v47, 0.0  ;;  %v6951_v28 = vpop.eup %6950 }
 0x4c5   : > { %v1340_v48 = vsel %vm738_vm5, %v6951_v28, 0.0 }
 0x4c6   : > { %1151 = vadd.xlane.f32.xlu0 %v1150_v44 }
 0x4c7   : > { %v1172_v53 = vpop.permute.xlu0 %1171 }
 0x4c8   : > { %6164 = vmatpush.msk.msrb.mxu2 %vm811_vm3, %v1172_v53 }
 0x4c9   : > { %v1362_v56 = vpop.permute.xlu1 %1361  ;;  %1142 = vadd.xlane.f32.xlu2 %v1141_v62 }
 0x4ca   : > { %1206 = vmatpush.msrb.mxu2 %v6820_v38  ;;  %6180 = vmatpush.msk.msrb.mxu1 %vm811_vm3, %v1362_v56 }
 0x4cc   : > { %1207 = vmatpush.msrb.mxu2 %v6821_v58 }
 0x4ce   : > { %1208 = vmatpush.msrb.mxu2 %v6825_v60 }
 0x4d0   : > { %1209 = vmatpush.msrb.mxu2 %v6826_v20 }
 0x4d1   : > { %v6829_v45 = vpop.permute.xlu1 %6828  ;;  %1335 = vadd.xlane.f32.xlu2 %v1334_v57 }
 0x4d2   : > { %v6830_v46 = vunpack.i.l.bf16 %v6829_v45  ;;  %v6831_v50 = vunpack.i.h.bf16 %v6829_v45 }
 0x4d4   : > { %1396 = vmatpush.msrb.mxu1 %v6830_v46 }
 0x4d6   : > { %1397 = vmatpush.msrb.mxu1 %v6831_v50  ;;  %v1494_v50 = vld [vmem:[%s11354_s6 + $0x10] sm:$0xff] }
 0x4d7   : > { %1528 = vmatpush.msrb.mxu3 %v1494_v50 }
 0x4d9   : > { %v6834_v0 = vpop.permute.xlu1 %6833  ;;  %1338 = vadd.xlane.f32.xlu2 %v1337_v3  ;;  %v1492_v3 = vld [vmem:[%s11354_s6] sm:$0xff] }
 0x4da   : > { %v6835_v63 = vunpack.i.l.bf16 %v6834_v0  ;;  %v6836_v5 = vunpack.i.h.bf16 %v6834_v0 }
 0x4dc   : > { %1398 = vmatpush.msrb.mxu1 %v6835_v63 }
 0x4de   : > { %1399 = vmatpush.msrb.mxu1 %v6836_v5 }
 0x4e1   : > { %1341 = vadd.xlane.f32.xlu2 %v1340_v48 }
 0x4f2   : > { %v1330_v9 = vpop.xlane.xlu0 %1329 }
 0x4f3   : > { %6952 = vrcp.f32 %v1330_v9 }
 0x4f9   : > { %v6953_v12 = vpop.eup %6952 }
 0x4fa   : > { %v1348_v14 = vmul.f32 %v6953_v12, %v7585_v51 }
 0x4fc   : > { %6181 = vmatmul.msk.f32.vlgmr.msrb.gmra.mxu1 %vm725_vm4, %v1348_v14 }
 0x504   : > { %v1333_v4 = vpop.xlane.xlu1 %1332  ;;  %v1021_v18 = vpop.f32.mrf.mxu1 }
 0x505   : > { %6954 = vrcp.f32 %v1333_v4  ;;  %1421 = vrot.lane.b32.xlu0 %v1021_v18, %s11368_s28 }
 0x50b   : > { %v6955_v21 = vpop.eup %6954 }
 0x50c   : > { %v1024_v22 = vpop.f32.mrf.mxu1  ;;  %v1349_v25 = vmul.f32 %v6955_v21, %v7592_v34 }
 0x50d   : > { %1423 = vrot.lane.b32.xlu0 %v1024_v22, %s11368_s28 }
 0x50e   : > { %6182 = vmatmul.msk.f32.gmra.mxu1 %vm725_vm4, %v1349_v25 }
 0x514   : > { %v1027_v55 = vpop.f32.mrf.mxu1 }
 0x51c   : > { %v1030_v56 = vpop.f32.mrf.mxu1 }
 0x524   : > { %v1033_v58 = vpop.f32.mrf.mxu1 }
 0x529   : > { %v1146_v51 = vpop.xlane.xlu0 %1145 }
 0x531   : > { %v1149_v34 = vpop.xlane.xlu0 %1148 }
 0x534   : > { %v1140_v8 = vpop.xlane.xlu2 %1139 }
 0x535   : > { %6956 = vrcp.f32 %v1140_v8 }
 0x53b   : > { %v6957_v29 = vpop.eup %6956 }
 0x53c   : > { %v1143_v30 = vpop.xlane.xlu2 %1142  ;;  %v1158_v11 = vmul.f32 %v6957_v29, %v7617_v23  ;;  %v1152_v23 = vpop.xlane.xlu0 %1151 }
 0x53d   : > { %6958 = vrcp.f32 %v1143_v30 }
 0x53e   : > { %6165 = vmatmul.msk.f32.vlgmr.msrb.gmra.mxu2 %vm725_vm4, %v1158_v11  ;;  %6960 = vrcp.f32 %v1146_v51 }
 0x543   : > { %v6959_v32 = vpop.eup %6958 }
 0x544   : > { %v1336_v16 = vpop.xlane.xlu2 %1335  ;;  %v1159_v17 = vmul.f32 %v6959_v32, %v7625_v40  ;;  %v6961_v33 = vpop.eup %6960 }
 0x545   : > { %6962 = vrcp.f32 %v1336_v16  ;;  %v1160_v13 = vmul.f32 %v6961_v33, %v7606_v26 }
 0x546   : > { %6166 = vmatmul.msk.f32.gmra.mxu2 %vm725_vm4, %v1159_v17  ;;  %6964 = vrcp.f32 %v1149_v34 }
 0x54b   : > { %v6963_v36 = vpop.eup %6962 }
 0x54c   : > { %v1339_v42 = vpop.xlane.xlu2 %1338  ;;  %v1350_v43 = vmul.f32 %v6963_v36, %v6947_v39  ;;  %v6965_v6 = vpop.eup %6964 }
 0x54d   : > { %6966 = vrcp.f32 %v1339_v42  ;;  %v1161_v44 = vmul.f32 %v6965_v6, %v7613_v35 }
 0x54e   : > { %6167 = vmatmul.msk.f32.gmra.mxu2 %vm725_vm4, %v1160_v13  ;;  %6183 = vmatmul.msk.f32.gmra.mxu1 %vm725_vm4, %v1350_v43  ;;  %6968 = vrcp.f32 %v1152_v23 }
 0x553   : > { %v6967_v41 = vpop.eup %6966 }
 0x554   : > { %v1342_v40 = vpop.xlane.xlu2 %1341  ;;  %v1351_v52 = vmul.f32 %v6967_v41, %v6949_v47  ;;  %v6969_v26 = vpop.eup %6968  ;;  %v1493_v47 = vld [vmem:[%s11354_s6 + $0x8] sm:$0xff] }
 0x555   : > { %6970 = vrcp.f32 %v1342_v40  ;;  %v1162_v62 = vmul.f32 %v6969_v26, %v7623_v49  ;;  %1529 = vmatpush.msrb.mxu3 %v1493_v47 }
 0x556   : > { %6168 = vmatmul.msk.f32.gmra.mxu2 %vm725_vm4, %v1161_v44  ;;  %6184 = vmatmul.msk.f32.gmra.mxu1 %vm725_vm4, %v1351_v52 }
 0x557   : > { %1530 = vmatpush.msrb.mxu3 %v1492_v3 }
 0x55b   : > { %v6971_v53 = vpop.eup %6970 }
 0x55c   : > { %v1352_v38 = vmul.f32 %v6971_v53, %v6951_v28 }
 0x55e   : > { %6169 = vmatmul.msk.f32.gmra.mxu2 %vm725_vm4, %v1162_v62  ;;  %6185 = vmatmul.msk.f32.gmra.mxu1 %vm725_vm4, %v1352_v38 }
 0x577   : > { %v1422_v0 = vpop.permute.xlu0 %1421 }
 0x578   : > { %v1476_v63 = vsel %vm667_vm2, %v7497_v54, %v1422_v0 }
 0x579   : > { %v1401_v59 = vpop.f32.mrf.mxu1 }
 0x57a   : > { %1461 = vrot.lane.b32.xlu1 %v1401_v59, %s11386_s29 }
 0x57f   : > { %v1424_v12 = vpop.permute.xlu0 %1423 }
 0x580   : > { %v1477_v4 = vsel %vm667_vm2, %v7504_v61, %v1424_v12 }
 0x582   : > { %1425 = vrot.lane.b32.xlu1 %v1027_v55, %s11368_s28 }
 0x58a   : > { %1427 = vrot.lane.b32.xlu1 %v1030_v56, %s11368_s28 }
 0x58b   : > { %v1404_v49 = vpop.f32.mrf.mxu1 }
 0x592   : > { %1429 = vrot.lane.b32.xlu1 %v1033_v58, %s11368_s28  ;;  %s11456_s28 = smov 16  }
 0x5c1   : > { %v1211_v35 = vpop.f32.mrf.mxu2 }
 0x5c2   : > { %1441 = vrot.lane.b32.xlu2 %v1211_v35, %s11384_s26 }
 0x5c9   : > { %v1214_v60 = vpop.f32.mrf.mxu2 }
 0x5ca   : > { %1463 = vrot.lane.b32.xlu2 %v1404_v49, %s11386_s29  ;;  %1443 = vrot.lane.b32.xlu0 %v1214_v60, %s11384_s26 }
 0x5cb   : > { %v1407_v39 = vpop.f32.mrf.mxu1 }
 0x5d1   : > { %v1217_v20 = vpop.f32.mrf.mxu2 }
 0x5d2   : > { %1465 = vrot.lane.b32.xlu2 %v1407_v39, %s11386_s29  ;;  %1445 = vrot.lane.b32.xlu0 %v1217_v20, %s11384_s26  ;;  %v7116_v39 = vmov 32.0  }
 0x5d3   : > { %v1410_v37 = vpop.f32.mrf.mxu1  ;;  %6972 = vrcp.f32 %v7116_v39 }
 0x5d9   : > { %v1220_v57 = vpop.f32.mrf.mxu2 }
 0x5da   : > { %1467 = vrot.lane.b32.xlu2 %v1410_v37, %s11386_s29  ;;  %1447 = vrot.lane.b32.xlu0 %v1220_v57, %s11384_s26 }
 0x5db   : > { %v1413_v45 = vpop.f32.mrf.mxu1 }
 0x5e1   : > { %v1223_v46 = vpop.f32.mrf.mxu2 }
 0x5e2   : > { %1469 = vrot.lane.b32.xlu2 %v1413_v45, %s11386_s29  ;;  %1449 = vrot.lane.b32.xlu0 %v1223_v46, %s11384_s26  ;;  %s11446_s29 = smov 72   ;;  %s11447_s26 = smov 80  }
 0x5ec   : > { %v1462_v28 = vpop.permute.xlu1 %1461 }
 0x5f4   : > { %v1426_v21 = vpop.permute.xlu1 %1425 }
 0x5f5   : > { %v1478_v8 = vsel %vm667_vm2, %v7514_v1, %v1426_v21 }
 0x5fc   : > { %v1428_v11 = vpop.permute.xlu1 %1427 }
 0x5fd   : > { %v1479_v32 = vsel %vm667_vm2, %v7527_v7, %v1428_v11  ;;  %v6879_v7 = vld [vmem:[%s11355_s7] ss:$0 sm:$0xff] }
 0x604   : > { %v1430_v1 = vpop.permute.xlu1 %1429 }
 0x605   : > { %v1480_v33 = vsel %vm667_vm2, %v7537_v10, %v1430_v1  ;;  %v1697_v1 = vld [vmem:[%s11358_s10 + $0x108] sm:$0xff] }
 0x61c   : > { %v1442_v5 = vpop.permute.xlu2 %1441 }
 0x61d   : > { %v1481_v48 = vsel %vm533_vm0, %v1476_v63, %v1442_v5 }
 0x61e   : > { %v1487_v9 = vsel %vm1486_vm6, %v1481_v48, %v1462_v28 }
 0x61f   : > { %6186 = vmatmul.msk.f32.vlgmr.msrb.gmra.mxu3 %vm599_vm1, %v1487_v9 }
 0x624   : > { %v1464_v14 = vpop.permute.xlu2 %1463 }
 0x62c   : > { %v1466_v54 = vpop.permute.xlu2 %1465 }
 0x634   : > { %v1468_v61 = vpop.permute.xlu2 %1467 }
 0x63c   : > { %v1444_v18 = vpop.permute.xlu0 %1443  ;;  %v1470_v42 = vpop.permute.xlu2 %1469 }
 0x63d   : > { %v1482_v22 = vsel %vm533_vm0, %v1477_v4, %v1444_v18 }
 0x63e   : > { %v1488_v25 = vsel %vm1486_vm6, %v1482_v22, %v1464_v14 }
 0x63f   : > { %6187 = vmatmul.msk.f32.gmra.mxu3 %vm599_vm1, %v1488_v25 }
 0x644   : > { %v1446_v29 = vpop.permute.xlu0 %1445 }
 0x645   : > { %v1483_v51 = vsel %vm533_vm0, %v1478_v8, %v1446_v29 }
 0x646   : > { %v1489_v30 = vsel %vm1486_vm6, %v1483_v51, %v1466_v54 }
 0x647   : > { %6188 = vmatmul.msk.f32.gmra.mxu3 %vm599_vm1, %v1489_v30 }
 0x64c   : > { %v1448_v16 = vpop.permute.xlu0 %1447 }
 0x64d   : > { %v1484_v17 = vsel %vm533_vm0, %v1479_v32, %v1448_v16  ;;  %v1701_v32 = vld [vmem:[%s11358_s10 + $0x188] sm:$0xff]  ;;  %v1702_v16 = vld [vmem:[%s11358_s10 + $0x190] sm:$0xff] }
 0x64e   : > { %v1490_v34 = vsel %vm1486_vm6, %v1484_v17, %v1468_v61  ;;  %v1700_v61 = vld [vmem:[%s11358_s10 + $0x180] sm:$0xff]  ;;  %1773 = vmatpush.msrb.mxu0 %v1701_v32  ;;  %v1703_v17 = vld [vmem:[%s11358_s10 + $0x198] sm:$0xff]  ;;  %1805 = vmatpush.msra.mxu1 %v1702_v16 }
 0x64f   : > { %6189 = vmatmul.msk.f32.gmra.mxu3 %vm599_vm1, %v1490_v34  ;;  %1741 = vmatpush.msra.mxu2 %v1700_v61  ;;  %v1696_v34 = vld [vmem:[%s11358_s10 + $0x100] sm:$0xff] }
 0x650   : > { %1837 = vmatpush.msra.mxu3 %v1703_v17  ;;  %1774 = vmatpush.msrb.mxu0 %v1697_v1  ;;  %v1945_v61 = vld [vmem:[%s11358_s10 + $0xa0] sm:$0xff]  ;;  %v1947_v17 = vld [vmem:[%s11358_s10 + $0xb0] sm:$0xff] }
 0x651   : > { %1742 = vmatpush.msra.mxu2 %v1696_v34  ;;  %v1948_v34 = vld [vmem:[%s11358_s10 + $0xb8] sm:$0xff] }
 0x654   : > { %v1450_v36 = vpop.permute.xlu0 %1449 }
 0x655   : > { %v1485_v13 = vsel %vm533_vm0, %v1480_v33, %v1450_v36  ;;  %v1698_v33 = vld [vmem:[%s11358_s10 + $0x110] sm:$0xff]  ;;  %v1699_v36 = vld [vmem:[%s11358_s10 + $0x118] sm:$0xff] }
 0x656   : > { %v1491_v43 = vsel %vm1486_vm6, %v1485_v13, %v1470_v42  ;;  %1806 = vmatpush.msra.mxu1 %v1698_v33  ;;  %1838 = vmatpush.msra.mxu3 %v1699_v36  ;;  %v1692_v42 = vld [vmem:[%s11358_s10 + $0x80] sm:$0xff]  ;;  %v1693_v13 = vld [vmem:[%s11358_s10 + $0x88] sm:$0xff] }
 0x657   : > { %6190 = vmatmul.msk.f32.gmra.mxu3 %vm599_vm1, %v1491_v43  ;;  %v1694_v43 = vld [vmem:[%s11358_s10 + $0x90] sm:$0xff]  ;;  %1743 = vmatpush.msra.mxu2 %v1692_v42  ;;  %v1941_v36 = vld [vmem:[%s11358_s10 + $0x20] sm:$0xff] }
 0x658   : > { %1775 = vmatpush.msrb.mxu0 %v1693_v13  ;;  %1807 = vmatpush.msra.mxu1 %v1694_v43  ;;  %v1944_v13 = vld [vmem:[%s11358_s10 + $0x38] sm:$0xff] }
 0x6a2   : > { %v1532_v23 = vpop.f32.mrf.mxu3 }
 0x6a3   : > { %v1533_v6 = vadd.f32 %v6879_v7, %v1532_v23  ;;  %v1688_v23 = vld [vmem:[%s11358_s10] sm:$0xff] }
 0x6a4   : > { %1744 = vmatpush.msra.mxu2 %v1688_v23 }
 0x6a5   : > { %v1547_v41 = vadd.f32 %v1533_v6, %v7247_v15  ;;  %v1689_v6 = vld [vmem:[%s11358_s10 + $0x8] sm:$0xff] }
 0x6a6   : > { %1776 = vmatpush.msrb.mxu0 %v1689_v6 }
 0x6a7   : > { %v1554_v40 = vsel %vm599_vm1, %v1547_v41, 0.0 }
 0x6a8   : > { %1555 = vadd.xlane.f32.xlu1 %v1554_v40  ;;  %v1691_v40 = vld [vmem:[%s11358_s10 + $0x18] sm:$0xff] }
 0x6c2   : > { %v1535_v10 = vpop.f32.mrf.mxu3 }
 0x6c3   : > { %v1536_v44 = vadd.f32 %v6879_v7, %v1535_v10 }
 0x6c5   : > { %v1548_v52 = vadd.f32 %v1536_v44, %v7254_v19 }
 0x6c7   : > { %v1557_v26 = vsel %vm599_vm1, %v1548_v52, 0.0 }
 0x6c8   : > { %1558 = vadd.xlane.f32.xlu0 %v1557_v26 }
 0x6ca   : > { %v1538_v53 = vpop.f32.mrf.mxu3 }
 0x6cb   : > { %v1539_v62 = vadd.f32 %v6879_v7, %v1538_v53 }
 0x6cd   : > { %v1549_v38 = vadd.f32 %v1539_v62, %v7261_v24  ;;  %v6973_v24 = vpop.eup %6972 }
 0x6ce   : > { %v1571_v20 = vmul.f32 32.0, %v6973_v24  ;;  %vm1575_vm8 = vweird.f32 %v6973_v24 }
 0x6cf   : > { %v1560_v55 = vsel %vm599_vm1, %v1549_v38, 0.0 }
 0x6d0   : > { %1561 = vadd.xlane.f32.xlu2 %v1560_v55  ;;  %v1572_v37 = vsub.f32 1.0, %v1571_v20 }
 0x6d2   : > { %v1541_v56 = vpop.f32.mrf.mxu3  ;;  %v1573_v57 = vmul.f32 %v6973_v24, %v1572_v37 }
 0x6d3   : > { %v1542_v58 = vadd.f32 %v6879_v7, %v1541_v56 }
 0x6d4   : > { %v1574_v45 = vadd.f32 %v6973_v24, %v1573_v57 }
 0x6d5   : > { %v1550_v15 = vadd.f32 %v1542_v58, %v7268_v27  ;;  %v7804_v58 = vld [vmem:[%s11356_s8] ss:$0 sm:$0xff] }
 0x6d6   : > { %v7720_v27 = vsel %vm1575_vm8, %v6973_v24, %v1574_v45 }
 0x6d7   : > { %v1563_v59 = vsel %vm599_vm1, %v1550_v15, 0.0  ;;  %11396 = vst [vmem:[#allocation2_spill] sm:$0xff] %v7720_v27 }
 0x6d8   : > { %1564 = vadd.xlane.f32.xlu1 %v1563_v59  ;;  %v7809_v59 = vld [vmem:[%s11357_s9] ss:$0 sm:$0xff] }
 0x6da   : > { %v1544_v35 = vpop.f32.mrf.mxu3 }
 0x6db   : > { %v1545_v49 = vadd.f32 %v6879_v7, %v1544_v35  ;;  %v1695_v7 = vld [vmem:[%s11358_s10 + $0x98] sm:$0xff] }
 0x6dc   : > { %1839 = vmatpush.msra.mxu3 %v1695_v7 }
 0x6dd   : > { %v1551_v19 = vadd.f32 %v1545_v49, %v7275_v31 }
 0x6de   : > { %1840 = vmatpush.msra.mxu3 %v1691_v40  ;;  %v1942_v40 = vld [vmem:[%s11358_s10 + $0x28] sm:$0xff] }
 0x6df   : > { %v1567_v60 = vsel %vm1566_vm7, %v1551_v19, 0.0 }
 0x6e0   : > { %1568 = vadd.xlane.f32.xlu2 %v1567_v60 }
 0x71b   : > { %v1556_v46 = vpop.xlane.xlu1 %1555 }
 0x71c   : > { %v1577_v2 = vmul.f32 %v7720_v27, %v1556_v46 }
 0x71e   : > { %v7723_v50 = vsub.f32 %v1547_v41, %v1577_v2  ;;  %v1690_v41 = vld [vmem:[%s11358_s10 + $0x10] sm:$0xff] }
 0x71f   : > { %1808 = vmatpush.msra.mxu1 %v1690_v41 }
 0x720   : > { %v1587_v31 = vmul.f32 %v7723_v50, %v7723_v50 }
 0x722   : > { %v1592_v47 = vsel %vm599_vm1, %v1587_v31, 0.0 }
 0x723   : > { %1593 = vadd.xlane.f32.xlu0 %v1592_v47 }
 0x73b   : > { %v1559_v3 = vpop.xlane.xlu0 %1558 }
 0x73c   : > { %v1578_v0 = vmul.f32 %v7720_v27, %v1559_v3 }
 0x73e   : > { %v7729_v63 = vsub.f32 %v1548_v52, %v1578_v0 }
 0x740   : > { %v1588_v5 = vmul.f32 %v7729_v63, %v7729_v63 }
 0x742   : > { %v1595_v28 = vsel %vm599_vm1, %v1588_v5, 0.0 }
 0x743   : > { %v1562_v48 = vpop.xlane.xlu2 %1561  ;;  %1596 = vadd.xlane.f32.xlu1 %v1595_v28  ;;  %v1953_v28 = vld [vmem:[%s11358_s10 + $0x1a0] sm:$0xff] }
 0x744   : > { %v1579_v9 = vmul.f32 %v7720_v27, %v1562_v48  ;;  %v1956_v48 = vld [vmem:[%s11358_s10 + $0x1b8] sm:$0xff]  ;;  %1979 = vmatpush.msrb.mxu2 %v1953_v28 }
 0x745   : > { %2075 = vmatpush.msrb.mxu3 %v1956_v48  ;;  %v2178_v28 = vld [vmem:[%s11360_s12 + $0x3f8] sm:$0xff]  ;;  %v2129_v48 = vld [vmem:[%s11360_s12 + $0x270] sm:$0xff] }
 0x746   : > { %v7735_v12 = vsub.f32 %v1549_v38, %v1579_v9  ;;  %v1949_v9 = vld [vmem:[%s11358_s10 + $0x120] sm:$0xff] }
 0x747   : > { %1980 = vmatpush.msrb.mxu2 %v1949_v9  ;;  %v2142_v9 = vld [vmem:[%s11360_s12 + $0x2d8] sm:$0xff] }
 0x748   : > { %v1589_v14 = vmul.f32 %v7735_v12, %v7735_v12 }
 0x749   : > { %1981 = vmatpush.msrb.mxu2 %v1945_v61  ;;  %v2126_v61 = vld [vmem:[%s11360_s12 + $0x258] sm:$0xff] }
 0x74a   : > { %v1598_v4 = vsel %vm599_vm1, %v1589_v14, 0.0 }
 0x74b   : > { %v1565_v18 = vpop.xlane.xlu1 %1564  ;;  %1599 = vadd.xlane.f32.xlu2 %v1598_v4  ;;  %1982 = vmatpush.msrb.mxu2 %v1941_v36 }
 0x74c   : > { %v1580_v21 = vmul.f32 %v7720_v27, %v1565_v18 }
 0x74e   : > { %v7741_v22 = vsub.f32 %v1550_v15, %v1580_v21 }
 0x750   : > { %v1590_v25 = vmul.f32 %v7741_v22, %v7741_v22 }
 0x752   : > { %v1601_v54 = vsel %vm599_vm1, %v1590_v25, 0.0  ;;  %v1954_v25 = vld [vmem:[%s11358_s10 + $0x1a8] sm:$0xff] }
 0x753   : > { %1602 = vadd.xlane.f32.xlu0 %v1601_v54  ;;  %v1569_v8 = vpop.xlane.xlu2 %1568  ;;  %v1955_v54 = vld [vmem:[%s11358_s10 + $0x1b0] sm:$0xff]  ;;  %2011 = vmatpush.msra.mxu0 %v1954_v25 }
 0x754   : > { %v1581_v29 = vmul.f32 %v7720_v27, %v1569_v8  ;;  %v1950_v8 = vld [vmem:[%s11358_s10 + $0x128] sm:$0xff]  ;;  %2043 = vmatpush.msrb.mxu1 %v1955_v54  ;;  %v2157_v25 = vld [vmem:[%s11360_s12 + $0x350] sm:$0xff] }
 0x755   : > { %2012 = vmatpush.msra.mxu0 %v1950_v8  ;;  %v2176_v54 = vld [vmem:[%s11360_s12 + $0x3e8] sm:$0xff]  ;;  %v2127_v8 = vld [vmem:[%s11360_s12 + $0x260] sm:$0xff] }
 0x756   : > { %v7747_v51 = vsub.f32 %v1551_v19, %v1581_v29 }
 0x758   : > { %v1591_v30 = vmul.f32 %v7747_v51, %v7747_v51 }
 0x75a   : > { %v1604_v11 = vsel %vm1566_vm7, %v1591_v30, 0.0  ;;  %v1951_v30 = vld [vmem:[%s11358_s10 + $0x130] sm:$0xff] }
 0x75b   : > { %1605 = vadd.xlane.f32.xlu1 %v1604_v11  ;;  %v1952_v11 = vld [vmem:[%s11358_s10 + $0x138] sm:$0xff]  ;;  %2044 = vmatpush.msrb.mxu1 %v1951_v30  ;;  %v2156_v30 = vld [vmem:[%s11360_s12 + $0x348] sm:$0xff] }
 0x75c   : > { %2076 = vmatpush.msrb.mxu3 %v1952_v11  ;;  %v2175_v11 = vld [vmem:[%s11360_s12 + $0x3e0] sm:$0xff] }
 0x75d   : > { %2045 = vmatpush.msrb.mxu1 %v1947_v17  ;;  %v2125_v17 = vld [vmem:[%s11360_s12 + $0x250] sm:$0xff] }
 0x75e   : > { %2077 = vmatpush.msrb.mxu3 %v1948_v34  ;;  %v2138_v34 = vld [vmem:[%s11360_s12 + $0x2b8] sm:$0xff] }
 0x760   : > { %2078 = vmatpush.msrb.mxu3 %v1944_v13  ;;  %v2137_v13 = vld [vmem:[%s11360_s12 + $0x2b0] sm:$0xff] }
 0x796   : > { %v1594_v10 = vpop.xlane.xlu0 %1593 }
 0x797   : > { %v1607_v44 = vmul.f32 %v1594_v10, %v7720_v27  ;;  %v1943_v10 = vld [vmem:[%s11358_s10 + $0x30] sm:$0xff] }
 0x798   : > { %2046 = vmatpush.msrb.mxu1 %v1943_v10  ;;  %v2152_v10 = vld [vmem:[%s11360_s12 + $0x328] sm:$0xff] }
 0x799   : > { %v1612_v52 = vadd.f32 1e-05, %v1607_v44 }
 0x79b   : > { %6974 = vrsqrt.f32 %v1612_v52  ;;  %vm1623_vm10 = vweird.f32 %v1612_v52 }
 0x7a1   : > { %v6975_v26 = vpop.eup %6974 }
 0x7a2   : > { %v1618_v53 = vmul.f32 %v6975_v26, %v1612_v52  ;;  %vm1624_vm9 = vweird.f32 %v6975_v26 }
 0x7a3   : > { %vm1625_vm11 = vmor %vm1623_vm10, %vm1624_vm9 }
 0x7a4   : > { %v1619_v62 = vmul.f32 %v6975_v26, %v1618_v53 }
 0x7a6   : > { %v1620_v38 = vmul.f32 0.5, %v1619_v62 }
 0x7a8   : > { %v1621_v55 = vsub.f32 1.5, %v1620_v38 }
 0x7aa   : > { %v1622_v56 = vmul.f32 %v6975_v26, %v1621_v55 }
 0x7ac   : > { %v1626_v15 = vsel %vm1625_vm11, %v6975_v26, %v1622_v56 }
 0x7ad   : > { %v1667_v35 = vmul.f32 %v1626_v15, %v7723_v50 }
 0x7af   : > { %v1675_v49 = vmul.f32 %v7804_v58, %v1667_v35 }
 0x7b1   : > { %v7814_v19 = vadd.f32 %v7809_v59, %v1675_v49 }
 0x7b3   : > { %6191 = vmatmul.msk.f32.vlgmr.msra.gmra.mxu2 %vm599_vm1, %v7814_v19  ;;  %6196 = vmatmul.msk.f32.vlgmr.msrb.gmra.mxu0 %vm599_vm1, %v7814_v19 }
 0x7b4   : > { %6201 = vmatmul.msk.f32.vlgmr.msra.gmra.mxu1 %vm599_vm1, %v7814_v19  ;;  %6206 = vmatmul.msk.f32.vlgmr.msra.gmra.mxu3 %vm599_vm1, %v7814_v19 }
 0x7b5   : > { %2275 = vmatpush.msra.mxu3 %v2178_v28 }
 0x7b6   : > { %v1597_v60 = vpop.xlane.xlu1 %1596 }
 0x7b7   : > { %v1608_v39 = vmul.f32 %v1597_v60, %v7720_v27 }
 0x7b9   : > { %v1613_v24 = vadd.f32 1e-05, %v1608_v39 }
 0x7bb   : > { %6976 = vrsqrt.f32 %v1613_v24  ;;  %vm1633_vm13 = vweird.f32 %v1613_v24 }
 0x7be   : > { %v1600_v20 = vpop.xlane.xlu2 %1599 }
 0x7bf   : > { %v1609_v37 = vmul.f32 %v1600_v20, %v7720_v27 }
 0x7c1   : > { %v6977_v57 = vpop.eup %6976  ;;  %v1614_v45 = vadd.f32 1e-05, %v1609_v37 }
 0x7c2   : > { %v1628_v46 = vmul.f32 %v6977_v57, %v1613_v24  ;;  %vm1634_vm12 = vweird.f32 %v6977_v57 }
 0x7c3   : > { %6978 = vrsqrt.f32 %v1614_v45  ;;  %vm1635_vm14 = vmor %vm1633_vm13, %vm1634_vm12  ;;  %vm1643_vm8 = vweird.f32 %v1614_v45 }
 0x7c4   : > { %v1629_v2 = vmul.f32 %v6977_v57, %v1628_v46 }
 0x7c6   : > { %v1630_v50 = vmul.f32 0.5, %v1629_v2  ;;  %v1603_v31 = vpop.xlane.xlu0 %1602 }
 0x7c7   : > { %v1610_v47 = vmul.f32 %v1603_v31, %v7720_v27  ;;  %v2144_v31 = vld [vmem:[%s11360_s12 + $0x2e8] sm:$0xff] }
 0x7c8   : > { %v1631_v3 = vsub.f32 1.5, %v1630_v50  ;;  %v2161_v50 = vld [vmem:[%s11360_s12 + $0x370] sm:$0xff] }
 0x7c9   : > { %v6979_v0 = vpop.eup %6978  ;;  %v7827_v5 = vadd.f32 1e-05, %v1610_v47  ;;  %v2160_v47 = vld [vmem:[%s11360_s12 + $0x368] sm:$0xff] }
 0x7ca   : > { %v1632_v14 = vmul.f32 %v6977_v57, %v1631_v3  ;;  %v1638_v4 = vmul.f32 %v6979_v0, %v1614_v45  ;;  %vm1644_vm15 = vweird.f32 %v6979_v0  ;;  %v2130_v3 = vld [vmem:[%s11360_s12 + $0x278] sm:$0xff] }
 0x7cb   : > { %6980 = vrsqrt.f32 %v7827_v5  ;;  %vm1645_vm9 = vmor %vm1643_vm8, %vm1644_vm15  ;;  %vm1653_vm11 = vweird.f32 %v7827_v5  ;;  %2179 = vmatpush.msra.mxu2 %v2130_v3 }
 0x7cc   : > { %v1636_v18 = vsel %vm1635_vm14, %v6977_v57, %v1632_v14  ;;  %v1639_v21 = vmul.f32 %v6979_v0, %v1638_v4  ;;  %v2158_v14 = vld [vmem:[%s11360_s12 + $0x358] sm:$0xff]  ;;  %v2177_v4 = vld [vmem:[%s11360_s12 + $0x3f0] sm:$0xff] }
 0x7cd   : > { %v1668_v29 = vmul.f32 %v1636_v18, %v7729_v63  ;;  %v1946_v63 = vld [vmem:[%s11358_s10 + $0xa8] sm:$0xff]  ;;  %2180 = vmatpush.msra.mxu2 %v2129_v48  ;;  %2276 = vmatpush.msra.mxu3 %v2177_v4 }
 0x7ce   : > { %v1640_v32 = vmul.f32 0.5, %v1639_v21  ;;  %v1606_v16 = vpop.xlane.xlu1 %1605  ;;  %2013 = vmatpush.msra.mxu0 %v1946_v63  ;;  %v2128_v18 = vld [vmem:[%s11360_s12 + $0x268] sm:$0xff]  ;;  %v2141_v21 = vld [vmem:[%s11360_s12 + $0x2d0] sm:$0xff]  ;;  %v2174_v63 = vld [vmem:[%s11360_s12 + $0x3d8] sm:$0xff] }
 0x7cf   : > { %v1676_v1 = vmul.f32 %v7804_v58, %v1668_v29  ;;  %v1611_v33 = vmul.f32 %v1606_v16, %v7720_v27  ;;  %2181 = vmatpush.msra.mxu2 %v2128_v18  ;;  %2277 = vmatpush.msra.mxu3 %v2176_v54  ;;  %v2140_v29 = vld [vmem:[%s11360_s12 + $0x2c8] sm:$0xff]  ;;  %v2155_v16 = vld [vmem:[%s11360_s12 + $0x340] sm:$0xff]  ;;  %v1908_v54 = vld [vmem:[%s11360_s12 + $0xf8] sm:$0xff] }
 0x7d0   : > { %v1641_v42 = vsub.f32 1.5, %v1640_v32  ;;  %2014 = vmatpush.msra.mxu0 %v1942_v40  ;;  %v2139_v32 = vld [vmem:[%s11360_s12 + $0x2c0] sm:$0xff]  ;;  %v2136_v40 = vld [vmem:[%s11360_s12 + $0x2a8] sm:$0xff] }
 0x7d1   : > { %v6981_v43 = vpop.eup %6980  ;;  %v7876_v7 = vadd.f32 %v7809_v59, %v1676_v1  ;;  %v1616_v23 = vadd.f32 1e-05, %v1611_v33  ;;  %2182 = vmatpush.msra.mxu2 %v2127_v8  ;;  %2278 = vmatpush.msra.mxu3 %v2175_v11  ;;  %v2154_v1 = vld [vmem:[%s11360_s12 + $0x338] sm:$0xff]  ;;  %v2173_v33 = vld [vmem:[%s11360_s12 + $0x3d0] sm:$0xff]  ;;  %v2115_v18 = vld [vmem:[%s11360_s12 + $0x200] sm:$0xff] }
 0x7d2   : > { %v1642_v6 = vmul.f32 %v6979_v0, %v1641_v42  ;;  %v1648_v41 = vmul.f32 %v6981_v43, %v7827_v5  ;;  %vm1654_vm10 = vweird.f32 %v6981_v43  ;;  %v2159_v5 = vld [vmem:[%s11360_s12 + $0x360] sm:$0xff]  ;;  %v2124_v42 = vld [vmem:[%s11360_s12 + $0x248] sm:$0xff]  ;;  %v1924_v8 = vld [vmem:[%s11360_s12 + $0x178] sm:$0xff] }
 0x7d3   : > { %11397 = vst [vmem:[#allocation3_spill] sm:$0xff] %v7876_v7  ;;  %6982 = vrsqrt.f32 %v1616_v23  ;;  %6192 = vmatmul.msk.f32.gmra.mxu2 %vm599_vm1, %v7876_v7  ;;  %6197 = vmatmul.msk.f32.gmra.mxu0 %vm599_vm1, %v7876_v7  ;;  %vm1655_vm12 = vmor %vm1653_vm11, %vm1654_vm10  ;;  %vm1663_vm14 = vweird.f32 %v1616_v23  ;;  %v1907_v11 = vld [vmem:[%s11360_s12 + $0xf0] sm:$0xff] }
 0x7d4   : > { %v1646_v44 = vsel %vm1645_vm9, %v6979_v0, %v1642_v6  ;;  %v1649_v52 = vmul.f32 %v6981_v43, %v1648_v41  ;;  %6202 = vmatmul.msk.f32.gmra.mxu1 %vm599_vm1, %v7876_v7  ;;  %6207 = vmatmul.msk.f32.gmra.mxu3 %vm599_vm1, %v7876_v7  ;;  %v2143_v0 = vld [vmem:[%s11360_s12 + $0x2e0] sm:$0xff]  ;;  %v2172_v6 = vld [vmem:[%s11360_s12 + $0x3c8] sm:$0xff] }
 0x7d5   : > { %v1669_v26 = vmul.f32 %v1646_v44, %v7735_v12  ;;  %2183 = vmatpush.msra.mxu2 %v2126_v61  ;;  %2279 = vmatpush.msra.mxu3 %v2174_v63  ;;  %v2123_v41 = vld [vmem:[%s11360_s12 + $0x240] sm:$0xff]  ;;  %v1923_v61 = vld [vmem:[%s11360_s12 + $0x170] sm:$0xff]  ;;  %v1922_v63 = vld [vmem:[%s11360_s12 + $0x168] sm:$0xff] }
 0x7d6   : > { %v1650_v53 = vmul.f32 0.5, %v1649_v52  ;;  %v2171_v44 = vld [vmem:[%s11360_s12 + $0x3c0] sm:$0xff]  ;;  %v2122_v52 = vld [vmem:[%s11360_s12 + $0x238] sm:$0xff] }
 0x7d7   : > { %v1677_v62 = vmul.f32 %v7804_v58, %v1669_v26  ;;  %2184 = vmatpush.msra.mxu2 %v2125_v17  ;;  %2280 = vmatpush.msra.mxu3 %v2173_v33  ;;  %v2135_v26 = vld [vmem:[%s11360_s12 + $0x2a0] sm:$0xff]  ;;  %v1892_v17 = vld [vmem:[%s11360_s12 + $0x78] sm:$0xff] }
 0x7d8   : > { %v1651_v38 = vsub.f32 1.5, %v1650_v53  ;;  %v2151_v53 = vld [vmem:[%s11360_s12 + $0x320] sm:$0xff]  ;;  %v1940_v33 = vld [vmem:[%s11360_s12 + $0x1f8] sm:$0xff] }
 0x7d9   : > { %v6983_v55 = vpop.eup %6982  ;;  %v7897_v56 = vadd.f32 %v7809_v59, %v1677_v62  ;;  %2185 = vmatpush.msra.mxu2 %v2124_v42  ;;  %2281 = vmatpush.msra.mxu3 %v2172_v6  ;;  %v2170_v62 = vld [vmem:[%s11360_s12 + $0x3b8] sm:$0xff] }
 0x7da   : > { %v1652_v15 = vmul.f32 %v6981_v43, %v1651_v38  ;;  %v1658_v35 = vmul.f32 %v6983_v55, %v1616_v23  ;;  %vm1664_vm13 = vweird.f32 %v6983_v55  ;;  %v1920_v6 = vld [vmem:[%s11360_s12 + $0x158] sm:$0xff] }
 0x7db   : > { %11398 = vst [vmem:[#allocation4_spill] sm:$0xff] %v7897_v56  ;;  %6193 = vmatmul.msk.f32.gmra.mxu2 %vm599_vm1, %v7897_v56  ;;  %6198 = vmatmul.msk.f32.gmra.mxu0 %vm599_vm1, %v7897_v56  ;;  %vm1665_vm15 = vmor %vm1663_vm14, %vm1664_vm13 }
 0x7dc   : > { %v1656_v12 = vsel %vm1655_vm12, %v6981_v43, %v1652_v15  ;;  %v1659_v49 = vmul.f32 %v6983_v55, %v1658_v35  ;;  %6203 = vmatmul.msk.f32.gmra.mxu1 %vm599_vm1, %v7897_v56  ;;  %6208 = vmatmul.msk.f32.gmra.mxu3 %vm599_vm1, %v7897_v56  ;;  %v2153_v43 = vld [vmem:[%s11360_s12 + $0x330] sm:$0xff]  ;;  %v2134_v15 = vld [vmem:[%s11360_s12 + $0x298] sm:$0xff] }
 0x7dd   : > { %v1670_v60 = vmul.f32 %v1656_v12, %v7741_v22  ;;  %2186 = vmatpush.msra.mxu2 %v2123_v41  ;;  %2282 = vmatpush.msra.mxu3 %v2171_v44  ;;  %v2150_v35 = vld [vmem:[%s11360_s12 + $0x318] sm:$0xff]  ;;  %v1890_v44 = vld [vmem:[%s11360_s12 + $0x68] sm:$0xff] }
 0x7de   : > { %v1660_v39 = vmul.f32 0.5, %v1659_v49  ;;  %v2169_v49 = vld [vmem:[%s11360_s12 + $0x3b0] sm:$0xff] }
 0x7df   : > { %v1678_v24 = vmul.f32 %v7804_v58, %v1670_v60  ;;  %2187 = vmatpush.msra.mxu2 %v2122_v52  ;;  %2283 = vmatpush.msra.mxu3 %v2170_v62  ;;  %v1903_v52 = vld [vmem:[%s11360_s12 + $0xd0] sm:$0xff]  ;;  %v1957_v62 = vld [vmem:[%s11359_s11 + $0x4] sm:$0xf] }
 0x7e0   : > { %v1661_v20 = vsub.f32 1.5, %v1660_v39  ;;  %v2120_v39 = vld [vmem:[%s11360_s12 + $0x228] sm:$0xff] }
 0x7e1   : > { %v7911_v37 = vadd.f32 %v7809_v59, %v1678_v24  ;;  %2284 = vmatpush.msra.mxu3 %v2169_v49  ;;  %v2133_v24 = vld [vmem:[%s11360_s12 + $0x290] sm:$0xff]  ;;  %v1918_v49 = vld [vmem:[%s11360_s12 + $0x148] sm:$0xff] }
 0x7e2   : > { %v1662_v57 = vmul.f32 %v6983_v55, %v1661_v20  ;;  %v2149_v20 = vld [vmem:[%s11360_s12 + $0x310] sm:$0xff] }
 0x7e3   : > { %11399 = vst [vmem:[#allocation5_spill] sm:$0xff] %v7911_v37  ;;  %6194 = vmatmul.msk.f32.gmra.mxu2 %vm599_vm1, %v7911_v37  ;;  %6199 = vmatmul.msk.f32.gmra.mxu0 %vm599_vm1, %v7911_v37 }
 0x7e4   : > { %v1666_v45 = vsel %vm1665_vm15, %v6983_v55, %v1662_v57  ;;  %6204 = vmatmul.msk.f32.gmra.mxu1 %vm599_vm1, %v7911_v37  ;;  %6209 = vmatmul.msk.f32.gmra.mxu3 %vm599_vm1, %v7911_v37  ;;  %v2121_v55 = vld [vmem:[%s11360_s12 + $0x230] sm:$0xff] }
 0x7e5   : > { %v1671_v22 = vmul.f32 %v1666_v45, %v7747_v51  ;;  %v2146_v51 = vld [vmem:[%s11360_s12 + $0x2f8] sm:$0xff]  ;;  %2188 = vmatpush.msra.mxu2 %v2121_v55  ;;  %v2168_v45 = vld [vmem:[%s11360_s12 + $0x3a8] sm:$0xff] }
 0x7e6   : > { %2211 = vmatpush.msrb.mxu0 %v2146_v51  ;;  %2285 = vmatpush.msra.mxu3 %v2168_v45  ;;  %v2148_v51 = vld [vmem:[%s11360_s12 + $0x308] sm:$0xff]  ;;  %v1917_v45 = vld [vmem:[%s11360_s12 + $0x140] sm:$0xff] }
 0x7e7   : > { %v1679_v46 = vmul.f32 %v7804_v58, %v1671_v22  ;;  %v2162_v58 = vld [vmem:[%s11360_s12 + $0x378] sm:$0xff]  ;;  %2189 = vmatpush.msra.mxu2 %v2120_v39  ;;  %v2119_v22 = vld [vmem:[%s11360_s12 + $0x220] sm:$0xff]  ;;  %v1938_v55 = vld [vmem:[%s11360_s12 + $0x1e8] sm:$0xff] }
 0x7e8   : > { %2243 = vmatpush.msra.mxu1 %v2162_v58  ;;  %v2167_v58 = vld [vmem:[%s11360_s12 + $0x3a0] sm:$0xff] }
 0x7e9   : > { %v7924_v2 = vadd.f32 %v7809_v59, %v1679_v46  ;;  %v2145_v59 = vld [vmem:[%s11360_s12 + $0x2f0] sm:$0xff]  ;;  %v2132_v46 = vld [vmem:[%s11360_s12 + $0x288] sm:$0xff]  ;;  %2190 = vmatpush.msra.mxu2 %v2119_v22  ;;  %2286 = vmatpush.msra.mxu3 %v2167_v58  ;;  %v1937_v39 = vld [vmem:[%s11360_s12 + $0x1e0] sm:$0xff]  ;;  %v8280_v22 = vperm.slane %v1957_v62, 1  ;;  %v8287_v58 = vperm.slane %v1957_v62, 2 }
 0x7ea   : > { %2212 = vmatpush.msrb.mxu0 %v2145_v59  ;;  %2244 = vmatpush.msra.mxu1 %v2161_v50  ;;  %v2118_v59 = vld [vmem:[%s11360_s12 + $0x218] sm:$0xff]  ;;  %v2131_v50 = vld [vmem:[%s11360_s12 + $0x280] sm:$0xff] }
 0x7eb   : > { %11400 = vst [vmem:[#allocation6_spill] sm:$0xff] %v7924_v2  ;;  %6195 = vmatmul.msk.f32.gmra.mxu2 %vm599_vm1, %v7924_v2  ;;  %6200 = vmatmul.msk.f32.gmra.mxu0 %vm599_vm1, %v7924_v2 }
 0x7ec   : > { %6205 = vmatmul.msk.f32.gmra.mxu1 %vm599_vm1, %v7924_v2  ;;  %6210 = vmatmul.msk.f32.gmra.mxu3 %vm599_vm1, %v7924_v2 }
 0x7ed   : > { %2213 = vmatpush.msrb.mxu0 %v2144_v31  ;;  %2245 = vmatpush.msra.mxu1 %v2160_v47  ;;  %v2147_v31 = vld [vmem:[%s11360_s12 + $0x300] sm:$0xff]  ;;  %v2166_v47 = vld [vmem:[%s11360_s12 + $0x398] sm:$0xff] }
 0x7ee   : > { %2191 = vmatpush.msra.mxu2 %v2118_v59  ;;  %2287 = vmatpush.msra.mxu3 %v2166_v47  ;;  %v1887_v59 = vld [vmem:[%s11360_s12 + $0x50] sm:$0xff] }
 0x7ef   : > { %2214 = vmatpush.msrb.mxu0 %v2143_v0  ;;  %2246 = vmatpush.msra.mxu1 %v2159_v5  ;;  %v2117_v0 = vld [vmem:[%s11360_s12 + $0x210] sm:$0xff] }
 0x7f0   : > { %v2165_v5 = vld [vmem:[%s11360_s12 + $0x390] sm:$0xff]  ;;  %2192 = vmatpush.msra.mxu2 %v2117_v0 }
 0x7f1   : > { %2215 = vmatpush.msrb.mxu0 %v2142_v9  ;;  %2247 = vmatpush.msra.mxu1 %v2158_v14  ;;  %v2116_v9 = vld [vmem:[%s11360_s12 + $0x208] sm:$0xff]  ;;  %v1935_v0 = vld [vmem:[%s11360_s12 + $0x1d0] sm:$0xff] }
 0x7f2   : > { %2288 = vmatpush.msra.mxu3 %v2165_v5  ;;  %v2164_v14 = vld [vmem:[%s11360_s12 + $0x388] sm:$0xff]  ;;  %2193 = vmatpush.msra.mxu2 %v2116_v9 }
 0x7f3   : > { %6211 = vmatmul.msk.f32.vlgmr.msrb.gmra.mxu2 %vm599_vm1, %v7814_v19  ;;  %6216 = vmatmul.msk.f32.vlgmr.msra.gmra.mxu0 %vm599_vm1, %v7814_v19  ;;  %v1886_v9 = vld [vmem:[%s11360_s12 + $0x48] sm:$0xff] }
 0x7f4   : > { %6221 = vmatmul.msk.f32.vlgmr.msrb.gmra.mxu1 %vm599_vm1, %v7814_v19  ;;  %6226 = vmatmul.msk.f32.vlgmr.msrb.gmra.mxu3 %vm599_vm1, %v7814_v19 }
 0x7f5   : > { %2216 = vmatpush.msrb.mxu0 %v2141_v21  ;;  %2248 = vmatpush.msra.mxu1 %v2157_v25  ;;  %v2163_v21 = vld [vmem:[%s11360_s12 + $0x380] sm:$0xff] }
 0x7f6   : > { %2289 = vmatpush.msra.mxu3 %v2164_v14  ;;  %2194 = vmatpush.msra.mxu2 %v2115_v18  ;;  %v1899_v14 = vld [vmem:[%s11360_s12 + $0xb0] sm:$0xff] }
 0x7f7   : > { %2217 = vmatpush.msrb.mxu0 %v2140_v29  ;;  %2249 = vmatpush.msra.mxu1 %v2156_v30  ;;  %v1915_v18 = vld [vmem:[%s11360_s12 + $0x130] sm:$0xff] }
 0x7f8   : > { %2290 = vmatpush.msra.mxu3 %v2163_v21  ;;  %2307 = vmatpush.msrb.mxu2 %v1892_v17 }
 0x7f9   : > { %2218 = vmatpush.msrb.mxu0 %v2139_v32  ;;  %2250 = vmatpush.msra.mxu1 %v2155_v16  ;;  %v1906_v16 = vld [vmem:[%s11360_s12 + $0xe8] sm:$0xff] }
 0x7fa   : > { %2403 = vmatpush.msrb.mxu3 %v1940_v33 }
 0x7fb   : > { %6212 = vmatmul.msk.f32.gmra.mxu2 %vm599_vm1, %v7876_v7  ;;  %6217 = vmatmul.msk.f32.gmra.mxu0 %vm599_vm1, %v7876_v7 }
 0x7fc   : > { %6222 = vmatmul.msk.f32.gmra.mxu1 %vm599_vm1, %v7876_v7  ;;  %6227 = vmatmul.msk.f32.gmra.mxu3 %vm599_vm1, %v7876_v7 }
 0x7fd   : > { %2219 = vmatpush.msrb.mxu0 %v2138_v34  ;;  %2251 = vmatpush.msra.mxu1 %v2154_v1  ;;  %v1905_v34 = vld [vmem:[%s11360_s12 + $0xe0] sm:$0xff] }
 0x7fe   : > { %v1921_v1 = vld [vmem:[%s11360_s12 + $0x160] sm:$0xff] }
 0x7ff   : > { %2220 = vmatpush.msrb.mxu0 %v2137_v13  ;;  %2252 = vmatpush.msra.mxu1 %v2153_v43  ;;  %v1891_v13 = vld [vmem:[%s11360_s12 + $0x70] sm:$0xff]  ;;  %v1904_v43 = vld [vmem:[%s11360_s12 + $0xd8] sm:$0xff] }
 0x800   : > { %2308 = vmatpush.msrb.mxu2 %v1891_v13  ;;  %v8331_v13 = vperm.slane %v1957_v62, 3 }
 0x801   : > { %2221 = vmatpush.msrb.mxu0 %v2136_v40  ;;  %2253 = vmatpush.msra.mxu1 %v2152_v10  ;;  %v1939_v40 = vld [vmem:[%s11360_s12 + $0x1f0] sm:$0xff] }
 0x802   : > { %2404 = vmatpush.msrb.mxu3 %v1939_v40  ;;  %2309 = vmatpush.msrb.mxu2 %v1890_v44  ;;  %v1913_v40 = vld [vmem:[%s11360_s12 + $0x120] sm:$0xff]  ;;  %v1932_v44 = vld [vmem:[%s11360_s12 + $0x1b8] sm:$0xff] }
 0x803   : > { %6213 = vmatmul.msk.f32.gmra.mxu2 %vm599_vm1, %v7897_v56  ;;  %6218 = vmatmul.msk.f32.gmra.mxu0 %vm599_vm1, %v7897_v56 }
 0x804   : > { %6223 = vmatmul.msk.f32.gmra.mxu1 %vm599_vm1, %v7897_v56  ;;  %6228 = vmatmul.msk.f32.gmra.mxu3 %vm599_vm1, %v7897_v56 }
 0x805   : > { %2222 = vmatpush.msrb.mxu0 %v2135_v26  ;;  %2254 = vmatpush.msra.mxu1 %v2151_v53  ;;  %v1919_v26 = vld [vmem:[%s11360_s12 + $0x150] sm:$0xff] }
 0x806   : > { %2405 = vmatpush.msrb.mxu3 %v1938_v55  ;;  %v1912_v55 = vld [vmem:[%s11360_s12 + $0x118] sm:$0xff] }
 0x807   : > { %2223 = vmatpush.msrb.mxu0 %v2134_v15  ;;  %2255 = vmatpush.msra.mxu1 %v2150_v35  ;;  %v1889_v15 = vld [vmem:[%s11360_s12 + $0x60] sm:$0xff]  ;;  %v1902_v35 = vld [vmem:[%s11360_s12 + $0xc8] sm:$0xff] }
 0x808   : > { %2310 = vmatpush.msrb.mxu2 %v1889_v15  ;;  %2406 = vmatpush.msrb.mxu3 %v1937_v39 }
 0x809   : > { %2224 = vmatpush.msrb.mxu0 %v2133_v24  ;;  %2256 = vmatpush.msra.mxu1 %v2149_v20  ;;  %v1888_v24 = vld [vmem:[%s11360_s12 + $0x58] sm:$0xff]  ;;  %v1901_v20 = vld [vmem:[%s11360_s12 + $0xc0] sm:$0xff] }
 0x80a   : > { %2311 = vmatpush.msrb.mxu2 %v1888_v24 }
 0x80b   : > { %6214 = vmatmul.msk.f32.gmra.mxu2 %vm599_vm1, %v7911_v37  ;;  %6219 = vmatmul.msk.f32.gmra.mxu0 %vm599_vm1, %v7911_v37 }
 0x80c   : > { %6224 = vmatmul.msk.f32.gmra.mxu1 %vm599_vm1, %v7911_v37  ;;  %6229 = vmatmul.msk.f32.gmra.mxu3 %vm599_vm1, %v7911_v37 }
 0x80d   : > { %2225 = vmatpush.msrb.mxu0 %v2132_v46  ;;  %2257 = vmatpush.msra.mxu1 %v2148_v51  ;;  %v1936_v46 = vld [vmem:[%s11360_s12 + $0x1d8] sm:$0xff] }
 0x80e   : > { %2407 = vmatpush.msrb.mxu3 %v1936_v46  ;;  %2312 = vmatpush.msrb.mxu2 %v1887_v59  ;;  %v1911_v46 = vld [vmem:[%s11360_s12 + $0x110] sm:$0xff] }
 0x80f   : > { %2226 = vmatpush.msrb.mxu0 %v2131_v50  ;;  %2258 = vmatpush.msra.mxu1 %v2147_v31  ;;  %v1900_v50 = vld [vmem:[%s11360_s12 + $0xb8] sm:$0xff] }
 0x810   : > { %v1916_v31 = vld [vmem:[%s11360_s12 + $0x138] sm:$0xff]  ;;  %2408 = vmatpush.msrb.mxu3 %v1935_v0  ;;  %2313 = vmatpush.msrb.mxu2 %v1886_v9  ;;  %v1930_v9 = vld [vmem:[%s11360_s12 + $0x1a8] sm:$0xff] }
 0x811   : > { %2339 = vmatpush.msra.mxu0 %v1908_v54  ;;  %2371 = vmatpush.msrb.mxu1 %v1924_v8  ;;  %v1934_v8 = vld [vmem:[%s11360_s12 + $0x1c8] sm:$0xff] }
 0x812   : > { %2409 = vmatpush.msrb.mxu3 %v1934_v8  ;;  %v1910_v8 = vld [vmem:[%s11360_s12 + $0x108] sm:$0xff] }
 0x813   : > { %6215 = vmatmul.msk.f32.gmra.mxu2 %vm599_vm1, %v7924_v2  ;;  %6220 = vmatmul.msk.f32.gmra.mxu0 %vm599_vm1, %v7924_v2 }
 0x814   : > { %6225 = vmatmul.msk.f32.gmra.mxu1 %vm599_vm1, %v7924_v2  ;;  %6230 = vmatmul.msk.f32.gmra.mxu3 %vm599_vm1, %v7924_v2 }
 0x815   : > { %2340 = vmatpush.msra.mxu0 %v1907_v11  ;;  %2372 = vmatpush.msrb.mxu1 %v1923_v61  ;;  %v1885_v61 = vld [vmem:[%s11360_s12 + $0x40] sm:$0xff] }
 0x816   : > { %2314 = vmatpush.msrb.mxu2 %v1885_v61  ;;  %v1880_v61 = vld [vmem:[%s11360_s12 + $0x18] sm:$0xff] }
 0x817   : > { %2341 = vmatpush.msra.mxu0 %v1906_v16  ;;  %2373 = vmatpush.msrb.mxu1 %v1922_v63  ;;  %v1898_v16 = vld [vmem:[%s11360_s12 + $0xa8] sm:$0xff] }
 0x818   : > { %v1914_v63 = vld [vmem:[%s11360_s12 + $0x128] sm:$0xff] }
 0x819   : > { %2342 = vmatpush.msra.mxu0 %v1905_v34  ;;  %2374 = vmatpush.msrb.mxu1 %v1921_v1  ;;  %v8326_v34 = vperm.slane %v1957_v62, 0  ;;  %v1933_v1 = vld [vmem:[%s11360_s12 + $0x1c0] sm:$0xff]  ;;  %v1896_v62 = vld [vmem:[%s11360_s12 + $0x98] sm:$0xff] }
 0x81a   : > { %2410 = vmatpush.msrb.mxu3 %v1933_v1  ;;  %v1928_v1 = vld [vmem:[%s11360_s12 + $0x198] sm:$0xff] }
 0x81b   : > { %2343 = vmatpush.msra.mxu0 %v1904_v43  ;;  %2375 = vmatpush.msrb.mxu1 %v1920_v6  ;;  %v1884_v43 = vld [vmem:[%s11360_s12 + $0x38] sm:$0xff]  ;;  %v1897_v6 = vld [vmem:[%s11360_s12 + $0xa0] sm:$0xff] }
 0x81c   : > { %2315 = vmatpush.msrb.mxu2 %v1884_v43  ;;  %2411 = vmatpush.msrb.mxu3 %v1932_v44 }
 0x81d   : > { %2344 = vmatpush.msra.mxu0 %v1903_v52  ;;  %2376 = vmatpush.msrb.mxu1 %v1919_v26  ;;  %v1883_v26 = vld [vmem:[%s11360_s12 + $0x30] sm:$0xff] }
 0x81e   : > { %2316 = vmatpush.msrb.mxu2 %v1883_v26 }
 0x81f   : > { %2345 = vmatpush.msra.mxu0 %v1902_v35  ;;  %2377 = vmatpush.msrb.mxu1 %v1918_v49  ;;  %v1931_v49 = vld [vmem:[%s11360_s12 + $0x1b0] sm:$0xff] }
 0x820   : > { %2412 = vmatpush.msrb.mxu3 %v1931_v49 }
 0x821   : > { %2346 = vmatpush.msra.mxu0 %v1901_v20  ;;  %2378 = vmatpush.msrb.mxu1 %v1917_v45  ;;  %v1882_v20 = vld [vmem:[%s11360_s12 + $0x28] sm:$0xff]  ;;  %v1895_v45 = vld [vmem:[%s11360_s12 + $0x90] sm:$0xff] }
 0x822   : > { %2317 = vmatpush.msrb.mxu2 %v1882_v20  ;;  %2413 = vmatpush.msrb.mxu3 %v1930_v9  ;;  %v1877_v20 = vld [vmem:[%s11360_s12] sm:$0xff] }
 0x823   : > { %2347 = vmatpush.msra.mxu0 %v1900_v50  ;;  %2379 = vmatpush.msrb.mxu1 %v1916_v31 }
 0x825   : > { %2348 = vmatpush.msra.mxu0 %v1899_v14  ;;  %2380 = vmatpush.msrb.mxu1 %v1915_v18  ;;  %v1881_v14 = vld [vmem:[%s11360_s12 + $0x20] sm:$0xff] }
 0x826   : > { %2318 = vmatpush.msrb.mxu2 %v1881_v14 }
 0x827   : > { %2349 = vmatpush.msra.mxu0 %v1898_v16  ;;  %2381 = vmatpush.msrb.mxu1 %v1914_v63  ;;  %v1893_v16 = vld [vmem:[%s11360_s12 + $0x80] sm:$0xff] }
 0x828   : > { %2319 = vmatpush.msrb.mxu2 %v1880_v61 }
 0x829   : > { %2350 = vmatpush.msra.mxu0 %v1897_v6  ;;  %2382 = vmatpush.msrb.mxu1 %v1913_v40  ;;  %v1879_v6 = vld [vmem:[%s11360_s12 + $0x10] sm:$0xff] }
 0x82a   : > { %2320 = vmatpush.msrb.mxu2 %v1879_v6 }
 0x82b   : > { %2351 = vmatpush.msra.mxu0 %v1896_v62  ;;  %2383 = vmatpush.msrb.mxu1 %v1912_v55 }
 0x82d   : > { %2352 = vmatpush.msra.mxu0 %v1895_v45  ;;  %2384 = vmatpush.msrb.mxu1 %v1911_v46  ;;  %v1925_v46 = vld [vmem:[%s11360_s12 + $0x180] sm:$0xff] }
 0x82f   : > { %2385 = vmatpush.msrb.mxu1 %v1910_v8 }
 0x830   : > { %v8064_v36 = vpop.f32.mrf.mxu0 }
 0x831   : > { %v8075_v23 = vpop.f32.mrf.mxu1 }
 0x836   : > { %v8104_v38 = vpop.f32.mrf.mxu2 }
 0x837   : > { %v8115_v12 = vpop.f32.mrf.mxu3 }
 0x850   : > { %v8120_v60 = vpop.f32.mrf.mxu0 }
 0x851   : > { %v8131_v57 = vpop.f32.mrf.mxu1 }
 0x856   : > { %v8160_v3 = vpop.f32.mrf.mxu2 }
 0x857   : > { %v8168_v28 = vpop.f32.mrf.mxu3 }
 0x858   : > { %v8170_v48 = vpop.f32.mrf.mxu0 }
 0x859   : > { %v8178_v4 = vpop.f32.mrf.mxu1 }
 0x85e   : > { %v8186_v25 = vpop.f32.mrf.mxu2 }
 0x85f   : > { %v8194_v29 = vpop.f32.mrf.mxu3 }
 0x860   : > { %v8196_v30 = vpop.f32.mrf.mxu0 }
 0x861   : > { %v8204_v32 = vpop.f32.mrf.mxu1 }
 0x866   : > { %v8224_v42 = vpop.f32.mrf.mxu2 }
 0x867   : > { %v8235_v41 = vpop.f32.mrf.mxu3 }
 0x868   : > { %v8240_v10 = vpop.f32.mrf.mxu0 }
 0x869   : > { %v8251_v53 = vpop.f32.mrf.mxu1 }
 0x86e   : > { %v8285_v51 = vpop.f32.mrf.mxu2 }
 0x86f   : > { %v8298_v47 = vpop.f32.mrf.mxu3 }
 0x870   : > { %v2016_v5 = vpop.f32.mrf.mxu0 }
 0x871   : > { %v2017_v21 = vadd.f32 %v2016_v5, %v8280_v22  ;;  %v2048_v54 = vpop.f32.mrf.mxu1 }
 0x872   : > { %v2049_v11 = vadd.f32 %v2048_v54, %v8287_v58 }
 0x873   : > { %v2096_v17 = vmax.f32 %v2017_v21, 0.0  ;;  %v1894_v21 = vld [vmem:[%s11360_s12 + $0x88] sm:$0xff] }
 0x874   : > { %v2097_v33 = vmax.f32 %v2049_v11, 0.0  ;;  %v1929_v11 = vld [vmem:[%s11360_s12 + $0x1a0] sm:$0xff]  ;;  %2353 = vmatpush.msra.mxu0 %v1894_v21 }
 0x875   : > { %2227 = vmatmul.f32.vlgmr.msrb.gmra.mxu0 %v2096_v17  ;;  %v1909_v17 = vld [vmem:[%s11360_s12 + $0x100] sm:$0xff]  ;;  %2414 = vmatpush.msrb.mxu3 %v1929_v11 }
 0x876   : > { %2259 = vmatmul.f32.vlgmr.msra.gmra.mxu1 %v2097_v33  ;;  %v1984_v52 = vpop.f32.mrf.mxu2  ;;  %2354 = vmatpush.msra.mxu0 %v1893_v16 }
 0x877   : > { %v1985_v15 = vadd.f32 %v1984_v52, %v8326_v34  ;;  %v2080_v35 = vpop.f32.mrf.mxu3  ;;  %v1927_v52 = vld [vmem:[%s11360_s12 + $0x190] sm:$0xff]  ;;  %2386 = vmatpush.msrb.mxu1 %v1909_v17  ;;  %2415 = vmatpush.msrb.mxu3 %v1928_v1  ;;  %v1704_v17 = vld [vmem:[%s11359_s11] sm:$0xf] }
 0x878   : > { %v2081_v39 = vadd.f32 %v2080_v35, %v8331_v13  ;;  %v2019_v24 = vpop.f32.mrf.mxu0 }
 0x879   : > { %v2095_v59 = vmax.f32 %v1985_v15, 0.0  ;;  %v2020_v50 = vadd.f32 %v2019_v24, %v8280_v22  ;;  %v2051_v31 = vpop.f32.mrf.mxu1  ;;  %v1878_v15 = vld [vmem:[%s11360_s12 + $0x8] sm:$0xff]  ;;  %2416 = vmatpush.msrb.mxu3 %v1927_v52 }
 0x87a   : > { %v2098_v0 = vmax.f32 %v2081_v39, 0.0  ;;  %v2052_v5 = vadd.f32 %v2051_v31, %v8287_v58  ;;  %v1926_v39 = vld [vmem:[%s11360_s12 + $0x188] sm:$0xff]  ;;  %2321 = vmatpush.msrb.mxu2 %v1878_v15 }
 0x87b   : > { %2195 = vmatmul.f32.vlgmr.msra.gmra.mxu2 %v2095_v59  ;;  %v2100_v18 = vmax.f32 %v2020_v50, 0.0  ;;  %2417 = vmatpush.msrb.mxu3 %v1926_v39 }
 0x87c   : > { %v2101_v54 = vmax.f32 %v2052_v5, 0.0  ;;  %2291 = vmatmul.f32.vlgmr.msra.gmra.mxu3 %v2098_v0  ;;  %2322 = vmatpush.msrb.mxu2 %v1877_v20 }
 0x87d   : > { %2230 = vmatmul.f32.gmra.mxu0 %v2100_v18  ;;  %2418 = vmatpush.msrb.mxu3 %v1925_v46 }
 0x87e   : > { %2262 = vmatmul.f32.gmra.mxu1 %v2101_v54  ;;  %v1987_v63 = vpop.f32.mrf.mxu2 }
 0x87f   : > { %v1988_v33 = vadd.f32 %v1987_v63, %v8326_v34  ;;  %v2083_v43 = vpop.f32.mrf.mxu3 }
 0x880   : > { %v2084_v40 = vadd.f32 %v2083_v43, %v8331_v13  ;;  %v2022_v44 = vpop.f32.mrf.mxu0 }
 0x881   : > { %v2023_v26 = vadd.f32 %v2022_v44, %v8280_v22  ;;  %v2054_v62 = vpop.f32.mrf.mxu1  ;;  %v2099_v55 = vmax.f32 %v1988_v33, 0.0 }
 0x882   : > { %v2102_v35 = vmax.f32 %v2084_v40, 0.0  ;;  %v2055_v49 = vadd.f32 %v2054_v62, %v8287_v58 }
 0x883   : > { %v2104_v24 = vmax.f32 %v2023_v26, 0.0  ;;  %2198 = vmatmul.f32.gmra.mxu2 %v2099_v55  ;;  %v8430_v26 = vperm.slane %v1704_v17, 1  ;;  %v8432_v55 = vperm.slane %v1704_v17, 2 }
 0x884   : > { %v2105_v45 = vmax.f32 %v2055_v49, 0.0  ;;  %2294 = vmatmul.f32.gmra.mxu3 %v2102_v35 }
 0x885   : > { %2233 = vmatmul.f32.gmra.mxu0 %v2104_v24  ;;  %v1779_v49 = vadd.f32 %v8064_v36, %v8430_v26  ;;  %v1811_v24 = vadd.f32 %v8075_v23, %v8432_v55  ;;  %v2450_v36 = vld [vmem:[%s11358_s10 + $0x1d8] sm:$0xff] }
 0x886   : > { %2265 = vmatmul.f32.gmra.mxu1 %v2105_v45  ;;  %v1990_v59 = vpop.f32.mrf.mxu2  ;;  %v8443_v45 = vperm.slane %v1704_v17, 0  ;;  %2569 = vmatpush.msra.mxu3 %v2450_v36 }
 0x887   : > { %v1991_v50 = vadd.f32 %v1990_v59, %v8326_v34  ;;  %v2086_v31 = vpop.f32.mrf.mxu3  ;;  %v8445_v59 = vperm.slane %v1704_v17, 3 }
 0x888   : > { %v2087_v0 = vadd.f32 %v2086_v31, %v8331_v13  ;;  %v2025_v5 = vpop.f32.mrf.mxu0  ;;  %v1858_v31 = vmax.f32 %v1779_v49, 0.0 }
 0x889   : > { %v2026_v9 = vadd.f32 %v2025_v5, %v8280_v22  ;;  %v2057_v14 = vpop.f32.mrf.mxu1  ;;  %v2103_v18 = vmax.f32 %v1991_v50, 0.0  ;;  %v1843_v23 = vadd.f32 %v8115_v12, %v8445_v59  ;;  %v2449_v5 = vld [vmem:[%s11358_s10 + $0x1d0] sm:$0xff]  ;;  %v1846_v17 = vadd.f32 %v8168_v28, %v8445_v59  ;;  %v2435_v28 = vld [vmem:[%s11358_s10 + $0x40] sm:$0xff] }
 0x88a   : > { %v2106_v21 = vmax.f32 %v2087_v0, 0.0  ;;  %v2058_v54 = vadd.f32 %v2057_v14, %v8287_v58  ;;  %v1859_v0 = vmax.f32 %v1811_v24, 0.0  ;;  %2537 = vmatpush.msra.mxu1 %v2449_v5  ;;  %v2445_v12 = vld [vmem:[%s11358_s10 + $0x150] sm:$0xff]  ;;  %v2443_v14 = vld [vmem:[%s11358_s10 + $0x140] sm:$0xff]  ;;  %v2656_v5 = vld [vmem:[%s11360_s12 + $0x578] sm:$0xff] }
 0x88b   : > { %v2108_v8 = vmax.f32 %v2026_v9, 0.0  ;;  %2201 = vmatmul.f32.gmra.mxu2 %v2103_v18  ;;  %v2444_v9 = vld [vmem:[%s11358_s10 + $0x148] sm:$0xff]  ;;  %v1814_v18 = vadd.f32 %v8131_v57, %v8432_v55 }
 0x88c   : > { %v2109_v11 = vmax.f32 %v2058_v54, 0.0  ;;  %2297 = vmatmul.f32.gmra.mxu3 %v2106_v21  ;;  %v2440_v21 = vld [vmem:[%s11358_s10 + $0xc8] sm:$0xff]  ;;  %2538 = vmatpush.msra.mxu1 %v2445_v12  ;;  %v2655_v12 = vld [vmem:[%s11360_s12 + $0x570] sm:$0xff] }
 0x88d   : > { %2236 = vmatmul.f32.gmra.mxu0 %v2108_v8  ;;  %v1860_v8 = vmax.f32 %v1843_v23, 0.0  ;;  %v2436_v57 = vld [vmem:[%s11358_s10 + $0x48] sm:$0xff] }
 0x88e   : > { %2268 = vmatmul.f32.gmra.mxu1 %v2109_v11  ;;  %v1993_v61 = vpop.f32.mrf.mxu2 }
 0x88f   : > { %v1994_v16 = vadd.f32 %v1993_v61, %v8326_v34  ;;  %v2089_v63 = vpop.f32.mrf.mxu3  ;;  %v1863_v61 = vmax.f32 %v1814_v18, 0.0  ;;  %v2638_v18 = vld [vmem:[%s11360_s12 + $0x4e8] sm:$0xff] }
 0x890   : > { %v2090_v1 = vadd.f32 %v2089_v63, %v8331_v13  ;;  %v2028_v33 = vpop.f32.mrf.mxu0  ;;  %v1750_v63 = vadd.f32 %v8160_v3, %v8443_v45  ;;  %v1785_v3 = vadd.f32 %v8170_v48, %v8430_v26 }
 0x891   : > { %v2029_v43 = vadd.f32 %v2028_v33, %v8280_v22  ;;  %v2060_v6 = vpop.f32.mrf.mxu1  ;;  %v2107_v40 = vmax.f32 %v1994_v16, 0.0  ;;  %v2447_v22 = vld [vmem:[%s11358_s10 + $0x1c0] sm:$0xff]  ;;  %v2437_v16 = vld [vmem:[%s11358_s10 + $0x50] sm:$0xff] }
 0x892   : > { %v2110_v44 = vmax.f32 %v2090_v1, 0.0  ;;  %v2061_v52 = vadd.f32 %v2060_v6, %v8287_v58  ;;  %2473 = vmatpush.msra.mxu2 %v2447_v22  ;;  %v2446_v1 = vld [vmem:[%s11358_s10 + $0x158] sm:$0xff]  ;;  %v2439_v33 = vld [vmem:[%s11358_s10 + $0xc0] sm:$0xff]  ;;  %v1817_v6 = vadd.f32 %v8178_v4, %v8432_v55  ;;  %v1849_v4 = vadd.f32 %v8194_v29, %v8445_v59 }
 0x893   : > { %v2112_v62 = vmax.f32 %v2029_v43, 0.0  ;;  %2204 = vmatmul.f32.gmra.mxu2 %v2107_v40  ;;  %v2442_v43 = vld [vmem:[%s11358_s10 + $0xd8] sm:$0xff]  ;;  %2570 = vmatpush.msra.mxu3 %v2446_v1  ;;  %v1820_v22 = vadd.f32 %v8204_v32, %v8432_v55  ;;  %v1852_v29 = vadd.f32 %v8235_v41, %v8445_v59  ;;  %v1823_v32 = vadd.f32 %v8251_v53, %v8432_v55 }
 0x894   : > { %v2113_v15 = vmax.f32 %v2061_v52, 0.0  ;;  %2300 = vmatmul.f32.gmra.mxu3 %v2110_v44  ;;  %2474 = vmatpush.msra.mxu2 %v2443_v14  ;;  %v2438_v40 = vld [vmem:[%s11358_s10 + $0x58] sm:$0xff]  ;;  %v1861_v44 = vmax.f32 %v1750_v63, 0.0  ;;  %v1864_v52 = vmax.f32 %v1846_v17, 0.0  ;;  %v1867_v48 = vmax.f32 %v1817_v6, 0.0  ;;  %v2635_v63 = vld [vmem:[%s11360_s12 + $0x4d0] sm:$0xff] }
 0x895   : > { %2239 = vmatmul.f32.gmra.mxu0 %v2112_v62  ;;  %2571 = vmatpush.msra.mxu3 %v2442_v43  ;;  %v1866_v62 = vmax.f32 %v1785_v3, 0.0  ;;  %v1871_v24 = vmax.f32 %v1820_v22, 0.0  ;;  %v1855_v41 = vadd.f32 %v8298_v47, %v8445_v59  ;;  %v2651_v17 = vld [vmem:[%s11360_s12 + $0x550] sm:$0xff]  ;;  %v2634_v43 = vld [vmem:[%s11360_s12 + $0x4c8] sm:$0xff] }
 0x896   : > { %2271 = vmatmul.f32.gmra.mxu1 %v2113_v15  ;;  %v1996_v35 = vpop.f32.mrf.mxu2  ;;  %2475 = vmatpush.msra.mxu2 %v2439_v33  ;;  %v1753_v15 = vadd.f32 %v8186_v25, %v8443_v45  ;;  %v1756_v25 = vadd.f32 %v8224_v42, %v8443_v45  ;;  %v1759_v42 = vadd.f32 %v8285_v51, %v8443_v45  ;;  %v2624_v33 = vld [vmem:[%s11360_s12 + $0x478] sm:$0xff]  ;;  %v2650_v3 = vld [vmem:[%s11360_s12 + $0x548] sm:$0xff] }
 0x897   : > { %v1997_v58 = vadd.f32 %v1996_v35, %v8326_v34  ;;  %v2092_v39 = vpop.f32.mrf.mxu3  ;;  %v1747_v34 = vadd.f32 %v8104_v38, %v8443_v45  ;;  %v1782_v38 = vadd.f32 %v8120_v60, %v8430_v26  ;;  %v2441_v60 = vld [vmem:[%s11358_s10 + $0xd0] sm:$0xff]  ;;  %2572 = vmatpush.msra.mxu3 %v2438_v40  ;;  %v1788_v35 = vadd.f32 %v8196_v30, %v8430_v26  ;;  %v2670_v22 = vld [vmem:[%s11360_s12 + $0x5e8] sm:$0xff] }
 0x898   : > { %v2093_v20 = vadd.f32 %v2092_v39, %v8331_v13  ;;  %v2448_v13 = vld [vmem:[%s11358_s10 + $0x1c8] sm:$0xff]  ;;  %2539 = vmatpush.msra.mxu1 %v2441_v60  ;;  %2476 = vmatpush.msra.mxu2 %v2435_v28  ;;  %v1865_v49 = vmax.f32 %v1753_v15, 0.0  ;;  %v1791_v30 = vadd.f32 %v8240_v10, %v8430_v26  ;;  %v1876_v36 = vmax.f32 %v1855_v41, 0.0  ;;  %v2637_v60 = vld [vmem:[%s11360_s12 + $0x4e0] sm:$0xff]  ;;  %v2672_v28 = vld [vmem:[%s11360_s12 + $0x5f8] sm:$0xff] }
 0x899   : > { %v2111_v46 = vmax.f32 %v1997_v58, 0.0  ;;  %2505 = vmatpush.msrb.mxu0 %v2448_v13  ;;  %v1857_v54 = vmax.f32 %v1747_v34, 0.0  ;;  %v1862_v11 = vmax.f32 %v1782_v38, 0.0  ;;  %v1868_v58 = vmax.f32 %v1849_v4, 0.0  ;;  %v2640_v13 = vld [vmem:[%s11360_s12 + $0x4f8] sm:$0xff]  ;;  %v2639_v38 = vld [vmem:[%s11360_s12 + $0x4f0] sm:$0xff] }
 0x89a   : > { %v2114_v50 = vmax.f32 %v2093_v20, 0.0  ;;  %2540 = vmatpush.msra.mxu1 %v2437_v16  ;;  %v1870_v39 = vmax.f32 %v1788_v35, 0.0  ;;  %v1869_v20 = vmax.f32 %v1756_v25, 0.0  ;;  %v2623_v40 = vld [vmem:[%s11360_s12 + $0x470] sm:$0xff]  ;;  %v2622_v15 = vld [vmem:[%s11360_s12 + $0x468] sm:$0xff]  ;;  %v2632_v4 = vld [vmem:[%s11360_s12 + $0x4b8] sm:$0xff] }
 0x89b   : > { %2207 = vmatmul.f32.gmra.mxu2 %v2111_v46  ;;  %2506 = vmatpush.msrb.mxu0 %v2444_v9  ;;  %v1872_v46 = vmax.f32 %v1852_v29, 0.0  ;;  %v2648_v35 = vld [vmem:[%s11360_s12 + $0x538] sm:$0xff]  ;;  %v2669_v29 = vld [vmem:[%s11360_s12 + $0x5e0] sm:$0xff] }
 0x89c   : > { %2303 = vmatmul.f32.gmra.mxu3 %v2114_v50  ;;  %v1874_v50 = vmax.f32 %v1791_v30, 0.0  ;;  %v2620_v30 = vld [vmem:[%s11360_s12 + $0x458] sm:$0xff]  ;;  %v2645_v41 = vld [vmem:[%s11360_s12 + $0x520] sm:$0xff] }
 0x89d   : > { %2355 = vmatmul.f32.vlgmr.msra.gmra.mxu0 %v1858_v31  ;;  %v1875_v31 = vmax.f32 %v1823_v32, 0.0  ;;  %v2630_v32 = vld [vmem:[%s11360_s12 + $0x4a8] sm:$0xff] }
 0x89e   : > { %2387 = vmatmul.f32.vlgmr.msrb.gmra.mxu1 %v1859_v0  ;;  %2507 = vmatpush.msrb.mxu0 %v2440_v21  ;;  %v1873_v0 = vmax.f32 %v1759_v42, 0.0  ;;  %v2654_v21 = vld [vmem:[%s11360_s12 + $0x568] sm:$0xff]  ;;  %v2629_v42 = vld [vmem:[%s11360_s12 + $0x4a0] sm:$0xff] }
 0x89f   : > { %2737 = vmatpush.msrb.mxu1 %v2656_v5  ;;  %v2628_v5 = vld [vmem:[%s11360_s12 + $0x498] sm:$0xff] }
 0x8a0   : > { %2508 = vmatpush.msrb.mxu0 %v2436_v57  ;;  %v2652_v57 = vld [vmem:[%s11360_s12 + $0x558] sm:$0xff] }
 0x8a1   : > { %2738 = vmatpush.msrb.mxu1 %v2655_v12  ;;  %v2666_v12 = vld [vmem:[%s11360_s12 + $0x5c8] sm:$0xff] }
 0x8a2   : > { %2705 = vmatpush.msra.mxu0 %v2640_v13  ;;  %v2618_v13 = vld [vmem:[%s11360_s12 + $0x448] sm:$0xff] }
 0x8a3   : > { %2323 = vmatmul.f32.vlgmr.msrb.gmra.mxu2 %v1857_v54  ;;  %2739 = vmatpush.msrb.mxu1 %v2654_v21  ;;  %v2617_v21 = vld [vmem:[%s11360_s12 + $0x440] sm:$0xff] }
 0x8a4   : > { %2419 = vmatmul.f32.vlgmr.msrb.gmra.mxu3 %v1860_v8  ;;  %2706 = vmatpush.msra.mxu0 %v2639_v38  ;;  %v2653_v8 = vld [vmem:[%s11360_s12 + $0x560] sm:$0xff]  ;;  %v2644_v38 = vld [vmem:[%s11360_s12 + $0x518] sm:$0xff] }
 0x8a5   : > { %2358 = vmatmul.f32.gmra.mxu0 %v1862_v11  ;;  %2740 = vmatpush.msrb.mxu1 %v2653_v8  ;;  %v2643_v8 = vld [vmem:[%s11360_s12 + $0x510] sm:$0xff] }
 0x8a6   : > { %2390 = vmatmul.f32.gmra.mxu1 %v1863_v61  ;;  %2707 = vmatpush.msra.mxu0 %v2638_v18  ;;  %v2636_v61 = vld [vmem:[%s11360_s12 + $0x4d8] sm:$0xff] }
 0x8a7   : > { %2741 = vmatpush.msrb.mxu1 %v2652_v57  ;;  %2673 = vmatpush.msrb.mxu2 %v2624_v33  ;;  %v2665_v57 = vld [vmem:[%s11360_s12 + $0x5c0] sm:$0xff]  ;;  %v2642_v33 = vld [vmem:[%s11360_s12 + $0x508] sm:$0xff] }
 0x8a8   : > { %2708 = vmatpush.msra.mxu0 %v2637_v60  ;;  %2769 = vmatpush.msrb.mxu3 %v2672_v28  ;;  %v2627_v60 = vld [vmem:[%s11360_s12 + $0x490] sm:$0xff] }
 0x8a9   : > { %2742 = vmatpush.msrb.mxu1 %v2651_v17  ;;  %2674 = vmatpush.msrb.mxu2 %v2623_v40  ;;  %v2626_v17 = vld [vmem:[%s11360_s12 + $0x488] sm:$0xff]  ;;  %v2615_v28 = vld [vmem:[%s11360_s12 + $0x430] sm:$0xff]  ;;  %v2625_v40 = vld [vmem:[%s11360_s12 + $0x480] sm:$0xff] }
 0x8aa   : > { %2709 = vmatpush.msra.mxu0 %v2636_v61 }
 0x8ab   : > { %2326 = vmatmul.f32.gmra.mxu2 %v1861_v44  ;;  %2743 = vmatpush.msrb.mxu1 %v2650_v3  ;;  %v2633_v44 = vld [vmem:[%s11360_s12 + $0x4c0] sm:$0xff] }
 0x8ac   : > { %2422 = vmatmul.f32.gmra.mxu3 %v1864_v52  ;;  %2710 = vmatpush.msra.mxu0 %v2635_v63  ;;  %v2649_v52 = vld [vmem:[%s11360_s12 + $0x540] sm:$0xff]  ;;  %v2616_v63 = vld [vmem:[%s11360_s12 + $0x438] sm:$0xff] }
 0x8ad   : > { %2361 = vmatmul.f32.gmra.mxu0 %v1866_v62  ;;  %2744 = vmatpush.msrb.mxu1 %v2649_v52 }
 0x8ae   : > { %2393 = vmatmul.f32.gmra.mxu1 %v1867_v48  ;;  %2711 = vmatpush.msra.mxu0 %v2634_v43  ;;  %v2671_v48 = vld [vmem:[%s11360_s12 + $0x5f0] sm:$0xff]  ;;  %v2664_v43 = vld [vmem:[%s11360_s12 + $0x5b8] sm:$0xff] }
 0x8af   : > { %2770 = vmatpush.msrb.mxu3 %v2671_v48  ;;  %2675 = vmatpush.msrb.mxu2 %v2622_v15  ;;  %v2663_v48 = vld [vmem:[%s11360_s12 + $0x5b0] sm:$0xff]  ;;  %v2614_v15 = vld [vmem:[%s11360_s12 + $0x428] sm:$0xff] }
 0x8b0   : > { %2712 = vmatpush.msra.mxu0 %v2633_v44  ;;  %2745 = vmatpush.msrb.mxu1 %v2648_v35  ;;  %v2641_v44 = vld [vmem:[%s11360_s12 + $0x500] sm:$0xff] }
 0x8b1   : > { %2771 = vmatpush.msrb.mxu3 %v2670_v22  ;;  %v2613_v22 = vld [vmem:[%s11360_s12 + $0x420] sm:$0xff] }
 0x8b2   : > { %2713 = vmatpush.msra.mxu0 %v2632_v4  ;;  %v2662_v4 = vld [vmem:[%s11360_s12 + $0x5a8] sm:$0xff] }
 0x8b3   : > { %2329 = vmatmul.f32.gmra.mxu2 %v1865_v49  ;;  %2772 = vmatpush.msrb.mxu3 %v2669_v29  ;;  %v2660_v29 = vld [vmem:[%s11360_s12 + $0x598] sm:$0xff] }
 0x8b4   : > { %2425 = vmatmul.f32.gmra.mxu3 %v1868_v58  ;;  %v2621_v58 = vld [vmem:[%s11360_s12 + $0x460] sm:$0xff] }
 0x8b5   : > { %2364 = vmatmul.f32.gmra.mxu0 %v1870_v39  ;;  %v2631_v39 = vld [vmem:[%s11360_s12 + $0x4b0] sm:$0xff]  ;;  %2676 = vmatpush.msrb.mxu2 %v2621_v58  ;;  %v2661_v58 = vld [vmem:[%s11360_s12 + $0x5a0] sm:$0xff] }
 0x8b6   : > { %2396 = vmatmul.f32.gmra.mxu1 %v1871_v24  ;;  %v2647_v24 = vld [vmem:[%s11360_s12 + $0x530] sm:$0xff]  ;;  %2714 = vmatpush.msra.mxu0 %v2631_v39 }
 0x8b7   : > { %2746 = vmatpush.msrb.mxu1 %v2647_v24  ;;  %2677 = vmatpush.msrb.mxu2 %v2620_v30  ;;  %v2612_v24 = vld [vmem:[%s11360_s12 + $0x418] sm:$0xff] }
 0x8b8   : > { %2715 = vmatpush.msra.mxu0 %v2630_v32  ;;  %v2611_v32 = vld [vmem:[%s11360_s12 + $0x410] sm:$0xff] }
 0x8ba   : > { %2716 = vmatpush.msra.mxu0 %v2629_v42  ;;  %v2658_v42 = vld [vmem:[%s11360_s12 + $0x588] sm:$0xff] }
 0x8bb   : > { %2332 = vmatmul.f32.gmra.mxu2 %v1869_v20  ;;  %v2646_v20 = vld [vmem:[%s11360_s12 + $0x528] sm:$0xff] }
 0x8bc   : > { %2428 = vmatmul.f32.gmra.mxu3 %v1872_v46  ;;  %v2668_v46 = vld [vmem:[%s11360_s12 + $0x5d8] sm:$0xff]  ;;  %2747 = vmatpush.msrb.mxu1 %v2646_v20  ;;  %v2659_v20 = vld [vmem:[%s11360_s12 + $0x590] sm:$0xff] }
 0x8bd   : > { %2367 = vmatmul.f32.gmra.mxu0 %v1874_v50  ;;  %2773 = vmatpush.msrb.mxu3 %v2668_v46 }
 0x8be   : > { %2399 = vmatmul.f32.gmra.mxu1 %v1875_v31  ;;  %v2619_v31 = vld [vmem:[%s11360_s12 + $0x450] sm:$0xff]  ;;  %2717 = vmatpush.msra.mxu0 %v2628_v5 }
 0x8bf   : > { %2678 = vmatpush.msrb.mxu2 %v2619_v31  ;;  %2748 = vmatpush.msrb.mxu1 %v2645_v41  ;;  %v2610_v31 = vld [vmem:[%s11360_s12 + $0x408] sm:$0xff] }
 0x8c0   : > { %2718 = vmatpush.msra.mxu0 %v2627_v60 }
 0x8c1   : > { %2679 = vmatpush.msrb.mxu2 %v2618_v13  ;;  %2749 = vmatpush.msrb.mxu1 %v2644_v38  ;;  %v2657_v13 = vld [vmem:[%s11360_s12 + $0x580] sm:$0xff] }
 0x8c2   : > { %2719 = vmatpush.msra.mxu0 %v2626_v17 }
 0x8c3   : > { %2335 = vmatmul.f32.gmra.mxu2 %v1873_v0  ;;  %2750 = vmatpush.msrb.mxu1 %v2643_v8  ;;  %v2451_v8 = vld [vmem:[%s11359_s11 + $0x8] sm:$0xf] }
 0x8c4   : > { %2431 = vmatmul.f32.gmra.mxu3 %v1876_v36  ;;  %v2667_v36 = vld [vmem:[%s11360_s12 + $0x5d0] sm:$0xff]  ;;  %2680 = vmatpush.msrb.mxu2 %v2617_v21  ;;  %v8839_v17 = vperm.slane %v2451_v8, 1 }
 0x8c5   : > { %6236 = vmatmul.msk.f32.vlgmr.msrb.gmra.mxu0 %vm599_vm1, %v7814_v19  ;;  %2774 = vmatpush.msrb.mxu3 %v2667_v36  ;;  %v2609_v36 = vld [vmem:[%s11360_s12 + $0x400] sm:$0xff] }
 0x8c6   : > { %6241 = vmatmul.msk.f32.vlgmr.msra.gmra.mxu1 %vm599_vm1, %v7814_v19  ;;  %2681 = vmatpush.msrb.mxu2 %v2616_v63 }
 0x8c7   : > { %2775 = vmatpush.msrb.mxu3 %v2666_v12  ;;  %2751 = vmatpush.msrb.mxu1 %v2642_v33  ;;  %v8841_v33 = vperm.slane %v2451_v8, 2 }
 0x8c8   : > { %2682 = vmatpush.msrb.mxu2 %v2615_v28  ;;  %2720 = vmatpush.msra.mxu0 %v2625_v40 }
 0x8c9   : > { %2776 = vmatpush.msrb.mxu3 %v2665_v57  ;;  %2752 = vmatpush.msrb.mxu1 %v2641_v44 }
 0x8ca   : > { %2683 = vmatpush.msrb.mxu2 %v2614_v15 }
 0x8cb   : > { %6231 = vmatmul.msk.f32.vlgmr.msra.gmra.mxu2 %vm599_vm1, %v7814_v19  ;;  %2777 = vmatpush.msrb.mxu3 %v2664_v43 }
 0x8cc   : > { %6246 = vmatmul.msk.f32.vlgmr.msra.gmra.mxu3 %vm599_vm1, %v7814_v19  ;;  %2684 = vmatpush.msrb.mxu2 %v2613_v22 }
 0x8cd   : > { %6237 = vmatmul.msk.f32.gmra.mxu0 %vm599_vm1, %v7876_v7  ;;  %2778 = vmatpush.msrb.mxu3 %v2663_v48 }
 0x8ce   : > { %6242 = vmatmul.msk.f32.gmra.mxu1 %vm599_vm1, %v7876_v7  ;;  %2685 = vmatpush.msrb.mxu2 %v2612_v24  ;;  %v2820_v24 = vld [vmem:[%s11358_s10 + $0x1f0] sm:$0xff] }
 0x8cf   : > { %2779 = vmatpush.msrb.mxu3 %v2662_v4  ;;  %2908 = vmatpush.msra.mxu1 %v2820_v24 }
 0x8d0   : > { %2686 = vmatpush.msrb.mxu2 %v2611_v32  ;;  %v2818_v32 = vld [vmem:[%s11358_s10 + $0x1e0] sm:$0xff] }
 0x8d1   : > { %2780 = vmatpush.msrb.mxu3 %v2661_v58  ;;  %v2819_v58 = vld [vmem:[%s11358_s10 + $0x1e8] sm:$0xff] }
 0x8d2   : > { %2687 = vmatpush.msrb.mxu2 %v2610_v31  ;;  %2876 = vmatpush.msrb.mxu0 %v2819_v58  ;;  %v2816_v31 = vld [vmem:[%s11358_s10 + $0x170] sm:$0xff] }
 0x8d3   : > { %6232 = vmatmul.msk.f32.gmra.mxu2 %vm599_vm1, %v7876_v7  ;;  %2781 = vmatpush.msrb.mxu3 %v2660_v29 }
 0x8d4   : > { %6247 = vmatmul.msk.f32.gmra.mxu3 %vm599_vm1, %v7876_v7  ;;  %2688 = vmatpush.msrb.mxu2 %v2609_v36 }
 0x8d5   : > { %6238 = vmatmul.msk.f32.gmra.mxu0 %vm599_vm1, %v7897_v56  ;;  %2782 = vmatpush.msrb.mxu3 %v2659_v20  ;;  %v2815_v20 = vld [vmem:[%s11358_s10 + $0x168] sm:$0xff] }
 0x8d6   : > { %6243 = vmatmul.msk.f32.gmra.mxu1 %vm599_vm1, %v7897_v56  ;;  %2844 = vmatpush.msra.mxu2 %v2818_v32 }
 0x8d7   : > { %2783 = vmatpush.msrb.mxu3 %v2658_v42  ;;  %2877 = vmatpush.msrb.mxu0 %v2815_v20 }
 0x8d8   : > { %2909 = vmatpush.msra.mxu1 %v2816_v31 }
 0x8d9   : > { %2784 = vmatpush.msrb.mxu3 %v2657_v13  ;;  %v8865_v13 = vperm.slane %v2451_v8, 0 }
 0x8db   : > { %6233 = vmatmul.msk.f32.gmra.mxu2 %vm599_vm1, %v7897_v56 }
 0x8dc   : > { %6248 = vmatmul.msk.f32.gmra.mxu3 %vm599_vm1, %v7897_v56 }
 0x8dd   : > { %6239 = vmatmul.msk.f32.gmra.mxu0 %vm599_vm1, %v7911_v37 }
 0x8de   : > { %6244 = vmatmul.msk.f32.gmra.mxu1 %vm599_vm1, %v7911_v37 }
 0x8e3   : > { %6234 = vmatmul.msk.f32.gmra.mxu2 %vm599_vm1, %v7911_v37 }
 0x8e4   : > { %6249 = vmatmul.msk.f32.gmra.mxu3 %vm599_vm1, %v7911_v37 }
 0x8e5   : > { %6240 = vmatmul.msk.f32.gmra.mxu0 %vm599_vm1, %v7924_v2 }
 0x8e6   : > { %6245 = vmatmul.msk.f32.gmra.mxu1 %vm599_vm1, %v7924_v2 }
 0x8eb   : > { %6235 = vmatmul.msk.f32.gmra.mxu2 %vm599_vm1, %v7924_v2 }
 0x8ec   : > { %6250 = vmatmul.msk.f32.gmra.mxu3 %vm599_vm1, %v7924_v2 }
 0x8f2   : > { %v8568_v10 = vpop.f32.mrf.mxu0 }
 0x8f3   : > { %v8570_v53 = vpop.f32.mrf.mxu1 }
 0x8fa   : > { %v8572_v51 = vpop.f32.mrf.mxu0 }
 0x8fb   : > { %v8574_v47 = vpop.f32.mrf.mxu1 }
 0x8fe   : > { %v8576_v26 = vpop.f32.mrf.mxu2 }
 0x8ff   : > { %v8578_v55 = vpop.f32.mrf.mxu3 }
 0x902   : > { %v8580_v45 = vpop.f32.mrf.mxu0 }
 0x903   : > { %v8582_v59 = vpop.f32.mrf.mxu1 }
 0x906   : > { %v8584_v34 = vpop.f32.mrf.mxu2 }
 0x907   : > { %v8586_v23 = vpop.f32.mrf.mxu3 }
 0x90a   : > { %v8594_v9 = vpop.f32.mrf.mxu0 }
 0x90b   : > { %v8602_v14 = vpop.f32.mrf.mxu1 }
 0x90e   : > { %v8610_v54 = vpop.f32.mrf.mxu2 }
 0x90f   : > { %v8618_v11 = vpop.f32.mrf.mxu3 }
 0x912   : > { %v8626_v16 = vpop.f32.mrf.mxu0 }
 0x913   : > { %v8634_v1 = vpop.f32.mrf.mxu1 }
 0x914   : > { %11401 = vst [vmem:[#allocation7_spill] sm:$0xff] %v8634_v1 }
 0x916   : > { %v8648_v6 = vpop.f32.mrf.mxu2 }
 0x917   : > { %v8659_v62 = vpop.f32.mrf.mxu3 }
 0x91a   : > { %v8676_v49 = vpop.f32.mrf.mxu0 }
 0x91b   : > { %v8687_v25 = vpop.f32.mrf.mxu1 }
 0x91e   : > { %v8704_v50 = vpop.f32.mrf.mxu2 }
 0x91f   : > { %v8715_v0 = vpop.f32.mrf.mxu3 }
 0x920   : > { %11402 = vst [vmem:[#allocation8_spill] sm:$0xff] %v8715_v0 }
 0x922   : > { %v8732_v18 = vpop.f32.mrf.mxu0 }
 0x923   : > { %v8743_v61 = vpop.f32.mrf.mxu1 }
 0x926   : > { %v8760_v3 = vpop.f32.mrf.mxu2 }
 0x927   : > { %v8771_v52 = vpop.f32.mrf.mxu3 }
 0x92a   : > { %v8782_v35 = vpop.f32.mrf.mxu0 }
 0x92b   : > { %v8790_v39 = vpop.f32.mrf.mxu1 }
 0x92e   : > { %v8798_v30 = vpop.f32.mrf.mxu2 }
 0x92f   : > { %v8806_v46 = vpop.f32.mrf.mxu3 }
 0x932   : > { %v8814_v41 = vpop.f32.mrf.mxu0 }
 0x933   : > { %11403 = vst [vmem:[#allocation9_spill] sm:$0xff] %v8814_v41  ;;  %v8822_v5 = vpop.f32.mrf.mxu1 }
 0x934   : > { %11404 = vst [vmem:[#allocation10_spill] sm:$0xff] %v8822_v5 }
 0x936   : > { %v8824_v38 = vpop.f32.mrf.mxu2 }
 0x937   : > { %v8826_v12 = vpop.f32.mrf.mxu3 }
 0x938   : > { %11405 = vst [vmem:[#allocation11_spill] sm:$0xff] %v8826_v12 }
 0x93a   : > { %v8828_v21 = vpop.f32.mrf.mxu0 }
 0x93b   : > { %11406 = vst [vmem:[#allocation12_spill] sm:$0xff] %v8828_v21  ;;  %v8830_v60 = vpop.f32.mrf.mxu1 }
 0x93c   : > { %11407 = vst [vmem:[#allocation13_spill] sm:$0xff] %v8830_v60 }
 0x93e   : > { %v8835_v57 = vpop.f32.mrf.mxu2 }
 0x93f   : > { %11408 = vst [vmem:[#allocation14_spill] sm:$0xff] %v8835_v57  ;;  %v8837_v63 = vpop.f32.mrf.mxu3 }
 0x940   : > { %11409 = vst [vmem:[#allocation15_spill] sm:$0xff] %v8837_v63 }
 0x942   : > { %v2510_v43 = vpop.f32.mrf.mxu0 }
 0x943   : > { %v2511_v28 = vadd.f32 %v2510_v43, %v8839_v17  ;;  %v2542_v40 = vpop.f32.mrf.mxu1 }
 0x944   : > { %v2543_v44 = vadd.f32 %v2542_v40, %v8841_v33  ;;  %v2811_v40 = vld [vmem:[%s11358_s10 + $0xe8] sm:$0xff] }
 0x945   : > { %v2590_v48 = vmax.f32 %v2511_v28, 0.0  ;;  %v8868_v28 = vperm.slane %v2451_v8, 3  ;;  %2878 = vmatpush.msrb.mxu0 %v2811_v40  ;;  %v2807_v8 = vld [vmem:[%s11358_s10 + $0x68] sm:$0xff]  ;;  %v2814_v40 = vld [vmem:[%s11358_s10 + $0x160] sm:$0xff] }
 0x946   : > { %v2591_v15 = vmax.f32 %v2543_v44, 0.0  ;;  %v8845_v4 = vpop.f32.mrf.mxu2  ;;  %v2812_v44 = vld [vmem:[%s11358_s10 + $0xf0] sm:$0xff]  ;;  %2845 = vmatpush.msra.mxu2 %v2814_v40  ;;  %v2806_v40 = vld [vmem:[%s11358_s10 + $0x60] sm:$0xff] }
 0x947   : > { %11410 = vst [vmem:[#allocation16_spill] sm:$0xff] %v8845_v4  ;;  %v8847_v22 = vpop.f32.mrf.mxu3  ;;  %2721 = vmatmul.f32.vlgmr.msra.gmra.mxu0 %v2590_v48  ;;  %v2821_v48 = vld [vmem:[%s11358_s10 + $0x1f8] sm:$0xff]  ;;  %2910 = vmatpush.msra.mxu1 %v2812_v44 }
 0x948   : > { %11411 = vst [vmem:[#allocation17_spill] sm:$0xff] %v8847_v22  ;;  %2753 = vmatmul.f32.vlgmr.msrb.gmra.mxu1 %v2591_v15  ;;  %2940 = vmatpush.msra.mxu3 %v2821_v48 }
 0x949   : > { %2879 = vmatpush.msrb.mxu0 %v2807_v8 }
 0x94a   : > { %v2513_v29 = vpop.f32.mrf.mxu0 }
 0x94b   : > { %v2514_v42 = vadd.f32 %v2513_v29, %v8839_v17  ;;  %v2545_v36 = vpop.f32.mrf.mxu1  ;;  %v2808_v29 = vld [vmem:[%s11358_s10 + $0x70] sm:$0xff] }
 0x94c   : > { %v2546_v43 = vadd.f32 %v2545_v36, %v8841_v33  ;;  %2911 = vmatpush.msra.mxu1 %v2808_v29 }
 0x94d   : > { %v2594_v15 = vmax.f32 %v2514_v42, 0.0 }
 0x94e   : > { %v2595_v58 = vmax.f32 %v2546_v43, 0.0  ;;  %v2478_v24 = vpop.f32.mrf.mxu2 }
 0x94f   : > { %v2479_v32 = vadd.f32 %v2478_v24, %v8865_v13  ;;  %v2574_v20 = vpop.f32.mrf.mxu3  ;;  %2724 = vmatmul.f32.gmra.mxu0 %v2594_v15  ;;  %v2817_v15 = vld [vmem:[%s11358_s10 + $0x178] sm:$0xff] }
 0x950   : > { %v2575_v31 = vadd.f32 %v2574_v20, %v8868_v28  ;;  %2756 = vmatmul.f32.gmra.mxu1 %v2595_v58  ;;  %2941 = vmatpush.msra.mxu3 %v2817_v15 }
 0x951   : > { %v2589_v42 = vmax.f32 %v2479_v32, 0.0 }
 0x952   : > { %v2592_v36 = vmax.f32 %v2575_v31, 0.0  ;;  %v2516_v43 = vpop.f32.mrf.mxu0 }
 0x953   : > { %v2517_v44 = vadd.f32 %v2516_v43, %v8839_v17  ;;  %v2548_v48 = vpop.f32.mrf.mxu1  ;;  %2689 = vmatmul.f32.vlgmr.msrb.gmra.mxu2 %v2589_v42  ;;  %v2810_v42 = vld [vmem:[%s11358_s10 + $0xe0] sm:$0xff] }
 0x954   : > { %v2549_v24 = vadd.f32 %v2548_v48, %v8841_v33  ;;  %2785 = vmatmul.f32.vlgmr.msrb.gmra.mxu3 %v2592_v36  ;;  %v2813_v36 = vld [vmem:[%s11358_s10 + $0xf8] sm:$0xff]  ;;  %2846 = vmatpush.msra.mxu2 %v2810_v42 }
 0x955   : > { %v2598_v58 = vmax.f32 %v2517_v44, 0.0  ;;  %2942 = vmatpush.msra.mxu3 %v2813_v36  ;;  %v2809_v44 = vld [vmem:[%s11358_s10 + $0x78] sm:$0xff] }
 0x956   : > { %v2599_v8 = vmax.f32 %v2549_v24, 0.0  ;;  %v2481_v29 = vpop.f32.mrf.mxu2  ;;  %2847 = vmatpush.msra.mxu2 %v2806_v40 }
 0x957   : > { %v2482_v32 = vadd.f32 %v2481_v29, %v8865_v13  ;;  %v2577_v20 = vpop.f32.mrf.mxu3  ;;  %2727 = vmatmul.f32.gmra.mxu0 %v2598_v58  ;;  %2943 = vmatpush.msra.mxu3 %v2809_v44 }
 0x958   : > { %v2578_v31 = vadd.f32 %v2577_v20, %v8868_v28  ;;  %2759 = vmatmul.f32.gmra.mxu1 %v2599_v8 }
 0x959   : > { %v2593_v43 = vmax.f32 %v2482_v32, 0.0 }
 0x95a   : > { %v2596_v48 = vmax.f32 %v2578_v31, 0.0  ;;  %v2519_v24 = vpop.f32.mrf.mxu0 }
 0x95b   : > { %v2520_v15 = vadd.f32 %v2519_v24, %v8839_v17  ;;  %v2551_v58 = vpop.f32.mrf.mxu1  ;;  %2692 = vmatmul.f32.gmra.mxu2 %v2593_v43 }
 0x95c   : > { %v2552_v8 = vadd.f32 %v2551_v58, %v8841_v33  ;;  %2788 = vmatmul.f32.gmra.mxu3 %v2596_v48 }
 0x95d   : > { %v2602_v29 = vmax.f32 %v2520_v15, 0.0 }
 0x95e   : > { %v2603_v32 = vmax.f32 %v2552_v8, 0.0  ;;  %v2484_v20 = vpop.f32.mrf.mxu2 }
 0x95f   : > { %v2485_v42 = vadd.f32 %v2484_v20, %v8865_v13  ;;  %v2580_v36 = vpop.f32.mrf.mxu3  ;;  %2730 = vmatmul.f32.gmra.mxu0 %v2602_v29 }
 0x960   : > { %v2581_v27 = vadd.f32 %v2580_v36, %v8868_v28  ;;  %2762 = vmatmul.f32.gmra.mxu1 %v2603_v32 }
 0x961   : > { %v2597_v31 = vmax.f32 %v2485_v42, 0.0 }
 0x962   : > { %v2600_v22 = vmax.f32 %v2581_v27, 0.0  ;;  %v2522_v24 = vpop.f32.mrf.mxu0 }
 0x963   : > { %v2523_v43 = vadd.f32 %v2522_v24, %v8839_v17  ;;  %v2554_v44 = vpop.f32.mrf.mxu1  ;;  %2695 = vmatmul.f32.gmra.mxu2 %v2597_v31  ;;  %v3010_v24 = vld [vmem:[%s11360_s12 + $0x6f0] sm:$0xff] }
 0x964   : > { %v2555_v48 = vadd.f32 %v2554_v44, %v8841_v33  ;;  %2791 = vmatmul.f32.gmra.mxu3 %v2600_v22  ;;  %v3009_v44 = vld [vmem:[%s11360_s12 + $0x6e8] sm:$0xff] }
 0x965   : > { %v2606_v40 = vmax.f32 %v2523_v43, 0.0  ;;  %v3026_v43 = vld [vmem:[%s11360_s12 + $0x770] sm:$0xff] }
 0x966   : > { %v2607_v15 = vmax.f32 %v2555_v48, 0.0  ;;  %v2487_v58 = vpop.f32.mrf.mxu2  ;;  %v3025_v48 = vld [vmem:[%s11360_s12 + $0x768] sm:$0xff] }
 0x967   : > { %v2488_v8 = vadd.f32 %v2487_v58, %v8865_v13  ;;  %v2583_v20 = vpop.f32.mrf.mxu3  ;;  %2733 = vmatmul.f32.gmra.mxu0 %v2606_v40  ;;  %v3008_v40 = vld [vmem:[%s11360_s12 + $0x6e0] sm:$0xff]  ;;  %v3007_v58 = vld [vmem:[%s11360_s12 + $0x6d8] sm:$0xff] }
 0x968   : > { %v2584_v29 = vadd.f32 %v2583_v20, %v8868_v28  ;;  %2765 = vmatmul.f32.gmra.mxu1 %v2607_v15  ;;  %v3024_v15 = vld [vmem:[%s11360_s12 + $0x760] sm:$0xff]  ;;  %v3006_v20 = vld [vmem:[%s11360_s12 + $0x6d0] sm:$0xff] }
 0x969   : > { %v2601_v32 = vmax.f32 %v2488_v8, 0.0  ;;  %v3023_v8 = vld [vmem:[%s11360_s12 + $0x758] sm:$0xff] }
 0x96a   : > { %v2604_v27 = vmax.f32 %v2584_v29, 0.0  ;;  %v3022_v29 = vld [vmem:[%s11360_s12 + $0x750] sm:$0xff] }
 0x96b   : > { %2698 = vmatmul.f32.gmra.mxu2 %v2601_v32  ;;  %v3005_v32 = vld [vmem:[%s11360_s12 + $0x6c8] sm:$0xff] }
 0x96c   : > { %2794 = vmatmul.f32.gmra.mxu3 %v2604_v27  ;;  %v3021_v27 = vld [vmem:[%s11360_s12 + $0x748] sm:$0xff] }
 0x96e   : > { %v2490_v17 = vpop.f32.mrf.mxu2 }
 0x96f   : > { %v2491_v42 = vadd.f32 %v2490_v17, %v8865_v13  ;;  %v2586_v36 = vpop.f32.mrf.mxu3  ;;  %6256 = vmatmul.msk.f32.vlgmr.msrb.gmra.mxu0 %vm599_vm1, %v7814_v19  ;;  %v3011_v13 = vld [vmem:[%s11360_s12 + $0x6f8] sm:$0xff]  ;;  %v3004_v17 = vld [vmem:[%s11360_s12 + $0x6c0] sm:$0xff] }
 0x970   : > { %v2587_v33 = vadd.f32 %v2586_v36, %v8868_v28  ;;  %6261 = vmatmul.msk.f32.vlgmr.msra.gmra.mxu1 %vm599_vm1, %v7814_v19  ;;  %v3027_v28 = vld [vmem:[%s11360_s12 + $0x778] sm:$0xff]  ;;  %3076 = vmatpush.msra.mxu0 %v3011_v13  ;;  %v3002_v13 = vld [vmem:[%s11360_s12 + $0x6b0] sm:$0xff] }
 0x971   : > { %v2605_v22 = vmax.f32 %v2491_v42, 0.0  ;;  %3108 = vmatpush.msrb.mxu1 %v3027_v28  ;;  %v3020_v42 = vld [vmem:[%s11360_s12 + $0x740] sm:$0xff]  ;;  %v3003_v36 = vld [vmem:[%s11360_s12 + $0x6b8] sm:$0xff]  ;;  %v3018_v28 = vld [vmem:[%s11360_s12 + $0x730] sm:$0xff] }
 0x972   : > { %v2608_v31 = vmax.f32 %v2587_v33, 0.0  ;;  %3077 = vmatpush.msra.mxu0 %v3010_v24  ;;  %v3019_v33 = vld [vmem:[%s11360_s12 + $0x738] sm:$0xff] }
 0x973   : > { %2701 = vmatmul.f32.gmra.mxu2 %v2605_v22  ;;  %3109 = vmatpush.msrb.mxu1 %v3026_v43  ;;  %v3043_v43 = vld [vmem:[%s11360_s12 + $0x7f8] sm:$0xff] }
 0x974   : > { %2797 = vmatmul.f32.gmra.mxu3 %v2608_v31  ;;  %3078 = vmatpush.msra.mxu0 %v3009_v44  ;;  %v2995_v31 = vld [vmem:[%s11360_s12 + $0x678] sm:$0xff]  ;;  %v2994_v44 = vld [vmem:[%s11360_s12 + $0x670] sm:$0xff] }
 0x975   : > { %3110 = vmatpush.msrb.mxu1 %v3025_v48  ;;  %3044 = vmatpush.msrb.mxu2 %v2995_v31  ;;  %v3001_v48 = vld [vmem:[%s11360_s12 + $0x6a8] sm:$0xff]  ;;  %v2998_v31 = vld [vmem:[%s11360_s12 + $0x690] sm:$0xff] }
 0x976   : > { %3079 = vmatpush.msra.mxu0 %v3008_v40  ;;  %3140 = vmatpush.msrb.mxu3 %v3043_v43  ;;  %v3017_v40 = vld [vmem:[%s11360_s12 + $0x728] sm:$0xff]  ;;  %v3039_v43 = vld [vmem:[%s11360_s12 + $0x7d8] sm:$0xff] }
 0x977   : > { %6257 = vmatmul.msk.f32.gmra.mxu0 %vm599_vm1, %v7876_v7  ;;  %3111 = vmatpush.msrb.mxu1 %v3024_v15  ;;  %v3042_v15 = vld [vmem:[%s11360_s12 + $0x7f0] sm:$0xff] }
 0x978   : > { %6262 = vmatmul.msk.f32.gmra.mxu1 %vm599_vm1, %v7876_v7  ;;  %3080 = vmatpush.msra.mxu0 %v3007_v58  ;;  %v2993_v58 = vld [vmem:[%s11360_s12 + $0x668] sm:$0xff] }
 0x979   : > { %3112 = vmatpush.msrb.mxu1 %v3023_v8  ;;  %3045 = vmatpush.msrb.mxu2 %v2994_v44  ;;  %v3000_v8 = vld [vmem:[%s11360_s12 + $0x6a0] sm:$0xff]  ;;  %v2990_v44 = vld [vmem:[%s11360_s12 + $0x650] sm:$0xff] }
 0x97a   : > { %3081 = vmatpush.msra.mxu0 %v3006_v20  ;;  %3141 = vmatpush.msrb.mxu3 %v3042_v15  ;;  %v3016_v20 = vld [vmem:[%s11360_s12 + $0x720] sm:$0xff]  ;;  %v3038_v15 = vld [vmem:[%s11360_s12 + $0x7d0] sm:$0xff] }
 0x97b   : > { %6251 = vmatmul.msk.f32.vlgmr.msra.gmra.mxu2 %vm599_vm1, %v7814_v19  ;;  %3113 = vmatpush.msrb.mxu1 %v3022_v29  ;;  %v3041_v29 = vld [vmem:[%s11360_s12 + $0x7e8] sm:$0xff] }
 0x97c   : > { %6266 = vmatmul.msk.f32.vlgmr.msra.gmra.mxu3 %vm599_vm1, %v7814_v19  ;;  %3082 = vmatpush.msra.mxu0 %v3005_v32  ;;  %v2992_v32 = vld [vmem:[%s11360_s12 + $0x660] sm:$0xff] }
 0x97d   : > { %3114 = vmatpush.msrb.mxu1 %v3021_v27  ;;  %3046 = vmatpush.msrb.mxu2 %v2993_v58  ;;  %v2999_v27 = vld [vmem:[%s11360_s12 + $0x698] sm:$0xff]  ;;  %v2989_v58 = vld [vmem:[%s11360_s12 + $0x648] sm:$0xff] }
 0x97e   : > { %3083 = vmatpush.msra.mxu0 %v3004_v17  ;;  %3142 = vmatpush.msrb.mxu3 %v3041_v29  ;;  %v3015_v17 = vld [vmem:[%s11360_s12 + $0x718] sm:$0xff]  ;;  %v3037_v29 = vld [vmem:[%s11360_s12 + $0x7c8] sm:$0xff] }
 0x97f   : > { %6258 = vmatmul.msk.f32.gmra.mxu0 %vm599_vm1, %v7897_v56  ;;  %3115 = vmatpush.msrb.mxu1 %v3020_v42  ;;  %v3040_v42 = vld [vmem:[%s11360_s12 + $0x7e0] sm:$0xff] }
 0x980   : > { %6263 = vmatmul.msk.f32.gmra.mxu1 %vm599_vm1, %v7897_v56  ;;  %3084 = vmatpush.msra.mxu0 %v3003_v36 }
 0x981   : > { %3116 = vmatpush.msrb.mxu1 %v3019_v33  ;;  %3047 = vmatpush.msrb.mxu2 %v2992_v32  ;;  %v2991_v33 = vld [vmem:[%s11360_s12 + $0x658] sm:$0xff]  ;;  %v2988_v32 = vld [vmem:[%s11360_s12 + $0x640] sm:$0xff] }
 0x982   : > { %3085 = vmatpush.msra.mxu0 %v3002_v13  ;;  %3143 = vmatpush.msrb.mxu3 %v3040_v42  ;;  %v3014_v13 = vld [vmem:[%s11360_s12 + $0x710] sm:$0xff]  ;;  %v2987_v42 = vld [vmem:[%s11360_s12 + $0x638] sm:$0xff] }
 0x983   : > { %6252 = vmatmul.msk.f32.gmra.mxu2 %vm599_vm1, %v7876_v7  ;;  %3117 = vmatpush.msrb.mxu1 %v3018_v28 }
 0x984   : > { %6267 = vmatmul.msk.f32.gmra.mxu3 %vm599_vm1, %v7876_v7  ;;  %3086 = vmatpush.msra.mxu0 %v3001_v48  ;;  %v2997_v48 = vld [vmem:[%s11360_s12 + $0x688] sm:$0xff] }
 0x985   : > { %3118 = vmatpush.msrb.mxu1 %v3017_v40  ;;  %3048 = vmatpush.msrb.mxu2 %v2991_v33  ;;  %v3013_v40 = vld [vmem:[%s11360_s12 + $0x708] sm:$0xff]  ;;  %v3035_v33 = vld [vmem:[%s11360_s12 + $0x7b8] sm:$0xff] }
 0x986   : > { %3087 = vmatpush.msra.mxu0 %v3000_v8  ;;  %3144 = vmatpush.msrb.mxu3 %v3039_v43  ;;  %v2996_v8 = vld [vmem:[%s11360_s12 + $0x680] sm:$0xff]  ;;  %v2986_v43 = vld [vmem:[%s11360_s12 + $0x630] sm:$0xff] }
 0x987   : > { %6259 = vmatmul.msk.f32.gmra.mxu0 %vm599_vm1, %v7911_v37  ;;  %3119 = vmatpush.msrb.mxu1 %v3016_v20  ;;  %v3012_v20 = vld [vmem:[%s11360_s12 + $0x700] sm:$0xff] }
 0x988   : > { %6264 = vmatmul.msk.f32.gmra.mxu1 %vm599_vm1, %v7911_v37  ;;  %3088 = vmatpush.msra.mxu0 %v2999_v27  ;;  %v3036_v27 = vld [vmem:[%s11360_s12 + $0x7c0] sm:$0xff] }
 0x989   : > { %3120 = vmatpush.msrb.mxu1 %v3015_v17  ;;  %3049 = vmatpush.msrb.mxu2 %v2990_v44  ;;  %v3034_v44 = vld [vmem:[%s11360_s12 + $0x7b0] sm:$0xff] }
 0x98a   : > { %3089 = vmatpush.msra.mxu0 %v2998_v31  ;;  %3145 = vmatpush.msrb.mxu3 %v3038_v15  ;;  %v3033_v15 = vld [vmem:[%s11360_s12 + $0x7a8] sm:$0xff] }
 0x98b   : > { %6253 = vmatmul.msk.f32.gmra.mxu2 %vm599_vm1, %v7897_v56  ;;  %3121 = vmatpush.msrb.mxu1 %v3014_v13 }
 0x98c   : > { %6268 = vmatmul.msk.f32.gmra.mxu3 %vm599_vm1, %v7897_v56  ;;  %3090 = vmatpush.msra.mxu0 %v2997_v48 }
 0x98d   : > { %3122 = vmatpush.msrb.mxu1 %v3013_v40  ;;  %3050 = vmatpush.msrb.mxu2 %v2989_v58  ;;  %v2985_v40 = vld [vmem:[%s11360_s12 + $0x628] sm:$0xff]  ;;  %v2984_v58 = vld [vmem:[%s11360_s12 + $0x620] sm:$0xff] }
 0x98e   : > { %3091 = vmatpush.msra.mxu0 %v2996_v8  ;;  %3146 = vmatpush.msrb.mxu3 %v3037_v29  ;;  %v3032_v8 = vld [vmem:[%s11360_s12 + $0x7a0] sm:$0xff]  ;;  %v2983_v29 = vld [vmem:[%s11360_s12 + $0x618] sm:$0xff] }
 0x98f   : > { %6260 = vmatmul.msk.f32.gmra.mxu0 %vm599_vm1, %v7924_v2  ;;  %3123 = vmatpush.msrb.mxu1 %v3012_v20 }
 0x990   : > { %6265 = vmatmul.msk.f32.gmra.mxu1 %vm599_vm1, %v7924_v2  ;;  %3051 = vmatpush.msrb.mxu2 %v2988_v32  ;;  %v3031_v32 = vld [vmem:[%s11360_s12 + $0x798] sm:$0xff] }
 0x991   : > { %3147 = vmatpush.msrb.mxu3 %v3036_v27 }
 0x992   : > { %3052 = vmatpush.msrb.mxu2 %v2987_v42 }
 0x993   : > { %6254 = vmatmul.msk.f32.gmra.mxu2 %vm599_vm1, %v7911_v37  ;;  %3148 = vmatpush.msrb.mxu3 %v3035_v33  ;;  %v2982_v33 = vld [vmem:[%s11360_s12 + $0x610] sm:$0xff] }
 0x994   : > { %6269 = vmatmul.msk.f32.gmra.mxu3 %vm599_vm1, %v7911_v37  ;;  %3053 = vmatpush.msrb.mxu2 %v2986_v43  ;;  %v3030_v43 = vld [vmem:[%s11360_s12 + $0x790] sm:$0xff] }
 0x995   : > { %3149 = vmatpush.msrb.mxu3 %v3034_v44 }
 0x996   : > { %3054 = vmatpush.msrb.mxu2 %v2985_v40  ;;  %v2981_v40 = vld [vmem:[%s11360_s12 + $0x608] sm:$0xff] }
 0x997   : > { %3150 = vmatpush.msrb.mxu3 %v3033_v15  ;;  %v3029_v15 = vld [vmem:[%s11360_s12 + $0x788] sm:$0xff] }
 0x998   : > { %3055 = vmatpush.msrb.mxu2 %v2984_v58  ;;  %v2980_v58 = vld [vmem:[%s11360_s12 + $0x600] sm:$0xff] }
 0x999   : > { %3151 = vmatpush.msrb.mxu3 %v3032_v8  ;;  %v3028_v8 = vld [vmem:[%s11360_s12 + $0x780] sm:$0xff] }
 0x99a   : > { %3056 = vmatpush.msrb.mxu2 %v2983_v29 }
 0x99b   : > { %6255 = vmatmul.msk.f32.gmra.mxu2 %vm599_vm1, %v7924_v2  ;;  %3152 = vmatpush.msrb.mxu3 %v3031_v32 }
 0x99c   : > { %6270 = vmatmul.msk.f32.gmra.mxu3 %vm599_vm1, %v7924_v2  ;;  %3057 = vmatpush.msrb.mxu2 %v2982_v33 }
 0x99d   : > { %3153 = vmatpush.msrb.mxu3 %v3030_v43  ;;  %v2822_v43 = vld [vmem:[%s11359_s11 + $0xc] sm:$0xf] }
 0x99e   : > { %3058 = vmatpush.msrb.mxu2 %v2981_v40  ;;  %v2826_v2 = vperm.slane %v2822_v43, 2 }
 0x99f   : > { %3154 = vmatpush.msrb.mxu3 %v3029_v15  ;;  %v2825_v15 = vperm.slane %v2822_v43, 1 }
 0x9a0   : > { %3059 = vmatpush.msrb.mxu2 %v2980_v58 }
 0x9a1   : > { %3155 = vmatpush.msrb.mxu3 %v3028_v8 }
 0x9c4   : > { %v9013_v22 = vpop.f32.mrf.mxu0 }
 0x9c5   : > { %v9024_v24 = vpop.f32.mrf.mxu1 }
 0x9cc   : > { %v9065_v36 = vpop.f32.mrf.mxu0 }
 0x9cd   : > { %v9076_v28 = vpop.f32.mrf.mxu1 }
 0x9d4   : > { %v9111_v17 = vpop.f32.mrf.mxu0 }
 0x9d5   : > { %v9119_v31 = vpop.f32.mrf.mxu1 }
 0x9d6   : > { %v9121_v13 = vpop.f32.mrf.mxu2 }
 0x9d7   : > { %v9129_v48 = vpop.f32.mrf.mxu3 }
 0x9dc   : > { %v9143_v20 = vpop.f32.mrf.mxu0 }
 0x9dd   : > { %11412 = vst [vmem:[#allocation18_spill] sm:$0xff] %v9143_v20  ;;  %v9151_v27 = vpop.f32.mrf.mxu1 }
 0x9de   : > { %11413 = vst [vmem:[#allocation19_spill] sm:$0xff] %v9151_v27  ;;  %v9153_v42 = vpop.f32.mrf.mxu2 }
 0x9df   : > { %v9161_v44 = vpop.f32.mrf.mxu3 }
 0x9e4   : > { %v9175_v29 = vpop.f32.mrf.mxu0 }
 0x9e5   : > { %11414 = vst [vmem:[#allocation20_spill] sm:$0xff] %v9175_v29  ;;  %v9177_v32 = vpop.f32.mrf.mxu1 }
 0x9e6   : > { %11415 = vst [vmem:[#allocation21_spill] sm:$0xff] %v9177_v32  ;;  %v9179_v33 = vpop.f32.mrf.mxu2 }
 0x9e7   : > { %v9184_v40 = vpop.f32.mrf.mxu3 }
 0x9e8   : > { %11416 = vst [vmem:[#allocation22_spill] sm:$0xff] %v9184_v40 }
 0x9ec   : > { %v2881_v37 = vpop.f32.mrf.mxu0 }
 0x9ed   : > { %v2882_v60 = vadd.f32 %v2881_v37, %v2825_v15  ;;  %v2913_v56 = vpop.f32.mrf.mxu1 }
 0x9ee   : > { %v2914_v21 = vadd.f32 %v2913_v56, %v2826_v2  ;;  %v9186_v58 = vpop.f32.mrf.mxu2  ;;  %v2824_v56 = vperm.slane %v2822_v43, 0 }
 0x9ef   : > { %11417 = vst [vmem:[#allocation23_spill] sm:$0xff] %v9186_v58  ;;  %v2961_v63 = vmax.f32 %v2882_v60, 0.0  ;;  %v9188_v8 = vpop.f32.mrf.mxu3  ;;  %v2827_v60 = vperm.slane %v2822_v43, 3 }
 0x9f0   : > { %11418 = vst [vmem:[#allocation24_spill] sm:$0xff] %v9188_v8  ;;  %v2962_v32 = vmax.f32 %v2914_v21, 0.0 }
 0x9f1   : > { %3092 = vmatmul.f32.vlgmr.msra.gmra.mxu0 %v2961_v63 }
 0x9f2   : > { %3124 = vmatmul.f32.vlgmr.msrb.gmra.mxu1 %v2962_v32 }
 0x9f4   : > { %v2884_v29 = vpop.f32.mrf.mxu0 }
 0x9f5   : > { %v2885_v4 = vadd.f32 %v2884_v29, %v2825_v15  ;;  %v2916_v5 = vpop.f32.mrf.mxu1 }
 0x9f6   : > { %v2917_v27 = vadd.f32 %v2916_v5, %v2826_v2  ;;  %v9190_v0 = vpop.f32.mrf.mxu2 }
 0x9f7   : > { %11419 = vst [vmem:[#allocation25_spill] sm:$0xff] %v9190_v0  ;;  %v2965_v7 = vmax.f32 %v2885_v4, 0.0  ;;  %v9192_v41 = vpop.f32.mrf.mxu3 }
 0x9f8   : > { %11420 = vst [vmem:[#allocation26_spill] sm:$0xff] %v9192_v41  ;;  %v2966_v37 = vmax.f32 %v2917_v27, 0.0 }
 0x9f9   : > { %3095 = vmatmul.f32.gmra.mxu0 %v2965_v7 }
 0x9fa   : > { %3127 = vmatmul.f32.gmra.mxu1 %v2966_v37 }
 0x9fc   : > { %v2887_v12 = vpop.f32.mrf.mxu0 }
 0x9fd   : > { %v2888_v20 = vadd.f32 %v2887_v12, %v2825_v15  ;;  %v2919_v8 = vpop.f32.mrf.mxu1 }
 0x9fe   : > { %v2920_v21 = vadd.f32 %v2919_v8, %v2826_v2  ;;  %v2849_v63 = vpop.f32.mrf.mxu2 }
 0x9ff   : > { %v2969_v32 = vmax.f32 %v2888_v20, 0.0  ;;  %v2850_v58 = vadd.f32 %v2849_v63, %v2824_v56  ;;  %v2945_v29 = vpop.f32.mrf.mxu3 }
 0xa00   : > { %v2970_v40 = vmax.f32 %v2920_v21, 0.0  ;;  %v2946_v5 = vadd.f32 %v2945_v29, %v2827_v60 }
 0xa01   : > { %v2960_v1 = vmax.f32 %v2850_v58, 0.0  ;;  %3098 = vmatmul.f32.gmra.mxu0 %v2969_v32 }
 0xa02   : > { %v2963_v4 = vmax.f32 %v2946_v5, 0.0  ;;  %3130 = vmatmul.f32.gmra.mxu1 %v2970_v40 }
 0xa03   : > { %3060 = vmatmul.f32.vlgmr.msrb.gmra.mxu2 %v2960_v1 }
 0xa04   : > { %3156 = vmatmul.f32.vlgmr.msrb.gmra.mxu3 %v2963_v4  ;;  %v2890_v7 = vpop.f32.mrf.mxu0 }
 0xa05   : > { %v2891_v27 = vadd.f32 %v2890_v7, %v2825_v15  ;;  %v2922_v37 = vpop.f32.mrf.mxu1 }
 0xa06   : > { %v2923_v41 = vadd.f32 %v2922_v37, %v2826_v2  ;;  %v2852_v43 = vpop.f32.mrf.mxu2 }
 0xa07   : > { %v2973_v12 = vmax.f32 %v2891_v27, 0.0  ;;  %v2853_v0 = vadd.f32 %v2852_v43, %v2824_v56  ;;  %v2948_v8 = vpop.f32.mrf.mxu3 }
 0xa08   : > { %v2974_v57 = vmax.f32 %v2923_v41, 0.0  ;;  %v2949_v20 = vadd.f32 %v2948_v8, %v2827_v60 }
 0xa09   : > { %v2964_v63 = vmax.f32 %v2853_v0, 0.0  ;;  %3101 = vmatmul.f32.gmra.mxu0 %v2973_v12 }
 0xa0a   : > { %v2967_v21 = vmax.f32 %v2949_v20, 0.0  ;;  %3133 = vmatmul.f32.gmra.mxu1 %v2974_v57 }
 0xa0b   : > { %3063 = vmatmul.f32.gmra.mxu2 %v2964_v63 }
 0xa0c   : > { %3159 = vmatmul.f32.gmra.mxu3 %v2967_v21  ;;  %v2893_v58 = vpop.f32.mrf.mxu0 }
 0xa0d   : > { %v2894_v40 = vadd.f32 %v2893_v58, %v2825_v15  ;;  %v2925_v1 = vpop.f32.mrf.mxu1 }
 0xa0e   : > { %v2926_v32 = vadd.f32 %v2925_v1, %v2826_v2  ;;  %v2855_v29 = vpop.f32.mrf.mxu2 }
 0xa0f   : > { %v2977_v5 = vmax.f32 %v2894_v40, 0.0  ;;  %v2856_v4 = vadd.f32 %v2855_v29, %v2824_v56  ;;  %v2951_v7 = vpop.f32.mrf.mxu3 }
 0xa10   : > { %v2978_v37 = vmax.f32 %v2926_v32, 0.0  ;;  %v2952_v27 = vadd.f32 %v2951_v7, %v2827_v60  ;;  %v2229_v32 = vadd.f32 %v8568_v10, %v8576_v26 }
 0xa11   : > { %v2968_v43 = vmax.f32 %v2856_v4, 0.0  ;;  %3104 = vmatmul.f32.gmra.mxu0 %v2977_v5  ;;  %v2232_v4 = vadd.f32 %v8572_v51, %v8584_v34 }
 0xa12   : > { %v2971_v41 = vmax.f32 %v2952_v27, 0.0  ;;  %3136 = vmatmul.f32.gmra.mxu1 %v2978_v37  ;;  %v2261_v29 = vadd.f32 %v8570_v53, %v2229_v32  ;;  %v2235_v53 = vadd.f32 %v8580_v45, %v8610_v54 }
 0xa13   : > { %3066 = vmatmul.f32.gmra.mxu2 %v2968_v43 }
 0xa14   : > { %3162 = vmatmul.f32.gmra.mxu3 %v2971_v41  ;;  %v2293_v5 = vadd.f32 %v8578_v55, %v2261_v29  ;;  %v11423_v29 = vld [vmem:[#allocation22_spill] sm:$0xff] }
 0xa16   : > { %v2858_v0 = vpop.f32.mrf.mxu2  ;;  %v2325_v7 = vadd.f32 %v8760_v3, %v2293_v5  ;;  %v11425_v5 = vld [vmem:[#allocation18_spill] sm:$0xff] }
 0xa17   : > { %v2859_v57 = vadd.f32 %v2858_v0, %v2824_v56  ;;  %v2954_v12 = vpop.f32.mrf.mxu3 }
 0xa18   : > { %v2955_v8 = vadd.f32 %v2954_v12, %v2827_v60  ;;  %v2357_v43 = vadd.f32 %v8676_v49, %v2325_v7 }
 0xa19   : > { %v2972_v20 = vmax.f32 %v2859_v57, 0.0 }
 0xa1a   : > { %v2975_v15 = vmax.f32 %v2955_v8, 0.0  ;;  %v2389_v51 = vadd.f32 %v8687_v25, %v2357_v43  ;;  %v2238_v25 = vadd.f32 %v8594_v9, %v8648_v6 }
 0xa1b   : > { %3069 = vmatmul.f32.gmra.mxu2 %v2972_v20 }
 0xa1c   : > { %3165 = vmatmul.f32.gmra.mxu3 %v2975_v15  ;;  %v2421_v41 = vadd.f32 %v8771_v52, %v2389_v51  ;;  %v2270_v57 = vadd.f32 %v8602_v14, %v2238_v25 }
 0xa1e   : > { %v2861_v2 = vpop.f32.mrf.mxu2  ;;  %v2302_v14 = vadd.f32 %v8659_v62, %v2270_v57 }
 0xa1f   : > { %v2862_v63 = vadd.f32 %v2861_v2, %v2824_v56  ;;  %v2957_v21 = vpop.f32.mrf.mxu3  ;;  %v2264_v56 = vadd.f32 %v8574_v47, %v2232_v4  ;;  %v2267_v47 = vadd.f32 %v8582_v59, %v2235_v53 }
 0xa20   : > { %v2958_v58 = vadd.f32 %v2957_v21, %v2827_v60  ;;  %v2723_v60 = vadd.f32 %v9013_v22, %v9121_v13  ;;  %v2726_v22 = vadd.f32 %v9065_v36, %v9153_v42  ;;  %v9224_v36 = vld [vmem:[%s11361_s13] ss:$0 sm:$0xff] }
 0xa21   : > { %v2976_v40 = vmax.f32 %v2862_v63, 0.0  ;;  %v2296_v10 = vadd.f32 %v8586_v23, %v2264_v56  ;;  %v11426_v56 = vld [vmem:[#allocation11_spill] sm:$0xff] }
 0xa22   : > { %v2979_v1 = vmax.f32 %v2958_v58, 0.0  ;;  %v2755_v26 = vadd.f32 %v9024_v24, %v2723_v60  ;;  %v2299_v24 = vadd.f32 %v8618_v11, %v2267_v47  ;;  %v2729_v11 = vadd.f32 %v9111_v17, %v9179_v33  ;;  %v11421_v58 = vld [vmem:[#allocation14_spill] sm:$0xff] }
 0xa23   : > { %3072 = vmatmul.f32.gmra.mxu2 %v2976_v40  ;;  %v2328_v55 = vadd.f32 %v8798_v30, %v2296_v10  ;;  %v11428_v10 = vld [vmem:[#allocation3_spill] sm:$0xff] }
 0xa24   : > { %3168 = vmatmul.f32.gmra.mxu3 %v2979_v1  ;;  %v2787_v3 = vadd.f32 %v9129_v48, %v2755_v26  ;;  %v2758_v48 = vadd.f32 %v9076_v28, %v2726_v22  ;;  %v2761_v17 = vadd.f32 %v9119_v31, %v2729_v11  ;;  %v11422_v1 = vld [vmem:[#allocation7_spill] sm:$0xff]  ;;  %v11429_v26 = vld [vmem:[#allocation8_spill] sm:$0xff] }
 0xa25   : > { %v2360_v45 = vadd.f32 %v8732_v18, %v2328_v55  ;;  %v2331_v18 = vadd.f32 %v8824_v38, %v2299_v24  ;;  %v11433_v24 = vld [vmem:[#allocation24_spill] sm:$0xff] }
 0xa26   : > { %v2801_v59 = vadd.f32 %v2787_v3, %v2421_v41  ;;  %v2790_v6 = vadd.f32 %v9161_v44, %v2758_v48  ;;  %v2241_v44 = vadd.f32 %v8626_v16, %v8704_v50  ;;  %v2793_v16 = vadd.f32 %v11423_v29, %v2761_v17  ;;  %v11424_v50 = vld [vmem:[#allocation23_spill] sm:$0xff]  ;;  %v11432_v41 = vld [vmem:[#allocation16_spill] sm:$0xff]  ;;  %v11434_v48 = vld [vmem:[#allocation25_spill] sm:$0xff] }
 0xa27   : > { %v2392_v52 = vadd.f32 %v8743_v61, %v2360_v45  ;;  %v2363_v15 = vadd.f32 %v8782_v35, %v2331_v18  ;;  %v2732_v4 = vadd.f32 %v11425_v5, %v11424_v50  ;;  %v11437_v11 = vld [vmem:[#allocation12_spill] sm:$0xff] }
 0xa28   : > { %v2273_v62 = vadd.f32 %v11422_v1, %v2241_v44 }
 0xa29   : > { %v2424_v20 = vadd.f32 %v8806_v46, %v2392_v52  ;;  %v2395_v35 = vadd.f32 %v8790_v39, %v2363_v15 }
 0xa2a   : > { %v2305_v51 = vadd.f32 %v11429_v26, %v2273_v62  ;;  %v11442_v62 = vld [vmem:[#allocation17_spill] sm:$0xff] }
 0xa2b   : > { %v2802_v63 = vadd.f32 %v2790_v6, %v2424_v20  ;;  %v2427_v60 = vadd.f32 %v11426_v56, %v2395_v35  ;;  %v11441_v35 = vld [vmem:[#allocation26_spill] sm:$0xff] }
 0xa2c   : > { %v2337_v45 = vadd.f32 %v11432_v41, %v2305_v51 }
 0xa2d   : > { %v2803_v55 = vadd.f32 %v2793_v16, %v2427_v60  ;;  %v11443_v16 = vld [vmem:[#allocation5_spill] sm:$0xff]  ;;  %v11444_v60 = vld [vmem:[#allocation6_spill] sm:$0xff] }
 0xa6e   : > { %v3093_v37 = vpop.f32.mrf.mxu0 }
 0xa6f   : > { %v3125_v27 = vpop.f32.mrf.mxu1 }
 0xa76   : > { %v3096_v23 = vpop.f32.mrf.mxu0 }
 0xa77   : > { %v3128_v30 = vpop.f32.mrf.mxu1 }
 0xa7e   : > { %v3099_v2 = vpop.f32.mrf.mxu0 }
 0xa7f   : > { %v3131_v46 = vpop.f32.mrf.mxu1 }
 0xa86   : > { %v3061_v34 = vpop.f32.mrf.mxu2 }
 0xa87   : > { %v3094_v49 = vadd.f32 %v3093_v37, %v3061_v34  ;;  %v3157_v13 = vpop.f32.mrf.mxu3  ;;  %v11430_v34 = vld [vmem:[#allocation19_spill] sm:$0xff]  ;;  %v3134_v25 = vpop.f32.mrf.mxu1 }
 0xa88   : > { %v2764_v47 = vadd.f32 %v11430_v34, %v2732_v4 }
 0xa89   : > { %v3126_v54 = vadd.f32 %v3125_v27, %v3094_v49  ;;  %v11427_v27 = vld [vmem:[#allocation9_spill] sm:$0xff]  ;;  %v3102_v49 = vpop.f32.mrf.mxu0 }
 0xa8b   : > { %v3158_v0 = vadd.f32 %v3157_v13, %v3126_v54  ;;  %v11431_v13 = vld [vmem:[#allocation10_spill] sm:$0xff] }
 0xa8d   : > { %v3172_v42 = vadd.f32 %v3158_v0, %v2801_v59  ;;  %v2796_v59 = vadd.f32 %v11433_v24, %v2764_v47  ;;  %v11435_v0 = vld [vmem:[#allocation20_spill] sm:$0xff] }
 0xa8e   : > { %v3064_v9 = vpop.f32.mrf.mxu2  ;;  %v2735_v52 = vadd.f32 %v11435_v0, %v11434_v48 }
 0xa8f   : > { %v3097_v28 = vadd.f32 %v3096_v23, %v3064_v9  ;;  %v3160_v12 = vpop.f32.mrf.mxu3  ;;  %v3181_v8 = vadd.f32 %v9224_v36, %v3172_v42  ;;  %v11436_v9 = vld [vmem:[#allocation15_spill] sm:$0xff]  ;;  %v3137_v1 = vpop.f32.mrf.mxu1 }
 0xa91   : > { %v3129_v61 = vadd.f32 %v3128_v30, %v3097_v28  ;;  %v9236_v38 = vadd.f32 %v3181_v8, %v7814_v19  ;;  %v2334_v19 = vadd.f32 %v11421_v58, %v2302_v14  ;;  %v2369_v28 = vadd.f32 %v11437_v11, %v2337_v45  ;;  %v11438_v8 = vld [vmem:[#allocation4_spill] sm:$0xff] }
 0xa93   : > { %v3161_v33 = vadd.f32 %v3160_v12, %v3129_v61  ;;  %v3193_v21 = vsel %vm599_vm1, %v9236_v38, 0.0  ;;  %v2366_v43 = vadd.f32 %v11427_v27, %v2334_v19  ;;  %v11439_v61 = vld [vmem:[#allocation21_spill] sm:$0xff] }
 0xa94   : > { %3194 = vadd.xlane.f32.xlu2 %v3193_v21  ;;  %v2767_v14 = vadd.f32 %v11439_v61, %v2735_v52  ;;  %v3105_v21 = vpop.f32.mrf.mxu0 }
 0xa95   : > { %v3173_v40 = vadd.f32 %v3161_v33, %v2802_v63  ;;  %v2398_v23 = vadd.f32 %v11431_v13, %v2366_v43  ;;  %v11440_v63 = vld [vmem:[#allocation13_spill] sm:$0xff] }
 0xa96   : > { %v3067_v32 = vpop.f32.mrf.mxu2  ;;  %v2401_v17 = vadd.f32 %v11440_v63, %v2369_v28  ;;  %v2799_v58 = vadd.f32 %v11441_v35, %v2767_v14 }
 0xa97   : > { %v3100_v31 = vadd.f32 %v3099_v2, %v3067_v32  ;;  %v3163_v7 = vpop.f32.mrf.mxu3  ;;  %v3182_v37 = vadd.f32 %v9224_v36, %v3173_v40  ;;  %v2430_v6 = vadd.f32 %v11436_v9, %v2398_v23  ;;  %v6272_v9 = vld [vmem:[%s11352_s4 + $0x28] sm:$0xff] }
 0xa98   : > { %v2433_v32 = vadd.f32 %v11442_v62, %v2401_v17  ;;  %v9331_v62 = vld [vmem:[%s11363_s15] ss:$0 sm:$0xff] }
 0xa99   : > { %v3132_v39 = vadd.f32 %v3131_v46, %v3100_v31  ;;  %v3187_v53 = vadd.f32 %v3182_v37, %v11428_v10  ;;  %v2804_v15 = vadd.f32 %v2796_v59, %v2430_v6  ;;  %v11445_v10 = vld [vmem:[#allocation2_spill] sm:$0xff] }
 0xa9a   : > { %v2805_v4 = vadd.f32 %v2799_v58, %v2433_v32  ;;  %v6271_v6 = vld [vmem:[%s11352_s4 + $0x20] sm:$0xff] }
 0xa9b   : > { %v3164_v3 = vadd.f32 %v3163_v7, %v3132_v39  ;;  %v3196_v22 = vsel %vm599_vm1, %v3187_v53, 0.0 }
 0xa9c   : > { %3197 = vadd.xlane.f32.xlu0 %v3196_v22 }
 0xa9d   : > { %v3174_v54 = vadd.f32 %v3164_v3, %v2803_v55 }
 0xa9e   : > { %v3070_v30 = vpop.f32.mrf.mxu2 }
 0xa9f   : > { %v3103_v18 = vadd.f32 %v3102_v49, %v3070_v30  ;;  %v3183_v42 = vadd.f32 %v9224_v36, %v3174_v54  ;;  %v3166_v57 = vpop.f32.mrf.mxu3 }
 0xaa1   : > { %v3135_v12 = vadd.f32 %v3134_v25, %v3103_v18  ;;  %v3188_v20 = vadd.f32 %v3183_v42, %v11438_v8  ;;  %v6274_v42 = vld [vmem:[%s11352_s4 + $0x38] sm:$0xff] }
 0xaa2   : > { %3356 = vmatpush.msra.mxu2 %v6274_v42 }
 0xaa3   : > { %v3167_v44 = vadd.f32 %v3166_v57, %v3135_v12  ;;  %v3199_v2 = vsel %vm599_vm1, %v3188_v20, 0.0  ;;  %v6273_v57 = vld [vmem:[%s11352_s4 + $0x30] sm:$0xff] }
 0xaa4   : > { %3200 = vadd.xlane.f32.xlu1 %v3199_v2  ;;  %3357 = vmatpush.msra.mxu2 %v6273_v57 }
 0xaa5   : > { %v3175_v33 = vadd.f32 %v3167_v44, %v2804_v15 }
 0xaa6   : > { %v3073_v46 = vpop.f32.mrf.mxu2  ;;  %3358 = vmatpush.msra.mxu2 %v6272_v9 }
 0xaa7   : > { %v3106_v19 = vadd.f32 %v3105_v21, %v3073_v46  ;;  %v3184_v40 = vadd.f32 %v9224_v36, %v3175_v33  ;;  %v3169_v5 = vpop.f32.mrf.mxu3 }
 0xaa8   : > { %3359 = vmatpush.msra.mxu2 %v6271_v6 }
 0xaa9   : > { %v3138_v29 = vadd.f32 %v3137_v1, %v3106_v19  ;;  %v3189_v50 = vadd.f32 %v3184_v40, %v11443_v16  ;;  %v9326_v19 = vld [vmem:[%s11362_s14] ss:$0 sm:$0xff] }
 0xaab   : > { %v3170_v31 = vadd.f32 %v3169_v5, %v3138_v29  ;;  %v3202_v7 = vsel %vm599_vm1, %v3189_v50, 0.0 }
 0xaac   : > { %3203 = vadd.xlane.f32.xlu2 %v3202_v7 }
 0xaad   : > { %v3176_v37 = vadd.f32 %v3170_v31, %v2805_v4 }
 0xaaf   : > { %v3185_v56 = vadd.f32 %v9224_v36, %v3176_v37 }
 0xab1   : > { %v3190_v27 = vadd.f32 %v3185_v56, %v11444_v60 }
 0xab3   : > { %v3205_v43 = vsel %vm1566_vm7, %v3190_v27, 0.0 }
 0xab4   : > { %3206 = vadd.xlane.f32.xlu0 %v3205_v43 }
 0xb07   : > { %v3195_v39 = vpop.xlane.xlu2 %3194 }
 0xb08   : > { %v3208_v26 = vmul.f32 %v3195_v39, %v11445_v10 }
 0xb0a   : > { %v9279_v51 = vsub.f32 %v9236_v38, %v3208_v26 }
 0xb0c   : > { %v3218_v55 = vmul.f32 %v9279_v51, %v9279_v51 }
 0xb0e   : > { %v3223_v34 = vsel %vm599_vm1, %v3218_v55, 0.0 }
 0xb0f   : > { %v3198_v47 = vpop.xlane.xlu0 %3197  ;;  %3224 = vadd.xlane.f32.xlu1 %v3223_v34 }
 0xb10   : > { %v3209_v36 = vmul.f32 %v3198_v47, %v11445_v10 }
 0xb12   : > { %v9285_v3 = vsub.f32 %v3187_v53, %v3209_v36 }
 0xb14   : > { %v3219_v22 = vmul.f32 %v9285_v3, %v9285_v3 }
 0xb16   : > { %v3226_v49 = vsel %vm599_vm1, %v3219_v22, 0.0 }
 0xb17   : > { %v3201_v13 = vpop.xlane.xlu1 %3200  ;;  %3227 = vadd.xlane.f32.xlu2 %v3226_v49 }
 0xb18   : > { %v3210_v38 = vmul.f32 %v3201_v13, %v11445_v10 }
 0xb1a   : > { %v9291_v23 = vsub.f32 %v3188_v20, %v3210_v38 }
 0xb1c   : > { %v3220_v41 = vmul.f32 %v9291_v23, %v9291_v23 }
 0xb1e   : > { %v3229_v45 = vsel %vm599_vm1, %v3220_v41, 0.0 }
 0xb1f   : > { %3230 = vadd.xlane.f32.xlu0 %v3229_v45  ;;  %v3204_v54 = vpop.xlane.xlu2 %3203 }
 0xb20   : > { %v3211_v53 = vmul.f32 %v3204_v54, %v11445_v10 }
 0xb22   : > { %v9297_v25 = vsub.f32 %v3189_v50, %v3211_v53 }
 0xb24   : > { %v3221_v30 = vmul.f32 %v9297_v25, %v9297_v25 }
 0xb26   : > { %v3232_v24 = vsel %vm599_vm1, %v3221_v30, 0.0 }
 0xb27   : > { %v3207_v59 = vpop.xlane.xlu0 %3206  ;;  %3233 = vadd.xlane.f32.xlu1 %v3232_v24 }
 0xb28   : > { %v3212_v48 = vmul.f32 %v3207_v59, %v11445_v10 }
 0xb2a   : > { %v9303_v0 = vsub.f32 %v3190_v27, %v3212_v48 }
 0xb2c   : > { %v3222_v52 = vmul.f32 %v9303_v0, %v9303_v0 }
 0xb2e   : > { %v3235_v18 = vsel %vm1566_vm7, %v3222_v52, 0.0 }
 0xb2f   : > { %3236 = vadd.xlane.f32.xlu2 %v3235_v18 }
 0xb82   : > { %v3225_v11 = vpop.xlane.xlu1 %3224 }
 0xb83   : > { %v3238_v28 = vmul.f32 %v3225_v11, %v11445_v10 }
 0xb85   : > { %v3243_v12 = vadd.f32 1e-05, %v3238_v28 }
 0xb87   : > { %6984 = vrsqrt.f32 %v3243_v12  ;;  %vm3254_vm9 = vweird.f32 %v3243_v12 }
 0xb8a   : > { %v3228_v8 = vpop.xlane.xlu2 %3227 }
 0xb8b   : > { %v3239_v20 = vmul.f32 %v3228_v8, %v11445_v10 }
 0xb8d   : > { %v6985_v15 = vpop.eup %6984  ;;  %v3244_v61 = vadd.f32 1e-05, %v3239_v20 }
 0xb8e   : > { %v3249_v14 = vmul.f32 %v6985_v15, %v3243_v12  ;;  %vm3255_vm8 = vweird.f32 %v6985_v15 }
 0xb8f   : > { %6986 = vrsqrt.f32 %v3244_v61  ;;  %vm3256_vm10 = vmor %vm3254_vm9, %vm3255_vm8  ;;  %vm3264_vm12 = vweird.f32 %v3244_v61 }
 0xb90   : > { %v3250_v44 = vmul.f32 %v6985_v15, %v3249_v14  ;;  %v6885_v14 = vld [vmem:[%s11353_s5 + $0x1] ss:$0 sm:$0xff] }
 0xb92   : > { %v3251_v2 = vmul.f32 0.5, %v3250_v44  ;;  %v3231_v63 = vpop.xlane.xlu0 %3230 }
 0xb93   : > { %v3240_v17 = vmul.f32 %v3231_v63, %v11445_v10 }
 0xb94   : > { %v3252_v33 = vsub.f32 1.5, %v3251_v2 }
 0xb95   : > { %v6987_v21 = vpop.eup %6986  ;;  %v3245_v46 = vadd.f32 1e-05, %v3240_v17 }
 0xb96   : > { %v3253_v35 = vmul.f32 %v6985_v15, %v3252_v33  ;;  %v3259_v58 = vmul.f32 %v6987_v21, %v3244_v61  ;;  %vm3265_vm11 = vweird.f32 %v6987_v21 }
 0xb97   : > { %6988 = vrsqrt.f32 %v3245_v46  ;;  %vm3266_vm13 = vmor %vm3264_vm12, %vm3265_vm11  ;;  %vm3274_vm15 = vweird.f32 %v3245_v46 }
 0xb98   : > { %v3257_v40 = vsel %vm3256_vm10, %v6985_v15, %v3253_v35  ;;  %v3260_v1 = vmul.f32 %v6987_v21, %v3259_v58 }
 0xb99   : > { %v3298_v32 = vmul.f32 %v3257_v40, %v9279_v51 }
 0xb9a   : > { %v3261_v29 = vmul.f32 0.5, %v3260_v1  ;;  %v3234_v16 = vpop.xlane.xlu1 %3233 }
 0xb9b   : > { %v3306_v50 = vmul.f32 %v9326_v19, %v3298_v32  ;;  %v3241_v5 = vmul.f32 %v3234_v16, %v11445_v10 }
 0xb9c   : > { %v3262_v4 = vsub.f32 1.5, %v3261_v29 }
 0xb9d   : > { %v6989_v31 = vpop.eup %6988  ;;  %v9337_v7 = vadd.f32 %v9331_v62, %v3306_v50  ;;  %v3246_v37 = vadd.f32 1e-05, %v3241_v5 }
 0xb9e   : > { %v3263_v56 = vmul.f32 %v6987_v21, %v3262_v4  ;;  %v3269_v60 = vmul.f32 %v6989_v31, %v3245_v46  ;;  %vm3275_vm14 = vweird.f32 %v6989_v31 }
 0xb9f   : > { %6990 = vrsqrt.f32 %v3246_v37  ;;  %6276 = vmatmul.msk.f32.vlgmr.msra.gmra.mxu2 %vm599_vm1, %v9337_v7  ;;  %vm3276_vm8 = vmor %vm3274_vm15, %vm3275_vm14  ;;  %vm3284_vm10 = vweird.f32 %v3246_v37 }
 0xba0   : > { %v3267_v27 = vsel %vm3266_vm13, %v6987_v21, %v3263_v56  ;;  %v3270_v43 = vmul.f32 %v6989_v31, %v3269_v60 }
 0xba1   : > { %v3299_v39 = vmul.f32 %v3267_v27, %v9285_v3 }
 0xba2   : > { %v3271_v26 = vmul.f32 0.5, %v3270_v43  ;;  %v3237_v51 = vpop.xlane.xlu2 %3236 }
 0xba3   : > { %v3242_v55 = vmul.f32 %v3237_v51, %v11445_v10  ;;  %v3307_v34 = vmul.f32 %v9326_v19, %v3299_v39 }
 0xba4   : > { %v3272_v47 = vsub.f32 1.5, %v3271_v26 }
 0xba5   : > { %v6991_v36 = vpop.eup %6990  ;;  %v3247_v22 = vadd.f32 1e-05, %v3242_v55  ;;  %v9345_v49 = vadd.f32 %v9331_v62, %v3307_v34 }
 0xba6   : > { %v3273_v13 = vmul.f32 %v6989_v31, %v3272_v47  ;;  %v3279_v38 = vmul.f32 %v6991_v36, %v3246_v37  ;;  %vm3285_vm9 = vweird.f32 %v6991_v36 }
 0xba7   : > { %6992 = vrsqrt.f32 %v3247_v22  ;;  %6277 = vmatmul.msk.f32.gmra.mxu2 %vm599_vm1, %v9345_v49  ;;  %vm3286_vm11 = vmor %vm3284_vm10, %vm3285_vm9  ;;  %vm3294_vm13 = vweird.f32 %v3247_v22 }
 0xba8   : > { %v3277_v3 = vsel %vm3276_vm8, %v6989_v31, %v3273_v13  ;;  %v3280_v41 = vmul.f32 %v6991_v36, %v3279_v38 }
 0xba9   : > { %v3300_v45 = vmul.f32 %v3277_v3, %v9291_v23 }
 0xbaa   : > { %v3281_v54 = vmul.f32 0.5, %v3280_v41 }
 0xbab   : > { %v3308_v53 = vmul.f32 %v9326_v19, %v3300_v45 }
 0xbac   : > { %v3282_v30 = vsub.f32 1.5, %v3281_v54 }
 0xbad   : > { %v6993_v24 = vpop.eup %6992  ;;  %v9352_v59 = vadd.f32 %v9331_v62, %v3308_v53 }
 0xbae   : > { %v3283_v48 = vmul.f32 %v6991_v36, %v3282_v30  ;;  %v3289_v52 = vmul.f32 %v6993_v24, %v3247_v22  ;;  %vm3295_vm12 = vweird.f32 %v6993_v24 }
 0xbaf   : > { %6278 = vmatmul.msk.f32.gmra.mxu2 %vm599_vm1, %v9352_v59  ;;  %vm3296_vm14 = vmor %vm3294_vm13, %vm3295_vm12 }
 0xbb0   : > { %v3287_v18 = vsel %vm3286_vm11, %v6991_v36, %v3283_v48  ;;  %v3290_v42 = vmul.f32 %v6993_v24, %v3289_v52 }
 0xbb1   : > { %v3301_v23 = vmul.f32 %v3287_v18, %v9297_v25 }
 0xbb2   : > { %v3291_v57 = vmul.f32 0.5, %v3290_v42 }
 0xbb3   : > { %v3309_v9 = vmul.f32 %v9326_v19, %v3301_v23 }
 0xbb4   : > { %v3292_v6 = vsub.f32 1.5, %v3291_v57 }
 0xbb5   : > { %v9359_v11 = vadd.f32 %v9331_v62, %v3309_v9 }
 0xbb6   : > { %v3293_v28 = vmul.f32 %v6993_v24, %v3292_v6 }
 0xbb7   : > { %6279 = vmatmul.msk.f32.gmra.mxu2 %vm599_vm1, %v9359_v11 }
 0xbb8   : > { %v3297_v12 = vsel %vm3296_vm14, %v6993_v24, %v3293_v28 }
 0xbb9   : > { %v3302_v8 = vmul.f32 %v3297_v12, %v9303_v0 }
 0xbbb   : > { %v3310_v20 = vmul.f32 %v9326_v19, %v3302_v8 }
 0xbbd   : > { %v9366_v25 = vadd.f32 %v9331_v62, %v3310_v20 }
 0xbbf   : > { %6280 = vmatmul.msk.f32.gmra.mxu2 %vm599_vm1, %v9366_v25 }
 0xc22   : > { %v3361_v15 = vpop.f32.mrf.mxu2 }
 0xc23   : > { %v3362_v0 = vadd.f32 %v6885_v14, %v3361_v15 }
 0xc25   : > { %v9382_v35 = vmul.f32 0.35355338, %v3362_v0 }
 0xc2a   : > { %v3364_v61 = vpop.f32.mrf.mxu2 }
 0xc2b   : > { %v3365_v21 = vadd.f32 %v6885_v14, %v3364_v61 }
 0xc2d   : > { %v9391_v19 = vmul.f32 0.35355338, %v3365_v21  ;;  %v9438_v32 = vpack.i.bf16 %v3362_v0, %v3365_v21 }
 0xc32   : > { %v3367_v44 = vpop.f32.mrf.mxu2 }
 0xc33   : > { %v3368_v2 = vadd.f32 %v6885_v14, %v3367_v44 }
 0xc35   : > { %3585 = vrot.lane.b32.xlu2 %v3368_v2, %s7104_s17  ;;  %v9384_v58 = vmul.f32 0.35355338, %v3368_v2 }
 0xc3a   : > { %v3370_v63 = vpop.f32.mrf.mxu2 }
 0xc3b   : > { %v3371_v17 = vadd.f32 %v6885_v14, %v3370_v63 }
 0xc3d   : > { %3587 = vrot.lane.b32.xlu1 %v3371_v17, %s7104_s17  ;;  %3581 = vrot.lane.b32.xlu2 %v3362_v0, %s7104_s17  ;;  %v9398_v40 = vmul.f32 0.35355338, %v3371_v17  ;;  %v9431_v62 = vpack.i.bf16 %v3368_v2, %v3371_v17 }
 0xc42   : > { %v3373_v33 = vpop.f32.mrf.mxu2 }
 0xc43   : > { %v9376_v46 = vadd.f32 %v6885_v14, %v3373_v33 }
 0xc45   : > { %3392 = vrot.lane.b32.xlu1 %v3371_v17, %s7102_s30  ;;  %3388 = vrot.lane.b32.xlu2 %v3365_v21, %s7102_s30  ;;  %v9409_v1 = vmul.f32 0.35355338, %v9376_v46 }
 0xc46   : > { %3589 = vrot.lane.b32.xlu0 %v9376_v46, %s7104_s17 }
 0xc4d   : > { %3571 = vrot.lane.b32.xlu1 %v9382_v35, %s7106_s19  ;;  %3575 = vrot.lane.b32.xlu2 %v9384_v58, %s7106_s19 }
 0xc4e   : > { %3583 = vrot.lane.b32.xlu0 %v3365_v21, %s7104_s17  ;;  %s11448_s17 = smov 112  }
 0xc55   : > { %3967 = vrot.lane.b32.xlu2 %v3371_v17, %s11446_s29  ;;  %3573 = vrot.lane.b32.xlu1 %v9391_v19, %s7106_s19 }
 0xc56   : > { %3394 = vrot.lane.b32.xlu0 %v9376_v46, %s7102_s30 }
 0xc5d   : > { %3577 = vrot.lane.b32.xlu1 %v9398_v40, %s7106_s19  ;;  %3779 = vrot.lane.b32.xlu2 %v9376_v46, %s11447_s26 }
 0xc5e   : > { %3390 = vrot.lane.b32.xlu0 %v3368_v2, %s7102_s30 }
 0xc65   : > { %3777 = vrot.lane.b32.xlu1 %v3371_v17, %s11447_s26  ;;  %3961 = vrot.lane.b32.xlu2 %v3362_v0, %s11446_s29 }
 0xc66   : > { %3386 = vrot.lane.b32.xlu0 %v3362_v0, %s7102_s30  ;;  %s11450_s30 = smov 56  }
 0xc6d   : > { %3773 = vrot.lane.b32.xlu2 %v3365_v21, %s11447_s26  ;;  %3579 = vrot.lane.b32.xlu1 %v9409_v1, %s7106_s19  ;;  %s11451_s19 = smov 64  }
 0xc6e   : > { %3969 = vrot.lane.b32.xlu0 %v9376_v46, %s11446_s29 }
 0xc75   : > { %3761 = vrot.lane.b32.xlu2 %v9382_v35, %s11448_s17  ;;  %3951 = vrot.lane.b32.xlu1 %v9382_v35, %s11449_s20 }
 0xc76   : > { %3965 = vrot.lane.b32.xlu0 %v3368_v2, %s11446_s29 }
 0xc7d   : > { %3957 = vrot.lane.b32.xlu2 %v9398_v40, %s11449_s20  ;;  %3953 = vrot.lane.b32.xlu1 %v9391_v19, %s11449_s20 }
 0xc7e   : > { %3963 = vrot.lane.b32.xlu0 %v3365_v21, %s11446_s29 }
 0xc85   : > { %3767 = vrot.lane.b32.xlu2 %v9398_v40, %s11448_s17  ;;  %3763 = vrot.lane.b32.xlu1 %v9391_v19, %s11448_s17 }
 0xc86   : > { %3775 = vrot.lane.b32.xlu0 %v3368_v2, %s11447_s26 }
 0xc8d   : > { %6838 = vrot.lane.b32.xlu2 %v9431_v62, %s11450_s30  ;;  %3959 = vrot.lane.b32.xlu1 %v9409_v1, %s11449_s20 }
 0xc8e   : > { %3771 = vrot.lane.b32.xlu0 %v3362_v0, %s11447_s26 }
 0xc8f   : > { %v3586_v29 = vpop.permute.xlu2 %3585 }
 0xc95   : > { %6848 = vrot.lane.b32.xlu2 %v9431_v62, %s11451_s19  ;;  %6843 = vrot.lane.b32.xlu1 %v9438_v32, %s11450_s30 }
 0xc96   : > { %3955 = vrot.lane.b32.xlu0 %v9384_v58, %s11449_s20  ;;  %s11457_s20 = smul.u32 40, %s11459_s22 }
 0xc97   : > { %v3582_v50 = vpop.permute.xlu2 %3581 }
 0xc9d   : > { %4086 = vrot.lane.b32.xlu2 %v9376_v46, %s11452_s23  ;;  %6853 = vrot.lane.b32.xlu1 %v9438_v32, %s11451_s19 }
 0xc9e   : > { %3765 = vrot.lane.b32.xlu0 %v9384_v58, %s11448_s17 }
 0xc9f   : > { %v3389_v31 = vpop.permute.xlu2 %3388 }
 0xca6   : > { %3769 = vrot.lane.b32.xlu0 %v9409_v1, %s11448_s17 }
 0xca7   : > { %v3576_v60 = vpop.permute.xlu2 %3575 }
 0xcae   : > { %3706 = vrot.lane.b32.xlu0 %v9376_v46, %s11450_s30 }
 0xcaf   : > { %v3588_v16 = vpop.permute.xlu1 %3587  ;;  %v3968_v39 = vpop.permute.xlu2 %3967 }
 0xcb6   : > { %3516 = vrot.lane.b32.xlu0 %v9376_v46, %s11451_s19 }
 0xcb7   : > { %v3393_v5 = vpop.permute.xlu1 %3392  ;;  %v3780_v34 = vpop.permute.xlu2 %3779 }
 0xcb8   : > { %v3590_v4 = vpop.permute.xlu0 %3589 }
 0xcb9   : > { %6297 = vmatpush.xpose.msk.msra.mxu3 %vm667_vm2, %v3590_v4 }
 0xcbd   : > { %6298 = vmatpush.xpose.msk.msra.mxu3 %vm667_vm2, %v3588_v16 }
 0xcbe   : > { %6858 = vrot.lane.b32.xlu0 %v9431_v62, %s11452_s23 }
 0xcbf   : > { %v3572_v37 = vpop.permute.xlu1 %3571  ;;  %v3962_v22 = vpop.permute.xlu2 %3961 }
 0xcc0   : > { %v3584_v56 = vpop.permute.xlu0 %3583 }
 0xcc1   : > { %6299 = vmatpush.xpose.msk.msra.mxu3 %vm667_vm2, %v3586_v29 }
 0xcc5   : > { %6300 = vmatpush.xpose.msk.msra.mxu3 %vm667_vm2, %v3584_v56 }
 0xcc7   : > { %v3574_v43 = vpop.permute.xlu1 %3573  ;;  %v3774_v3 = vpop.permute.xlu2 %3773 }
 0xcc8   : > { %v3395_v27 = vpop.permute.xlu0 %3394 }
 0xcc9   : > { %6281 = vmatpush.xpose.msk.msrb.mxu0 %vm667_vm2, %v3395_v27  ;;  %6301 = vmatpush.xpose.msk.msra.mxu3 %vm667_vm2, %v3582_v50 }
 0xccc   : > { %6302 = vmatmul.msk.f32.vlgmr.msra.gmra.mxu3 %vm667_vm2, %v3572_v37 }
 0xccd   : > { %6282 = vmatpush.xpose.msk.msrb.mxu0 %vm667_vm2, %v3393_v5 }
 0xccf   : > { %v3578_v51 = vpop.permute.xlu1 %3577  ;;  %v3762_v54 = vpop.permute.xlu2 %3761 }
 0xcd0   : > { %v3391_v26 = vpop.permute.xlu0 %3390 }
 0xcd1   : > { %6283 = vmatpush.xpose.msk.msrb.mxu0 %vm667_vm2, %v3391_v26 }
 0xcd4   : > { %6303 = vmatmul.msk.f32.gmra.mxu3 %vm667_vm2, %v3574_v43 }
 0xcd5   : > { %6284 = vmatpush.xpose.msk.msrb.mxu0 %vm667_vm2, %v3389_v31 }
 0xcd7   : > { %v3778_v47 = vpop.permute.xlu1 %3777  ;;  %v3958_v48 = vpop.permute.xlu2 %3957 }
 0xcd8   : > { %v3387_v55 = vpop.permute.xlu0 %3386 }
 0xcd9   : > { %6285 = vmatpush.xpose.msk.msrb.mxu0 %vm667_vm2, %v3387_v55 }
 0xcdc   : > { %6286 = vmatmul.msk.f32.vlgmr.msrb.gmra.mxu0 %vm667_vm2, %v9382_v35  ;;  %6304 = vmatmul.msk.f32.gmra.mxu3 %vm667_vm2, %v3576_v60 }
 0xcdd   : > { %6313 = vmatpush.xpose.msk.msra.mxu0 %vm667_vm2, %v3780_v34 }
 0xcdf   : > { %v3580_v38 = vpop.permute.xlu1 %3579  ;;  %v3768_v18 = vpop.permute.xlu2 %3767 }
 0xce0   : > { %v3970_v36 = vpop.permute.xlu0 %3969 }
 0xce1   : > { %6314 = vmatpush.xpose.msk.msra.mxu0 %vm667_vm2, %v3778_v47  ;;  %6329 = vmatpush.xpose.msk.msrb.mxu3 %vm667_vm2, %v3970_v36 }
 0xce4   : > { %6287 = vmatmul.msk.f32.gmra.mxu0 %vm667_vm2, %v9391_v19  ;;  %6305 = vmatmul.msk.f32.gmra.mxu3 %vm667_vm2, %v3578_v51 }
 0xce5   : > { %6330 = vmatpush.xpose.msk.msrb.mxu3 %vm667_vm2, %v3968_v39 }
 0xce7   : > { %v3952_v45 = vpop.permute.xlu1 %3951  ;;  %v6839_v57 = vpop.permute.xlu2 %6838 }
 0xce8   : > { %v3966_v13 = vpop.permute.xlu0 %3965  ;;  %v6840_v20 = vunpack.i.l.bf16 %v6839_v57  ;;  %v6841_v15 = vunpack.i.h.bf16 %v6839_v57 }
 0xce9   : > { %6331 = vmatpush.xpose.msk.msrb.mxu3 %vm667_vm2, %v3966_v13 }
 0xcec   : > { %6288 = vmatmul.msk.f32.gmra.mxu0 %vm667_vm2, %v9384_v58  ;;  %6306 = vmatmul.msk.f32.gmra.mxu3 %vm667_vm2, %v3580_v38 }
 0xcef   : > { %v3954_v30 = vpop.permute.xlu1 %3953  ;;  %v6849_v28 = vpop.permute.xlu2 %6848 }
 0xcf0   : > { %v3964_v41 = vpop.permute.xlu0 %3963  ;;  %v6850_v2 = vunpack.i.l.bf16 %v6849_v28  ;;  %v6851_v17 = vunpack.i.h.bf16 %v6849_v28 }
 0xcf1   : > { %6332 = vmatpush.xpose.msk.msrb.mxu3 %vm667_vm2, %v3964_v41 }
 0xcf4   : > { %6289 = vmatmul.msk.f32.gmra.mxu0 %vm667_vm2, %v9398_v40 }
 0xcf5   : > { %6333 = vmatpush.xpose.msk.msrb.mxu3 %vm667_vm2, %v3962_v22 }
 0xcf7   : > { %v3764_v42 = vpop.permute.xlu1 %3763  ;;  %v4087_v63 = vpop.permute.xlu2 %4086 }
 0xcf8   : > { %v3776_v53 = vpop.permute.xlu0 %3775  ;;  %6334 = vmatmul.msk.f32.vlgmr.msrb.gmra.mxu3 %vm667_vm2, %v3952_v45 }
 0xcf9   : > { %6315 = vmatpush.xpose.msk.msra.mxu0 %vm667_vm2, %v3776_v53 }
 0xcfc   : > { %6290 = vmatmul.msk.f32.gmra.mxu0 %vm667_vm2, %v9409_v1 }
 0xcfd   : > { %6316 = vmatpush.xpose.msk.msra.mxu0 %vm667_vm2, %v3774_v3 }
 0xcff   : > { %v3960_v9 = vpop.permute.xlu1 %3959 }
 0xd00   : > { %v3772_v24 = vpop.permute.xlu0 %3771  ;;  %6335 = vmatmul.msk.f32.gmra.mxu3 %vm667_vm2, %v3954_v30 }
 0xd01   : > { %6317 = vmatpush.xpose.msk.msra.mxu0 %vm667_vm2, %v3772_v24 }
 0xd04   : > { %6318 = vmatmul.msk.f32.vlgmr.msra.gmra.mxu0 %vm667_vm2, %v3762_v54 }
 0xd07   : > { %v6844_v12 = vpop.permute.xlu1 %6843 }
 0xd08   : > { %v3956_v52 = vpop.permute.xlu0 %3955  ;;  %v6845_v61 = vunpack.i.l.bf16 %v6844_v12  ;;  %v6846_v14 = vunpack.i.h.bf16 %v6844_v12 }
 0xd09   : > { %6336 = vmatmul.msk.f32.gmra.mxu3 %vm667_vm2, %v3956_v52 }
 0xd0c   : > { %6319 = vmatmul.msk.f32.gmra.mxu0 %vm667_vm2, %v3764_v42 }
 0xd0f   : > { %v6854_v0 = vpop.permute.xlu1 %6853 }
 0xd10   : > { %v3766_v23 = vpop.permute.xlu0 %3765  ;;  %v6855_v33 = vunpack.i.l.bf16 %v6854_v0  ;;  %v6856_v21 = vunpack.i.h.bf16 %v6854_v0 }
 0xd11   : > { %6337 = vmatmul.msk.f32.gmra.mxu3 %vm667_vm2, %v3958_v48 }
 0xd14   : > { %6320 = vmatmul.msk.f32.gmra.mxu0 %vm667_vm2, %v3766_v23 }
 0xd18   : > { %v3770_v6 = vpop.permute.xlu0 %3769 }
 0xd19   : > { %6338 = vmatmul.msk.f32.gmra.mxu3 %vm667_vm2, %v3960_v9 }
 0xd1c   : > { %6321 = vmatmul.msk.f32.gmra.mxu0 %vm667_vm2, %v3768_v18 }
 0xd20   : > { %v3707_v8 = vpop.permute.xlu0 %3706 }
 0xd21   : > { %6307 = vmatpush.msk.msrb.mxu2 %vm811_vm3, %v3707_v8 }
 0xd23   : > { %3741 = vmatpush.msrb.mxu2 %v6840_v20 }
 0xd24   : > { %6322 = vmatmul.msk.f32.gmra.mxu0 %vm667_vm2, %v3770_v6 }
 0xd25   : > { %3742 = vmatpush.msrb.mxu2 %v6841_v15 }
 0xd27   : > { %3743 = vmatpush.msrb.mxu2 %v6845_v61 }
 0xd28   : > { %v3517_v44 = vpop.permute.xlu0 %3516 }
 0xd29   : > { %6291 = vmatpush.msk.msra.mxu1 %vm811_vm3, %v3517_v44  ;;  %3744 = vmatpush.msrb.mxu2 %v6846_v14 }
 0xd2b   : > { %6339 = vmatpush.msk.msra.mxu2 %vm811_vm3, %v4087_v63  ;;  %3551 = vmatpush.msra.mxu1 %v6850_v2 }
 0xd2d   : > { %3552 = vmatpush.msra.mxu1 %v6851_v17 }
 0xd2f   : > { %3553 = vmatpush.msra.mxu1 %v6855_v33 }
 0xd30   : > { %v6859_v35 = vpop.permute.xlu0 %6858 }
 0xd31   : > { %v6860_v58 = vunpack.i.l.bf16 %v6859_v35  ;;  %3554 = vmatpush.msra.mxu1 %v6856_v21  ;;  %v6861_v19 = vunpack.i.h.bf16 %v6859_v35 }
 0xd33   : > { %4121 = vmatpush.msra.mxu2 %v6860_v58 }
 0xd35   : > { %4122 = vmatpush.msra.mxu2 %v6861_v19 }
 0xd4f   : > { %v3628_v40 = vpop.f32.mrf.mxu3 }
 0xd50   : > { %v3643_v1 = vsel %vm725_vm4, %v3628_v40, -inf }
 0xd51   : > { %3644 = vmax.xlane.f32.xlu1 %v3643_v1 }
 0xd57   : > { %v9509_v29 = vpop.f32.mrf.mxu3 }
 0xd58   : > { %v3646_v16 = vsel %vm725_vm4, %v9509_v29, -inf }
 0xd59   : > { %3647 = vmax.xlane.f32.xlu0 %v3646_v16  ;;  %v3438_v50 = vpop.f32.mrf.mxu0 }
 0xd5a   : > { %v3453_v5 = vsel %vm725_vm4, %v3438_v50, -inf }
 0xd5b   : > { %3454 = vmax.xlane.f32.xlu2 %v3453_v5 }
 0xd5f   : > { %v9514_v4 = vpop.f32.mrf.mxu3 }
 0xd60   : > { %v3649_v56 = vsel %vm725_vm4, %v9514_v4, -inf }
 0xd61   : > { %v9516_v31 = vpop.f32.mrf.mxu0 }
 0xd62   : > { %v3456_v37 = vsel %vm725_vm4, %v9516_v31, -inf }
 0xd63   : > { %3457 = vmax.xlane.f32.xlu1 %v3456_v37  ;;  %3650 = vmax.xlane.f32.xlu2 %v3649_v56 }
 0xd67   : > { %v9522_v60 = vpop.f32.mrf.mxu3 }
 0xd68   : > { %v3652_v39 = vsel %vm725_vm4, %v9522_v60, -inf }
 0xd69   : > { %v9524_v27 = vpop.f32.mrf.mxu0 }
 0xd6a   : > { %v3459_v43 = vsel %vm725_vm4, %v9524_v27, -inf }
 0xd6b   : > { %3460 = vmax.xlane.f32.xlu0 %v3459_v43  ;;  %3653 = vmax.xlane.f32.xlu1 %v3652_v39 }
 0xd6f   : > { %v9530_v26 = vpop.f32.mrf.mxu3 }
 0xd70   : > { %v3655_v34 = vsel %vm738_vm5, %v9530_v26, -inf }
 0xd71   : > { %v9532_v51 = vpop.f32.mrf.mxu0 }
 0xd72   : > { %v3462_v55 = vsel %vm725_vm4, %v9532_v51, -inf }
 0xd73   : > { %3463 = vmax.xlane.f32.xlu2 %v3462_v55  ;;  %3656 = vmax.xlane.f32.xlu0 %v3655_v34 }
 0xd79   : > { %v9538_v47 = vpop.f32.mrf.mxu0 }
 0xd7a   : > { %v3465_v36 = vsel %vm738_vm5, %v9538_v47, -inf }
 0xd7b   : > { %3466 = vmax.xlane.f32.xlu1 %v3465_v36  ;;  %v9542_v22 = vpop.f32.mrf.mxu3 }
 0xd7c   : > { %v4023_v13 = vsel %vm725_vm4, %v9542_v22, -inf }
 0xd7d   : > { %4024 = vmax.xlane.f32.xlu2 %v4023_v13 }
 0xd81   : > { %v9546_v38 = vpop.f32.mrf.mxu0 }
 0xd82   : > { %v3833_v3 = vsel %vm725_vm4, %v9546_v38, -inf }
 0xd83   : > { %v9550_v41 = vpop.f32.mrf.mxu3  ;;  %3834 = vmax.xlane.f32.xlu0 %v3833_v3 }
 0xd84   : > { %v4026_v24 = vsel %vm725_vm4, %v9550_v41, -inf }
 0xd89   : > { %v9552_v45 = vpop.f32.mrf.mxu0 }
 0xd8a   : > { %v3836_v54 = vsel %vm725_vm4, %v9552_v45, -inf }
 0xd8b   : > { %3837 = vmax.xlane.f32.xlu1 %v3836_v54 }
 0xd8c   : > { %v9556_v53 = vpop.f32.mrf.mxu3 }
 0xd8d   : > { %v4029_v42 = vsel %vm725_vm4, %v9556_v53, -inf }
 0xd91   : > { %v9558_v30 = vpop.f32.mrf.mxu0 }
 0xd92   : > { %v3839_v48 = vsel %vm725_vm4, %v9558_v30, -inf }
 0xd93   : > { %4027 = vmax.xlane.f32.xlu1 %v4026_v24  ;;  %3840 = vmax.xlane.f32.xlu2 %v3839_v48 }
 0xd94   : > { %v9564_v52 = vpop.f32.mrf.mxu3 }
 0xd95   : > { %v4032_v28 = vsel %vm725_vm4, %v9564_v52, -inf }
 0xd99   : > { %v9566_v18 = vpop.f32.mrf.mxu0 }
 0xd9a   : > { %v3842_v23 = vsel %vm725_vm4, %v9566_v18, -inf }
 0xd9b   : > { %4030 = vmax.xlane.f32.xlu1 %v4029_v42  ;;  %3843 = vmax.xlane.f32.xlu0 %v3842_v23 }
 0xd9c   : > { %v9572_v57 = vpop.f32.mrf.mxu3 }
 0xd9d   : > { %v4035_v9 = vsel %vm738_vm5, %v9572_v57, -inf }
 0xd9e   : > { %4036 = vmax.xlane.f32.xlu2 %v4035_v9 }
 0xda1   : > { %v9576_v6 = vpop.f32.mrf.mxu0 }
 0xda2   : > { %v3845_v12 = vsel %vm738_vm5, %v9576_v6, -inf }
 0xda3   : > { %4033 = vmax.xlane.f32.xlu1 %v4032_v28  ;;  %3846 = vmax.xlane.f32.xlu0 %v3845_v12 }
 0xdc4   : > { %v3645_v8 = vpop.xlane.xlu1 %3644 }
 0xdc5   : > { %v3658_v20 = vsub.f32 %v3628_v40, %v3645_v8 }
 0xdc7   : > { %v3663_v15 = vmul.f32 1.442695, %v3658_v20 }
 0xdc9   : > { %6994 = vpow2.f32 %v3663_v15 }
 0xdcc   : > { %v3648_v0 = vpop.xlane.xlu0 %3647 }
 0xdcd   : > { %v3659_v19 = vsub.f32 %v9509_v29, %v3648_v0 }
 0xdce   : > { %v3455_v61 = vpop.xlane.xlu2 %3454 }
 0xdcf   : > { %v9582_v14 = vpop.eup %6994  ;;  %v3468_v44 = vsub.f32 %v3438_v50, %v3455_v61  ;;  %v3665_v50 = vmul.f32 1.442695, %v3659_v19 }
 0xdd0   : > { %v3673_v2 = vsel %vm725_vm4, %v9582_v14, 0.0 }
 0xdd1   : > { %v3473_v63 = vmul.f32 1.442695, %v3468_v44  ;;  %3674 = vadd.xlane.f32.xlu2 %v3673_v2 }
 0xdd3   : > { %6996 = vpow2.f32 %v3473_v63 }
 0xdd6   : > { %v3458_v17 = vpop.xlane.xlu1 %3457  ;;  %v3651_v33 = vpop.xlane.xlu2 %3650 }
 0xdd7   : > { %v3469_v21 = vsub.f32 %v9516_v31, %v3458_v17  ;;  %v3660_v35 = vsub.f32 %v9514_v4, %v3651_v33 }
 0xdd9   : > { %v9588_v58 = vpop.eup %6996  ;;  %v3475_v40 = vmul.f32 1.442695, %v3469_v21  ;;  %v3667_v1 = vmul.f32 1.442695, %v3660_v35 }
 0xdda   : > { %v3483_v16 = vsel %vm725_vm4, %v9588_v58, 0.0 }
 0xddb   : > { %6998 = vpow2.f32 %v3475_v40  ;;  %3484 = vadd.xlane.f32.xlu1 %v3483_v16 }
 0xddc   : > { %7000 = vpow2.f32 %v3667_v1 }
 0xddd   : > { %7002 = vpow2.f32 %v3665_v50 }
 0xdde   : > { %v3461_v5 = vpop.xlane.xlu0 %3460  ;;  %v3654_v37 = vpop.xlane.xlu1 %3653 }
 0xddf   : > { %v3661_v56 = vsub.f32 %v9522_v60, %v3654_v37  ;;  %v3470_v4 = vsub.f32 %v9524_v27, %v3461_v5 }
 0xde1   : > { %v9594_v31 = vpop.eup %6998  ;;  %v3669_v43 = vmul.f32 1.442695, %v3661_v56  ;;  %v3477_v34 = vmul.f32 1.442695, %v3470_v4 }
 0xde2   : > { %v9597_v29 = vpop.eup %7000  ;;  %v3486_v39 = vsel %vm725_vm4, %v9594_v31, 0.0 }
 0xde3   : > { %3487 = vadd.xlane.f32.xlu0 %v3486_v39  ;;  %v3679_v55 = vsel %vm725_vm4, %v9597_v29, 0.0  ;;  %7004 = vpow2.f32 %v3669_v43  ;;  %v9603_v13 = vpop.eup %7002 }
 0xde4   : > { %3680 = vadd.xlane.f32.xlu2 %v3679_v55  ;;  %7006 = vpow2.f32 %v3477_v34  ;;  %v3676_v42 = vsel %vm725_vm4, %v9603_v13, 0.0 }
 0xde6   : > { %v3657_v36 = vpop.xlane.xlu0 %3656  ;;  %v3464_v60 = vpop.xlane.xlu2 %3463 }
 0xde7   : > { %v3662_v3 = vsub.f32 %v9530_v26, %v3657_v36  ;;  %v3471_v27 = vsub.f32 %v9532_v51, %v3464_v60 }
 0xde9   : > { %v3671_v54 = vmul.f32 1.442695, %v3662_v3  ;;  %v3479_v24 = vmul.f32 1.442695, %v3471_v27  ;;  %v9607_v48 = vpop.eup %7004 }
 0xdea   : > { %v3682_v23 = vsel %vm725_vm4, %v9607_v48, 0.0  ;;  %v9613_v28 = vpop.eup %7006 }
 0xdeb   : > { %7008 = vpow2.f32 %v3671_v54  ;;  %3677 = vadd.xlane.f32.xlu0 %v3676_v42  ;;  %v3489_v20 = vsel %vm725_vm4, %v9613_v28, 0.0 }
 0xdec   : > { %7010 = vpow2.f32 %v3479_v24  ;;  %3683 = vadd.xlane.f32.xlu2 %v3682_v23 }
 0xdee   : > { %v3467_v9 = vpop.xlane.xlu1 %3466 }
 0xdef   : > { %v3472_v26 = vsub.f32 %v9538_v47, %v3467_v9 }
 0xdf0   : > { %v4025_v44 = vpop.xlane.xlu2 %4024 }
 0xdf1   : > { %v9616_v51 = vpop.eup %7008  ;;  %v3481_v12 = vmul.f32 1.442695, %v3472_v26  ;;  %v4038_v0 = vsub.f32 %v9542_v22, %v4025_v44 }
 0xdf2   : > { %v9618_v8 = vpop.eup %7010  ;;  %v3685_v15 = vsel %vm738_vm5, %v9616_v51, 0.0 }
 0xdf3   : > { %7012 = vpow2.f32 %v3481_v12  ;;  %3490 = vadd.xlane.f32.xlu0 %v3489_v20  ;;  %v3492_v61 = vsel %vm725_vm4, %v9618_v8, 0.0  ;;  %v4043_v21 = vmul.f32 1.442695, %v4038_v0 }
 0xdf4   : > { %3686 = vadd.xlane.f32.xlu2 %v3685_v15  ;;  %3493 = vadd.xlane.f32.xlu1 %v3492_v61 }
 0xdf6   : > { %v3835_v47 = vpop.xlane.xlu0 %3834 }
 0xdf7   : > { %v3848_v2 = vsub.f32 %v9546_v38, %v3835_v47 }
 0xdf9   : > { %v9627_v63 = vpop.eup %7012  ;;  %v3853_v17 = vmul.f32 1.442695, %v3848_v2 }
 0xdfa   : > { %v3495_v33 = vsel %vm738_vm5, %v9627_v63, 0.0 }
 0xdfb   : > { %7014 = vpow2.f32 %v3853_v17  ;;  %3496 = vadd.xlane.f32.xlu0 %v3495_v33 }
 0xdfc   : > { %7016 = vpow2.f32 %v4043_v21 }
 0xdfe   : > { %v3838_v22 = vpop.xlane.xlu1 %3837 }
 0xdff   : > { %v3849_v5 = vsub.f32 %v9552_v45, %v3838_v22 }
 0xe01   : > { %v9632_v35 = vpop.eup %7014  ;;  %v3855_v4 = vmul.f32 1.442695, %v3849_v5 }
 0xe02   : > { %v3863_v19 = vsel %vm725_vm4, %v9632_v35, 0.0  ;;  %v9636_v40 = vpop.eup %7016 }
 0xe03   : > { %3864 = vadd.xlane.f32.xlu1 %v3863_v19  ;;  %v4053_v38 = vsel %vm725_vm4, %v9636_v40, 0.0 }
 0xe06   : > { %v4028_v1 = vpop.xlane.xlu1 %4027  ;;  %v3841_v56 = vpop.xlane.xlu2 %3840 }
 0xe07   : > { %v4039_v16 = vsub.f32 %v9550_v41, %v4028_v1 }
 0xe09   : > { %v4045_v37 = vmul.f32 1.442695, %v4039_v16 }
 0xe0b   : > { %4054 = vadd.xlane.f32.xlu1 %v4053_v38  ;;  %7018 = vpow2.f32 %v4045_v37 }
 0xe0c   : > { %6868 = vrot.lane.b32.xlu2 %v9431_v62, %s11453_s24  ;;  %v3850_v62 = vsub.f32 %v9558_v30, %v3841_v56  ;;  %7020 = vpow2.f32 %v3855_v4 }
 0xe0e   : > { %v4031_v50 = vpop.xlane.xlu1 %4030  ;;  %v3844_v43 = vpop.xlane.xlu0 %3843  ;;  %v3857_v39 = vmul.f32 1.442695, %v3850_v62 }
 0xe0f   : > { %6863 = vrot.lane.b32.xlu0 %v9438_v32, %s11452_s23  ;;  %v4040_v60 = vsub.f32 %v9556_v53, %v4031_v50  ;;  %s11319_s23 = scalar_lea.vmem %s11364_s16, %s11457_s20 }
 0xe10   : > { %7022 = vpow2.f32 %v3857_v39 }
 0xe11   : > { %v9652_v34 = vpop.eup %7018  ;;  %v4037_v3 = vpop.xlane.xlu2 %4036  ;;  %v4047_v24 = vmul.f32 1.442695, %v4040_v60 }
 0xe12   : > { %v4056_v45 = vsel %vm725_vm4, %v9652_v34, 0.0  ;;  %v9657_v36 = vpop.eup %7020  ;;  %v4042_v53 = vsub.f32 %v9572_v57, %v4037_v3 }
 0xe14   : > { %6873 = vrot.lane.b32.xlu2 %v9438_v32, %s11453_s24  ;;  %v3851_v32 = vsub.f32 %v9566_v18, %v3844_v43  ;;  %v3866_v18 = vsel %vm725_vm4, %v9657_v36, 0.0 }
 0xe16   : > { %v4034_v55 = vpop.xlane.xlu1 %4033  ;;  %v3847_v27 = vpop.xlane.xlu0 %3846 }
 0xe17   : > { %v4041_v41 = vsub.f32 %v9564_v52, %v4034_v55  ;;  %v9662_v54 = vpop.eup %7022  ;;  %v3852_v52 = vsub.f32 %v9576_v6, %v3847_v27  ;;  %v4051_v6 = vmul.f32 1.442695, %v4042_v53 }
 0xe18   : > { %v3869_v42 = vsel %vm725_vm4, %v9662_v54, 0.0 }
 0xe19   : > { %v4049_v30 = vmul.f32 1.442695, %v4041_v41  ;;  %v3861_v9 = vmul.f32 1.442695, %v3852_v52 }
 0xe24   : > { %3896 = vrot.lane.b32.xlu1 %v9376_v46, %s11453_s24  ;;  %v3859_v46 = vmul.f32 1.442695, %v3851_v32 }
 0xe26   : > { %7024 = vpow2.f32 %v3859_v46 }
 0xe27   : > { %7026 = vpow2.f32 %v4049_v30 }
 0xe28   : > { %7028 = vpow2.f32 %v4047_v24 }
 0xe2c   : > { %v9667_v23 = vpop.eup %7024 }
 0xe2d   : > { %v3872_v26 = vsel %vm725_vm4, %v9667_v23, 0.0  ;;  %v9672_v20 = vpop.eup %7026 }
 0xe2e   : > { %v4062_v15 = vsel %vm725_vm4, %v9672_v20, 0.0  ;;  %v9676_v61 = vpop.eup %7028 }
 0xe2f   : > { %v4059_v2 = vsel %vm725_vm4, %v9676_v61, 0.0 }
 0xe39   : > { %4057 = vadd.xlane.f32.xlu0 %v4056_v45 }
 0xe3d   : > { %3867 = vadd.xlane.f32.xlu2 %v3866_v18 }
 0xe41   : > { %3870 = vadd.xlane.f32.xlu0 %v3869_v42 }
 0xe44   : > { %v3675_v12 = vpop.xlane.xlu2 %3674 }
 0xe45   : > { %3873 = vadd.xlane.f32.xlu2 %v3872_v26  ;;  %7030 = vrcp.f32 %v3675_v12 }
 0xe46   : > { %7032 = vpow2.f32 %v3861_v9 }
 0xe47   : > { %7034 = vpow2.f32 %v4051_v6 }
 0xe49   : > { %4063 = vadd.xlane.f32.xlu0 %v4062_v15 }
 0xe4b   : > { %v7031_v44 = vpop.eup %7030 }
 0xe4c   : > { %v3693_v57 = vmul.f32 %v7031_v44, %v9582_v14  ;;  %v9679_v47 = vpop.eup %7032 }
 0xe4d   : > { %v3875_v17 = vsel %vm738_vm5, %v9679_v47, 0.0  ;;  %v9686_v33 = vpop.eup %7034 }
 0xe4e   : > { %v3485_v0 = vpop.xlane.xlu1 %3484  ;;  %4060 = vadd.xlane.f32.xlu1 %v4059_v2  ;;  %6308 = vmatmul.msk.f32.vlgmr.msrb.gmra.mxu2 %vm725_vm4, %v3693_v57  ;;  %v4065_v14 = vsel %vm738_vm5, %v9686_v33, 0.0 }
 0xe4f   : > { %7036 = vrcp.f32 %v3485_v0 }
 0xe51   : > { %3876 = vadd.xlane.f32.xlu0 %v3875_v17 }
 0xe55   : > { %v7037_v21 = vpop.eup %7036 }
 0xe56   : > { %v3503_v19 = vmul.f32 %v7037_v21, %v9588_v58  ;;  %v3488_v38 = vpop.xlane.xlu0 %3487  ;;  %4066 = vadd.xlane.f32.xlu1 %v4065_v14 }
 0xe57   : > { %7038 = vrcp.f32 %v3488_v38  ;;  %v3681_v1 = vpop.xlane.xlu2 %3680 }
 0xe58   : > { %6292 = vmatmul.msk.f32.vlgmr.msra.gmra.mxu1 %vm725_vm4, %v3503_v19 }
 0xe5d   : > { %v7039_v22 = vpop.eup %7038 }
 0xe5e   : > { %v3678_v16 = vpop.xlane.xlu0 %3677  ;;  %v3504_v50 = vmul.f32 %v7039_v22, %v9594_v31 }
 0xe5f   : > { %7040 = vrcp.f32 %v3678_v16  ;;  %v3684_v4 = vpop.xlane.xlu2 %3683 }
 0xe60   : > { %6293 = vmatmul.msk.f32.gmra.mxu1 %vm725_vm4, %v3504_v50  ;;  %7042 = vrcp.f32 %v3681_v1 }
 0xe65   : > { %v7041_v5 = vpop.eup %7040 }
 0xe66   : > { %v3491_v37 = vpop.xlane.xlu0 %3490  ;;  %v3694_v56 = vmul.f32 %v7041_v5, %v9603_v13  ;;  %v7043_v62 = vpop.eup %7042 }
 0xe67   : > { %7044 = vrcp.f32 %v3491_v37  ;;  %v3494_v58 = vpop.xlane.xlu1 %3493  ;;  %v3695_v31 = vmul.f32 %v7043_v62, %v9597_v29  ;;  %v3687_v32 = vpop.xlane.xlu2 %3686 }
 0xe68   : > { %6309 = vmatmul.msk.f32.gmra.mxu2 %vm725_vm4, %v3694_v56  ;;  %7046 = vrcp.f32 %v3684_v4 }
 0xe69   : > { %7048 = vrcp.f32 %v3494_v58 }
 0xe6a   : > { %7050 = vrcp.f32 %v3687_v32 }
 0xe6d   : > { %v7045_v43 = vpop.eup %7044 }
 0xe6e   : > { %v3505_v39 = vmul.f32 %v7045_v43, %v9613_v28  ;;  %v7047_v55 = vpop.eup %7046  ;;  %v3497_v13 = vpop.xlane.xlu0 %3496 }
 0xe6f   : > { %v7049_v46 = vpop.eup %7048  ;;  %7052 = vrcp.f32 %v3497_v13  ;;  %v3696_v30 = vmul.f32 %v7047_v55, %v9607_v48  ;;  %v6869_v42 = vpop.permute.xlu2 %6868 }
 0xe70   : > { %6294 = vmatmul.msk.f32.gmra.mxu1 %vm725_vm4, %v3505_v39  ;;  %6310 = vmatmul.msk.f32.gmra.mxu2 %vm725_vm4, %v3695_v31  ;;  %v3506_v45 = vmul.f32 %v7049_v46, %v9618_v8  ;;  %v7051_v29 = vpop.eup %7050  ;;  %v6870_v9 = vunpack.i.l.bf16 %v6869_v42  ;;  %v6871_v53 = vunpack.i.h.bf16 %v6869_v42 }
 0xe71   : > { %v3697_v27 = vmul.f32 %v7051_v29, %v9616_v51 }
 0xe75   : > { %v7053_v28 = vpop.eup %7052 }
 0xe76   : > { %v3865_v41 = vpop.xlane.xlu1 %3864  ;;  %v3507_v3 = vmul.f32 %v7053_v28, %v9627_v63 }
 0xe77   : > { %v6874_v51 = vpop.permute.xlu2 %6873 }
 0xe78   : > { %6295 = vmatmul.msk.f32.gmra.mxu1 %vm725_vm4, %v3506_v45  ;;  %6311 = vmatmul.msk.f32.gmra.mxu2 %vm725_vm4, %v3696_v30  ;;  %v6875_v12 = vunpack.i.l.bf16 %v6874_v51  ;;  %v6876_v6 = vunpack.i.h.bf16 %v6874_v51 }
 0xe7e   : > { %v4055_v60 = vpop.xlane.xlu1 %4054 }
 0xe7f   : > { %7054 = vrcp.f32 %v4055_v60 }
 0xe80   : > { %6296 = vmatmul.msk.f32.gmra.mxu1 %vm725_vm4, %v3507_v3  ;;  %6312 = vmatmul.msk.f32.gmra.mxu2 %vm725_vm4, %v3697_v27  ;;  %7056 = vrcp.f32 %v3865_v41 }
 0xe81   : > { %v6864_v18 = vpop.permute.xlu0 %6863 }
 0xe82   : > { %v6865_v8 = vunpack.i.l.bf16 %v6864_v18  ;;  %v6866_v52 = vunpack.i.h.bf16 %v6864_v18  ;;  %v6348_v18 = vld [vmem:[%s11354_s6 + $0x38] sm:$0xff] }
 0xe83   : > { %4253 = vmatpush.msrb.mxu0 %v6348_v18 }
 0xe84   : > { %4123 = vmatpush.msra.mxu2 %v6865_v8  ;;  %v6347_v8 = vld [vmem:[%s11354_s6 + $0x30] sm:$0xff] }
 0xe85   : > { %v7055_v48 = vpop.eup %7054  ;;  %4254 = vmatpush.msrb.mxu0 %v6347_v8 }
 0xe86   : > { %v4073_v24 = vmul.f32 %v7055_v48, %v9636_v40  ;;  %4124 = vmatpush.msra.mxu2 %v6866_v52  ;;  %v7057_v26 = vpop.eup %7056  ;;  %v6346_v52 = vld [vmem:[%s11354_s6 + $0x28] sm:$0xff]  ;;  %v6345_v48 = vld [vmem:[%s11354_s6 + $0x20] sm:$0xff] }
 0xe87   : > { %v3883_v15 = vmul.f32 %v7057_v26, %v9632_v35  ;;  %4255 = vmatpush.msrb.mxu0 %v6346_v52 }
 0xe88   : > { %6340 = vmatmul.msk.f32.vlgmr.msra.gmra.mxu2 %vm725_vm4, %v4073_v24 }
 0xe89   : > { %4256 = vmatpush.msrb.mxu0 %v6345_v48 }
 0xe96   : > { %v3897_v63 = vpop.permute.xlu1 %3896 }
 0xe97   : > { %6323 = vmatpush.msk.msrb.mxu1 %vm811_vm3, %v3897_v63 }
 0xe99   : > { %3931 = vmatpush.msrb.mxu1 %v6870_v9 }
 0xe9b   : > { %3932 = vmatpush.msrb.mxu1 %v6871_v53 }
 0xe9d   : > { %3933 = vmatpush.msrb.mxu1 %v6875_v12 }
 0xe9f   : > { %3934 = vmatpush.msrb.mxu1 %v6876_v6 }
 0xea0   : > { %6324 = vmatmul.msk.f32.vlgmr.msrb.gmra.mxu1 %vm725_vm4, %v3883_v15 }
 0xeac   : > { %v4058_v40 = vpop.xlane.xlu0 %4057 }
 0xead   : > { %7058 = vrcp.f32 %v4058_v40 }
 0xeb0   : > { %v3868_v44 = vpop.xlane.xlu2 %3867 }
 0xeb1   : > { %7060 = vrcp.f32 %v3868_v44 }
 0xeb3   : > { %v7059_v57 = vpop.eup %7058 }
 0xeb4   : > { %v3871_v2 = vpop.xlane.xlu0 %3870  ;;  %v4074_v0 = vmul.f32 %v7059_v57, %v9652_v34 }
 0xeb5   : > { %7062 = vrcp.f32 %v3871_v2 }
 0xeb6   : > { %6341 = vmatmul.msk.f32.gmra.mxu2 %vm725_vm4, %v4074_v0 }
 0xeb7   : > { %v7061_v17 = vpop.eup %7060 }
 0xeb8   : > { %v3884_v21 = vmul.f32 %v7061_v17, %v9657_v36  ;;  %v3874_v35 = vpop.xlane.xlu2 %3873 }
 0xeb9   : > { %7064 = vrcp.f32 %v3874_v35 }
 0xeba   : > { %6325 = vmatmul.msk.f32.gmra.mxu1 %vm725_vm4, %v3884_v21 }
 0xebb   : > { %v7063_v19 = vpop.eup %7062 }
 0xebc   : > { %v4064_v14 = vpop.xlane.xlu0 %4063  ;;  %v3885_v38 = vmul.f32 %v7063_v19, %v9662_v54 }
 0xebf   : > { %v7065_v34 = vpop.eup %7064 }
 0xec0   : > { %v3886_v50 = vmul.f32 %v7065_v34, %v9667_v23 }
 0xec1   : > { %v4061_v22 = vpop.xlane.xlu1 %4060 }
 0xec2   : > { %7066 = vrcp.f32 %v4061_v22  ;;  %6326 = vmatmul.msk.f32.gmra.mxu1 %vm725_vm4, %v3885_v38 }
 0xec4   : > { %v3877_v1 = vpop.xlane.xlu0 %3876 }
 0xec5   : > { %7068 = vrcp.f32 %v3877_v1 }
 0xec6   : > { %7070 = vrcp.f32 %v4064_v14 }
 0xec8   : > { %v7067_v16 = vpop.eup %7066 }
 0xec9   : > { %v4075_v36 = vmul.f32 %v7067_v16, %v9676_v61  ;;  %v4067_v37 = vpop.xlane.xlu1 %4066 }
 0xeca   : > { %6327 = vmatmul.msk.f32.gmra.mxu1 %vm725_vm4, %v3886_v50  ;;  %7072 = vrcp.f32 %v4067_v37 }
 0xecb   : > { %6342 = vmatmul.msk.f32.gmra.mxu2 %vm725_vm4, %v4075_v36  ;;  %v7069_v5 = vpop.eup %7068 }
 0xecc   : > { %v7071_v54 = vpop.eup %7070  ;;  %v3887_v56 = vmul.f32 %v7069_v5, %v9679_v47 }
 0xecd   : > { %v4076_v58 = vmul.f32 %v7071_v54, %v9672_v20 }
 0xed0   : > { %v7073_v23 = vpop.eup %7072 }
 0xed1   : > { %v3746_v4 = vpop.f32.mrf.mxu2  ;;  %v4077_v61 = vmul.f32 %v7073_v23, %v9686_v33 }
 0xed2   : > { %6328 = vmatmul.msk.f32.gmra.mxu1 %vm725_vm4, %v3887_v56  ;;  %4146 = vrot.lane.b32.xlu2 %v3746_v4, %s11454_s25  ;;  %v6886_v56 = vld [vmem:[%s11355_s7 + $0x1] ss:$0 sm:$0xff] }
 0xed3   : > { %6343 = vmatmul.msk.f32.gmra.mxu2 %vm725_vm4, %v4076_v58 }
 0xed5   : > { %v3556_v43 = vpop.f32.mrf.mxu1 }
 0xedb   : > { %6344 = vmatmul.msk.f32.gmra.mxu2 %vm725_vm4, %v4077_v61 }
 0xedd   : > { %v3559_v47 = vpop.f32.mrf.mxu1 }
 0xeeb   : > { %v3749_v62 = vpop.f32.mrf.mxu2 }
 0xeec   : > { %4148 = vrot.lane.b32.xlu2 %v3749_v62, %s11454_s25 }
 0xeed   : > { %v3562_v31 = vpop.f32.mrf.mxu1 }
 0xef3   : > { %v3752_v39 = vpop.f32.mrf.mxu2 }
 0xef4   : > { %4150 = vrot.lane.b32.xlu2 %v3752_v39, %s11454_s25 }
 0xef5   : > { %v3565_v55 = vpop.f32.mrf.mxu1 }
 0xefb   : > { %v3755_v20 = vpop.f32.mrf.mxu2 }
 0xefc   : > { %4152 = vrot.lane.b32.xlu2 %v3755_v20, %s11454_s25 }
 0xefd   : > { %v3568_v33 = vpop.f32.mrf.mxu1 }
 0xf03   : > { %v3758_v32 = vpop.f32.mrf.mxu2 }
 0xf04   : > { %4154 = vrot.lane.b32.xlu2 %v3758_v32, %s11454_s25 }
 0xf0b   : > { %v4126_v13 = vpop.f32.mrf.mxu2 }
 0xf0c   : > { %4186 = vrot.lane.b32.xlu0 %v4126_v13, %s11455_s27 }
 0xf1d   : > { %v3936_v46 = vpop.f32.mrf.mxu1 }
 0xf1e   : > { %4166 = vrot.lane.b32.xlu1 %v3936_v46, %s11456_s28 }
 0xf2c   : > { %v4147_v24 = vpop.permute.xlu2 %4146 }
 0xf2d   : > { %v4201_v42 = vsel %vm667_vm2, %v3556_v43, %v4147_v24 }
 0xf37   : > { %v3939_v41 = vpop.f32.mrf.mxu1 }
 0xf38   : > { %4168 = vrot.lane.b32.xlu1 %v3939_v41, %s11456_s28 }
 0xf39   : > { %v4129_v45 = vpop.f32.mrf.mxu2 }
 0xf3a   : > { %4188 = vrot.lane.b32.xlu0 %v4129_v45, %s11455_s27 }
 0xf3f   : > { %v3942_v30 = vpop.f32.mrf.mxu1 }
 0xf40   : > { %4170 = vrot.lane.b32.xlu1 %v3942_v30, %s11456_s28 }
 0xf46   : > { %v4149_v26 = vpop.permute.xlu2 %4148 }
 0xf47   : > { %v3945_v29 = vpop.f32.mrf.mxu1  ;;  %v4202_v6 = vsel %vm667_vm2, %v3559_v47, %v4149_v26 }
 0xf48   : > { %4172 = vrot.lane.b32.xlu1 %v3945_v29, %s11456_s28 }
 0xf4e   : > { %v4132_v28 = vpop.f32.mrf.mxu2  ;;  %v4151_v57 = vpop.permute.xlu2 %4150 }
 0xf4f   : > { %v3948_v60 = vpop.f32.mrf.mxu1  ;;  %4190 = vrot.lane.b32.xlu0 %v4132_v28, %s11455_s27  ;;  %v4203_v0 = vsel %vm667_vm2, %v3562_v31, %v4151_v57 }
 0xf50   : > { %4174 = vrot.lane.b32.xlu1 %v3948_v60, %s11456_s28 }
 0xf56   : > { %v4135_v3 = vpop.f32.mrf.mxu2  ;;  %v4153_v14 = vpop.permute.xlu2 %4152 }
 0xf57   : > { %4192 = vrot.lane.b32.xlu0 %v4135_v3, %s11455_s27  ;;  %v4204_v38 = vsel %vm667_vm2, %v3565_v55, %v4153_v14  ;;  %v6366_v14 = vld [vmem:[%s11358_s10 + $0x308] sm:$0xff] }
 0xf5e   : > { %v4138_v27 = vpop.f32.mrf.mxu2  ;;  %v4155_v16 = vpop.permute.xlu2 %4154 }
 0xf5f   : > { %4194 = vrot.lane.b32.xlu0 %v4138_v27, %s11455_s27  ;;  %v4205_v36 = vsel %vm667_vm2, %v3568_v33, %v4155_v16  ;;  %v6364_v16 = vld [vmem:[%s11358_s10 + $0x298] sm:$0xff] }
 0xf7e   : > { %v4187_v9 = vpop.permute.xlu0 %4186 }
 0xf90   : > { %v4167_v63 = vpop.permute.xlu1 %4166 }
 0xf91   : > { %v4206_v51 = vsel %vm533_vm0, %v4201_v42, %v4167_v63 }
 0xf92   : > { %v4211_v53 = vsel %vm1486_vm6, %v4206_v51, %v4187_v9 }
 0xf93   : > { %6350 = vmatmul.msk.f32.vlgmr.msrb.gmra.mxu0 %vm599_vm1, %v4211_v53 }
 0xfaa   : > { %v4169_v12 = vpop.permute.xlu1 %4168 }
 0xfab   : > { %v4207_v15 = vsel %vm533_vm0, %v4202_v6, %v4169_v12 }
 0xfac   : > { %v4189_v40 = vpop.permute.xlu0 %4188 }
 0xfad   : > { %v4212_v44 = vsel %vm1486_vm6, %v4207_v15, %v4189_v40 }
 0xfae   : > { %6351 = vmatmul.msk.f32.gmra.mxu0 %vm599_vm1, %v4212_v44 }
 0xfb2   : > { %v4171_v2 = vpop.permute.xlu1 %4170 }
 0xfb3   : > { %v4208_v17 = vsel %vm533_vm0, %v4203_v0, %v4171_v2  ;;  %v6369_v2 = vld [vmem:[%s11358_s10 + $0x380] sm:$0xff]  ;;  %v6370_v0 = vld [vmem:[%s11358_s10 + $0x388] sm:$0xff] }
 0xfb4   : > { %4463 = vmatpush.msra.mxu1 %v6369_v2  ;;  %4495 = vmatpush.msra.mxu3 %v6370_v0  ;;  %v6469_v2 = vld [vmem:[%s11358_s10 + $0x338] sm:$0xff] }
 0xfb6   : > { %4496 = vmatpush.msra.mxu3 %v6366_v14  ;;  %v6464_v14 = vld [vmem:[%s11358_s10 + $0x2b0] sm:$0xff] }
 0xfba   : > { %v4173_v19 = vpop.permute.xlu1 %4172 }
 0xfbb   : > { %v4209_v22 = vsel %vm533_vm0, %v4204_v38, %v4173_v19  ;;  %v6367_v19 = vld [vmem:[%s11358_s10 + $0x310] sm:$0xff]  ;;  %v6368_v38 = vld [vmem:[%s11358_s10 + $0x318] sm:$0xff] }
 0xfc1   : > { %v4191_v21 = vpop.permute.xlu0 %4190 }
 0xfc2   : > { %v4213_v35 = vsel %vm1486_vm6, %v4208_v17, %v4191_v21  ;;  %v4175_v50 = vpop.permute.xlu1 %4174  ;;  %v6371_v17 = vld [vmem:[%s11358_s10 + $0x390] sm:$0xff]  ;;  %v6372_v21 = vld [vmem:[%s11358_s10 + $0x398] sm:$0xff] }
 0xfc3   : > { %6352 = vmatmul.msk.f32.gmra.mxu0 %vm599_vm1, %v4213_v35  ;;  %v4210_v5 = vsel %vm533_vm0, %v4205_v36, %v4175_v50  ;;  %4527 = vmatpush.msrb.mxu2 %v6371_v17  ;;  %v6365_v35 = vld [vmem:[%s11358_s10 + $0x300] sm:$0xff]  ;;  %v6358_v36 = vld [vmem:[%s11358_s10 + $0x208] sm:$0xff] }
 0xfc4   : > { %4559 = vmatpush.msra.mxu0 %v6372_v21  ;;  %4464 = vmatpush.msra.mxu1 %v6365_v35  ;;  %v6357_v50 = vld [vmem:[%s11358_s10 + $0x200] sm:$0xff]  ;;  %v6463_v35 = vld [vmem:[%s11358_s10 + $0x2a8] sm:$0xff] }
 0xfc5   : > { %4528 = vmatpush.msrb.mxu2 %v6367_v19  ;;  %v6462_v21 = vld [vmem:[%s11358_s10 + $0x2a0] sm:$0xff] }
 0xfc6   : > { %4560 = vmatpush.msra.mxu0 %v6368_v38  ;;  %v6465_v38 = vld [vmem:[%s11358_s10 + $0x2b8] sm:$0xff] }
 0xfc8   : > { %4561 = vmatpush.msra.mxu0 %v6364_v16  ;;  %v6458_v16 = vld [vmem:[%s11358_s10 + $0x220] sm:$0xff] }
 0xfc9   : > { %v4193_v1 = vpop.permute.xlu0 %4192 }
 0xfca   : > { %v4214_v34 = vsel %vm1486_vm6, %v4209_v22, %v4193_v1  ;;  %v6361_v22 = vld [vmem:[%s11358_s10 + $0x280] sm:$0xff]  ;;  %v6362_v1 = vld [vmem:[%s11358_s10 + $0x288] sm:$0xff] }
 0xfcb   : > { %6353 = vmatmul.msk.f32.gmra.mxu0 %vm599_vm1, %v4214_v34  ;;  %v6363_v34 = vld [vmem:[%s11358_s10 + $0x290] sm:$0xff]  ;;  %4465 = vmatpush.msra.mxu1 %v6361_v22  ;;  %v6459_v22 = vld [vmem:[%s11358_s10 + $0x228] sm:$0xff] }
 0xfcc   : > { %4497 = vmatpush.msra.mxu3 %v6362_v1  ;;  %4529 = vmatpush.msrb.mxu2 %v6363_v34  ;;  %v6460_v1 = vld [vmem:[%s11358_s10 + $0x230] sm:$0xff] }
 0xfcd   : > { %4466 = vmatpush.msra.mxu1 %v6357_v50 }
 0xfce   : > { %4498 = vmatpush.msra.mxu3 %v6358_v36 }
 0xfd1   : > { %v4195_v37 = vpop.permute.xlu0 %4194 }
 0xfd2   : > { %v4215_v54 = vsel %vm1486_vm6, %v4210_v5, %v4195_v37  ;;  %v6359_v5 = vld [vmem:[%s11358_s10 + $0x210] sm:$0xff]  ;;  %v6360_v37 = vld [vmem:[%s11358_s10 + $0x218] sm:$0xff] }
 0xfd3   : > { %6354 = vmatmul.msk.f32.gmra.mxu0 %vm599_vm1, %v4215_v54  ;;  %4530 = vmatpush.msrb.mxu2 %v6359_v5  ;;  %v6461_v5 = vld [vmem:[%s11358_s10 + $0x238] sm:$0xff] }
 0xfd4   : > { %4562 = vmatpush.msra.mxu0 %v6360_v37 }
0x1010   : > { %v4258_v4 = vpop.f32.mrf.mxu0 }
0x1011   : > { %v4259_v58 = vadd.f32 %v6886_v56, %v4258_v4 }
0x1013   : > { %v4273_v23 = vadd.f32 %v4259_v58, %v9337_v7 }
0x1015   : > { %v4282_v61 = vsel %vm599_vm1, %v4273_v23, 0.0 }
0x1016   : > { %4283 = vadd.xlane.f32.xlu2 %v4282_v61 }
0x102b   : > { %v4261_v62 = vpop.f32.mrf.mxu0 }
0x102c   : > { %v4262_v43 = vadd.f32 %v6886_v56, %v4261_v62 }
0x102e   : > { %v4274_v39 = vadd.f32 %v4262_v43, %v9345_v49 }
0x1030   : > { %v4285_v47 = vsel %vm599_vm1, %v4274_v39, 0.0 }
0x1031   : > { %4286 = vadd.xlane.f32.xlu1 %v4285_v47  ;;  %v9871_v47 = vld [vmem:[%s11356_s8 + $0x1] ss:$0 sm:$0xff] }
0x1040   : > { %v4264_v20 = vpop.f32.mrf.mxu0 }
0x1041   : > { %v4265_v31 = vadd.f32 %v6886_v56, %v4264_v20 }
0x1043   : > { %v4275_v32 = vadd.f32 %v4265_v31, %v9352_v59  ;;  %v9876_v31 = vld [vmem:[%s11357_s9 + $0x1] ss:$0 sm:$0xff] }
0x1045   : > { %v4288_v55 = vsel %vm599_vm1, %v4275_v32, 0.0 }
0x1046   : > { %4289 = vadd.xlane.f32.xlu0 %v4288_v55 }
0x1048   : > { %v4267_v13 = vpop.f32.mrf.mxu0 }
0x1049   : > { %v4268_v33 = vadd.f32 %v6886_v56, %v4267_v13 }
0x104b   : > { %v4276_v7 = vadd.f32 %v4268_v33, %v9359_v11 }
0x104d   : > { %v4291_v46 = vsel %vm599_vm1, %v4276_v7, 0.0 }
0x104e   : > { %4292 = vadd.xlane.f32.xlu2 %v4291_v46 }
0x1050   : > { %v4270_v41 = vpop.f32.mrf.mxu0 }
0x1051   : > { %v4271_v45 = vadd.f32 %v6886_v56, %v4270_v41 }
0x1053   : > { %v4277_v49 = vadd.f32 %v4271_v45, %v9366_v25 }
0x1055   : > { %v4294_v30 = vsel %vm1566_vm7, %v4277_v49, 0.0 }
0x1056   : > { %4295 = vadd.xlane.f32.xlu1 %v4294_v30 }
0x1089   : > { %v4284_v29 = vpop.xlane.xlu2 %4283 }
0x108a   : > { %v4297_v59 = vmul.f32 %v4284_v29, %v11445_v10 }
0x108c   : > { %v9790_v28 = vsub.f32 %v4273_v23, %v4297_v59 }
0x108e   : > { %v4307_v60 = vmul.f32 %v9790_v28, %v9790_v28 }
0x1090   : > { %v4312_v11 = vsel %vm599_vm1, %v4307_v60, 0.0 }
0x1091   : > { %4313 = vadd.xlane.f32.xlu0 %v4312_v11 }
0x10a4   : > { %v4287_v3 = vpop.xlane.xlu1 %4286 }
0x10a5   : > { %v4298_v27 = vmul.f32 %v4287_v3, %v11445_v10 }
0x10a7   : > { %v9796_v18 = vsub.f32 %v4274_v39, %v4298_v27 }
0x10a9   : > { %v4308_v25 = vmul.f32 %v9796_v18, %v9796_v18 }
0x10ab   : > { %v4315_v8 = vsel %vm599_vm1, %v4308_v25, 0.0 }
0x10ac   : > { %4316 = vadd.xlane.f32.xlu2 %v4315_v8 }
0x10b9   : > { %v4290_v52 = vpop.xlane.xlu0 %4289 }
0x10ba   : > { %v4299_v48 = vmul.f32 %v4290_v52, %v11445_v10 }
0x10bc   : > { %v9802_v24 = vsub.f32 %v4275_v32, %v4299_v48 }
0x10be   : > { %v4309_v42 = vmul.f32 %v9802_v24, %v9802_v24 }
0x10c0   : > { %v4318_v63 = vsel %vm599_vm1, %v4309_v42, 0.0 }
0x10c1   : > { %v4293_v9 = vpop.xlane.xlu2 %4292  ;;  %4319 = vadd.xlane.f32.xlu1 %v4318_v63  ;;  %v6471_v63 = vld [vmem:[%s11358_s10 + $0x3a8] sm:$0xff] }
0x10c2   : > { %v4300_v51 = vmul.f32 %v4293_v9, %v11445_v10  ;;  %v6472_v9 = vld [vmem:[%s11358_s10 + $0x3b0] sm:$0xff]  ;;  %4734 = vmatpush.msrb.mxu3 %v6471_v63  ;;  %v6554_v63 = vld [vmem:[%s11360_s12 + $0xbd8] sm:$0xff] }
0x10c3   : > { %4766 = vmatpush.msra.mxu2 %v6472_v9  ;;  %v6505_v9 = vld [vmem:[%s11360_s12 + $0xa50] sm:$0xff] }
0x10c4   : > { %v9808_v53 = vsub.f32 %v4276_v7, %v4300_v51  ;;  %v6467_v51 = vld [vmem:[%s11358_s10 + $0x328] sm:$0xff] }
0x10c5   : > { %4735 = vmatpush.msrb.mxu3 %v6467_v51  ;;  %v6524_v51 = vld [vmem:[%s11360_s12 + $0xae8] sm:$0xff] }
0x10c6   : > { %v4310_v26 = vmul.f32 %v9808_v53, %v9808_v53 }
0x10c7   : > { %4736 = vmatpush.msrb.mxu3 %v6463_v35  ;;  %v6502_v35 = vld [vmem:[%s11360_s12 + $0xa38] sm:$0xff] }
0x10c8   : > { %v4321_v12 = vsel %vm599_vm1, %v4310_v26, 0.0 }
0x10c9   : > { %4322 = vadd.xlane.f32.xlu0 %v4321_v12  ;;  %v4296_v6 = vpop.xlane.xlu1 %4295  ;;  %4737 = vmatpush.msrb.mxu3 %v6459_v22  ;;  %v6550_v22 = vld [vmem:[%s11360_s12 + $0xbb8] sm:$0xff] }
0x10ca   : > { %v4301_v15 = vmul.f32 %v4296_v6, %v11445_v10  ;;  %v6470_v6 = vld [vmem:[%s11358_s10 + $0x3a0] sm:$0xff] }
0x10cb   : > { %4702 = vmatpush.msrb.mxu1 %v6470_v6  ;;  %v6504_v6 = vld [vmem:[%s11360_s12 + $0xa48] sm:$0xff] }
0x10cc   : > { %v9814_v40 = vsub.f32 %v4277_v49, %v4301_v15  ;;  %v6468_v15 = vld [vmem:[%s11358_s10 + $0x330] sm:$0xff] }
0x10cd   : > { %4767 = vmatpush.msra.mxu2 %v6468_v15  ;;  %v6523_v15 = vld [vmem:[%s11360_s12 + $0xae0] sm:$0xff] }
0x10ce   : > { %v4311_v44 = vmul.f32 %v9814_v40, %v9814_v40 }
0x10cf   : > { %4768 = vmatpush.msra.mxu2 %v6464_v14  ;;  %v6521_v14 = vld [vmem:[%s11360_s12 + $0xad0] sm:$0xff] }
0x10d0   : > { %v4324_v57 = vsel %vm1566_vm7, %v4311_v44, 0.0  ;;  %v6473_v44 = vld [vmem:[%s11358_s10 + $0x3b8] sm:$0xff] }
0x10d1   : > { %4325 = vadd.xlane.f32.xlu2 %v4324_v57  ;;  %v6466_v57 = vld [vmem:[%s11358_s10 + $0x320] sm:$0xff]  ;;  %4798 = vmatpush.msrb.mxu0 %v6473_v44 }
0x10d2   : > { %4703 = vmatpush.msrb.mxu1 %v6466_v57  ;;  %4769 = vmatpush.msra.mxu2 %v6460_v1  ;;  %v6539_v44 = vld [vmem:[%s11360_s12 + $0xb60] sm:$0xff]  ;;  %v6552_v57 = vld [vmem:[%s11360_s12 + $0xbc8] sm:$0xff] }
0x10d3   : > { %4799 = vmatpush.msrb.mxu0 %v6469_v2  ;;  %v6503_v2 = vld [vmem:[%s11360_s12 + $0xa40] sm:$0xff] }
0x10d4   : > { %4704 = vmatpush.msrb.mxu1 %v6462_v21  ;;  %v6551_v21 = vld [vmem:[%s11360_s12 + $0xbc0] sm:$0xff] }
0x10d5   : > { %4800 = vmatpush.msrb.mxu0 %v6465_v38 }
0x10d6   : > { %4705 = vmatpush.msrb.mxu1 %v6458_v16  ;;  %v6520_v16 = vld [vmem:[%s11360_s12 + $0xac8] sm:$0xff] }
0x10d7   : > { %4801 = vmatpush.msrb.mxu0 %v6461_v5  ;;  %v6500_v5 = vld [vmem:[%s11360_s12 + $0xa28] sm:$0xff] }
0x1104   : > { %v4314_v54 = vpop.xlane.xlu0 %4313 }
0x1105   : > { %v4327_v56 = vmul.f32 %v4314_v54, %v11445_v10 }
0x1107   : > { %v4332_v4 = vadd.f32 1e-05, %v4327_v56 }
0x1109   : > { %7074 = vrsqrt.f32 %v4332_v4  ;;  %vm4343_vm2 = vweird.f32 %v4332_v4 }
0x110f   : > { %v7075_v58 = vpop.eup %7074 }
0x1110   : > { %v4338_v23 = vmul.f32 %v7075_v58, %v4332_v4  ;;  %vm4344_vm0 = vweird.f32 %v7075_v58 }
0x1111   : > { %vm4345_vm3 = vmor %vm4343_vm2, %vm4344_vm0 }
0x1112   : > { %v4339_v61 = vmul.f32 %v7075_v58, %v4338_v23 }
0x1114   : > { %v4340_v62 = vmul.f32 0.5, %v4339_v61 }
0x1116   : > { %v4341_v43 = vsub.f32 1.5, %v4340_v62 }
0x1118   : > { %v4342_v39 = vmul.f32 %v7075_v58, %v4341_v43 }
0x111a   : > { %v4346_v20 = vsel %vm4345_vm3, %v7075_v58, %v4342_v39 }
0x111b   : > { %v4387_v32 = vmul.f32 %v4346_v20, %v9790_v28 }
0x111d   : > { %v4395_v55 = vmul.f32 %v9871_v47, %v4387_v32 }
0x111f   : > { %v9881_v13 = vadd.f32 %v9876_v31, %v4395_v55  ;;  %v4317_v33 = vpop.xlane.xlu2 %4316 }
0x1120   : > { %v4328_v7 = vmul.f32 %v4317_v33, %v11445_v10 }
0x1121   : > { %6374 = vmatmul.msk.f32.vlgmr.msra.gmra.mxu1 %vm599_vm1, %v9881_v13  ;;  %6379 = vmatmul.msk.f32.vlgmr.msra.gmra.mxu3 %vm599_vm1, %v9881_v13 }
0x1122   : > { %v4333_v46 = vadd.f32 1e-05, %v4328_v7  ;;  %6384 = vmatmul.msk.f32.vlgmr.msrb.gmra.mxu2 %vm599_vm1, %v9881_v13  ;;  %6389 = vmatmul.msk.f32.vlgmr.msra.gmra.mxu0 %vm599_vm1, %v9881_v13 }
0x1124   : > { %7076 = vrsqrt.f32 %v4333_v46  ;;  %vm4353_vm5 = vweird.f32 %v4333_v46 }
0x112a   : > { %v7077_v41 = vpop.eup %7076 }
0x112b   : > { %v4348_v45 = vmul.f32 %v7077_v41, %v4333_v46  ;;  %vm4354_vm4 = vweird.f32 %v7077_v41 }
0x112c   : > { %vm4355_vm6 = vmor %vm4353_vm5, %vm4354_vm4 }
0x112d   : > { %v4349_v49 = vmul.f32 %v7077_v41, %v4348_v45 }
0x112f   : > { %v4350_v30 = vmul.f32 0.5, %v4349_v49 }
0x1131   : > { %v4351_v29 = vsub.f32 1.5, %v4350_v30 }
0x1133   : > { %v4352_v59 = vmul.f32 %v7077_v41, %v4351_v29 }
0x1134   : > { %v4320_v28 = vpop.xlane.xlu1 %4319 }
0x1135   : > { %v4356_v60 = vsel %vm4355_vm6, %v7077_v41, %v4352_v59  ;;  %v4329_v11 = vmul.f32 %v4320_v28, %v11445_v10  ;;  %v6557_v28 = vld [vmem:[%s11360_s12 + $0xbf0] sm:$0xff] }
0x1136   : > { %v4388_v3 = vmul.f32 %v4356_v60, %v9796_v18  ;;  %v6508_v60 = vld [vmem:[%s11360_s12 + $0xa68] sm:$0xff] }
0x1137   : > { %v4334_v27 = vadd.f32 1e-05, %v4329_v11  ;;  %v6556_v11 = vld [vmem:[%s11360_s12 + $0xbe8] sm:$0xff] }
0x1138   : > { %v4396_v25 = vmul.f32 %v9871_v47, %v4388_v3  ;;  %v6507_v3 = vld [vmem:[%s11360_s12 + $0xa60] sm:$0xff] }
0x1139   : > { %7078 = vrsqrt.f32 %v4334_v27  ;;  %vm4363_vm8 = vweird.f32 %v4334_v27 }
0x113a   : > { %v9896_v8 = vadd.f32 %v9876_v31, %v4396_v25  ;;  %v6542_v25 = vld [vmem:[%s11360_s12 + $0xb78] sm:$0xff] }
0x113b   : > { %4966 = vmatpush.msrb.mxu2 %v6542_v25  ;;  %v6513_v25 = vld [vmem:[%s11360_s12 + $0xa90] sm:$0xff] }
0x113c   : > { %6375 = vmatmul.msk.f32.gmra.mxu1 %vm599_vm1, %v9896_v8  ;;  %6380 = vmatmul.msk.f32.gmra.mxu3 %vm599_vm1, %v9896_v8  ;;  %v4323_v52 = vpop.xlane.xlu0 %4322 }
0x113d   : > { %6385 = vmatmul.msk.f32.gmra.mxu2 %vm599_vm1, %v9896_v8  ;;  %6390 = vmatmul.msk.f32.gmra.mxu0 %vm599_vm1, %v9896_v8  ;;  %v4330_v18 = vmul.f32 %v4323_v52, %v11445_v10  ;;  %v6555_v52 = vld [vmem:[%s11360_s12 + $0xbe0] sm:$0xff] }
0x113f   : > { %v7079_v48 = vpop.eup %7078  ;;  %v4335_v42 = vadd.f32 1e-05, %v4330_v18  ;;  %v6506_v18 = vld [vmem:[%s11360_s12 + $0xa58] sm:$0xff] }
0x1140   : > { %v4358_v26 = vmul.f32 %v7079_v48, %v4334_v27  ;;  %vm4364_vm15 = vweird.f32 %v7079_v48  ;;  %v6526_v27 = vld [vmem:[%s11360_s12 + $0xaf8] sm:$0xff] }
0x1141   : > { %7080 = vrsqrt.f32 %v4335_v42  ;;  %vm4365_vm9 = vmor %vm4363_vm8, %vm4364_vm15  ;;  %vm4373_vm11 = vweird.f32 %v4335_v42  ;;  %4934 = vmatpush.msra.mxu3 %v6526_v27 }
0x1142   : > { %v4359_v12 = vmul.f32 %v7079_v48, %v4358_v26  ;;  %v6540_v26 = vld [vmem:[%s11360_s12 + $0xb68] sm:$0xff] }
0x1144   : > { %v4360_v0 = vmul.f32 0.5, %v4359_v12  ;;  %v4326_v17 = vpop.xlane.xlu2 %4325  ;;  %v6553_v12 = vld [vmem:[%s11360_s12 + $0xbd0] sm:$0xff] }
0x1145   : > { %v4331_v19 = vmul.f32 %v4326_v17, %v11445_v10  ;;  %v6538_v17 = vld [vmem:[%s11360_s12 + $0xb58] sm:$0xff] }
0x1146   : > { %v4361_v34 = vsub.f32 1.5, %v4360_v0  ;;  %v6522_v0 = vld [vmem:[%s11360_s12 + $0xad8] sm:$0xff] }
0x1147   : > { %v7081_v50 = vpop.eup %7080  ;;  %v4336_v36 = vadd.f32 1e-05, %v4331_v19  ;;  %v6537_v19 = vld [vmem:[%s11360_s12 + $0xb50] sm:$0xff] }
0x1148   : > { %v4362_v37 = vmul.f32 %v7079_v48, %v4361_v34  ;;  %v4368_v54 = vmul.f32 %v7081_v50, %v4335_v42  ;;  %vm4374_vm10 = vweird.f32 %v7081_v50  ;;  %v6541_v42 = vld [vmem:[%s11360_s12 + $0xb70] sm:$0xff] }
0x1149   : > { %7082 = vrsqrt.f32 %v4336_v36  ;;  %vm4375_vm12 = vmor %vm4373_vm11, %vm4374_vm10  ;;  %vm4383_vm14 = vweird.f32 %v4336_v36  ;;  %4967 = vmatpush.msrb.mxu2 %v6541_v42  ;;  %v6501_v34 = vld [vmem:[%s11360_s12 + $0xa30] sm:$0xff]  ;;  %v6512_v42 = vld [vmem:[%s11360_s12 + $0xa88] sm:$0xff] }
0x114a   : > { %v4366_v56 = vsel %vm4365_vm9, %v7079_v48, %v4362_v37  ;;  %v4369_v4 = vmul.f32 %v7081_v50, %v4368_v54  ;;  %v6525_v48 = vld [vmem:[%s11360_s12 + $0xaf0] sm:$0xff]  ;;  %v6519_v37 = vld [vmem:[%s11360_s12 + $0xac0] sm:$0xff] }
0x114b   : > { %v4389_v58 = vmul.f32 %v4366_v56, %v9802_v24  ;;  %4935 = vmatpush.msra.mxu3 %v6525_v48  ;;  %4968 = vmatpush.msrb.mxu2 %v6540_v26  ;;  %v6535_v54 = vld [vmem:[%s11360_s12 + $0xb40] sm:$0xff]  ;;  %v6548_v56 = vld [vmem:[%s11360_s12 + $0xba8] sm:$0xff] }
0x114c   : > { %v4370_v23 = vmul.f32 0.5, %v4369_v4  ;;  %v6499_v4 = vld [vmem:[%s11360_s12 + $0xa20] sm:$0xff] }
0x114d   : > { %v4397_v61 = vmul.f32 %v9871_v47, %v4389_v58  ;;  %4936 = vmatpush.msra.mxu3 %v6524_v51  ;;  %4969 = vmatpush.msrb.mxu2 %v6539_v44  ;;  %v6518_v58 = vld [vmem:[%s11360_s12 + $0xab8] sm:$0xff]  ;;  %v6527_v51 = vld [vmem:[%s11360_s12 + $0xb00] sm:$0xff] }
0x114e   : > { %v4371_v62 = vsub.f32 1.5, %v4370_v23  ;;  %v6534_v23 = vld [vmem:[%s11360_s12 + $0xb38] sm:$0xff] }
0x114f   : > { %v7083_v43 = vpop.eup %7082  ;;  %v9959_v39 = vadd.f32 %v9876_v31, %v4397_v61  ;;  %4937 = vmatpush.msra.mxu3 %v6523_v15  ;;  %4970 = vmatpush.msrb.mxu2 %v6538_v17  ;;  %v6547_v61 = vld [vmem:[%s11360_s12 + $0xba0] sm:$0xff]  ;;  %v6457_v15 = vld [vmem:[%s11360_s12 + $0x9f8] sm:$0xff]  ;;  %v6407_v17 = vld [vmem:[%s11360_s12 + $0x868] sm:$0xff] }
0x1150   : > { %v4372_v20 = vmul.f32 %v7081_v50, %v4371_v62  ;;  %v4378_v32 = vmul.f32 %v7083_v43, %v4336_v36  ;;  %vm4384_vm13 = vweird.f32 %v7083_v43  ;;  %v6549_v36 = vld [vmem:[%s11360_s12 + $0xbb0] sm:$0xff] }
0x1151   : > { %6376 = vmatmul.msk.f32.gmra.mxu1 %vm599_vm1, %v9959_v39  ;;  %6381 = vmatmul.msk.f32.gmra.mxu3 %vm599_vm1, %v9959_v39  ;;  %vm4385_vm0 = vmor %vm4383_vm14, %vm4384_vm13 }
0x1152   : > { %v4376_v24 = vsel %vm4375_vm12, %v7081_v50, %v4372_v20  ;;  %v4379_v55 = vmul.f32 %v7083_v43, %v4378_v32  ;;  %6386 = vmatmul.msk.f32.gmra.mxu2 %vm599_vm1, %v9959_v39  ;;  %6391 = vmatmul.msk.f32.gmra.mxu0 %vm599_vm1, %v9959_v39  ;;  %v6536_v50 = vld [vmem:[%s11360_s12 + $0xb48] sm:$0xff]  ;;  %v6498_v20 = vld [vmem:[%s11360_s12 + $0xa18] sm:$0xff]  ;;  %v6517_v32 = vld [vmem:[%s11360_s12 + $0xab0] sm:$0xff] }
0x1153   : > { %v4390_v33 = vmul.f32 %v4376_v24, %v9808_v53  ;;  %4938 = vmatpush.msra.mxu3 %v6522_v0  ;;  %4971 = vmatpush.msrb.mxu2 %v6537_v19  ;;  %v6533_v24 = vld [vmem:[%s11360_s12 + $0xb30] sm:$0xff]  ;;  %v6441_v19 = vld [vmem:[%s11360_s12 + $0x978] sm:$0xff] }
0x1154   : > { %v4380_v7 = vmul.f32 0.5, %v4379_v55  ;;  %v6456_v0 = vld [vmem:[%s11360_s12 + $0x9f0] sm:$0xff] }
0x1155   : > { %v4398_v46 = vmul.f32 %v9871_v47, %v4390_v33  ;;  %4939 = vmatpush.msra.mxu3 %v6521_v14  ;;  %4972 = vmatpush.msrb.mxu2 %v6536_v50  ;;  %v6546_v33 = vld [vmem:[%s11360_s12 + $0xb98] sm:$0xff] }
0x1156   : > { %v4381_v41 = vsub.f32 1.5, %v4380_v7  ;;  %v6425_v14 = vld [vmem:[%s11360_s12 + $0x8f8] sm:$0xff] }
0x1157   : > { %v9972_v45 = vadd.f32 %v9876_v31, %v4398_v46  ;;  %4940 = vmatpush.msra.mxu3 %v6520_v16  ;;  %4973 = vmatpush.msrb.mxu2 %v6535_v54  ;;  %v6497_v46 = vld [vmem:[%s11360_s12 + $0xa10] sm:$0xff]  ;;  %v6405_v50 = vld [vmem:[%s11360_s12 + $0x858] sm:$0xff] }
0x1158   : > { %v4382_v49 = vmul.f32 %v7083_v43, %v4381_v41  ;;  %v6516_v41 = vld [vmem:[%s11360_s12 + $0xaa8] sm:$0xff]  ;;  %v6453_v54 = vld [vmem:[%s11360_s12 + $0x9d8] sm:$0xff] }
0x1159   : > { %6377 = vmatmul.msk.f32.gmra.mxu1 %vm599_vm1, %v9972_v45  ;;  %6382 = vmatmul.msk.f32.gmra.mxu3 %vm599_vm1, %v9972_v45 }
0x115a   : > { %v4386_v30 = vsel %vm4385_vm0, %v7083_v43, %v4382_v49  ;;  %6387 = vmatmul.msk.f32.gmra.mxu2 %vm599_vm1, %v9972_v45  ;;  %6392 = vmatmul.msk.f32.gmra.mxu0 %vm599_vm1, %v9972_v45  ;;  %v6532_v49 = vld [vmem:[%s11360_s12 + $0xb28] sm:$0xff] }
0x115b   : > { %v4391_v53 = vmul.f32 %v4386_v30, %v9814_v40  ;;  %v6510_v40 = vld [vmem:[%s11360_s12 + $0xa78] sm:$0xff]  ;;  %4941 = vmatpush.msra.mxu3 %v6519_v37  ;;  %4974 = vmatpush.msrb.mxu2 %v6534_v23  ;;  %v6545_v30 = vld [vmem:[%s11360_s12 + $0xb90] sm:$0xff]  ;;  %v6439_v23 = vld [vmem:[%s11360_s12 + $0x968] sm:$0xff] }
0x115c   : > { %4902 = vmatpush.msra.mxu1 %v6510_v40  ;;  %v6531_v40 = vld [vmem:[%s11360_s12 + $0xb20] sm:$0xff] }
0x115d   : > { %v4399_v29 = vmul.f32 %v9871_v47, %v4391_v53  ;;  %v6558_v47 = vld [vmem:[%s11360_s12 + $0xbf8] sm:$0xff]  ;;  %4942 = vmatpush.msra.mxu3 %v6518_v58  ;;  %4975 = vmatpush.msrb.mxu2 %v6533_v24  ;;  %v6496_v53 = vld [vmem:[%s11360_s12 + $0xa08] sm:$0xff]  ;;  %v6422_v24 = vld [vmem:[%s11360_s12 + $0x8e0] sm:$0xff] }
0x115e   : > { %4998 = vmatpush.msra.mxu0 %v6558_v47  ;;  %v6544_v47 = vld [vmem:[%s11360_s12 + $0xb88] sm:$0xff] }
0x115f   : > { %v9985_v59 = vadd.f32 %v9876_v31, %v4399_v29  ;;  %v6509_v31 = vld [vmem:[%s11360_s12 + $0xa70] sm:$0xff]  ;;  %4943 = vmatpush.msra.mxu3 %v6517_v32  ;;  %4976 = vmatpush.msrb.mxu2 %v6532_v49  ;;  %v6515_v29 = vld [vmem:[%s11360_s12 + $0xaa0] sm:$0xff]  ;;  %v6423_v58 = vld [vmem:[%s11360_s12 + $0x8e8] sm:$0xff] }
0x1160   : > { %4903 = vmatpush.msra.mxu1 %v6509_v31  ;;  %4999 = vmatpush.msra.mxu0 %v6557_v28  ;;  %v6495_v31 = vld [vmem:[%s11360_s12 + $0xa00] sm:$0xff]  ;;  %v6514_v28 = vld [vmem:[%s11360_s12 + $0xa98] sm:$0xff]  ;;  %v6403_v32 = vld [vmem:[%s11360_s12 + $0x848] sm:$0xff] }
0x1161   : > { %6378 = vmatmul.msk.f32.gmra.mxu1 %vm599_vm1, %v9985_v59  ;;  %6383 = vmatmul.msk.f32.gmra.mxu3 %vm599_vm1, %v9985_v59  ;;  %v6421_v49 = vld [vmem:[%s11360_s12 + $0x8d8] sm:$0xff] }
0x1162   : > { %6388 = vmatmul.msk.f32.gmra.mxu2 %vm599_vm1, %v9985_v59  ;;  %6393 = vmatmul.msk.f32.gmra.mxu0 %vm599_vm1, %v9985_v59 }
0x1163   : > { %4904 = vmatpush.msra.mxu1 %v6508_v60  ;;  %5000 = vmatpush.msra.mxu0 %v6556_v11  ;;  %v6530_v60 = vld [vmem:[%s11360_s12 + $0xb18] sm:$0xff]  ;;  %v6543_v11 = vld [vmem:[%s11360_s12 + $0xb80] sm:$0xff] }
0x1164   : > { %4944 = vmatpush.msra.mxu3 %v6516_v41  ;;  %4977 = vmatpush.msrb.mxu2 %v6531_v40  ;;  %v6402_v41 = vld [vmem:[%s11360_s12 + $0x840] sm:$0xff] }
0x1165   : > { %4905 = vmatpush.msra.mxu1 %v6507_v3  ;;  %5001 = vmatpush.msra.mxu0 %v6555_v52  ;;  %v6529_v52 = vld [vmem:[%s11360_s12 + $0xb10] sm:$0xff] }
0x1166   : > { %4945 = vmatpush.msra.mxu3 %v6515_v29  ;;  %4978 = vmatpush.msrb.mxu2 %v6530_v60  ;;  %v6450_v29 = vld [vmem:[%s11360_s12 + $0x9c0] sm:$0xff]  ;;  %v6420_v60 = vld [vmem:[%s11360_s12 + $0x8d0] sm:$0xff] }
0x1167   : > { %4906 = vmatpush.msra.mxu1 %v6506_v18  ;;  %5002 = vmatpush.msra.mxu0 %v6554_v63  ;;  %v6528_v63 = vld [vmem:[%s11360_s12 + $0xb08] sm:$0xff] }
0x1168   : > { %4946 = vmatpush.msra.mxu3 %v6514_v28  ;;  %4979 = vmatpush.msrb.mxu2 %v6529_v52  ;;  %v6401_v28 = vld [vmem:[%s11360_s12 + $0x838] sm:$0xff] }
0x1169   : > { %6475 = vmatmul.msk.f32.vlgmr.msrb.gmra.mxu1 %vm599_vm1, %v9881_v13  ;;  %6480 = vmatmul.msk.f32.vlgmr.msrb.gmra.mxu3 %vm599_vm1, %v9881_v13  ;;  %v6449_v52 = vld [vmem:[%s11360_s12 + $0x9b8] sm:$0xff] }
0x116a   : > { %6485 = vmatmul.msk.f32.vlgmr.msra.gmra.mxu2 %vm599_vm1, %v9881_v13  ;;  %6490 = vmatmul.msk.f32.vlgmr.msrb.gmra.mxu0 %vm599_vm1, %v9881_v13 }
0x116b   : > { %4907 = vmatpush.msra.mxu1 %v6505_v9  ;;  %5003 = vmatpush.msra.mxu0 %v6553_v12  ;;  %v6511_v9 = vld [vmem:[%s11360_s12 + $0xa80] sm:$0xff] }
0x116c   : > { %4947 = vmatpush.msra.mxu3 %v6513_v25  ;;  %4980 = vmatpush.msrb.mxu2 %v6528_v63 }
0x116d   : > { %4908 = vmatpush.msra.mxu1 %v6504_v6  ;;  %5004 = vmatpush.msra.mxu0 %v6552_v57  ;;  %v6409_v6 = vld [vmem:[%s11360_s12 + $0x878] sm:$0xff] }
0x116e   : > { %4948 = vmatpush.msra.mxu3 %v6512_v42  ;;  %4981 = vmatpush.msrb.mxu2 %v6527_v51  ;;  %v6419_v51 = vld [vmem:[%s11360_s12 + $0x8c8] sm:$0xff] }
0x116f   : > { %4909 = vmatpush.msra.mxu1 %v6503_v2  ;;  %5005 = vmatpush.msra.mxu0 %v6551_v21  ;;  %v6408_v2 = vld [vmem:[%s11360_s12 + $0x870] sm:$0xff]  ;;  %v6455_v21 = vld [vmem:[%s11360_s12 + $0x9e8] sm:$0xff] }
0x1170   : > { %4949 = vmatpush.msra.mxu3 %v6511_v9  ;;  %5094 = vmatpush.msra.mxu2 %v6441_v19  ;;  %v6400_v9 = vld [vmem:[%s11360_s12 + $0x830] sm:$0xff] }
0x1171   : > { %6476 = vmatmul.msk.f32.gmra.mxu1 %vm599_vm1, %v9896_v8  ;;  %6481 = vmatmul.msk.f32.gmra.mxu3 %vm599_vm1, %v9896_v8 }
0x1172   : > { %6486 = vmatmul.msk.f32.gmra.mxu2 %vm599_vm1, %v9896_v8  ;;  %6491 = vmatmul.msk.f32.gmra.mxu0 %vm599_vm1, %v9896_v8 }
0x1173   : > { %4910 = vmatpush.msra.mxu1 %v6502_v35  ;;  %5006 = vmatpush.msra.mxu0 %v6550_v22  ;;  %v6406_v35 = vld [vmem:[%s11360_s12 + $0x860] sm:$0xff] }
0x1174   : > { %5062 = vmatpush.msrb.mxu3 %v6425_v14  ;;  %v6454_v22 = vld [vmem:[%s11360_s12 + $0x9e0] sm:$0xff] }
0x1175   : > { %4911 = vmatpush.msra.mxu1 %v6501_v34  ;;  %5007 = vmatpush.msra.mxu0 %v6549_v36  ;;  %v6424_v36 = vld [vmem:[%s11360_s12 + $0x8f0] sm:$0xff]  ;;  %v6434_v14 = vld [vmem:[%s11360_s12 + $0x940] sm:$0xff] }
0x1176   : > { %5063 = vmatpush.msrb.mxu3 %v6424_v36  ;;  %v6398_v36 = vld [vmem:[%s11360_s12 + $0x820] sm:$0xff] }
0x1177   : > { %4912 = vmatpush.msra.mxu1 %v6500_v5  ;;  %5008 = vmatpush.msra.mxu0 %v6548_v56  ;;  %v6440_v5 = vld [vmem:[%s11360_s12 + $0x970] sm:$0xff] }
0x1178   : > { %5095 = vmatpush.msra.mxu2 %v6440_v5  ;;  %5064 = vmatpush.msrb.mxu3 %v6423_v58  ;;  %v6417_v5 = vld [vmem:[%s11360_s12 + $0x8b8] sm:$0xff]  ;;  %v6446_v58 = vld [vmem:[%s11360_s12 + $0x9a0] sm:$0xff] }
0x1179   : > { %6477 = vmatmul.msk.f32.gmra.mxu1 %vm599_vm1, %v9959_v39  ;;  %6482 = vmatmul.msk.f32.gmra.mxu3 %vm599_vm1, %v9959_v39 }
0x117a   : > { %6487 = vmatmul.msk.f32.gmra.mxu2 %vm599_vm1, %v9959_v39  ;;  %6492 = vmatmul.msk.f32.gmra.mxu0 %vm599_vm1, %v9959_v39 }
0x117b   : > { %4913 = vmatpush.msra.mxu1 %v6499_v4  ;;  %5009 = vmatpush.msra.mxu0 %v6547_v61  ;;  %v6404_v4 = vld [vmem:[%s11360_s12 + $0x850] sm:$0xff] }
0x117c   : > { %v6474_v61 = vld [vmem:[%s11359_s11 + $0x14] sm:$0xf]  ;;  %5096 = vmatpush.msra.mxu2 %v6439_v23  ;;  %5065 = vmatpush.msrb.mxu3 %v6422_v24 }
0x117d   : > { %4914 = vmatpush.msra.mxu1 %v6498_v20  ;;  %5010 = vmatpush.msra.mxu0 %v6546_v33  ;;  %v6452_v20 = vld [vmem:[%s11360_s12 + $0x9d0] sm:$0xff]  ;;  %v6438_v33 = vld [vmem:[%s11360_s12 + $0x960] sm:$0xff] }
0x117e   : > { %5097 = vmatpush.msra.mxu2 %v6438_v33  ;;  %5066 = vmatpush.msrb.mxu3 %v6421_v49  ;;  %v6432_v24 = vld [vmem:[%s11360_s12 + $0x930] sm:$0xff] }
0x117f   : > { %4915 = vmatpush.msra.mxu1 %v6497_v46  ;;  %5011 = vmatpush.msra.mxu0 %v6545_v30  ;;  %v6451_v46 = vld [vmem:[%s11360_s12 + $0x9c8] sm:$0xff]  ;;  %v10338_v30 = vperm.slane %v6474_v61, 0 }
0x1180   : > { %5067 = vmatpush.msrb.mxu3 %v6420_v60  ;;  %v6415_v60 = vld [vmem:[%s11360_s12 + $0x8a8] sm:$0xff] }
0x1181   : > { %6478 = vmatmul.msk.f32.gmra.mxu1 %vm599_vm1, %v9972_v45  ;;  %6483 = vmatmul.msk.f32.gmra.mxu3 %vm599_vm1, %v9972_v45 }
0x1182   : > { %6488 = vmatmul.msk.f32.gmra.mxu2 %vm599_vm1, %v9972_v45  ;;  %6493 = vmatmul.msk.f32.gmra.mxu0 %vm599_vm1, %v9972_v45 }
0x1183   : > { %4916 = vmatpush.msra.mxu1 %v6496_v53  ;;  %5012 = vmatpush.msra.mxu0 %v6544_v47  ;;  %v6437_v53 = vld [vmem:[%s11360_s12 + $0x958] sm:$0xff]  ;;  %v10348_v47 = vperm.slane %v6474_v61, 3 }
0x1184   : > { %5098 = vmatpush.msra.mxu2 %v6437_v53  ;;  %5068 = vmatpush.msrb.mxu3 %v6419_v51  ;;  %v6444_v51 = vld [vmem:[%s11360_s12 + $0x990] sm:$0xff] }
0x1185   : > { %4917 = vmatpush.msra.mxu1 %v6495_v31  ;;  %5013 = vmatpush.msra.mxu0 %v6543_v11  ;;  %v6436_v11 = vld [vmem:[%s11360_s12 + $0x950] sm:$0xff] }
0x1186   : > { %5099 = vmatpush.msra.mxu2 %v6436_v11 }
0x1187   : > { %5030 = vmatpush.msrb.mxu1 %v6409_v6  ;;  %5126 = vmatpush.msrb.mxu0 %v6457_v15  ;;  %v6435_v6 = vld [vmem:[%s11360_s12 + $0x948] sm:$0xff] }
0x1188   : > { %5100 = vmatpush.msra.mxu2 %v6435_v6  ;;  %v6414_v6 = vld [vmem:[%s11360_s12 + $0x8a0] sm:$0xff] }
0x1189   : > { %6479 = vmatmul.msk.f32.gmra.mxu1 %vm599_vm1, %v9985_v59  ;;  %6484 = vmatmul.msk.f32.gmra.mxu3 %vm599_vm1, %v9985_v59 }
0x118a   : > { %6489 = vmatmul.msk.f32.gmra.mxu2 %vm599_vm1, %v9985_v59  ;;  %6494 = vmatmul.msk.f32.gmra.mxu0 %vm599_vm1, %v9985_v59 }
0x118b   : > { %5031 = vmatpush.msrb.mxu1 %v6408_v2  ;;  %5127 = vmatpush.msrb.mxu0 %v6456_v0  ;;  %v6448_v2 = vld [vmem:[%s11360_s12 + $0x9b0] sm:$0xff] }
0x118c   : > { %5101 = vmatpush.msra.mxu2 %v6434_v14 }
0x118d   : > { %5032 = vmatpush.msrb.mxu1 %v6407_v17  ;;  %5128 = vmatpush.msrb.mxu0 %v6455_v21  ;;  %v10378_v17 = vperm.slane %v6474_v61, 1  ;;  %v6399_v21 = vld [vmem:[%s11360_s12 + $0x828] sm:$0xff] }
0x118f   : > { %5033 = vmatpush.msrb.mxu1 %v6406_v35  ;;  %5129 = vmatpush.msrb.mxu0 %v6454_v22  ;;  %v6418_v35 = vld [vmem:[%s11360_s12 + $0x8c0] sm:$0xff]  ;;  %v10389_v22 = vperm.slane %v6474_v61, 2 }
0x1190   : > { %5069 = vmatpush.msrb.mxu3 %v6418_v35  ;;  %v6413_v35 = vld [vmem:[%s11360_s12 + $0x898] sm:$0xff] }
0x1191   : > { %5034 = vmatpush.msrb.mxu1 %v6405_v50  ;;  %5130 = vmatpush.msrb.mxu0 %v6453_v54  ;;  %v6447_v50 = vld [vmem:[%s11360_s12 + $0x9a8] sm:$0xff]  ;;  %v6433_v54 = vld [vmem:[%s11360_s12 + $0x938] sm:$0xff] }
0x1192   : > { %5070 = vmatpush.msrb.mxu3 %v6417_v5  ;;  %5102 = vmatpush.msra.mxu2 %v6433_v54  ;;  %v6442_v54 = vld [vmem:[%s11360_s12 + $0x980] sm:$0xff] }
0x1193   : > { %5035 = vmatpush.msrb.mxu1 %v6404_v4  ;;  %5131 = vmatpush.msrb.mxu0 %v6452_v20  ;;  %v6397_v20 = vld [vmem:[%s11360_s12 + $0x818] sm:$0xff] }
0x1194   : > { %5103 = vmatpush.msra.mxu2 %v6432_v24  ;;  %v6428_v24 = vld [vmem:[%s11360_s12 + $0x910] sm:$0xff] }
0x1195   : > { %5036 = vmatpush.msrb.mxu1 %v6403_v32  ;;  %5132 = vmatpush.msrb.mxu0 %v6451_v46  ;;  %v6416_v32 = vld [vmem:[%s11360_s12 + $0x8b0] sm:$0xff] }
0x1196   : > { %5071 = vmatpush.msrb.mxu3 %v6416_v32 }
0x1197   : > { %5037 = vmatpush.msrb.mxu1 %v6402_v41  ;;  %5133 = vmatpush.msrb.mxu0 %v6450_v29  ;;  %v6445_v41 = vld [vmem:[%s11360_s12 + $0x998] sm:$0xff] }
0x1198   : > { %5072 = vmatpush.msrb.mxu3 %v6415_v60 }
0x1199   : > { %5038 = vmatpush.msrb.mxu1 %v6401_v28  ;;  %5134 = vmatpush.msrb.mxu0 %v6449_v52  ;;  %v6396_v28 = vld [vmem:[%s11360_s12 + $0x810] sm:$0xff]  ;;  %v6431_v52 = vld [vmem:[%s11360_s12 + $0x928] sm:$0xff] }
0x119a   : > { %5104 = vmatpush.msra.mxu2 %v6431_v52  ;;  %5073 = vmatpush.msrb.mxu3 %v6414_v6 }
0x119b   : > { %5039 = vmatpush.msrb.mxu1 %v6400_v9  ;;  %5135 = vmatpush.msrb.mxu0 %v6448_v2  ;;  %v6394_v2 = vld [vmem:[%s11360_s12 + $0x800] sm:$0xff] }
0x119c   : > { %5074 = vmatpush.msrb.mxu3 %v6413_v35 }
0x119d   : > { %5040 = vmatpush.msrb.mxu1 %v6399_v21  ;;  %5136 = vmatpush.msrb.mxu0 %v6447_v50  ;;  %v6443_v21 = vld [vmem:[%s11360_s12 + $0x988] sm:$0xff]  ;;  %v6429_v50 = vld [vmem:[%s11360_s12 + $0x918] sm:$0xff] }
0x119e   : > { %v10122_v38 = vpop.f32.mrf.mxu1 }
0x119f   : > { %v10127_v1 = vpop.f32.mrf.mxu0  ;;  %5041 = vmatpush.msrb.mxu1 %v6398_v36  ;;  %5137 = vmatpush.msrb.mxu0 %v6446_v58 }
0x11a1   : > { %5042 = vmatpush.msrb.mxu1 %v6397_v20  ;;  %5138 = vmatpush.msrb.mxu0 %v6445_v41 }
0x11a3   : > { %5043 = vmatpush.msrb.mxu1 %v6396_v28  ;;  %5139 = vmatpush.msrb.mxu0 %v6444_v51  ;;  %v6426_v28 = vld [vmem:[%s11360_s12 + $0x900] sm:$0xff] }
0x11a4   : > { %v10165_v62 = vpop.f32.mrf.mxu3 }
0x11a5   : > { %v10167_v43 = vpop.f32.mrf.mxu2  ;;  %5140 = vmatpush.msrb.mxu0 %v6443_v21 }
0x11a7   : > { %5141 = vmatpush.msrb.mxu0 %v6442_v54 }
0x11b9   : > { %v10178_v55 = vpop.f32.mrf.mxu1 }
0x11ba   : > { %v10183_v7 = vpop.f32.mrf.mxu0 }
0x11bf   : > { %v10221_v3 = vpop.f32.mrf.mxu3 }
0x11c0   : > { %v10223_v27 = vpop.f32.mrf.mxu2 }
0x11ce   : > { %v10231_v18 = vpop.f32.mrf.mxu1 }
0x11cf   : > { %v10233_v48 = vpop.f32.mrf.mxu0 }
0x11d4   : > { %v10247_v26 = vpop.f32.mrf.mxu3 }
0x11d5   : > { %v10249_v12 = vpop.f32.mrf.mxu2 }
0x11d6   : > { %v10257_v44 = vpop.f32.mrf.mxu1 }
0x11d7   : > { %v10259_v57 = vpop.f32.mrf.mxu0 }
0x11dc   : > { %v10285_v34 = vpop.f32.mrf.mxu3 }
0x11dd   : > { %v10287_v16 = vpop.f32.mrf.mxu2 }
0x11de   : > { %v10298_v37 = vpop.f32.mrf.mxu1 }
0x11df   : > { %v10303_v56 = vpop.f32.mrf.mxu0 }
0x11e4   : > { %v10346_v40 = vpop.f32.mrf.mxu3 }
0x11e5   : > { %v10350_v31 = vpop.f32.mrf.mxu2 }
0x11e6   : > { %v4707_v25 = vpop.f32.mrf.mxu1 }
0x11e7   : > { %v4708_v42 = vadd.f32 %v4707_v25, %v10338_v30  ;;  %v4803_v63 = vpop.f32.mrf.mxu0 }
0x11e8   : > { %v4804_v15 = vadd.f32 %v4803_v63, %v10348_v47  ;;  %v6395_v63 = vld [vmem:[%s11360_s12 + $0x808] sm:$0xff] }
0x11e9   : > { %v4818_v0 = vmax.f32 %v4708_v42, 0.0  ;;  %5044 = vmatpush.msrb.mxu1 %v6395_v63 }
0x11ea   : > { %v4821_v19 = vmax.f32 %v4804_v15, 0.0  ;;  %v6430_v15 = vld [vmem:[%s11360_s12 + $0x920] sm:$0xff] }
0x11eb   : > { %4918 = vmatmul.f32.vlgmr.msra.gmra.mxu1 %v4818_v0  ;;  %5105 = vmatpush.msra.mxu2 %v6430_v15 }
0x11ec   : > { %5014 = vmatmul.f32.vlgmr.msra.gmra.mxu0 %v4821_v19  ;;  %v4739_v4 = vpop.f32.mrf.mxu3  ;;  %5045 = vmatpush.msrb.mxu1 %v6394_v2 }
0x11ed   : > { %v4740_v23 = vadd.f32 %v4739_v4, %v10378_v17  ;;  %v4771_v61 = vpop.f32.mrf.mxu2  ;;  %5106 = vmatpush.msra.mxu2 %v6429_v50 }
0x11ee   : > { %v4772_v33 = vadd.f32 %v4771_v61, %v10389_v22  ;;  %v4710_v46 = vpop.f32.mrf.mxu1  ;;  %v6412_v61 = vld [vmem:[%s11360_s12 + $0x890] sm:$0xff] }
0x11ef   : > { %v4819_v49 = vmax.f32 %v4740_v23, 0.0  ;;  %v4711_v53 = vadd.f32 %v4710_v46, %v10338_v30  ;;  %v4806_v29 = vpop.f32.mrf.mxu0  ;;  %v6411_v46 = vld [vmem:[%s11360_s12 + $0x888] sm:$0xff]  ;;  %5075 = vmatpush.msrb.mxu3 %v6412_v61  ;;  %5107 = vmatpush.msra.mxu2 %v6428_v24 }
0x11f0   : > { %v4820_v11 = vmax.f32 %v4772_v33, 0.0  ;;  %v4807_v25 = vadd.f32 %v4806_v29, %v10348_v47 }
0x11f1   : > { %v4822_v42 = vmax.f32 %v4711_v53, 0.0  ;;  %4950 = vmatmul.f32.vlgmr.msra.gmra.mxu3 %v4819_v49  ;;  %v6427_v49 = vld [vmem:[%s11360_s12 + $0x908] sm:$0xff]  ;;  %v6410_v53 = vld [vmem:[%s11360_s12 + $0x880] sm:$0xff] }
0x11f2   : > { %v4825_v9 = vmax.f32 %v4807_v25, 0.0  ;;  %4982 = vmatmul.f32.vlgmr.msrb.gmra.mxu2 %v4820_v11  ;;  %5076 = vmatpush.msrb.mxu3 %v6411_v46 }
0x11f3   : > { %4921 = vmatmul.f32.gmra.mxu1 %v4822_v42  ;;  %5108 = vmatpush.msra.mxu2 %v6427_v49 }
0x11f4   : > { %5017 = vmatmul.f32.gmra.mxu0 %v4825_v9  ;;  %v4742_v0 = vpop.f32.mrf.mxu3  ;;  %5077 = vmatpush.msrb.mxu3 %v6410_v53 }
0x11f5   : > { %v4743_v14 = vadd.f32 %v4742_v0, %v10378_v17  ;;  %v4774_v19 = vpop.f32.mrf.mxu2  ;;  %5109 = vmatpush.msra.mxu2 %v6426_v28 }
0x11f6   : > { %v4775_v36 = vadd.f32 %v4774_v19, %v10389_v22  ;;  %v4713_v5 = vpop.f32.mrf.mxu1 }
0x11f7   : > { %v4823_v4 = vmax.f32 %v4743_v14, 0.0  ;;  %v4714_v58 = vadd.f32 %v4713_v5, %v10338_v30  ;;  %v4809_v23 = vpop.f32.mrf.mxu0  ;;  %v6373_v14 = vld [vmem:[%s11359_s11 + $0x10] sm:$0xf] }
0x11f8   : > { %v4824_v20 = vmax.f32 %v4775_v36, 0.0  ;;  %v4810_v32 = vadd.f32 %v4809_v23, %v10348_v47  ;;  %v10491_v23 = vperm.slane %v6373_v14, 0 }
0x11f9   : > { %v4826_v33 = vmax.f32 %v4714_v58, 0.0  ;;  %4953 = vmatmul.f32.gmra.mxu3 %v4823_v4 }
0x11fa   : > { %v4829_v41 = vmax.f32 %v4810_v32, 0.0  ;;  %4985 = vmatmul.f32.gmra.mxu2 %v4824_v20  ;;  %v10493_v20 = vperm.slane %v6373_v14, 3 }
0x11fb   : > { %4924 = vmatmul.f32.gmra.mxu1 %v4826_v33  ;;  %v6572_v33 = vld [vmem:[%s11358_s10 + $0x3c8] sm:$0xff] }
0x11fc   : > { %5020 = vmatmul.f32.gmra.mxu0 %v4829_v41  ;;  %v4745_v29 = vpop.f32.mrf.mxu3  ;;  %5228 = vmatpush.msra.mxu3 %v6572_v33  ;;  %v4565_v49 = vadd.f32 %v10127_v1, %v10493_v20  ;;  %v6571_v1 = vld [vmem:[%s11358_s10 + $0x3c0] sm:$0xff]  ;;  %v4574_v33 = vadd.f32 %v10259_v57, %v10493_v20  ;;  %v4577_v57 = vadd.f32 %v10303_v56, %v10493_v20 }
0x11fd   : > { %v4746_v60 = vadd.f32 %v4745_v29, %v10378_v17  ;;  %v4777_v11 = vpop.f32.mrf.mxu2  ;;  %v10507_v29 = vperm.slane %v6373_v14, 1  ;;  %5196 = vmatpush.msra.mxu1 %v6571_v1  ;;  %v6611_v1 = vld [vmem:[%s11360_s12 + $0xc78] sm:$0xff] }
0x11fe   : > { %v4778_v25 = vadd.f32 %v4777_v11, %v10389_v22  ;;  %v4716_v52 = vpop.f32.mrf.mxu1 }
0x11ff   : > { %v4827_v42 = vmax.f32 %v4746_v60, 0.0  ;;  %v4717_v63 = vadd.f32 %v4716_v52, %v10338_v30  ;;  %v4812_v9 = vpop.f32.mrf.mxu0  ;;  %v10509_v60 = vperm.slane %v6373_v14, 2  ;;  %v4582_v52 = vmax.f32 %v4565_v49, 0.0 }
0x1200   : > { %v4828_v51 = vmax.f32 %v4778_v25, 0.0  ;;  %v4813_v6 = vadd.f32 %v4812_v9, %v10348_v47  ;;  %v4568_v9 = vadd.f32 %v10183_v7, %v10493_v20  ;;  %v6559_v7 = vld [vmem:[%s11358_s10 + $0x240] sm:$0xff]  ;;  %v4504_v14 = vadd.f32 %v10221_v3, %v10507_v29 }
0x1201   : > { %v4830_v15 = vmax.f32 %v4717_v63, 0.0  ;;  %4956 = vmatmul.f32.gmra.mxu3 %v4827_v42  ;;  %v6567_v42 = vld [vmem:[%s11358_s10 + $0x340] sm:$0xff]  ;;  %v6568_v63 = vld [vmem:[%s11358_s10 + $0x348] sm:$0xff]  ;;  %v4475_v3 = vadd.f32 %v10231_v18, %v10491_v23  ;;  %v4507_v18 = vadd.f32 %v10247_v26, %v10507_v29  ;;  %v4510_v26 = vadd.f32 %v10285_v34, %v10507_v29 }
0x1202   : > { %v4833_v2 = vmax.f32 %v4813_v6, 0.0  ;;  %4988 = vmatmul.f32.gmra.mxu2 %v4828_v51  ;;  %v6563_v51 = vld [vmem:[%s11358_s10 + $0x2c0] sm:$0xff]  ;;  %5229 = vmatpush.msra.mxu3 %v6568_v63  ;;  %v4513_v34 = vadd.f32 %v10346_v40, %v10507_v29  ;;  %v6658_v63 = vld [vmem:[%s11360_s12 + $0xdf0] sm:$0xff] }
0x1203   : > { %4927 = vmatmul.f32.gmra.mxu1 %v4830_v15  ;;  %v4592_v49 = vmax.f32 %v4510_v26, 0.0  ;;  %v6640_v26 = vld [vmem:[%s11360_s12 + $0xd60] sm:$0xff] }
0x1204   : > { %5023 = vmatmul.f32.gmra.mxu0 %v4833_v2  ;;  %v4748_v0 = vpop.f32.mrf.mxu3  ;;  %5197 = vmatpush.msra.mxu1 %v6567_v42 }
0x1205   : > { %v4749_v21 = vadd.f32 %v4748_v0, %v10378_v17  ;;  %v4780_v35 = vpop.f32.mrf.mxu2  ;;  %v4586_v0 = vmax.f32 %v4568_v9, 0.0  ;;  %v6609_v9 = vld [vmem:[%s11360_s12 + $0xc68] sm:$0xff] }
0x1206   : > { %v4781_v19 = vadd.f32 %v4780_v35, %v10389_v22  ;;  %v4719_v50 = vpop.f32.mrf.mxu1  ;;  %5198 = vmatpush.msra.mxu1 %v6563_v51  ;;  %v6562_v35 = vld [vmem:[%s11358_s10 + $0x258] sm:$0xff]  ;;  %v6657_v51 = vld [vmem:[%s11360_s12 + $0xde8] sm:$0xff] }
0x1207   : > { %v4831_v36 = vmax.f32 %v4749_v21, 0.0  ;;  %v4720_v5 = vadd.f32 %v4719_v50, %v10338_v30  ;;  %v4815_v54 = vpop.f32.mrf.mxu0  ;;  %v6573_v30 = vld [vmem:[%s11358_s10 + $0x3d0] sm:$0xff]  ;;  %v6564_v50 = vld [vmem:[%s11358_s10 + $0x2c8] sm:$0xff] }
0x1208   : > { %v4832_v4 = vmax.f32 %v4781_v19, 0.0  ;;  %v4816_v58 = vadd.f32 %v4815_v54, %v10348_v47  ;;  %v4469_v47 = vadd.f32 %v10122_v38, %v10491_v23  ;;  %5260 = vmatpush.msrb.mxu2 %v6573_v30  ;;  %v4501_v38 = vadd.f32 %v10165_v62, %v10507_v29  ;;  %v6569_v21 = vld [vmem:[%s11358_s10 + $0x350] sm:$0xff]  ;;  %5199 = vmatpush.msra.mxu1 %v6559_v7  ;;  %v6655_v7 = vld [vmem:[%s11360_s12 + $0xdd8] sm:$0xff] }
0x1209   : > { %v4834_v61 = vmax.f32 %v4720_v5, 0.0  ;;  %4959 = vmatmul.f32.gmra.mxu3 %v4831_v36  ;;  %v4472_v62 = vadd.f32 %v10178_v55, %v10491_v23  ;;  %v6566_v55 = vld [vmem:[%s11358_s10 + $0x2d8] sm:$0xff]  ;;  %v4536_v19 = vadd.f32 %v10223_v27, %v10509_v60  ;;  %v6565_v36 = vld [vmem:[%s11358_s10 + $0x2d0] sm:$0xff]  ;;  %v6560_v5 = vld [vmem:[%s11358_s10 + $0x248] sm:$0xff]  ;;  %v4571_v54 = vadd.f32 %v10233_v48, %v10493_v20 }
0x120a   : > { %v4837_v32 = vmax.f32 %v4816_v58, 0.0  ;;  %4991 = vmatmul.f32.gmra.mxu2 %v4832_v4  ;;  %v4579_v25 = vmax.f32 %v4469_v47, 0.0  ;;  %v4580_v6 = vmax.f32 %v4501_v38, 0.0  ;;  %5230 = vmatpush.msra.mxu3 %v6564_v50  ;;  %v6561_v27 = vld [vmem:[%s11358_s10 + $0x250] sm:$0xff]  ;;  %v4584_v4 = vmax.f32 %v4504_v14, 0.0  ;;  %v6605_v50 = vld [vmem:[%s11360_s12 + $0xc48] sm:$0xff] }
0x120b   : > { %4930 = vmatmul.f32.gmra.mxu1 %v4834_v61  ;;  %v4583_v2 = vmax.f32 %v4472_v62, 0.0  ;;  %5261 = vmatpush.msrb.mxu2 %v6569_v21  ;;  %v4585_v58 = vmax.f32 %v4536_v19, 0.0  ;;  %v4587_v61 = vmax.f32 %v4475_v3, 0.0  ;;  %v4478_v48 = vadd.f32 %v10257_v44, %v10491_v23  ;;  %v6606_v14 = vld [vmem:[%s11360_s12 + $0xc50] sm:$0xff]  ;;  %v6653_v3 = vld [vmem:[%s11360_s12 + $0xdc8] sm:$0xff] }
0x120c   : > { %5026 = vmatmul.f32.gmra.mxu0 %v4837_v32  ;;  %v4751_v24 = vpop.f32.mrf.mxu3  ;;  %5231 = vmatpush.msra.mxu3 %v6560_v5  ;;  %v4590_v32 = vmax.f32 %v4571_v54, 0.0  ;;  %v4588_v30 = vmax.f32 %v4507_v18, 0.0  ;;  %v4481_v44 = vadd.f32 %v10298_v37, %v10491_v23  ;;  %v6654_v19 = vld [vmem:[%s11360_s12 + $0xdd0] sm:$0xff]  ;;  %v6643_v5 = vld [vmem:[%s11360_s12 + $0xd78] sm:$0xff] }
0x120d   : > { %v4752_v46 = vadd.f32 %v4751_v24, %v10378_v17  ;;  %v4783_v41 = vpop.f32.mrf.mxu2  ;;  %v4533_v17 = vadd.f32 %v10167_v43, %v10509_v60  ;;  %v6570_v43 = vld [vmem:[%s11358_s10 + $0x358] sm:$0xff]  ;;  %5262 = vmatpush.msrb.mxu2 %v6565_v36  ;;  %v4539_v24 = vadd.f32 %v10249_v12, %v10509_v60  ;;  %v4542_v12 = vadd.f32 %v10287_v16, %v10509_v60 }
0x120e   : > { %v4784_v53 = vadd.f32 %v4783_v41, %v10389_v22  ;;  %v6574_v22 = vld [vmem:[%s11358_s10 + $0x3d8] sm:$0xff]  ;;  %v4594_v41 = vmax.f32 %v4574_v33, 0.0  ;;  %v4545_v16 = vadd.f32 %v10350_v31, %v10509_v60 }
0x120f   : > { %v4835_v28 = vmax.f32 %v4752_v46, 0.0  ;;  %5292 = vmatpush.msra.mxu0 %v6574_v22  ;;  %v4581_v15 = vmax.f32 %v4533_v17, 0.0  ;;  %5263 = vmatpush.msrb.mxu2 %v6561_v27  ;;  %v4589_v47 = vmax.f32 %v4539_v24, 0.0  ;;  %v4591_v46 = vmax.f32 %v4478_v48, 0.0  ;;  %v6659_v22 = vld [vmem:[%s11360_s12 + $0xdf8] sm:$0xff]  ;;  %v6625_v24 = vld [vmem:[%s11360_s12 + $0xce8] sm:$0xff] }
0x1210   : > { %v4836_v11 = vmax.f32 %v4784_v53, 0.0  ;;  %v4593_v53 = vmax.f32 %v4542_v12, 0.0  ;;  %v6627_v36 = vld [vmem:[%s11360_s12 + $0xcf8] sm:$0xff]  ;;  %v6641_v48 = vld [vmem:[%s11360_s12 + $0xd68] sm:$0xff]  ;;  %v6650_v12 = vld [vmem:[%s11360_s12 + $0xdb0] sm:$0xff] }
0x1211   : > { %4962 = vmatmul.f32.gmra.mxu3 %v4835_v28  ;;  %5293 = vmatpush.msra.mxu0 %v6570_v43  ;;  %v4595_v28 = vmax.f32 %v4481_v44, 0.0  ;;  %v6610_v43 = vld [vmem:[%s11360_s12 + $0xc70] sm:$0xff]  ;;  %v6603_v18 = vld [vmem:[%s11360_s12 + $0xc38] sm:$0xff]  ;;  %v6601_v44 = vld [vmem:[%s11360_s12 + $0xc28] sm:$0xff] }
0x1212   : > { %4994 = vmatmul.f32.gmra.mxu2 %v4836_v11  ;;  %v4598_v11 = vmax.f32 %v4577_v57, 0.0  ;;  %v6623_v57 = vld [vmem:[%s11360_s12 + $0xcd8] sm:$0xff] }
0x1213   : > { %5046 = vmatmul.f32.vlgmr.msrb.gmra.mxu1 %v4579_v25  ;;  %5294 = vmatpush.msra.mxu0 %v6566_v55  ;;  %v4596_v25 = vmax.f32 %v4513_v34, 0.0  ;;  %v6600_v34 = vld [vmem:[%s11360_s12 + $0xc20] sm:$0xff] }
0x1214   : > { %5142 = vmatmul.f32.vlgmr.msrb.gmra.mxu0 %v4582_v52  ;;  %v4597_v52 = vmax.f32 %v4545_v16, 0.0  ;;  %5396 = vmatpush.msrb.mxu1 %v6611_v1  ;;  %v6622_v16 = vld [vmem:[%s11360_s12 + $0xcd0] sm:$0xff]  ;;  %v6599_v1 = vld [vmem:[%s11360_s12 + $0xc18] sm:$0xff] }
0x1215   : > { %5295 = vmatpush.msra.mxu0 %v6562_v35 }
0x1216   : > { %5397 = vmatpush.msrb.mxu1 %v6610_v43  ;;  %v6637_v43 = vld [vmem:[%s11360_s12 + $0xd48] sm:$0xff] }
0x1217   : > { %5492 = vmatpush.msrb.mxu0 %v6659_v22  ;;  %v6621_v22 = vld [vmem:[%s11360_s12 + $0xcc8] sm:$0xff] }
0x1218   : > { %5398 = vmatpush.msrb.mxu1 %v6609_v9  ;;  %v6647_v9 = vld [vmem:[%s11360_s12 + $0xd98] sm:$0xff] }
0x1219   : > { %5078 = vmatmul.f32.vlgmr.msrb.gmra.mxu3 %v4580_v6  ;;  %5493 = vmatpush.msrb.mxu0 %v6658_v63 }
0x121a   : > { %5110 = vmatmul.f32.vlgmr.msra.gmra.mxu2 %v4581_v15  ;;  %v6608_v15 = vld [vmem:[%s11360_s12 + $0xc60] sm:$0xff]  ;;  %5428 = vmatpush.msrb.mxu3 %v6627_v36  ;;  %v6645_v36 = vld [vmem:[%s11360_s12 + $0xd88] sm:$0xff] }
0x121b   : > { %5049 = vmatmul.f32.gmra.mxu1 %v4583_v2  ;;  %5494 = vmatpush.msrb.mxu0 %v6657_v51  ;;  %v6656_v2 = vld [vmem:[%s11360_s12 + $0xde0] sm:$0xff] }
0x121c   : > { %5145 = vmatmul.f32.gmra.mxu0 %v4586_v0  ;;  %5399 = vmatpush.msrb.mxu1 %v6608_v15  ;;  %v6607_v0 = vld [vmem:[%s11360_s12 + $0xc58] sm:$0xff] }
0x121d   : > { %5495 = vmatpush.msrb.mxu0 %v6656_v2  ;;  %5460 = vmatpush.msra.mxu2 %v6643_v5  ;;  %v6598_v2 = vld [vmem:[%s11360_s12 + $0xc10] sm:$0xff] }
0x121e   : > { %5400 = vmatpush.msrb.mxu1 %v6607_v0  ;;  %v6620_v0 = vld [vmem:[%s11360_s12 + $0xcc0] sm:$0xff] }
0x121f   : > { %5496 = vmatpush.msrb.mxu0 %v6655_v7  ;;  %v6636_v7 = vld [vmem:[%s11360_s12 + $0xd40] sm:$0xff] }
0x1220   : > { %5401 = vmatpush.msrb.mxu1 %v6606_v14  ;;  %v6619_v14 = vld [vmem:[%s11360_s12 + $0xcb8] sm:$0xff] }
0x1221   : > { %5081 = vmatmul.f32.gmra.mxu3 %v4584_v4  ;;  %5497 = vmatpush.msrb.mxu0 %v6654_v19  ;;  %v6604_v4 = vld [vmem:[%s11360_s12 + $0xc40] sm:$0xff]  ;;  %v6635_v19 = vld [vmem:[%s11360_s12 + $0xd38] sm:$0xff] }
0x1222   : > { %5113 = vmatmul.f32.gmra.mxu2 %v4585_v58  ;;  %5402 = vmatpush.msrb.mxu1 %v6605_v50  ;;  %v6626_v58 = vld [vmem:[%s11360_s12 + $0xcf0] sm:$0xff] }
0x1223   : > { %5052 = vmatmul.f32.gmra.mxu1 %v4587_v61  ;;  %5498 = vmatpush.msrb.mxu0 %v6653_v3  ;;  %v6642_v61 = vld [vmem:[%s11360_s12 + $0xd70] sm:$0xff] }
0x1224   : > { %5148 = vmatmul.f32.gmra.mxu0 %v4590_v32  ;;  %5403 = vmatpush.msrb.mxu1 %v6604_v4  ;;  %v6652_v32 = vld [vmem:[%s11360_s12 + $0xdc0] sm:$0xff] }
0x1225   : > { %5429 = vmatpush.msrb.mxu3 %v6626_v58  ;;  %5461 = vmatpush.msra.mxu2 %v6642_v61  ;;  %v6596_v4 = vld [vmem:[%s11360_s12 + $0xc00] sm:$0xff]  ;;  %v6618_v58 = vld [vmem:[%s11360_s12 + $0xcb0] sm:$0xff] }
0x1226   : > { %5499 = vmatpush.msrb.mxu0 %v6652_v32  ;;  %5404 = vmatpush.msrb.mxu1 %v6603_v18  ;;  %v6634_v61 = vld [vmem:[%s11360_s12 + $0xd30] sm:$0xff]  ;;  %v6617_v32 = vld [vmem:[%s11360_s12 + $0xca8] sm:$0xff] }
0x1227   : > { %5430 = vmatpush.msrb.mxu3 %v6625_v24  ;;  %5462 = vmatpush.msra.mxu2 %v6641_v48  ;;  %v6633_v18 = vld [vmem:[%s11360_s12 + $0xd28] sm:$0xff] }
0x1229   : > { %5084 = vmatmul.f32.gmra.mxu3 %v4588_v30  ;;  %v6651_v30 = vld [vmem:[%s11360_s12 + $0xdb8] sm:$0xff]  ;;  %5463 = vmatpush.msra.mxu2 %v6640_v26  ;;  %v6632_v26 = vld [vmem:[%s11360_s12 + $0xd20] sm:$0xff] }
0x122a   : > { %5116 = vmatmul.f32.gmra.mxu2 %v4589_v47  ;;  %5500 = vmatpush.msrb.mxu0 %v6651_v30 }
0x122b   : > { %5055 = vmatmul.f32.gmra.mxu1 %v4591_v46  ;;  %v6602_v46 = vld [vmem:[%s11360_s12 + $0xc30] sm:$0xff] }
0x122c   : > { %5151 = vmatmul.f32.gmra.mxu0 %v4594_v41  ;;  %v6624_v41 = vld [vmem:[%s11360_s12 + $0xce0] sm:$0xff]  ;;  %5405 = vmatpush.msrb.mxu1 %v6602_v46 }
0x122d   : > { %5431 = vmatpush.msrb.mxu3 %v6624_v41  ;;  %5501 = vmatpush.msrb.mxu0 %v6650_v12  ;;  %v6616_v41 = vld [vmem:[%s11360_s12 + $0xca0] sm:$0xff] }
0x122e   : > { %5406 = vmatpush.msrb.mxu1 %v6601_v44  ;;  %v6615_v44 = vld [vmem:[%s11360_s12 + $0xc98] sm:$0xff] }
0x122f   : > { %5432 = vmatpush.msrb.mxu3 %v6623_v57 }
0x1230   : > { %5407 = vmatpush.msrb.mxu1 %v6600_v34  ;;  %v6630_v34 = vld [vmem:[%s11360_s12 + $0xd10] sm:$0xff] }
0x1231   : > { %5087 = vmatmul.f32.gmra.mxu3 %v4592_v49  ;;  %v6639_v49 = vld [vmem:[%s11360_s12 + $0xd58] sm:$0xff] }
0x1232   : > { %5119 = vmatmul.f32.gmra.mxu2 %v4593_v53  ;;  %v6649_v53 = vld [vmem:[%s11360_s12 + $0xda8] sm:$0xff]  ;;  %5433 = vmatpush.msrb.mxu3 %v6622_v16 }
0x1233   : > { %5058 = vmatmul.f32.gmra.mxu1 %v4595_v28  ;;  %5464 = vmatpush.msra.mxu2 %v6639_v49 }
0x1234   : > { %5154 = vmatmul.f32.gmra.mxu0 %v4598_v11  ;;  %5408 = vmatpush.msrb.mxu1 %v6599_v1 }
0x1235   : > { %5502 = vmatpush.msrb.mxu0 %v6649_v53  ;;  %5434 = vmatpush.msrb.mxu3 %v6621_v22  ;;  %v6614_v53 = vld [vmem:[%s11360_s12 + $0xc90] sm:$0xff] }
0x1236   : > { %5409 = vmatpush.msrb.mxu1 %v6598_v2 }
0x1237   : > { %5435 = vmatpush.msrb.mxu3 %v6620_v0 }
0x1239   : > { %5090 = vmatmul.f32.gmra.mxu3 %v4596_v25  ;;  %v6638_v25 = vld [vmem:[%s11360_s12 + $0xd50] sm:$0xff] }
0x123a   : > { %5122 = vmatmul.f32.gmra.mxu2 %v4597_v52  ;;  %v6648_v52 = vld [vmem:[%s11360_s12 + $0xda0] sm:$0xff]  ;;  %5436 = vmatpush.msrb.mxu3 %v6619_v14 }
0x123b   : > { %6576 = vmatmul.msk.f32.vlgmr.msra.gmra.mxu1 %vm599_vm1, %v9881_v13  ;;  %5465 = vmatpush.msra.mxu2 %v6638_v25  ;;  %v6613_v25 = vld [vmem:[%s11360_s12 + $0xc88] sm:$0xff] }
0x123c   : > { %6591 = vmatmul.msk.f32.vlgmr.msra.gmra.mxu0 %vm599_vm1, %v9881_v13  ;;  %5437 = vmatpush.msrb.mxu3 %v6618_v58 }
0x123d   : > { %5503 = vmatpush.msrb.mxu0 %v6648_v52  ;;  %5466 = vmatpush.msra.mxu2 %v6637_v43 }
0x123e   : > { %5438 = vmatpush.msrb.mxu3 %v6617_v32 }
0x123f   : > { %5504 = vmatpush.msrb.mxu0 %v6647_v9  ;;  %5467 = vmatpush.msra.mxu2 %v6636_v7  ;;  %v6612_v9 = vld [vmem:[%s11360_s12 + $0xc80] sm:$0xff] }
0x1240   : > { %5439 = vmatpush.msrb.mxu3 %v6616_v41 }
0x1241   : > { %6581 = vmatmul.msk.f32.vlgmr.msra.gmra.mxu3 %vm599_vm1, %v9881_v13  ;;  %5468 = vmatpush.msra.mxu2 %v6635_v19 }
0x1242   : > { %6586 = vmatmul.msk.f32.vlgmr.msrb.gmra.mxu2 %vm599_vm1, %v9881_v13  ;;  %5440 = vmatpush.msrb.mxu3 %v6615_v44 }
0x1243   : > { %6577 = vmatmul.msk.f32.gmra.mxu1 %vm599_vm1, %v9896_v8  ;;  %5469 = vmatpush.msra.mxu2 %v6634_v61 }
0x1244   : > { %6592 = vmatmul.msk.f32.gmra.mxu0 %vm599_vm1, %v9896_v8  ;;  %5441 = vmatpush.msrb.mxu3 %v6614_v53  ;;  %v6674_v53 = vld [vmem:[%s11358_s10 + $0x3f0] sm:$0xff] }
0x1245   : > { %5470 = vmatpush.msra.mxu2 %v6633_v18 }
0x1246   : > { %5442 = vmatpush.msrb.mxu3 %v6613_v25 }
0x1247   : > { %5471 = vmatpush.msra.mxu2 %v6632_v26 }
0x1248   : > { %5443 = vmatpush.msrb.mxu3 %v6612_v9  ;;  %v6667_v9 = vld [vmem:[%s11358_s10 + $0x2f8] sm:$0xff] }
0x1249   : > { %6582 = vmatmul.msk.f32.gmra.mxu3 %vm599_vm1, %v9896_v8 }
0x124a   : > { %6587 = vmatmul.msk.f32.gmra.mxu2 %vm599_vm1, %v9896_v8 }
0x124b   : > { %6578 = vmatmul.msk.f32.gmra.mxu1 %vm599_vm1, %v9959_v39 }
0x124c   : > { %6593 = vmatmul.msk.f32.gmra.mxu0 %vm599_vm1, %v9959_v39 }
0x1251   : > { %6583 = vmatmul.msk.f32.gmra.mxu3 %vm599_vm1, %v9959_v39 }
0x1252   : > { %6588 = vmatmul.msk.f32.gmra.mxu2 %vm599_vm1, %v9959_v39 }
0x1253   : > { %6579 = vmatmul.msk.f32.gmra.mxu1 %vm599_vm1, %v9972_v45 }
0x1254   : > { %6594 = vmatmul.msk.f32.gmra.mxu0 %vm599_vm1, %v9972_v45 }
0x1259   : > { %6584 = vmatmul.msk.f32.gmra.mxu3 %vm599_vm1, %v9972_v45 }
0x125a   : > { %6589 = vmatmul.msk.f32.gmra.mxu2 %vm599_vm1, %v9972_v45 }
0x125b   : > { %6580 = vmatmul.msk.f32.gmra.mxu1 %vm599_vm1, %v9985_v59 }
0x125c   : > { %6595 = vmatmul.msk.f32.gmra.mxu0 %vm599_vm1, %v9985_v59 }
0x1261   : > { %6585 = vmatmul.msk.f32.gmra.mxu3 %vm599_vm1, %v9985_v59 }
0x1262   : > { %6590 = vmatmul.msk.f32.gmra.mxu2 %vm599_vm1, %v9985_v59 }
0x1268   : > { %v10629_v37 = vpop.f32.mrf.mxu1 }
0x1269   : > { %v10631_v56 = vpop.f32.mrf.mxu0 }
0x1270   : > { %v10633_v40 = vpop.f32.mrf.mxu1 }
0x1271   : > { %v10635_v31 = vpop.f32.mrf.mxu0 }
0x1274   : > { %v10637_v23 = vpop.f32.mrf.mxu3 }
0x1275   : > { %v10639_v20 = vpop.f32.mrf.mxu2 }
0x1278   : > { %v10641_v29 = vpop.f32.mrf.mxu1 }
0x1279   : > { %v10643_v60 = vpop.f32.mrf.mxu0 }
0x127c   : > { %v10645_v38 = vpop.f32.mrf.mxu3 }
0x127d   : > { %v10647_v17 = vpop.f32.mrf.mxu2  ;;  %v4955_v51 = vadd.f32 %v10645_v38, %v10633_v40  ;;  %v6646_v40 = vld [vmem:[%s11360_s12 + $0xd90] sm:$0xff]  ;;  %v6597_v38 = vld [vmem:[%s11360_s12 + $0xc08] sm:$0xff] }
0x127e   : > { %5505 = vmatpush.msrb.mxu0 %v6646_v40  ;;  %5410 = vmatpush.msrb.mxu1 %v6597_v38 }
0x127f   : > { %v4987_v5 = vadd.f32 %v10647_v17, %v4955_v51  ;;  %v6644_v17 = vld [vmem:[%s11360_s12 + $0xd80] sm:$0xff] }
0x1280   : > { %v10655_v42 = vpop.f32.mrf.mxu1  ;;  %5506 = vmatpush.msrb.mxu0 %v6645_v36  ;;  %5411 = vmatpush.msrb.mxu1 %v6596_v4  ;;  %v6628_v51 = vld [vmem:[%s11360_s12 + $0xd00] sm:$0xff]  ;;  %v6575_v36 = vld [vmem:[%s11359_s11 + $0x18] sm:$0xf] }
0x1281   : > { %v10657_v62 = vpop.f32.mrf.mxu0  ;;  %v5019_v30 = vadd.f32 %v10635_v31, %v4987_v5  ;;  %v6631_v31 = vld [vmem:[%s11360_s12 + $0xd18] sm:$0xff]  ;;  %v10893_v32 = vperm.slane %v6575_v36, 3 }
0x1282   : > { %5507 = vmatpush.msrb.mxu0 %v6644_v17  ;;  %5472 = vmatpush.msra.mxu2 %v6631_v31  ;;  %v10891_v17 = vperm.slane %v6575_v36, 0 }
0x1284   : > { %v10671_v6 = vpop.f32.mrf.mxu3  ;;  %5473 = vmatpush.msra.mxu2 %v6630_v34 }
0x1285   : > { %v10673_v55 = vpop.f32.mrf.mxu2  ;;  %v4958_v48 = vadd.f32 %v10671_v6, %v10641_v29 }
0x1287   : > { %v4990_v6 = vadd.f32 %v10673_v55, %v4958_v48  ;;  %v6629_v55 = vld [vmem:[%s11360_s12 + $0xd08] sm:$0xff] }
0x1288   : > { %v10687_v21 = vpop.f32.mrf.mxu1  ;;  %5474 = vmatpush.msra.mxu2 %v6629_v55  ;;  %v10918_v55 = vperm.slane %v6575_v36, 1 }
0x1289   : > { %v10689_v35 = vpop.f32.mrf.mxu0  ;;  %v5022_v22 = vadd.f32 %v10643_v60, %v4990_v6 }
0x128a   : > { %5475 = vmatpush.msra.mxu2 %v6628_v51 }
0x128c   : > { %v10709_v27 = vpop.f32.mrf.mxu3  ;;  %5631 = vmatpush.msrb.mxu2 %v6674_v53 }
0x128d   : > { %v10711_v54 = vpop.f32.mrf.mxu2  ;;  %v4961_v1 = vadd.f32 %v10709_v27, %v10655_v42 }
0x128f   : > { %v4993_v42 = vadd.f32 %v10711_v54, %v4961_v1 }
0x1290   : > { %v10734_v33 = vpop.f32.mrf.mxu1 }
0x1291   : > { %v10739_v47 = vpop.f32.mrf.mxu0  ;;  %v5025_v38 = vadd.f32 %v10657_v62, %v4993_v42 }
0x1294   : > { %v10765_v28 = vpop.f32.mrf.mxu3 }
0x1295   : > { %v10767_v11 = vpop.f32.mrf.mxu2  ;;  %v4964_v40 = vadd.f32 %v10765_v28, %v10687_v21 }
0x1297   : > { %v4996_v54 = vadd.f32 %v10767_v11, %v4964_v40 }
0x1298   : > { %v5050_v63 = vpop.f32.mrf.mxu1 }
0x1299   : > { %v5146_v15 = vpop.f32.mrf.mxu0  ;;  %v5051_v12 = vadd.f32 %v5050_v63, %v5019_v30  ;;  %v5028_v62 = vadd.f32 %v10689_v35, %v4996_v54  ;;  %v6672_v35 = vld [vmem:[%s11358_s10 + $0x3e0] sm:$0xff] }
0x129a   : > { %5567 = vmatpush.msra.mxu1 %v6672_v35 }
0x129c   : > { %v10816_v50 = vpop.f32.mrf.mxu3 }
0x129d   : > { %v10822_v3 = vpop.f32.mrf.mxu2 }
0x12a0   : > { %v5053_v24 = vpop.f32.mrf.mxu1 }
0x12a1   : > { %v5149_v46 = vpop.f32.mrf.mxu0  ;;  %v5054_v2 = vadd.f32 %v5053_v24, %v5022_v22  ;;  %v10924_v22 = vperm.slane %v6575_v36, 2  ;;  %v6669_v36 = vld [vmem:[%s11358_s10 + $0x368] sm:$0xff] }
0x12a4   : > { %v5082_v29 = vpop.f32.mrf.mxu3 }
0x12a5   : > { %v5083_v57 = vadd.f32 %v5082_v29, %v5051_v12  ;;  %v5114_v49 = vpop.f32.mrf.mxu2  ;;  %v6675_v29 = vld [vmem:[%s11358_s10 + $0x3f8] sm:$0xff] }
0x12a6   : > { %5663 = vmatpush.msra.mxu0 %v6675_v29 }
0x12a7   : > { %v5115_v16 = vadd.f32 %v5114_v49, %v5083_v57  ;;  %v6673_v57 = vld [vmem:[%s11358_s10 + $0x3e8] sm:$0xff]  ;;  %v6668_v49 = vld [vmem:[%s11358_s10 + $0x360] sm:$0xff] }
0x12a8   : > { %v5056_v52 = vpop.f32.mrf.mxu1  ;;  %5599 = vmatpush.msra.mxu3 %v6673_v57  ;;  %5568 = vmatpush.msra.mxu1 %v6668_v49 }
0x12a9   : > { %v10873_v43 = vadd.f32 %v5146_v15, %v5115_v16  ;;  %v5152_v63 = vpop.f32.mrf.mxu0  ;;  %v5057_v5 = vadd.f32 %v5056_v52, %v5025_v38  ;;  %v6671_v52 = vld [vmem:[%s11358_s10 + $0x378] sm:$0xff] }
0x12aa   : > { %5664 = vmatpush.msra.mxu0 %v6671_v52  ;;  %5600 = vmatpush.msra.mxu3 %v6669_v36 }
0x12ac   : > { %v5085_v0 = vpop.f32.mrf.mxu3  ;;  %5665 = vmatpush.msra.mxu0 %v6667_v9 }
0x12ad   : > { %v5086_v27 = vadd.f32 %v5085_v0, %v5054_v2  ;;  %v5117_v60 = vpop.f32.mrf.mxu2 }
0x12af   : > { %v5118_v15 = vadd.f32 %v5117_v60, %v5086_v27  ;;  %v6660_v60 = vld [vmem:[%s11358_s10 + $0x260] sm:$0xff] }
0x12b0   : > { %v5059_v7 = vpop.f32.mrf.mxu1 }
0x12b1   : > { %v10885_v14 = vadd.f32 %v5149_v46, %v5118_v15  ;;  %v5155_v19 = vpop.f32.mrf.mxu0  ;;  %v5060_v46 = vadd.f32 %v5059_v7, %v5028_v62  ;;  %v6663_v15 = vld [vmem:[%s11358_s10 + $0x278] sm:$0xff] }
0x12b2   : > { %5666 = vmatpush.msra.mxu0 %v6663_v15 }
0x12b4   : > { %v5088_v4 = vpop.f32.mrf.mxu3 }
0x12b5   : > { %v5089_v58 = vadd.f32 %v5088_v4, %v5057_v5  ;;  %v5120_v61 = vpop.f32.mrf.mxu2 }
0x12b7   : > { %v5121_v21 = vadd.f32 %v5120_v61, %v5089_v58  ;;  %v6670_v58 = vld [vmem:[%s11358_s10 + $0x370] sm:$0xff] }
0x12b8   : > { %v5201_v28 = vpop.f32.mrf.mxu1  ;;  %5632 = vmatpush.msrb.mxu2 %v6670_v58  ;;  %v6759_v58 = vld [vmem:[%s11360_s12 + $0xff0] sm:$0xff] }
0x12b9   : > { %v10896_v18 = vadd.f32 %v5152_v63, %v5121_v21  ;;  %v5202_v24 = vadd.f32 %v5201_v28, %v10891_v17  ;;  %v5297_v48 = vpop.f32.mrf.mxu0  ;;  %v6664_v63 = vld [vmem:[%s11358_s10 + $0x2e0] sm:$0xff] }
0x12ba   : > { %v5298_v30 = vadd.f32 %v5297_v48, %v10893_v32  ;;  %5569 = vmatpush.msra.mxu1 %v6664_v63 }
0x12bb   : > { %v5312_v41 = vmax.f32 %v5202_v24, 0.0 }
0x12bc   : > { %v5315_v11 = vmax.f32 %v5298_v30, 0.0  ;;  %v5091_v26 = vpop.f32.mrf.mxu3  ;;  %5570 = vmatpush.msra.mxu1 %v6660_v60  ;;  %v6665_v30 = vld [vmem:[%s11358_s10 + $0x2e8] sm:$0xff] }
0x12bd   : > { %v5092_v12 = vadd.f32 %v5091_v26, %v5060_v46  ;;  %v5123_v44 = vpop.f32.mrf.mxu2  ;;  %5412 = vmatmul.f32.vlgmr.msrb.gmra.mxu1 %v5312_v41  ;;  %v6666_v46 = vld [vmem:[%s11358_s10 + $0x2f0] sm:$0xff]  ;;  %5601 = vmatpush.msra.mxu3 %v6665_v30 }
0x12be   : > { %5508 = vmatmul.f32.vlgmr.msrb.gmra.mxu0 %v5315_v11  ;;  %5633 = vmatpush.msrb.mxu2 %v6666_v46  ;;  %v6661_v11 = vld [vmem:[%s11358_s10 + $0x268] sm:$0xff]  ;;  %v6662_v26 = vld [vmem:[%s11358_s10 + $0x270] sm:$0xff] }
0x12bf   : > { %v5124_v31 = vadd.f32 %v5123_v44, %v5092_v12  ;;  %5602 = vmatpush.msra.mxu3 %v6661_v11  ;;  %v6707_v30 = vld [vmem:[%s11360_s12 + $0xe50] sm:$0xff]  ;;  %v6754_v11 = vld [vmem:[%s11360_s12 + $0xfc8] sm:$0xff] }
0x12c0   : > { %v5204_v6 = vpop.f32.mrf.mxu1  ;;  %5634 = vmatpush.msrb.mxu2 %v6662_v26  ;;  %v6755_v46 = vld [vmem:[%s11360_s12 + $0xfd0] sm:$0xff]  ;;  %v6705_v26 = vld [vmem:[%s11360_s12 + $0xe40] sm:$0xff] }
0x12c1   : > { %v10915_v34 = vadd.f32 %v5155_v19, %v5124_v31  ;;  %v5205_v16 = vadd.f32 %v5204_v6, %v10891_v17  ;;  %v5300_v25 = vpop.f32.mrf.mxu0 }
0x12c2   : > { %v5301_v1 = vadd.f32 %v5300_v25, %v10893_v32 }
0x12c3   : > { %v5316_v51 = vmax.f32 %v5205_v16, 0.0 }
0x12c4   : > { %v5319_v2 = vmax.f32 %v5301_v1, 0.0  ;;  %v5233_v0 = vpop.f32.mrf.mxu3 }
0x12c5   : > { %v5234_v42 = vadd.f32 %v5233_v0, %v10918_v55  ;;  %v5265_v27 = vpop.f32.mrf.mxu2  ;;  %5415 = vmatmul.f32.gmra.mxu1 %v5316_v51 }
0x12c6   : > { %v5266_v7 = vadd.f32 %v5265_v27, %v10924_v22  ;;  %5511 = vmatmul.f32.gmra.mxu0 %v5319_v2 }
0x12c7   : > { %v5313_v40 = vmax.f32 %v5234_v42, 0.0 }
0x12c8   : > { %v5314_v38 = vmax.f32 %v5266_v7, 0.0  ;;  %v5207_v19 = vpop.f32.mrf.mxu1 }
0x12c9   : > { %v5208_v5 = vadd.f32 %v5207_v19, %v10891_v17  ;;  %v5303_v4 = vpop.f32.mrf.mxu0  ;;  %5444 = vmatmul.f32.vlgmr.msrb.gmra.mxu3 %v5313_v40 }
0x12ca   : > { %v5304_v54 = vadd.f32 %v5303_v4, %v10893_v32  ;;  %5476 = vmatmul.f32.vlgmr.msra.gmra.mxu2 %v5314_v38 }
0x12cb   : > { %v5320_v61 = vmax.f32 %v5208_v5, 0.0 }
0x12cc   : > { %v5323_v21 = vmax.f32 %v5304_v54, 0.0  ;;  %v5236_v28 = vpop.f32.mrf.mxu3  ;;  %v6711_v54 = vld [vmem:[%s11360_s12 + $0xe70] sm:$0xff] }
0x12cd   : > { %v5237_v62 = vadd.f32 %v5236_v28, %v10918_v55  ;;  %v5268_v24 = vpop.f32.mrf.mxu2  ;;  %5418 = vmatmul.f32.gmra.mxu1 %v5320_v61  ;;  %v6710_v61 = vld [vmem:[%s11360_s12 + $0xe68] sm:$0xff]  ;;  %v6709_v28 = vld [vmem:[%s11360_s12 + $0xe60] sm:$0xff] }
0x12ce   : > { %v5269_v48 = vadd.f32 %v5268_v24, %v10924_v22  ;;  %5514 = vmatmul.f32.gmra.mxu0 %v5323_v21  ;;  %v6758_v21 = vld [vmem:[%s11360_s12 + $0xfe8] sm:$0xff]  ;;  %v6708_v24 = vld [vmem:[%s11360_s12 + $0xe58] sm:$0xff] }
0x12cf   : > { %v5317_v41 = vmax.f32 %v5237_v62, 0.0  ;;  %v6757_v62 = vld [vmem:[%s11360_s12 + $0xfe0] sm:$0xff] }
0x12d0   : > { %v5318_v12 = vmax.f32 %v5269_v48, 0.0  ;;  %v5210_v44 = vpop.f32.mrf.mxu1  ;;  %v6756_v48 = vld [vmem:[%s11360_s12 + $0xfd8] sm:$0xff] }
0x12d1   : > { %v5211_v31 = vadd.f32 %v5210_v44, %v10891_v17  ;;  %v5306_v35 = vpop.f32.mrf.mxu0  ;;  %5447 = vmatmul.f32.gmra.mxu3 %v5317_v41  ;;  %v6706_v41 = vld [vmem:[%s11360_s12 + $0xe48] sm:$0xff]  ;;  %v6704_v44 = vld [vmem:[%s11360_s12 + $0xe38] sm:$0xff] }
0x12d2   : > { %v5307_v29 = vadd.f32 %v5306_v35, %v10893_v32  ;;  %5479 = vmatmul.f32.gmra.mxu2 %v5318_v12  ;;  %v6753_v12 = vld [vmem:[%s11360_s12 + $0xfc0] sm:$0xff] }
0x12d3   : > { %v5324_v6 = vmax.f32 %v5211_v31, 0.0  ;;  %v6752_v31 = vld [vmem:[%s11360_s12 + $0xfb8] sm:$0xff] }
0x12d4   : > { %v5327_v57 = vmax.f32 %v5307_v29, 0.0  ;;  %v5239_v49 = vpop.f32.mrf.mxu3 }
0x12d5   : > { %v5240_v53 = vadd.f32 %v5239_v49, %v10918_v55  ;;  %v5271_v16 = vpop.f32.mrf.mxu2  ;;  %5421 = vmatmul.f32.gmra.mxu1 %v5324_v6  ;;  %v6703_v6 = vld [vmem:[%s11360_s12 + $0xe30] sm:$0xff]  ;;  %v6744_v49 = vld [vmem:[%s11360_s12 + $0xf78] sm:$0xff] }
0x12d6   : > { %v5272_v25 = vadd.f32 %v5271_v16, %v10924_v22  ;;  %5517 = vmatmul.f32.gmra.mxu0 %v5327_v57  ;;  %v6728_v57 = vld [vmem:[%s11360_s12 + $0xef8] sm:$0xff]  ;;  %5831 = vmatpush.msra.mxu2 %v6744_v49  ;;  %v6702_v16 = vld [vmem:[%s11360_s12 + $0xe28] sm:$0xff] }
0x12d7   : > { %v5321_v52 = vmax.f32 %v5240_v53, 0.0  ;;  %5799 = vmatpush.msrb.mxu3 %v6728_v57  ;;  %v6751_v53 = vld [vmem:[%s11360_s12 + $0xfb0] sm:$0xff]  ;;  %v6733_v57 = vld [vmem:[%s11360_s12 + $0xf20] sm:$0xff] }
0x12d8   : > { %v5322_v1 = vmax.f32 %v5272_v25, 0.0  ;;  %v5213_v63 = vpop.f32.mrf.mxu1  ;;  %v6727_v25 = vld [vmem:[%s11360_s12 + $0xef0] sm:$0xff] }
0x12d9   : > { %v5214_v9 = vadd.f32 %v5213_v63, %v10891_v17  ;;  %v5309_v51 = vpop.f32.mrf.mxu0  ;;  %5450 = vmatmul.f32.gmra.mxu3 %v5321_v52  ;;  %v6743_v52 = vld [vmem:[%s11360_s12 + $0xf70] sm:$0xff]  ;;  %v6701_v63 = vld [vmem:[%s11360_s12 + $0xe20] sm:$0xff] }
0x12da   : > { %v5310_v2 = vadd.f32 %v5309_v51, %v10893_v32  ;;  %5482 = vmatmul.f32.gmra.mxu2 %v5322_v1  ;;  %5800 = vmatpush.msrb.mxu3 %v6727_v25  ;;  %v6750_v1 = vld [vmem:[%s11360_s12 + $0xfa8] sm:$0xff] }
0x12db   : > { %v5328_v0 = vmax.f32 %v5214_v9, 0.0  ;;  %5832 = vmatpush.msra.mxu2 %v6743_v52  ;;  %v6726_v9 = vld [vmem:[%s11360_s12 + $0xee8] sm:$0xff] }
0x12dc   : > { %v5331_v42 = vmax.f32 %v5310_v2, 0.0  ;;  %v5242_v27 = vpop.f32.mrf.mxu3  ;;  %v6742_v51 = vld [vmem:[%s11360_s12 + $0xf68] sm:$0xff]  ;;  %5801 = vmatpush.msrb.mxu3 %v6726_v9  ;;  %v6749_v2 = vld [vmem:[%s11360_s12 + $0xfa0] sm:$0xff]  ;;  %v6731_v9 = vld [vmem:[%s11360_s12 + $0xf10] sm:$0xff] }
0x12dd   : > { %v5243_v60 = vadd.f32 %v5242_v27, %v10918_v55  ;;  %v5274_v15 = vpop.f32.mrf.mxu2  ;;  %5424 = vmatmul.f32.gmra.mxu1 %v5328_v0  ;;  %5833 = vmatpush.msra.mxu2 %v6742_v51  ;;  %v6700_v0 = vld [vmem:[%s11360_s12 + $0xe18] sm:$0xff]  ;;  %v6741_v27 = vld [vmem:[%s11360_s12 + $0xf60] sm:$0xff] }
0x12de   : > { %v5275_v7 = vadd.f32 %v5274_v15, %v10924_v22  ;;  %5520 = vmatmul.f32.gmra.mxu0 %v5331_v42  ;;  %v6725_v42 = vld [vmem:[%s11360_s12 + $0xee0] sm:$0xff]  ;;  %v6748_v15 = vld [vmem:[%s11360_s12 + $0xf98] sm:$0xff] }
0x12df   : > { %v5325_v40 = vmax.f32 %v5243_v60, 0.0  ;;  %5802 = vmatpush.msrb.mxu3 %v6725_v42  ;;  %5834 = vmatpush.msra.mxu2 %v6741_v27  ;;  %v6713_v42 = vld [vmem:[%s11360_s12 + $0xe80] sm:$0xff] }
0x12e0   : > { %v5326_v38 = vmax.f32 %v5275_v7, 0.0  ;;  %v6729_v27 = vld [vmem:[%s11360_s12 + $0xf00] sm:$0xff] }
0x12e1   : > { %5453 = vmatmul.f32.gmra.mxu3 %v5325_v40  ;;  %v6699_v40 = vld [vmem:[%s11360_s12 + $0xe10] sm:$0xff] }
0x12e2   : > { %5485 = vmatmul.f32.gmra.mxu2 %v5326_v38  ;;  %v6724_v38 = vld [vmem:[%s11360_s12 + $0xed8] sm:$0xff] }
0x12e3   : > { %5803 = vmatpush.msrb.mxu3 %v6724_v38 }
0x12e4   : > { %v5245_v17 = vpop.f32.mrf.mxu3 }
0x12e5   : > { %v5246_v19 = vadd.f32 %v5245_v17, %v10918_v55  ;;  %v5277_v36 = vpop.f32.mrf.mxu2  ;;  %6677 = vmatmul.msk.f32.vlgmr.msra.gmra.mxu1 %vm599_vm1, %v9881_v13  ;;  %v6712_v55 = vld [vmem:[%s11360_s12 + $0xe78] sm:$0xff] }
0x12e6   : > { %v5278_v32 = vadd.f32 %v5277_v36, %v10924_v22  ;;  %6692 = vmatmul.msk.f32.vlgmr.msra.gmra.mxu0 %vm599_vm1, %v9881_v13  ;;  %v6760_v22 = vld [vmem:[%s11360_s12 + $0xff8] sm:$0xff]  ;;  %5767 = vmatpush.msrb.mxu1 %v6712_v55  ;;  %v6698_v36 = vld [vmem:[%s11360_s12 + $0xe08] sm:$0xff]  ;;  %v6697_v55 = vld [vmem:[%s11360_s12 + $0xe00] sm:$0xff] }
0x12e7   : > { %v5329_v5 = vmax.f32 %v5246_v19, 0.0  ;;  %5863 = vmatpush.msrb.mxu0 %v6760_v22  ;;  %v6740_v17 = vld [vmem:[%s11360_s12 + $0xf58] sm:$0xff]  ;;  %v6747_v19 = vld [vmem:[%s11360_s12 + $0xf90] sm:$0xff]  ;;  %v6722_v22 = vld [vmem:[%s11360_s12 + $0xec8] sm:$0xff] }
0x12e8   : > { %v5330_v4 = vmax.f32 %v5278_v32, 0.0  ;;  %5768 = vmatpush.msrb.mxu1 %v6711_v54  ;;  %5835 = vmatpush.msra.mxu2 %v6740_v17  ;;  %v6723_v32 = vld [vmem:[%s11360_s12 + $0xed0] sm:$0xff]  ;;  %v6738_v54 = vld [vmem:[%s11360_s12 + $0xf48] sm:$0xff] }
0x12e9   : > { %5456 = vmatmul.f32.gmra.mxu3 %v5329_v5  ;;  %5864 = vmatpush.msrb.mxu0 %v6759_v58  ;;  %v6739_v5 = vld [vmem:[%s11360_s12 + $0xf50] sm:$0xff]  ;;  %v6745_v58 = vld [vmem:[%s11360_s12 + $0xf80] sm:$0xff] }
0x12ea   : > { %5488 = vmatmul.f32.gmra.mxu2 %v5330_v4  ;;  %5769 = vmatpush.msrb.mxu1 %v6710_v61  ;;  %v6746_v4 = vld [vmem:[%s11360_s12 + $0xf88] sm:$0xff]  ;;  %v6721_v61 = vld [vmem:[%s11360_s12 + $0xec0] sm:$0xff] }
0x12eb   : > { %5865 = vmatpush.msrb.mxu0 %v6758_v21  ;;  %5804 = vmatpush.msrb.mxu3 %v6723_v32  ;;  %v6737_v21 = vld [vmem:[%s11360_s12 + $0xf40] sm:$0xff] }
0x12ec   : > { %5770 = vmatpush.msrb.mxu1 %v6709_v28  ;;  %5836 = vmatpush.msra.mxu2 %v6739_v5 }
0x12ed   : > { %6678 = vmatmul.msk.f32.gmra.mxu1 %vm599_vm1, %v9896_v8  ;;  %5866 = vmatpush.msrb.mxu0 %v6757_v62 }
0x12ee   : > { %6693 = vmatmul.msk.f32.gmra.mxu0 %vm599_vm1, %v9896_v8  ;;  %5771 = vmatpush.msrb.mxu1 %v6708_v24  ;;  %v6720_v24 = vld [vmem:[%s11360_s12 + $0xeb8] sm:$0xff] }
0x12ef   : > { %5867 = vmatpush.msrb.mxu0 %v6756_v48  ;;  %5805 = vmatpush.msrb.mxu3 %v6722_v22  ;;  %v6736_v48 = vld [vmem:[%s11360_s12 + $0xf38] sm:$0xff] }
0x12f0   : > { %5772 = vmatpush.msrb.mxu1 %v6707_v30  ;;  %5837 = vmatpush.msra.mxu2 %v6738_v54 }
0x12f1   : > { %6682 = vmatmul.msk.f32.vlgmr.msra.gmra.mxu3 %vm599_vm1, %v9881_v13  ;;  %5868 = vmatpush.msrb.mxu0 %v6755_v46 }
0x12f2   : > { %6687 = vmatmul.msk.f32.vlgmr.msrb.gmra.mxu2 %vm599_vm1, %v9881_v13  ;;  %5773 = vmatpush.msrb.mxu1 %v6706_v41 }
0x12f3   : > { %5869 = vmatpush.msrb.mxu0 %v6754_v11  ;;  %5806 = vmatpush.msrb.mxu3 %v6721_v61  ;;  %v6719_v11 = vld [vmem:[%s11360_s12 + $0xeb0] sm:$0xff] }
0x12f4   : > { %5774 = vmatpush.msrb.mxu1 %v6705_v26  ;;  %5838 = vmatpush.msra.mxu2 %v6737_v21  ;;  %v6735_v26 = vld [vmem:[%s11360_s12 + $0xf30] sm:$0xff] }
0x12f5   : > { %6679 = vmatmul.msk.f32.gmra.mxu1 %vm599_vm1, %v9959_v39  ;;  %5870 = vmatpush.msrb.mxu0 %v6753_v12 }
0x12f6   : > { %6694 = vmatmul.msk.f32.gmra.mxu0 %vm599_vm1, %v9959_v39  ;;  %5775 = vmatpush.msrb.mxu1 %v6704_v44  ;;  %v6718_v44 = vld [vmem:[%s11360_s12 + $0xea8] sm:$0xff] }
0x12f7   : > { %5871 = vmatpush.msrb.mxu0 %v6752_v31  ;;  %5807 = vmatpush.msrb.mxu3 %v6720_v24  ;;  %v6734_v31 = vld [vmem:[%s11360_s12 + $0xf28] sm:$0xff] }
0x12f8   : > { %5776 = vmatpush.msrb.mxu1 %v6703_v6  ;;  %5839 = vmatpush.msra.mxu2 %v6736_v48  ;;  %v6717_v6 = vld [vmem:[%s11360_s12 + $0xea0] sm:$0xff] }
0x12f9   : > { %6683 = vmatmul.msk.f32.gmra.mxu3 %vm599_vm1, %v9896_v8  ;;  %5872 = vmatpush.msrb.mxu0 %v6751_v53 }
0x12fa   : > { %6688 = vmatmul.msk.f32.gmra.mxu2 %vm599_vm1, %v9896_v8  ;;  %5777 = vmatpush.msrb.mxu1 %v6702_v16  ;;  %v6716_v16 = vld [vmem:[%s11360_s12 + $0xe98] sm:$0xff] }
0x12fb   : > { %5873 = vmatpush.msrb.mxu0 %v6750_v1  ;;  %5808 = vmatpush.msrb.mxu3 %v6719_v11 }
0x12fc   : > { %5778 = vmatpush.msrb.mxu1 %v6701_v63  ;;  %5840 = vmatpush.msra.mxu2 %v6735_v26  ;;  %v6715_v63 = vld [vmem:[%s11360_s12 + $0xe90] sm:$0xff] }
0x12fd   : > { %6680 = vmatmul.msk.f32.gmra.mxu1 %vm599_vm1, %v9972_v45  ;;  %5874 = vmatpush.msrb.mxu0 %v6749_v2  ;;  %v6714_v2 = vld [vmem:[%s11360_s12 + $0xe88] sm:$0xff] }
0x12fe   : > { %6695 = vmatmul.msk.f32.gmra.mxu0 %vm599_vm1, %v9972_v45  ;;  %5779 = vmatpush.msrb.mxu1 %v6700_v0  ;;  %v6730_v0 = vld [vmem:[%s11360_s12 + $0xf08] sm:$0xff] }
0x12ff   : > { %5875 = vmatpush.msrb.mxu0 %v6748_v15  ;;  %5809 = vmatpush.msrb.mxu3 %v6718_v44 }
0x1300   : > { %5780 = vmatpush.msrb.mxu1 %v6699_v40  ;;  %5841 = vmatpush.msra.mxu2 %v6734_v31 }
0x1301   : > { %6684 = vmatmul.msk.f32.gmra.mxu3 %vm599_vm1, %v9959_v39  ;;  %5876 = vmatpush.msrb.mxu0 %v6747_v19  ;;  %v6676_v19 = vld [vmem:[%s11359_s11 + $0x1c] sm:$0xf] }
0x1302   : > { %6689 = vmatmul.msk.f32.gmra.mxu2 %vm599_vm1, %v9959_v39  ;;  %5781 = vmatpush.msrb.mxu1 %v6698_v36 }
0x1303   : > { %5877 = vmatpush.msrb.mxu0 %v6746_v4  ;;  %5810 = vmatpush.msrb.mxu3 %v6717_v6  ;;  %v11224_v4 = vperm.slane %v6676_v19, 0 }
0x1304   : > { %5782 = vmatpush.msrb.mxu1 %v6697_v55  ;;  %5842 = vmatpush.msra.mxu2 %v6733_v57  ;;  %v11226_v55 = vperm.slane %v6676_v19, 3 }
0x1305   : > { %6681 = vmatmul.msk.f32.gmra.mxu1 %vm599_vm1, %v9985_v59  ;;  %5878 = vmatpush.msrb.mxu0 %v6745_v58 }
0x1306   : > { %6696 = vmatmul.msk.f32.gmra.mxu0 %vm599_vm1, %v9985_v59  ;;  %5811 = vmatpush.msrb.mxu3 %v6716_v16 }
0x1308   : > { %5812 = vmatpush.msrb.mxu3 %v6715_v63 }
0x1309   : > { %6685 = vmatmul.msk.f32.gmra.mxu3 %vm599_vm1, %v9972_v45 }
0x130a   : > { %6690 = vmatmul.msk.f32.gmra.mxu2 %vm599_vm1, %v9972_v45  ;;  %5813 = vmatpush.msrb.mxu3 %v6714_v2 }
0x130c   : > { %5814 = vmatpush.msrb.mxu3 %v6713_v42 }
0x1311   : > { %6686 = vmatmul.msk.f32.gmra.mxu3 %vm599_vm1, %v9985_v59 }
0x1312   : > { %6691 = vmatmul.msk.f32.gmra.mxu2 %vm599_vm1, %v9985_v59 }
0x133a   : > { %v11066_v35 = vpop.f32.mrf.mxu1 }
0x133b   : > { %v11068_v29 = vpop.f32.mrf.mxu0 }
0x1342   : > { %v11115_v60 = vpop.f32.mrf.mxu1 }
0x1343   : > { %v11120_v7 = vpop.f32.mrf.mxu0 }
0x134a   : > { %v5419_v28 = vpop.f32.mrf.mxu1 }
0x134b   : > { %v5515_v62 = vpop.f32.mrf.mxu0 }
0x134c   : > { %v5445_v30 = vpop.f32.mrf.mxu3 }
0x134d   : > { %v5446_v46 = vadd.f32 %v5445_v30, %v11066_v35  ;;  %v5477_v41 = vpop.f32.mrf.mxu2 }
0x134f   : > { %v5478_v12 = vadd.f32 %v5477_v41, %v5446_v46 }
0x1351   : > { %v11184_v35 = vadd.f32 %v11068_v29, %v5478_v12  ;;  %v6732_v29 = vld [vmem:[%s11360_s12 + $0xf18] sm:$0xff] }
0x1352   : > { %v5422_v49 = vpop.f32.mrf.mxu1  ;;  %5843 = vmatpush.msra.mxu2 %v6732_v29 }
0x1353   : > { %v5518_v53 = vpop.f32.mrf.mxu0 }
0x1354   : > { %v5448_v25 = vpop.f32.mrf.mxu3  ;;  %5844 = vmatpush.msra.mxu2 %v6731_v9 }
0x1355   : > { %v5449_v52 = vadd.f32 %v5448_v25, %v11115_v60  ;;  %v5480_v1 = vpop.f32.mrf.mxu2  ;;  %v5548_v25 = vperm.slane %v6676_v19, 1 }
0x1356   : > { %5845 = vmatpush.msra.mxu2 %v6730_v0 }
0x1357   : > { %v5481_v51 = vadd.f32 %v5480_v1, %v5449_v52  ;;  %v5549_v52 = vperm.slane %v6676_v19, 2 }
0x1358   : > { %5846 = vmatpush.msra.mxu2 %v6729_v27 }
0x1359   : > { %v5513_v60 = vadd.f32 %v11120_v7, %v5481_v51 }
0x135a   : > { %v5425_v15 = vpop.f32.mrf.mxu1 }
0x135b   : > { %v11219_v40 = vadd.f32 %v5513_v60, %v10873_v43  ;;  %v5521_v38 = vpop.f32.mrf.mxu0 }
0x135c   : > { %v5451_v17 = vpop.f32.mrf.mxu3 }
0x135d   : > { %v5452_v36 = vadd.f32 %v5451_v17, %v5419_v28  ;;  %v5483_v32 = vpop.f32.mrf.mxu2 }
0x135f   : > { %v5484_v5 = vadd.f32 %v5483_v32, %v5452_v36 }
0x1361   : > { %v5516_v7 = vadd.f32 %v5515_v62, %v5484_v5 }
0x1362   : > { %v5572_v22 = vpop.f32.mrf.mxu1 }
0x1363   : > { %v11229_v54 = vadd.f32 %v5516_v7, %v10885_v14  ;;  %v5573_v43 = vadd.f32 %v5572_v22, %v11224_v4  ;;  %v5668_v58 = vpop.f32.mrf.mxu0 }
0x1364   : > { %v5669_v61 = vadd.f32 %v5668_v58, %v11226_v55  ;;  %v5454_v21 = vpop.f32.mrf.mxu3 }
0x1365   : > { %v5683_v24 = vmax.f32 %v5573_v43, 0.0  ;;  %v5455_v48 = vadd.f32 %v5454_v21, %v5422_v49  ;;  %v5486_v28 = vpop.f32.mrf.mxu2 }
0x1366   : > { %v5686_v30 = vmax.f32 %v5669_v61, 0.0 }
0x1367   : > { %v5487_v46 = vadd.f32 %v5486_v28, %v5455_v48  ;;  %5783 = vmatmul.f32.vlgmr.msrb.gmra.mxu1 %v5683_v24 }
0x1368   : > { %5879 = vmatmul.f32.vlgmr.msrb.gmra.mxu0 %v5686_v30 }
0x1369   : > { %v5519_v41 = vadd.f32 %v5518_v53, %v5487_v46 }
0x136a   : > { %v5575_v11 = vpop.f32.mrf.mxu1 }
0x136b   : > { %v11234_v62 = vadd.f32 %v5519_v41, %v10896_v18  ;;  %v5576_v14 = vadd.f32 %v5575_v11, %v11224_v4  ;;  %v5671_v26 = vpop.f32.mrf.mxu0 }
0x136c   : > { %v5672_v12 = vadd.f32 %v5671_v26, %v11226_v55  ;;  %v5457_v44 = vpop.f32.mrf.mxu3 }
0x136d   : > { %v5687_v31 = vmax.f32 %v5576_v14, 0.0  ;;  %v5458_v6 = vadd.f32 %v5457_v44, %v5425_v15  ;;  %v5489_v57 = vpop.f32.mrf.mxu2 }
0x136e   : > { %v5690_v49 = vmax.f32 %v5672_v12, 0.0 }
0x136f   : > { %v5490_v16 = vadd.f32 %v5489_v57, %v5458_v6  ;;  %5786 = vmatmul.f32.gmra.mxu1 %v5687_v31 }
0x1370   : > { %5882 = vmatmul.f32.gmra.mxu0 %v5690_v49 }
0x1371   : > { %v5522_v29 = vadd.f32 %v5521_v38, %v5490_v16 }
0x1372   : > { %v5578_v53 = vpop.f32.mrf.mxu1 }
0x1373   : > { %v11239_v18 = vadd.f32 %v5522_v29, %v10915_v34  ;;  %v5579_v1 = vadd.f32 %v5578_v53, %v11224_v4  ;;  %v5674_v63 = vpop.f32.mrf.mxu0 }
0x1374   : > { %v5675_v9 = vadd.f32 %v5674_v63, %v11226_v55  ;;  %v5604_v51 = vpop.f32.mrf.mxu3 }
0x1375   : > { %v5691_v2 = vmax.f32 %v5579_v1, 0.0  ;;  %v5605_v0 = vadd.f32 %v5604_v51, %v5548_v25  ;;  %v5636_v42 = vpop.f32.mrf.mxu2 }
0x1376   : > { %v5694_v27 = vmax.f32 %v5675_v9, 0.0  ;;  %v5637_v60 = vadd.f32 %v5636_v42, %v5549_v52 }
0x1377   : > { %v5684_v15 = vmax.f32 %v5605_v0, 0.0  ;;  %5789 = vmatmul.f32.gmra.mxu1 %v5691_v2  ;;  %v4952_v2 = vadd.f32 %v10637_v23, %v10629_v37 }
0x1378   : > { %v5685_v38 = vmax.f32 %v5637_v60, 0.0  ;;  %5885 = vmatmul.f32.gmra.mxu0 %v5694_v27 }
0x1379   : > { %5815 = vmatmul.f32.vlgmr.msrb.gmra.mxu3 %v5684_v15  ;;  %v4984_v0 = vadd.f32 %v10639_v20, %v4952_v2 }
0x137a   : > { %5847 = vmatmul.f32.vlgmr.msra.gmra.mxu2 %v5685_v38  ;;  %v5581_v17 = vpop.f32.mrf.mxu1 }
0x137b   : > { %v5582_v34 = vadd.f32 %v5581_v17, %v11224_v4  ;;  %v5677_v19 = vpop.f32.mrf.mxu0  ;;  %v5016_v42 = vadd.f32 %v10631_v56, %v4984_v0  ;;  %v6889_v56 = vld [vmem:[%s11361_s13 + $0x1] ss:$0 sm:$0xff] }
0x137c   : > { %v5678_v36 = vadd.f32 %v5677_v19, %v11226_v55  ;;  %v5607_v32 = vpop.f32.mrf.mxu3 }
0x137d   : > { %v5695_v5 = vmax.f32 %v5582_v34, 0.0  ;;  %v5608_v7 = vadd.f32 %v5607_v32, %v5548_v25  ;;  %v5639_v22 = vpop.f32.mrf.mxu2  ;;  %v5048_v60 = vadd.f32 %v10734_v33, %v5016_v42 }
0x137e   : > { %v5698_v43 = vmax.f32 %v5678_v36, 0.0  ;;  %v5640_v58 = vadd.f32 %v5639_v22, %v5549_v52 }
0x137f   : > { %v5688_v61 = vmax.f32 %v5608_v7, 0.0  ;;  %5792 = vmatmul.f32.gmra.mxu1 %v5695_v5  ;;  %v5080_v15 = vadd.f32 %v10816_v50, %v5048_v60 }
0x1380   : > { %v5689_v21 = vmax.f32 %v5640_v58, 0.0  ;;  %5888 = vmatmul.f32.gmra.mxu0 %v5698_v43 }
0x1381   : > { %5818 = vmatmul.f32.gmra.mxu3 %v5688_v61 }
0x1382   : > { %5850 = vmatmul.f32.gmra.mxu2 %v5689_v21  ;;  %v5584_v24 = vpop.f32.mrf.mxu1 }
0x1383   : > { %v5585_v48 = vadd.f32 %v5584_v24, %v11224_v4  ;;  %v5680_v28 = vpop.f32.mrf.mxu0 }
0x1384   : > { %v5681_v30 = vadd.f32 %v5680_v28, %v11226_v55  ;;  %v5610_v46 = vpop.f32.mrf.mxu3 }
0x1385   : > { %v5699_v41 = vmax.f32 %v5585_v48, 0.0  ;;  %v5611_v11 = vadd.f32 %v5610_v46, %v5548_v25  ;;  %v5642_v14 = vpop.f32.mrf.mxu2 }
0x1386   : > { %v5702_v26 = vmax.f32 %v5681_v30, 0.0  ;;  %v5643_v12 = vadd.f32 %v5642_v14, %v5549_v52 }
0x1387   : > { %v5692_v44 = vmax.f32 %v5611_v11, 0.0  ;;  %5795 = vmatmul.f32.gmra.mxu1 %v5699_v41 }
0x1388   : > { %v5693_v31 = vmax.f32 %v5643_v12, 0.0  ;;  %5891 = vmatmul.f32.gmra.mxu0 %v5702_v26 }
0x1389   : > { %5821 = vmatmul.f32.gmra.mxu3 %v5692_v44 }
0x138a   : > { %5853 = vmatmul.f32.gmra.mxu2 %v5693_v31 }
0x138c   : > { %v5613_v6 = vpop.f32.mrf.mxu3 }
0x138d   : > { %v5614_v57 = vadd.f32 %v5613_v6, %v5548_v25  ;;  %v5645_v49 = vpop.f32.mrf.mxu2 }
0x138e   : > { %v5646_v16 = vadd.f32 %v5645_v49, %v5549_v52 }
0x138f   : > { %v5696_v4 = vmax.f32 %v5614_v57, 0.0 }
0x1390   : > { %v5697_v29 = vmax.f32 %v5646_v16, 0.0 }
0x1391   : > { %5824 = vmatmul.f32.gmra.mxu3 %v5696_v4 }
0x1392   : > { %5856 = vmatmul.f32.gmra.mxu2 %v5697_v29 }
0x1394   : > { %v5616_v55 = vpop.f32.mrf.mxu3 }
0x1395   : > { %v5617_v53 = vadd.f32 %v5616_v55, %v5548_v25  ;;  %v5648_v1 = vpop.f32.mrf.mxu2  ;;  %v5112_v25 = vadd.f32 %v10822_v3, %v5080_v15 }
0x1396   : > { %v5649_v63 = vadd.f32 %v5648_v1, %v5549_v52 }
0x1397   : > { %v5700_v9 = vmax.f32 %v5617_v53, 0.0  ;;  %v5144_v36 = vadd.f32 %v10739_v47, %v5112_v25 }
0x1398   : > { %v5701_v51 = vmax.f32 %v5649_v63, 0.0 }
0x1399   : > { %5827 = vmatmul.f32.gmra.mxu3 %v5700_v9  ;;  %v5524_v37 = vadd.f32 %v11184_v35, %v5144_v36 }
0x139a   : > { %5859 = vmatmul.f32.gmra.mxu2 %v5701_v51 }
0x13e4   : > { %v5784_v27 = vpop.f32.mrf.mxu1 }
0x13e5   : > { %v5880_v38 = vpop.f32.mrf.mxu0 }
0x13ec   : > { %v5787_v19 = vpop.f32.mrf.mxu1 }
0x13ed   : > { %v5883_v20 = vpop.f32.mrf.mxu0 }
0x13f4   : > { %v5790_v58 = vpop.f32.mrf.mxu1 }
0x13f5   : > { %v5886_v21 = vpop.f32.mrf.mxu0 }
0x13fc   : > { %v5816_v52 = vpop.f32.mrf.mxu3  ;;  %v5793_v26 = vpop.f32.mrf.mxu1 }
0x13fd   : > { %v5817_v17 = vadd.f32 %v5816_v52, %v5784_v27  ;;  %v5848_v34 = vpop.f32.mrf.mxu2 }
0x13ff   : > { %v5849_v32 = vadd.f32 %v5848_v34, %v5817_v17 }
0x1401   : > { %v5881_v23 = vadd.f32 %v5880_v38, %v5849_v32 }
0x1403   : > { %v5895_v33 = vadd.f32 %v5881_v23, %v5524_v37 }
0x1404   : > { %v5819_v50 = vpop.f32.mrf.mxu3  ;;  %v5796_v29 = vpop.f32.mrf.mxu1 }
0x1405   : > { %v5820_v5 = vadd.f32 %v5819_v50, %v5787_v19  ;;  %v5851_v7 = vpop.f32.mrf.mxu2  ;;  %v5905_v3 = vadd.f32 %v6889_v56, %v5895_v33 }
0x1407   : > { %v5852_v22 = vadd.f32 %v5851_v7, %v5820_v5  ;;  %v5910_v43 = vadd.f32 %v5905_v3, %v9881_v13 }
0x1409   : > { %v5884_v61 = vadd.f32 %v5883_v20, %v5852_v22  ;;  %v5919_v47 = vsel %vm599_vm1, %v5910_v43, 0.0 }
0x140a   : > { %5920 = vadd.xlane.f32.xlu1 %v5919_v47 }
0x140b   : > { %v5896_v35 = vadd.f32 %v5884_v61, %v11219_v40  ;;  %v5889_v40 = vpop.f32.mrf.mxu0 }
0x140c   : > { %v5822_v24 = vpop.f32.mrf.mxu3 }
0x140d   : > { %v5823_v48 = vadd.f32 %v5822_v24, %v5790_v58  ;;  %v5854_v28 = vpop.f32.mrf.mxu2  ;;  %v5906_v30 = vadd.f32 %v6889_v56, %v5896_v35 }
0x140f   : > { %v5855_v46 = vadd.f32 %v5854_v28, %v5823_v48  ;;  %v5911_v41 = vadd.f32 %v5906_v30, %v9896_v8 }
0x1411   : > { %v5887_v11 = vadd.f32 %v5886_v21, %v5855_v46  ;;  %v5922_v14 = vsel %vm599_vm1, %v5911_v41, 0.0 }
0x1412   : > { %5923 = vadd.xlane.f32.xlu0 %v5922_v14 }
0x1413   : > { %v5897_v13 = vadd.f32 %v5887_v11, %v11229_v54  ;;  %v5892_v51 = vpop.f32.mrf.mxu0 }
0x1414   : > { %v5825_v12 = vpop.f32.mrf.mxu3 }
0x1415   : > { %v5826_v44 = vadd.f32 %v5825_v12, %v5793_v26  ;;  %v5857_v31 = vpop.f32.mrf.mxu2  ;;  %v5907_v6 = vadd.f32 %v6889_v56, %v5897_v13 }
0x1417   : > { %v5858_v57 = vadd.f32 %v5857_v31, %v5826_v44  ;;  %v5912_v49 = vadd.f32 %v5907_v6, %v9959_v39  ;;  %v11305_v6 = vld [vmem:[%s11362_s14 + $0x1] ss:$0 sm:$0xff] }
0x1419   : > { %v5890_v16 = vadd.f32 %v5889_v40, %v5858_v57  ;;  %v5925_v4 = vsel %vm599_vm1, %v5912_v49, 0.0 }
0x141a   : > { %5926 = vadd.xlane.f32.xlu2 %v5925_v4 }
0x141b   : > { %v5898_v8 = vadd.f32 %v5890_v16, %v11234_v62 }
0x141c   : > { %v5828_v55 = vpop.f32.mrf.mxu3 }
0x141d   : > { %v5829_v53 = vadd.f32 %v5828_v55, %v5796_v29  ;;  %v5908_v1 = vadd.f32 %v6889_v56, %v5898_v8  ;;  %v5860_v63 = vpop.f32.mrf.mxu2 }
0x141f   : > { %v5861_v54 = vadd.f32 %v5860_v63, %v5829_v53  ;;  %v5913_v9 = vadd.f32 %v5908_v1, %v9972_v45 }
0x1421   : > { %v5893_v2 = vadd.f32 %v5892_v51, %v5861_v54  ;;  %v5928_v0 = vsel %vm599_vm1, %v5913_v9, 0.0 }
0x1422   : > { %5929 = vadd.xlane.f32.xlu1 %v5928_v0 }
0x1423   : > { %v5899_v39 = vadd.f32 %v5893_v2, %v11239_v18 }
0x1425   : > { %v5909_v42 = vadd.f32 %v6889_v56, %v5899_v39 }
0x1427   : > { %v5914_v27 = vadd.f32 %v5909_v42, %v9985_v59 }
0x1429   : > { %v5931_v62 = vsel %vm1566_vm7, %v5914_v27, 0.0 }
0x142a   : > { %5932 = vadd.xlane.f32.xlu0 %v5931_v62 }
0x147d   : > { %v5921_v60 = vpop.xlane.xlu1 %5920 }
0x147e   : > { %v5934_v15 = vmul.f32 %v5921_v60, %v11445_v10 }
0x1480   : > { %v5939_v38 = vsub.f32 %v5910_v43, %v5934_v15 }
0x1482   : > { %v5944_v25 = vmul.f32 %v5939_v38, %v5939_v38 }
0x1484   : > { %v5949_v45 = vsel %vm599_vm1, %v5944_v25, 0.0 }
0x1485   : > { %v5924_v52 = vpop.xlane.xlu0 %5923  ;;  %5950 = vadd.xlane.f32.xlu2 %v5949_v45 }
0x1486   : > { %v5935_v17 = vmul.f32 %v5924_v52, %v11445_v10 }
0x1488   : > { %v11276_v34 = vsub.f32 %v5911_v41, %v5935_v17 }
0x148a   : > { %v5945_v18 = vmul.f32 %v11276_v34, %v11276_v34 }
0x148c   : > { %v5952_v59 = vsel %vm599_vm1, %v5945_v18, 0.0 }
0x148d   : > { %v5927_v19 = vpop.xlane.xlu2 %5926  ;;  %5953 = vadd.xlane.f32.xlu1 %v5952_v59 }
0x148e   : > { %v5936_v36 = vmul.f32 %v5927_v19, %v11445_v10 }
0x1490   : > { %v11282_v32 = vsub.f32 %v5912_v49, %v5936_v36  ;;  %v11310_v49 = vld [vmem:[%s11363_s15 + $0x1] ss:$0 sm:$0xff] }
0x1492   : > { %v5946_v37 = vmul.f32 %v11282_v32, %v11282_v32 }
0x1494   : > { %v5955_v23 = vsel %vm599_vm1, %v5946_v37, 0.0 }
0x1495   : > { %5956 = vadd.xlane.f32.xlu0 %v5955_v23  ;;  %v5930_v56 = vpop.xlane.xlu1 %5929 }
0x1496   : > { %v5937_v20 = vmul.f32 %v5930_v56, %v11445_v10 }
0x1498   : > { %v11288_v33 = vsub.f32 %v5913_v9, %v5937_v20 }
0x149a   : > { %v5947_v50 = vmul.f32 %v11288_v33, %v11288_v33 }
0x149c   : > { %v5958_v5 = vsel %vm599_vm1, %v5947_v50, 0.0 }
0x149d   : > { %v5933_v7 = vpop.xlane.xlu0 %5932  ;;  %5959 = vadd.xlane.f32.xlu2 %v5958_v5 }
0x149e   : > { %v5938_v3 = vmul.f32 %v5933_v7, %v11445_v10 }
0x14a0   : > { %v11294_v22 = vsub.f32 %v5914_v27, %v5938_v3 }
0x14a2   : > { %v5948_v43 = vmul.f32 %v11294_v22, %v11294_v22 }
0x14a4   : > { %v5961_v58 = vsel %vm1566_vm7, %v5948_v43, 0.0 }
0x14a5   : > { %5962 = vadd.xlane.f32.xlu1 %v5961_v58 }
0x14f8   : > { %v5951_v61 = vpop.xlane.xlu2 %5950 }
0x14f9   : > { %v5964_v47 = vmul.f32 %v5951_v61, %v11445_v10 }
0x14fb   : > { %v5969_v35 = vadd.f32 1e-05, %v5964_v47 }
0x14fd   : > { %7084 = vrsqrt.f32 %v5969_v35  ;;  %vm5980_vm3 = vweird.f32 %v5969_v35 }
0x1500   : > { %v5954_v21 = vpop.xlane.xlu1 %5953 }
0x1501   : > { %v5965_v24 = vmul.f32 %v5954_v21, %v11445_v10 }
0x1503   : > { %v7085_v48 = vpop.eup %7084  ;;  %v5970_v28 = vadd.f32 1e-05, %v5965_v24 }
0x1504   : > { %v5975_v30 = vmul.f32 %v7085_v48, %v5969_v35  ;;  %vm5981_vm2 = vweird.f32 %v7085_v48 }
0x1505   : > { %7086 = vrsqrt.f32 %v5970_v28  ;;  %vm5982_vm4 = vmor %vm5980_vm3, %vm5981_vm2  ;;  %vm5990_vm6 = vweird.f32 %v5970_v28 }
0x1506   : > { %v5976_v46 = vmul.f32 %v7085_v48, %v5975_v30 }
0x1508   : > { %v5977_v41 = vmul.f32 0.5, %v5976_v46  ;;  %v5957_v11 = vpop.xlane.xlu0 %5956 }
0x1509   : > { %v5966_v14 = vmul.f32 %v5957_v11, %v11445_v10 }
0x150a   : > { %v5978_v26 = vsub.f32 1.5, %v5977_v41 }
0x150b   : > { %v7087_v13 = vpop.eup %7086  ;;  %v5971_v12 = vadd.f32 1e-05, %v5966_v14 }
0x150c   : > { %v5979_v44 = vmul.f32 %v7085_v48, %v5978_v26  ;;  %v5985_v31 = vmul.f32 %v7087_v13, %v5970_v28  ;;  %vm5991_vm5 = vweird.f32 %v7087_v13 }
0x150d   : > { %7088 = vrsqrt.f32 %v5971_v12  ;;  %vm5992_vm15 = vmor %vm5990_vm6, %vm5991_vm5  ;;  %vm6000_vm9 = vweird.f32 %v5971_v12 }
0x150e   : > { %v5983_v40 = vsel %vm5982_vm4, %v7085_v48, %v5979_v44  ;;  %v5986_v57 = vmul.f32 %v7087_v13, %v5985_v31 }
0x150f   : > { %v6024_v16 = vmul.f32 %v5983_v40, %v5939_v38 }
0x1510   : > { %v5987_v4 = vmul.f32 0.5, %v5986_v57  ;;  %v5960_v8 = vpop.xlane.xlu2 %5959 }
0x1511   : > { %v6032_v29 = vmul.f32 %v11305_v6, %v6024_v16  ;;  %v5967_v55 = vmul.f32 %v5960_v8, %v11445_v10 }
0x1512   : > { %v5988_v53 = vsub.f32 1.5, %v5987_v4 }
0x1513   : > { %v7089_v1 = vpop.eup %7088  ;;  %v6040_v63 = vadd.f32 %v11310_v49, %v6032_v29  ;;  %v5972_v54 = vadd.f32 1e-05, %v5967_v55 }
0x1514   : > { %v5989_v9 = vmul.f32 %v7087_v13, %v5988_v53  ;;  %v5995_v51 = vmul.f32 %v7089_v1, %v5971_v12  ;;  %vm6001_vm8 = vweird.f32 %v7089_v1 }
0x1515   : > { %6045 = vst.msk [vmem:[%s11319_s23] sm:$0xff] %vm599_vm1, %v6040_v63  ;;  %7090 = vrsqrt.f32 %v5972_v54  ;;  %vm6002_vm10 = vmor %vm6000_vm9, %vm6001_vm8  ;;  %vm6010_vm12 = vweird.f32 %v5972_v54 }
0x1516   : > { %v5993_v2 = vsel %vm5992_vm15, %v7087_v13, %v5989_v9  ;;  %v5996_v0 = vmul.f32 %v7089_v1, %v5995_v51 }
0x1517   : > { %v6025_v39 = vmul.f32 %v5993_v2, %v11276_v34 }
0x1518   : > { %v5997_v42 = vmul.f32 0.5, %v5996_v0  ;;  %v5963_v27 = vpop.xlane.xlu1 %5962 }
0x1519   : > { %v6033_v62 = vmul.f32 %v11305_v6, %v6025_v39  ;;  %v5968_v60 = vmul.f32 %v5963_v27, %v11445_v10 }
0x151a   : > { %v5998_v15 = vsub.f32 1.5, %v5997_v42 }
0x151b   : > { %v7091_v38 = vpop.eup %7090  ;;  %v6041_v25 = vadd.f32 %v11310_v49, %v6033_v62  ;;  %v5973_v45 = vadd.f32 1e-05, %v5968_v60 }
0x151c   : > { %v5999_v52 = vmul.f32 %v7089_v1, %v5998_v15  ;;  %v6005_v17 = vmul.f32 %v7091_v38, %v5972_v54  ;;  %vm6011_vm11 = vweird.f32 %v7091_v38 }
0x151d   : > { %6046 = vst.msk [vmem:[%s11319_s23 + $0x8] sm:$0xff] %vm599_vm1, %v6041_v25  ;;  %7092 = vrsqrt.f32 %v5973_v45  ;;  %vm6012_vm13 = vmor %vm6010_vm12, %vm6011_vm11  ;;  %vm6020_vm0 = vweird.f32 %v5973_v45 }
0x151e   : > { %v6003_v34 = vsel %vm6002_vm10, %v7089_v1, %v5999_v52  ;;  %v6006_v18 = vmul.f32 %v7091_v38, %v6005_v17 }
0x151f   : > { %v6026_v59 = vmul.f32 %v6003_v34, %v11282_v32 }
0x1520   : > { %v6007_v19 = vmul.f32 0.5, %v6006_v18 }
0x1521   : > { %v6034_v10 = vmul.f32 %v11305_v6, %v6026_v59 }
0x1522   : > { %v6008_v36 = vsub.f32 1.5, %v6007_v19 }
0x1523   : > { %v7093_v37 = vpop.eup %7092  ;;  %v6042_v23 = vadd.f32 %v11310_v49, %v6034_v10 }
0x1524   : > { %v6009_v56 = vmul.f32 %v7091_v38, %v6008_v36  ;;  %v6015_v20 = vmul.f32 %v7093_v37, %v5973_v45  ;;  %vm6021_vm14 = vweird.f32 %v7093_v37 }
0x1525   : > { %6047 = vst.msk [vmem:[%s11319_s23 + $0x10] sm:$0xff] %vm599_vm1, %v6042_v23  ;;  %vm6022_vm2 = vmor %vm6020_vm0, %vm6021_vm14 }
0x1526   : > { %v6013_v50 = vsel %vm6012_vm13, %v7091_v38, %v6009_v56  ;;  %v6016_v5 = vmul.f32 %v7093_v37, %v6015_v20 }
0x1527   : > { %v6027_v32 = vmul.f32 %v6013_v50, %v11288_v33 }
0x1528   : > { %v6017_v7 = vmul.f32 0.5, %v6016_v5 }
0x1529   : > { %v6035_v3 = vmul.f32 %v11305_v6, %v6027_v32 }
0x152a   : > { %v6018_v43 = vsub.f32 1.5, %v6017_v7 }
0x152b   : > { %v6043_v58 = vadd.f32 %v11310_v49, %v6035_v3 }
0x152c   : > { %v6019_v61 = vmul.f32 %v7093_v37, %v6018_v43 }
0x152d   : > { %6048 = vst.msk [vmem:[%s11319_s23 + $0x18] sm:$0xff] %vm599_vm1, %v6043_v58 }
0x152e   : > { %v6023_v47 = vsel %vm6022_vm2, %v7093_v37, %v6019_v61 }
0x152f   : > { %v6028_v35 = vmul.f32 %v6023_v47, %v11294_v22 }
0x1531   : > { %v6036_v21 = vmul.f32 %v11305_v6, %v6028_v35 }
0x1533   : > { %v6044_v24 = vadd.f32 %v11310_v49, %v6036_v21 }
0x1535   : > { %6049 = vst.msk [vmem:[%s11319_s23 + $0x20] sm:$0xf] %vm1566_vm7, %v6044_v24 }
0x1536 PF: > { %s26_s21 = sadd.s32 1, %s7100_s21  }
0x1537   : > { %p23_p4 = scmp.ge.s32.totalorder %s26_s21, 4  }
0x1539   :  { %25 = sbr.rel (!%p23_p4) target bundleno = 2 (0x2), region = 126 }

</bundles_post_ra>
